<compile_context>
chip_gen: v7x
topology: tpu7x:2x2x1
jax: 0.10.0
libtpu: 0.0.40
codegen_flags: <defaults>
</compile_context>

<pallas_src>
import functools

import jax
import jax.numpy as jnp
from jax.experimental import pallas as pl
from jax.experimental.pallas import tpu as pltpu

_PADL = 8   # interior column offset inside the padded scratch (sublane aligned)


# ----------------------------------------------------------------------------
# Fused ResidualGroup kernel.
# ----------------------------------------------------------------------------
def _residual_group_kernel(x_ref, w1_ref, b1_ref, w2_ref, b2_ref,
                           cw1_ref, cb1_ref, cw2_ref, cb2_ref,
                           tw_ref, tb_ref, out_ref,
                           hpad_ref, tpad_ref, col_ref,
                           *, H, W, C, NB):
    """grid = (N, NB): image n (parallel) x residual block b (sequential).

    hpad_ref: (H+2, W+2*_PADL, C) zero-bordered running activation h.
    tpad_ref: (H+2, W+2*_PADL, C) zero-bordered conv1 output.
    col_ref : (H*W, 9*C)          im2col slab.
    The activation interior lives at rows [1, 1+H), cols [_PADL, _PADL+W).
    """
    b = pl.program_id(1)

    def conv3x3(src_ref, w, bias):
        # Pack the 3x3 neighbourhood into the im2col slab, then one MXU matmul
        # with K = 9*C (instead of nine K=C matmuls).
        for dy in range(3):
            for dx in range(3):
                k = dy * 3 + dx
                c0 = _PADL - 1 + dx
                col_ref[:, k * C:(k + 1) * C] = (
                    src_ref[dy:dy + H, c0:c0 + W, :].reshape(H * W, C))
        return jnp.dot(col_ref[...], w,
                       preferred_element_type=jnp.float32) + bias

    # ---- per-image init: zero the padded scratches, load x -----------------
    @pl.when(b == 0)
    def _():
        hpad_ref[...] = jnp.zeros_like(hpad_ref)
        tpad_ref[...] = jnp.zeros_like(tpad_ref)
        hpad_ref[1:H + 1, _PADL:_PADL + W, :] = x_ref[0]

    # ---- RCAB: conv3x3 -> ReLU -> conv3x3 -> channel attention -> skip -----
    t = conv3x3(hpad_ref, w1_ref[0], b1_ref[0])                     # (H*W, C)
    tpad_ref[1:H + 1, _PADL:_PADL + W, :] = (
        jnp.maximum(t, 0.0).reshape(H, W, C))

    r = conv3x3(tpad_ref, w2_ref[0], b2_ref[0])                     # (H*W, C)

    # channel attention: global avg-pool -> 1x1 -> ReLU -> 1x1 -> sigmoid
    y = jnp.mean(r, axis=0, keepdims=True)                          # (1, C)
    hid = jnp.maximum(
        jnp.dot(y, cw1_ref[0], preferred_element_type=jnp.float32)
        + cb1_ref[0], 0.0)                                          # (1, Cr)
    s = jax.nn.sigmoid(
        jnp.dot(hid, cw2_ref[0], preferred_element_type=jnp.float32)
        + cb2_ref[0])                                               # (1, C)

    # h <- r * s + h   (RCAB skip connection), interior update only.
    hpad_ref[1:H + 1, _PADL:_PADL + W, :] = (
        (r * s).reshape(H, W, C) + hpad_ref[1:H + 1, _PADL:_PADL + W, :])

    # ---- tail conv + global residual, only on the last block ---------------
    @pl.when(b == NB - 1)
    def _():
        tail = conv3x3(hpad_ref, tw_ref[...], tb_ref[...])          # (H*W, C)
        out_ref[0] = (tail.reshape(H, W, C) + x_ref[0]).astype(out_ref.dtype)


# ----------------------------------------------------------------------------
# Wrapper.
# ----------------------------------------------------------------------------
def residual_group_forward(x, params):
    """x: (N, H, W, C) f32.  params: stacked dict from make_params()."""
    N, H, W, C = x.shape
    NB = params["w1"].shape[0]
    Cr = params["ca_w1"].shape[-1]
    Wp = W + 2 * _PADL

    kernel = functools.partial(_residual_group_kernel, H=H, W=W, C=C, NB=NB)

    return pl.pallas_call(
        kernel,
        out_shape=jax.ShapeDtypeStruct((N, H, W, C), jnp.float32),
        grid=(N, NB),
        in_specs=[
            pl.BlockSpec((1, H, W, C), lambda n, b: (n, 0, 0, 0)),   # x
            pl.BlockSpec((1, 9 * C, C), lambda n, b: (b, 0, 0)),     # w1
            pl.BlockSpec((1, 1, C), lambda n, b: (b, 0, 0)),         # b1
            pl.BlockSpec((1, 9 * C, C), lambda n, b: (b, 0, 0)),     # w2
            pl.BlockSpec((1, 1, C), lambda n, b: (b, 0, 0)),         # b2
            pl.BlockSpec((1, C, Cr), lambda n, b: (b, 0, 0)),        # ca_w1
            pl.BlockSpec((1, 1, Cr), lambda n, b: (b, 0, 0)),        # ca_b1
            pl.BlockSpec((1, Cr, C), lambda n, b: (b, 0, 0)),        # ca_w2
            pl.BlockSpec((1, 1, C), lambda n, b: (b, 0, 0)),         # ca_b2
            pl.BlockSpec((9 * C, C), lambda n, b: (0, 0)),           # tail_w
            pl.BlockSpec((1, C), lambda n, b: (0, 0)),               # tail_b
        ],
        out_specs=pl.BlockSpec((1, H, W, C), lambda n, b: (n, 0, 0, 0)),
        scratch_shapes=[
            pltpu.VMEM((H + 2, Wp, C), jnp.float32),   # padded activation h
            pltpu.VMEM((H + 2, Wp, C), jnp.float32),   # padded conv1 output
            pltpu.VMEM((H * W, 9 * C), jnp.float32),   # im2col slab
        ],
        compiler_params=pltpu.CompilerParams(
            dimension_semantics=("parallel", "arbitrary")),
    )(x, params["w1"], params["b1"], params["w2"], params["b2"],
      params["ca_w1"], params["ca_b1"], params["ca_w2"], params["ca_b2"],
      params["tail_w"], params["tail_b"])


# ----------------------------------------------------------------------------
# Pure-JAX reference (for the correctness check only).
# ----------------------------------------------------------------------------
def _conv3x3_ref(x, w9c_c, b):
    C = x.shape[-1]
    whwio = w9c_c.reshape(3, 3, C, C)
    out = jax.lax.conv_general_dilated(
        x, whwio, (1, 1), "SAME",
        dimension_numbers=("NHWC", "HWIO", "NHWC"))
    return out + b.reshape(1, 1, 1, C)


def residual_group_ref(x, p):
    NB = p["w1"].shape[0]
    h = x
    for i in range(NB):
        r = jnp.maximum(_conv3x3_ref(h, p["w1"][i], p["b1"][i]), 0.0)
        r = _conv3x3_ref(r, p["w2"][i], p["b2"][i])
        y = jnp.mean(r, axis=(1, 2), keepdims=True)                 # (N,1,1,C)
        hid = jnp.maximum(
            jnp.einsum("nijc,cr->nijr", y, p["ca_w1"][i])
            + p["ca_b1"][i].reshape(1, 1, 1, -1), 0.0)
        s = jax.nn.sigmoid(
            jnp.einsum("nijr,rc->nijc", hid, p["ca_w2"][i])
            + p["ca_b2"][i].reshape(1, 1, 1, -1))
        h = r * s + h
    return _conv3x3_ref(h, p["tail_w"], p["tail_b"]) + x


# ----------------------------------------------------------------------------
# Deterministic synthetic parameters (stacked per residual block).
# ----------------------------------------------------------------------------
def make_params(key, n_feat, reduction, n_resblocks):
    C = n_feat
    Cr = max(n_feat // reduction, 1)
    ks = jax.random.split(key, 8)

    def nrm(k, shape, scale):
        return scale * jax.random.normal(k, shape, jnp.float32)

    return dict(
        w1=nrm(ks[0], (n_resblocks, 9 * C, C), 0.05),
        b1=nrm(ks[1], (n_resblocks, 1, C), 0.01),
        w2=nrm(ks[2], (n_resblocks, 9 * C, C), 0.05),
        b2=nrm(ks[3], (n_resblocks, 1, C), 0.01),
        ca_w1=nrm(ks[4], (n_resblocks, C, Cr), 0.1),
        ca_b1=jnp.zeros((n_resblocks, 1, Cr), jnp.float32),
        ca_w2=nrm(ks[5], (n_resblocks, Cr, C), 0.1),
        ca_b2=jnp.zeros((n_resblocks, 1, C), jnp.float32),
        tail_w=nrm(ks[6], (9 * C, C), 0.05),
        tail_b=nrm(ks[7], (1, C), 0.01),
    )


if __name__ == "__main__":
    N, H, W = 2, 16, 16
    n_feat, reduction, n_resblocks = 32, 8, 2

    key = jax.random.PRNGKey(0)
    kx, kp = jax.random.split(key)
    x = jax.random.normal(kx, (N, H, W, n_feat), jnp.float32)
    params = make_params(kp, n_feat, reduction, n_resblocks)

    out = jax.jit(residual_group_forward)(x, params)
    out = jax.block_until_ready(out)

    ref = residual_group_ref(x, params)
    assert out.shape == (N, H, W, n_feat)
    assert jnp.allclose(out, ref, atol=1e-3, rtol=1e-3), "mismatch vs reference"

    print("KERNEL_OK")
</pallas_src>

<mosaic_0001>
module attributes {stable_mosaic.version = 11 : i64} {
  func.func @_residual_group_kernel(%arg0: i32, %arg1: i32, %arg2: memref<1x16x16x32xf32, #tpu.memory_space<vmem>>, %arg3: memref<1x288x32xf32, #tpu.memory_space<vmem>>, %arg4: memref<1x1x32xf32, #tpu.memory_space<vmem>>, %arg5: memref<1x288x32xf32, #tpu.memory_space<vmem>>, %arg6: memref<1x1x32xf32, #tpu.memory_space<vmem>>, %arg7: memref<1x32x4xf32, #tpu.memory_space<vmem>>, %arg8: memref<1x1x4xf32, #tpu.memory_space<vmem>>, %arg9: memref<1x4x32xf32, #tpu.memory_space<vmem>>, %arg10: memref<1x1x32xf32, #tpu.memory_space<vmem>>, %arg11: memref<288x32xf32, #tpu.memory_space<vmem>>, %arg12: memref<1x32xf32, #tpu.memory_space<vmem>>, %arg13: memref<1x16x16x32xf32, #tpu.memory_space<vmem>>, %arg14: memref<18x32x32xf32, #tpu.memory_space<vmem>>, %arg15: memref<18x32x32xf32, #tpu.memory_space<vmem>>, %arg16: memref<256x288xf32, #tpu.memory_space<vmem>>) attributes {dimension_semantics = [#tpu.dimension_semantics<parallel>, #tpu.dimension_semantics<arbitrary>], iteration_bounds = array<i64: 2, 2>, scalar_prefetch = 0 : i64, scratch_operands = 3 : i64, tpu.core_type = #tpu.core_type<tc>, window_params = [{transform_indices = @transform_0, window_bounds = array<i64: 1, 16, 16, 32>}, {transform_indices = @transform_1, window_bounds = array<i64: 1, 288, 32>}, {transform_indices = @transform_2, window_bounds = array<i64: 1, 1, 32>}, {transform_indices = @transform_3, window_bounds = array<i64: 1, 288, 32>}, {transform_indices = @transform_4, window_bounds = array<i64: 1, 1, 32>}, {transform_indices = @transform_5, window_bounds = array<i64: 1, 32, 4>}, {transform_indices = @transform_6, window_bounds = array<i64: 1, 1, 4>}, {transform_indices = @transform_7, window_bounds = array<i64: 1, 4, 32>}, {transform_indices = @transform_8, window_bounds = array<i64: 1, 1, 32>}, {pipeline_mode = #tpu.pipeline_mode<synchronous>, transform_indices = @transform_9, window_bounds = array<i64: 288, 32>}, {pipeline_mode = #tpu.pipeline_mode<synchronous>, transform_indices = @transform_10, window_bounds = array<i64: 1, 32>}, {transform_indices = @transform_11, window_bounds = array<i64: 1, 16, 16, 32>}]} {
    %c0_i32 = arith.constant 0 : i32
    %0 = arith.cmpi eq, %arg1, %c0_i32 : i32
    %1 = arith.extui %0 : i1 to i32
    %c0_i32_0 = arith.constant 0 : i32
    %2 = arith.cmpi ne, %1, %c0_i32_0 : i32
    scf.if %2 {
      %cst_123 = arith.constant 0.000000e+00 : f32
      %109 = vector.broadcast %cst_123 : f32 to vector<18x32x32xf32>
      %c0_124 = arith.constant 0 : index
      %c0_125 = arith.constant 0 : index
      %c0_126 = arith.constant 0 : index
      %110 = vector.load %arg14[%c0_124, %c0_125, %c0_126] : memref<18x32x32xf32, #tpu.memory_space<vmem>>, vector<18x32x32xf32>
      tpu.vector_store %arg14[%c0_124, %c0_125, %c0_126], %109 {strides = array<i32>} : memref<18x32x32xf32, #tpu.memory_space<vmem>>, vector<18x32x32xf32>,
      %cst_127 = arith.constant 0.000000e+00 : f32
      %111 = vector.broadcast %cst_127 : f32 to vector<18x32x32xf32>
      %c0_128 = arith.constant 0 : index
      %c0_129 = arith.constant 0 : index
      %c0_130 = arith.constant 0 : index
      %112 = vector.load %arg15[%c0_128, %c0_129, %c0_130] : memref<18x32x32xf32, #tpu.memory_space<vmem>>, vector<18x32x32xf32>
      tpu.vector_store %arg15[%c0_128, %c0_129, %c0_130], %111 {strides = array<i32>} : memref<18x32x32xf32, #tpu.memory_space<vmem>>, vector<18x32x32xf32>,
      %c0_131 = arith.constant 0 : index
      %c0_132 = arith.constant 0 : index
      %c0_133 = arith.constant 0 : index
      %c0_134 = arith.constant 0 : index
      %113 = vector.load %arg2[%c0_131, %c0_132, %c0_133, %c0_134] : memref<1x16x16x32xf32, #tpu.memory_space<vmem>>, vector<1x16x16x32xf32>
      %114 = vector.shape_cast %113 : vector<1x16x16x32xf32> to vector<16x16x32xf32>
      %c1_135 = arith.constant 1 : index
      %c8_136 = arith.constant 8 : index
      %c0_137 = arith.constant 0 : index
      %115 = vector.load %arg14[%c1_135, %c8_136, %c0_137] : memref<18x32x32xf32, #tpu.memory_space<vmem>>, vector<16x16x32xf32>
      tpu.vector_store %arg14[%c1_135, %c8_136, %c0_137], %114 {strides = array<i32>} : memref<18x32x32xf32, #tpu.memory_space<vmem>>, vector<16x16x32xf32>,
    } else {
    }
    %c0 = arith.constant 0 : index
    %c0_1 = arith.constant 0 : index
    %c0_2 = arith.constant 0 : index
    %3 = vector.load %arg3[%c0, %c0_1, %c0_2] : memref<1x288x32xf32, #tpu.memory_space<vmem>>, vector<1x288x32xf32>
    %4 = vector.shape_cast %3 : vector<1x288x32xf32> to vector<288x32xf32>
    %c0_3 = arith.constant 0 : index
    %c0_4 = arith.constant 0 : index
    %c0_5 = arith.constant 0 : index
    %5 = vector.load %arg4[%c0_3, %c0_4, %c0_5] : memref<1x1x32xf32, #tpu.memory_space<vmem>>, vector<1x1x32xf32>
    %6 = vector.shape_cast %5 : vector<1x1x32xf32> to vector<1x32xf32>
    %c0_6 = arith.constant 0 : index
    %c7 = arith.constant 7 : index
    %c0_7 = arith.constant 0 : index
    %7 = vector.load %arg14[%c0_6, %c7, %c0_7] : memref<18x32x32xf32, #tpu.memory_space<vmem>>, vector<16x16x32xf32>
    %8 = vector.shape_cast %7 : vector<16x16x32xf32> to vector<256x32xf32>
    %c0_8 = arith.constant 0 : index
    %c0_9 = arith.constant 0 : index
    %9 = vector.load %arg16[%c0_8, %c0_9] : memref<256x288xf32, #tpu.memory_space<vmem>>, vector<256x32xf32>
    tpu.vector_store %arg16[%c0_8, %c0_9], %8 {strides = array<i32>} : memref<256x288xf32, #tpu.memory_space<vmem>>, vector<256x32xf32>,
    %c0_10 = arith.constant 0 : index
    %c8 = arith.constant 8 : index
    %c0_11 = arith.constant 0 : index
    %10 = vector.load %arg14[%c0_10, %c8, %c0_11] : memref<18x32x32xf32, #tpu.memory_space<vmem>>, vector<16x16x32xf32>
    %11 = vector.shape_cast %10 : vector<16x16x32xf32> to vector<256x32xf32>
    %c0_12 = arith.constant 0 : index
    %c32 = arith.constant 32 : index
    %12 = vector.load %arg16[%c0_12, %c32] : memref<256x288xf32, #tpu.memory_space<vmem>>, vector<256x32xf32>
    tpu.vector_store %arg16[%c0_12, %c32], %11 {strides = array<i32>} : memref<256x288xf32, #tpu.memory_space<vmem>>, vector<256x32xf32>,
    %c0_13 = arith.constant 0 : index
    %c9 = arith.constant 9 : index
    %c0_14 = arith.constant 0 : index
    %13 = vector.load %arg14[%c0_13, %c9, %c0_14] : memref<18x32x32xf32, #tpu.memory_space<vmem>>, vector<16x16x32xf32>
    %14 = vector.shape_cast %13 : vector<16x16x32xf32> to vector<256x32xf32>
    %c0_15 = arith.constant 0 : index
    %c64 = arith.constant 64 : index
    %15 = vector.load %arg16[%c0_15, %c64] : memref<256x288xf32, #tpu.memory_space<vmem>>, vector<256x32xf32>
    tpu.vector_store %arg16[%c0_15, %c64], %14 {strides = array<i32>} : memref<256x288xf32, #tpu.memory_space<vmem>>, vector<256x32xf32>,
    %c1 = arith.constant 1 : index
    %c7_16 = arith.constant 7 : index
    %c0_17 = arith.constant 0 : index
    %16 = vector.load %arg14[%c1, %c7_16, %c0_17] : memref<18x32x32xf32, #tpu.memory_space<vmem>>, vector<16x16x32xf32>
    %17 = vector.shape_cast %16 : vector<16x16x32xf32> to vector<256x32xf32>
    %c0_18 = arith.constant 0 : index
    %c96 = arith.constant 96 : index
    %18 = vector.load %arg16[%c0_18, %c96] : memref<256x288xf32, #tpu.memory_space<vmem>>, vector<256x32xf32>
    tpu.vector_store %arg16[%c0_18, %c96], %17 {strides = array<i32>} : memref<256x288xf32, #tpu.memory_space<vmem>>, vector<256x32xf32>,
    %c1_19 = arith.constant 1 : index
    %c8_20 = arith.constant 8 : index
    %c0_21 = arith.constant 0 : index
    %19 = vector.load %arg14[%c1_19, %c8_20, %c0_21] : memref<18x32x32xf32, #tpu.memory_space<vmem>>, vector<16x16x32xf32>
    %20 = vector.shape_cast %19 : vector<16x16x32xf32> to vector<256x32xf32>
    %c0_22 = arith.constant 0 : index
    %c128 = arith.constant 128 : index
    %21 = vector.load %arg16[%c0_22, %c128] : memref<256x288xf32, #tpu.memory_space<vmem>>, vector<256x32xf32>
    tpu.vector_store %arg16[%c0_22, %c128], %20 {strides = array<i32>} : memref<256x288xf32, #tpu.memory_space<vmem>>, vector<256x32xf32>,
    %c1_23 = arith.constant 1 : index
    %c9_24 = arith.constant 9 : index
    %c0_25 = arith.constant 0 : index
    %22 = vector.load %arg14[%c1_23, %c9_24, %c0_25] : memref<18x32x32xf32, #tpu.memory_space<vmem>>, vector<16x16x32xf32>
    %23 = vector.shape_cast %22 : vector<16x16x32xf32> to vector<256x32xf32>
    %c0_26 = arith.constant 0 : index
    %c160 = arith.constant 160 : index
    %24 = vector.load %arg16[%c0_26, %c160] : memref<256x288xf32, #tpu.memory_space<vmem>>, vector<256x32xf32>
    tpu.vector_store %arg16[%c0_26, %c160], %23 {strides = array<i32>} : memref<256x288xf32, #tpu.memory_space<vmem>>, vector<256x32xf32>,
    %c2 = arith.constant 2 : index
    %c7_27 = arith.constant 7 : index
    %c0_28 = arith.constant 0 : index
    %25 = vector.load %arg14[%c2, %c7_27, %c0_28] : memref<18x32x32xf32, #tpu.memory_space<vmem>>, vector<16x16x32xf32>
    %26 = vector.shape_cast %25 : vector<16x16x32xf32> to vector<256x32xf32>
    %c0_29 = arith.constant 0 : index
    %c192 = arith.constant 192 : index
    %27 = vector.load %arg16[%c0_29, %c192] : memref<256x288xf32, #tpu.memory_space<vmem>>, vector<256x32xf32>
    tpu.vector_store %arg16[%c0_29, %c192], %26 {strides = array<i32>} : memref<256x288xf32, #tpu.memory_space<vmem>>, vector<256x32xf32>,
    %c2_30 = arith.constant 2 : index
    %c8_31 = arith.constant 8 : index
    %c0_32 = arith.constant 0 : index
    %28 = vector.load %arg14[%c2_30, %c8_31, %c0_32] : memref<18x32x32xf32, #tpu.memory_space<vmem>>, vector<16x16x32xf32>
    %29 = vector.shape_cast %28 : vector<16x16x32xf32> to vector<256x32xf32>
    %c0_33 = arith.constant 0 : index
    %c224 = arith.constant 224 : index
    %30 = vector.load %arg16[%c0_33, %c224] : memref<256x288xf32, #tpu.memory_space<vmem>>, vector<256x32xf32>
    tpu.vector_store %arg16[%c0_33, %c224], %29 {strides = array<i32>} : memref<256x288xf32, #tpu.memory_space<vmem>>, vector<256x32xf32>,
    %c2_34 = arith.constant 2 : index
    %c9_35 = arith.constant 9 : index
    %c0_36 = arith.constant 0 : index
    %31 = vector.load %arg14[%c2_34, %c9_35, %c0_36] : memref<18x32x32xf32, #tpu.memory_space<vmem>>, vector<16x16x32xf32>
    %32 = vector.shape_cast %31 : vector<16x16x32xf32> to vector<256x32xf32>
    %c0_37 = arith.constant 0 : index
    %c256 = arith.constant 256 : index
    %33 = vector.load %arg16[%c0_37, %c256] : memref<256x288xf32, #tpu.memory_space<vmem>>, vector<256x32xf32>
    tpu.vector_store %arg16[%c0_37, %c256], %32 {strides = array<i32>} : memref<256x288xf32, #tpu.memory_space<vmem>>, vector<256x32xf32>,
    %c0_38 = arith.constant 0 : index
    %c0_39 = arith.constant 0 : index
    %34 = vector.load %arg16[%c0_38, %c0_39] : memref<256x288xf32, #tpu.memory_space<vmem>>, vector<256x288xf32>
    %cst = arith.constant dense<0.000000e+00> : vector<256x32xf32>
    %35 = tpu.matmul %34, %4, %cst {dimension_numbers = #tpu.dot_dimension_numbers<[1], [0], [0], [1], [0, 0, 1, 1], [], []>} : vector<256x288xf32>, vector<288x32xf32>, vector<256x32xf32> -> vector<256x32xf32>
    %36 = vector.broadcast %6 : vector<1x32xf32> to vector<256x32xf32>
    %37 = arith.addf %35, %36 : vector<256x32xf32>
    %cst_40 = arith.constant 0.000000e+00 : f32
    %38 = vector.broadcast %cst_40 : f32 to vector<256x32xf32>
    %39 = arith.maximumf %37, %38 : vector<256x32xf32>
    %40 = vector.shape_cast %39 : vector<256x32xf32> to vector<16x16x32xf32>
    %c1_41 = arith.constant 1 : index
    %c8_42 = arith.constant 8 : index
    %c0_43 = arith.constant 0 : index
    %41 = vector.load %arg15[%c1_41, %c8_42, %c0_43] : memref<18x32x32xf32, #tpu.memory_space<vmem>>, vector<16x16x32xf32>
    tpu.vector_store %arg15[%c1_41, %c8_42, %c0_43], %40 {strides = array<i32>} : memref<18x32x32xf32, #tpu.memory_space<vmem>>, vector<16x16x32xf32>,
    %c0_44 = arith.constant 0 : index
    %c0_45 = arith.constant 0 : index
    %c0_46 = arith.constant 0 : index
    %42 = vector.load %arg5[%c0_44, %c0_45, %c0_46] : memref<1x288x32xf32, #tpu.memory_space<vmem>>, vector<1x288x32xf32>
    %43 = vector.shape_cast %42 : vector<1x288x32xf32> to vector<288x32xf32>
    %c0_47 = arith.constant 0 : index
    %c0_48 = arith.constant 0 : index
    %c0_49 = arith.constant 0 : index
    %44 = vector.load %arg6[%c0_47, %c0_48, %c0_49] : memref<1x1x32xf32, #tpu.memory_space<vmem>>, vector<1x1x32xf32>
    %45 = vector.shape_cast %44 : vector<1x1x32xf32> to vector<1x32xf32>
    %c0_50 = arith.constant 0 : index
    %c7_51 = arith.constant 7 : index
    %c0_52 = arith.constant 0 : index
    %46 = vector.load %arg15[%c0_50, %c7_51, %c0_52] : memref<18x32x32xf32, #tpu.memory_space<vmem>>, vector<16x16x32xf32>
    %47 = vector.shape_cast %46 : vector<16x16x32xf32> to vector<256x32xf32>
    %c0_53 = arith.constant 0 : index
    %c0_54 = arith.constant 0 : index
    %48 = vector.load %arg16[%c0_53, %c0_54] : memref<256x288xf32, #tpu.memory_space<vmem>>, vector<256x32xf32>
    tpu.vector_store %arg16[%c0_53, %c0_54], %47 {strides = array<i32>} : memref<256x288xf32, #tpu.memory_space<vmem>>, vector<256x32xf32>,
    %c0_55 = arith.constant 0 : index
    %c8_56 = arith.constant 8 : index
    %c0_57 = arith.constant 0 : index
    %49 = vector.load %arg15[%c0_55, %c8_56, %c0_57] : memref<18x32x32xf32, #tpu.memory_space<vmem>>, vector<16x16x32xf32>
    %50 = vector.shape_cast %49 : vector<16x16x32xf32> to vector<256x32xf32>
    %c0_58 = arith.constant 0 : index
    %c32_59 = arith.constant 32 : index
    %51 = vector.load %arg16[%c0_58, %c32_59] : memref<256x288xf32, #tpu.memory_space<vmem>>, vector<256x32xf32>
    tpu.vector_store %arg16[%c0_58, %c32_59], %50 {strides = array<i32>} : memref<256x288xf32, #tpu.memory_space<vmem>>, vector<256x32xf32>,
    %c0_60 = arith.constant 0 : index
    %c9_61 = arith.constant 9 : index
    %c0_62 = arith.constant 0 : index
    %52 = vector.load %arg15[%c0_60, %c9_61, %c0_62] : memref<18x32x32xf32, #tpu.memory_space<vmem>>, vector<16x16x32xf32>
    %53 = vector.shape_cast %52 : vector<16x16x32xf32> to vector<256x32xf32>
    %c0_63 = arith.constant 0 : index
    %c64_64 = arith.constant 64 : index
    %54 = vector.load %arg16[%c0_63, %c64_64] : memref<256x288xf32, #tpu.memory_space<vmem>>, vector<256x32xf32>
    tpu.vector_store %arg16[%c0_63, %c64_64], %53 {strides = array<i32>} : memref<256x288xf32, #tpu.memory_space<vmem>>, vector<256x32xf32>,
    %c1_65 = arith.constant 1 : index
    %c7_66 = arith.constant 7 : index
    %c0_67 = arith.constant 0 : index
    %55 = vector.load %arg15[%c1_65, %c7_66, %c0_67] : memref<18x32x32xf32, #tpu.memory_space<vmem>>, vector<16x16x32xf32>
    %56 = vector.shape_cast %55 : vector<16x16x32xf32> to vector<256x32xf32>
    %c0_68 = arith.constant 0 : index
    %c96_69 = arith.constant 96 : index
    %57 = vector.load %arg16[%c0_68, %c96_69] : memref<256x288xf32, #tpu.memory_space<vmem>>, vector<256x32xf32>
    tpu.vector_store %arg16[%c0_68, %c96_69], %56 {strides = array<i32>} : memref<256x288xf32, #tpu.memory_space<vmem>>, vector<256x32xf32>,
    %c1_70 = arith.constant 1 : index
    %c8_71 = arith.constant 8 : index
    %c0_72 = arith.constant 0 : index
    %58 = vector.load %arg15[%c1_70, %c8_71, %c0_72] : memref<18x32x32xf32, #tpu.memory_space<vmem>>, vector<16x16x32xf32>
    %59 = vector.shape_cast %58 : vector<16x16x32xf32> to vector<256x32xf32>
    %c0_73 = arith.constant 0 : index
    %c128_74 = arith.constant 128 : index
    %60 = vector.load %arg16[%c0_73, %c128_74] : memref<256x288xf32, #tpu.memory_space<vmem>>, vector<256x32xf32>
    tpu.vector_store %arg16[%c0_73, %c128_74], %59 {strides = array<i32>} : memref<256x288xf32, #tpu.memory_space<vmem>>, vector<256x32xf32>,
    %c1_75 = arith.constant 1 : index
    %c9_76 = arith.constant 9 : index
    %c0_77 = arith.constant 0 : index
    %61 = vector.load %arg15[%c1_75, %c9_76, %c0_77] : memref<18x32x32xf32, #tpu.memory_space<vmem>>, vector<16x16x32xf32>
    %62 = vector.shape_cast %61 : vector<16x16x32xf32> to vector<256x32xf32>
    %c0_78 = arith.constant 0 : index
    %c160_79 = arith.constant 160 : index
    %63 = vector.load %arg16[%c0_78, %c160_79] : memref<256x288xf32, #tpu.memory_space<vmem>>, vector<256x32xf32>
    tpu.vector_store %arg16[%c0_78, %c160_79], %62 {strides = array<i32>} : memref<256x288xf32, #tpu.memory_space<vmem>>, vector<256x32xf32>,
    %c2_80 = arith.constant 2 : index
    %c7_81 = arith.constant 7 : index
    %c0_82 = arith.constant 0 : index
    %64 = vector.load %arg15[%c2_80, %c7_81, %c0_82] : memref<18x32x32xf32, #tpu.memory_space<vmem>>, vector<16x16x32xf32>
    %65 = vector.shape_cast %64 : vector<16x16x32xf32> to vector<256x32xf32>
    %c0_83 = arith.constant 0 : index
    %c192_84 = arith.constant 192 : index
    %66 = vector.load %arg16[%c0_83, %c192_84] : memref<256x288xf32, #tpu.memory_space<vmem>>, vector<256x32xf32>
    tpu.vector_store %arg16[%c0_83, %c192_84], %65 {strides = array<i32>} : memref<256x288xf32, #tpu.memory_space<vmem>>, vector<256x32xf32>,
    %c2_85 = arith.constant 2 : index
    %c8_86 = arith.constant 8 : index
    %c0_87 = arith.constant 0 : index
    %67 = vector.load %arg15[%c2_85, %c8_86, %c0_87] : memref<18x32x32xf32, #tpu.memory_space<vmem>>, vector<16x16x32xf32>
    %68 = vector.shape_cast %67 : vector<16x16x32xf32> to vector<256x32xf32>
    %c0_88 = arith.constant 0 : index
    %c224_89 = arith.constant 224 : index
    %69 = vector.load %arg16[%c0_88, %c224_89] : memref<256x288xf32, #tpu.memory_space<vmem>>, vector<256x32xf32>
    tpu.vector_store %arg16[%c0_88, %c224_89], %68 {strides = array<i32>} : memref<256x288xf32, #tpu.memory_space<vmem>>, vector<256x32xf32>,
    %c2_90 = arith.constant 2 : index
    %c9_91 = arith.constant 9 : index
    %c0_92 = arith.constant 0 : index
    %70 = vector.load %arg15[%c2_90, %c9_91, %c0_92] : memref<18x32x32xf32, #tpu.memory_space<vmem>>, vector<16x16x32xf32>
    %71 = vector.shape_cast %70 : vector<16x16x32xf32> to vector<256x32xf32>
    %c0_93 = arith.constant 0 : index
    %c256_94 = arith.constant 256 : index
    %72 = vector.load %arg16[%c0_93, %c256_94] : memref<256x288xf32, #tpu.memory_space<vmem>>, vector<256x32xf32>
    tpu.vector_store %arg16[%c0_93, %c256_94], %71 {strides = array<i32>} : memref<256x288xf32, #tpu.memory_space<vmem>>, vector<256x32xf32>,
    %c0_95 = arith.constant 0 : index
    %c0_96 = arith.constant 0 : index
    %73 = vector.load %arg16[%c0_95, %c0_96] : memref<256x288xf32, #tpu.memory_space<vmem>>, vector<256x288xf32>
    %cst_97 = arith.constant dense<0.000000e+00> : vector<256x32xf32>
    %74 = tpu.matmul %73, %43, %cst_97 {dimension_numbers = #tpu.dot_dimension_numbers<[1], [0], [0], [1], [0, 0, 1, 1], [], []>} : vector<256x288xf32>, vector<288x32xf32>, vector<256x32xf32> -> vector<256x32xf32>
    %75 = vector.broadcast %45 : vector<1x32xf32> to vector<256x32xf32>
    %76 = arith.addf %74, %75 : vector<256x32xf32>
    %cst_98 = arith.constant dense<0.000000e+00> : vector<32xf32>
    %77 = vector.multi_reduction <add>, %76, %cst_98 [0] : vector<256x32xf32> to vector<32xf32>
    %78 = vector.shape_cast %77 : vector<32xf32> to vector<1x32xf32>
    %cst_99 = arith.constant 2.560000e+02 : f32
    %79 = vector.broadcast %cst_99 : f32 to vector<1x32xf32>
    %80 = arith.divf %78, %79 : vector<1x32xf32>
    %c0_100 = arith.constant 0 : index
    %c0_101 = arith.constant 0 : index
    %c0_102 = arith.constant 0 : index
    %81 = vector.load %arg7[%c0_100, %c0_101, %c0_102] : memref<1x32x4xf32, #tpu.memory_space<vmem>>, vector<1x32x4xf32>
    %82 = vector.shape_cast %81 : vector<1x32x4xf32> to vector<32x4xf32>
    %cst_103 = arith.constant dense<0.000000e+00> : vector<1x4xf32>
    %83 = tpu.matmul %80, %82, %cst_103 {dimension_numbers = #tpu.dot_dimension_numbers<[1], [0], [0], [1], [0, 0, 1, 1], [], []>} : vector<1x32xf32>, vector<32x4xf32>, vector<1x4xf32> -> vector<1x4xf32>
    %c0_104 = arith.constant 0 : index
    %c0_105 = arith.constant 0 : index
    %c0_106 = arith.constant 0 : index
    %84 = vector.load %arg8[%c0_104, %c0_105, %c0_106] : memref<1x1x4xf32, #tpu.memory_space<vmem>>, vector<1x1x4xf32>
    %85 = vector.shape_cast %84 : vector<1x1x4xf32> to vector<1x4xf32>
    %86 = arith.addf %83, %85 : vector<1x4xf32>
    %cst_107 = arith.constant 0.000000e+00 : f32
    %87 = vector.broadcast %cst_107 : f32 to vector<1x4xf32>
    %88 = arith.maximumf %86, %87 : vector<1x4xf32>
    %c0_108 = arith.constant 0 : index
    %c0_109 = arith.constant 0 : index
    %c0_110 = arith.constant 0 : index
    %89 = vector.load %arg9[%c0_108, %c0_109, %c0_110] : memref<1x4x32xf32, #tpu.memory_space<vmem>>, vector<1x4x32xf32>
    %90 = vector.shape_cast %89 : vector<1x4x32xf32> to vector<4x32xf32>
    %cst_111 = arith.constant dense<0.000000e+00> : vector<1x32xf32>
    %91 = tpu.matmul %88, %90, %cst_111 {dimension_numbers = #tpu.dot_dimension_numbers<[1], [0], [0], [1], [0, 0, 1, 1], [], []>} : vector<1x4xf32>, vector<4x32xf32>, vector<1x32xf32> -> vector<1x32xf32>
    %c0_112 = arith.constant 0 : index
    %c0_113 = arith.constant 0 : index
    %c0_114 = arith.constant 0 : index
    %92 = vector.load %arg10[%c0_112, %c0_113, %c0_114] : memref<1x1x32xf32, #tpu.memory_space<vmem>>, vector<1x1x32xf32>
    %93 = vector.shape_cast %92 : vector<1x1x32xf32> to vector<1x32xf32>
    %94 = arith.addf %91, %93 : vector<1x32xf32>
    %95 = arith.negf %94 : vector<1x32xf32>
    %96 = math.exp %95 : vector<1x32xf32>
    %cst_115 = arith.constant 1.000000e+00 : f32
    %97 = vector.broadcast %cst_115 : f32 to vector<1x32xf32>
    %98 = arith.addf %97, %96 : vector<1x32xf32>
    %99 = arith.divf %97, %98 : vector<1x32xf32>
    %100 = vector.broadcast %99 : vector<1x32xf32> to vector<256x32xf32>
    %101 = arith.mulf %76, %100 : vector<256x32xf32>
    %102 = vector.shape_cast %101 : vector<256x32xf32> to vector<16x16x32xf32>
    %c1_116 = arith.constant 1 : index
    %c8_117 = arith.constant 8 : index
    %c0_118 = arith.constant 0 : index
    %103 = vector.load %arg14[%c1_116, %c8_117, %c0_118] : memref<18x32x32xf32, #tpu.memory_space<vmem>>, vector<16x16x32xf32>
    %104 = arith.addf %102, %103 : vector<16x16x32xf32>
    %c1_119 = arith.constant 1 : index
    %c8_120 = arith.constant 8 : index
    %c0_121 = arith.constant 0 : index
    %105 = vector.load %arg14[%c1_119, %c8_120, %c0_121] : memref<18x32x32xf32, #tpu.memory_space<vmem>>, vector<16x16x32xf32>
    tpu.vector_store %arg14[%c1_119, %c8_120, %c0_121], %104 {strides = array<i32>} : memref<18x32x32xf32, #tpu.memory_space<vmem>>, vector<16x16x32xf32>,
    %c1_i32 = arith.constant 1 : i32
    %106 = arith.cmpi eq, %arg1, %c1_i32 : i32
    %107 = arith.extui %106 : i1 to i32
    %c0_i32_122 = arith.constant 0 : i32
    %108 = arith.cmpi ne, %107, %c0_i32_122 : i32
    scf.if %108 {
      %c0_123 = arith.constant 0 : index
      %c0_124 = arith.constant 0 : index
      %109 = vector.load %arg11[%c0_123, %c0_124] : memref<288x32xf32, #tpu.memory_space<vmem>>, vector<288x32xf32>
      %c0_125 = arith.constant 0 : index
      %c0_126 = arith.constant 0 : index
      %110 = vector.load %arg12[%c0_125, %c0_126] : memref<1x32xf32, #tpu.memory_space<vmem>>, vector<1x32xf32>
      %c0_127 = arith.constant 0 : index
      %c7_128 = arith.constant 7 : index
      %c0_129 = arith.constant 0 : index
      %111 = vector.load %arg14[%c0_127, %c7_128, %c0_129] : memref<18x32x32xf32, #tpu.memory_space<vmem>>, vector<16x16x32xf32>
      %112 = vector.shape_cast %111 : vector<16x16x32xf32> to vector<256x32xf32>
      %c0_130 = arith.constant 0 : index
      %c0_131 = arith.constant 0 : index
      %113 = vector.load %arg16[%c0_130, %c0_131] : memref<256x288xf32, #tpu.memory_space<vmem>>, vector<256x32xf32>
      tpu.vector_store %arg16[%c0_130, %c0_131], %112 {strides = array<i32>} : memref<256x288xf32, #tpu.memory_space<vmem>>, vector<256x32xf32>,
      %c0_132 = arith.constant 0 : index
      %c8_133 = arith.constant 8 : index
      %c0_134 = arith.constant 0 : index
      %114 = vector.load %arg14[%c0_132, %c8_133, %c0_134] : memref<18x32x32xf32, #tpu.memory_space<vmem>>, vector<16x16x32xf32>
      %115 = vector.shape_cast %114 : vector<16x16x32xf32> to vector<256x32xf32>
      %c0_135 = arith.constant 0 : index
      %c32_136 = arith.constant 32 : index
      %116 = vector.load %arg16[%c0_135, %c32_136] : memref<256x288xf32, #tpu.memory_space<vmem>>, vector<256x32xf32>
      tpu.vector_store %arg16[%c0_135, %c32_136], %115 {strides = array<i32>} : memref<256x288xf32, #tpu.memory_space<vmem>>, vector<256x32xf32>,
      %c0_137 = arith.constant 0 : index
      %c9_138 = arith.constant 9 : index
      %c0_139 = arith.constant 0 : index
      %117 = vector.load %arg14[%c0_137, %c9_138, %c0_139] : memref<18x32x32xf32, #tpu.memory_space<vmem>>, vector<16x16x32xf32>
      %118 = vector.shape_cast %117 : vector<16x16x32xf32> to vector<256x32xf32>
      %c0_140 = arith.constant 0 : index
      %c64_141 = arith.constant 64 : index
      %119 = vector.load %arg16[%c0_140, %c64_141] : memref<256x288xf32, #tpu.memory_space<vmem>>, vector<256x32xf32>
      tpu.vector_store %arg16[%c0_140, %c64_141], %118 {strides = array<i32>} : memref<256x288xf32, #tpu.memory_space<vmem>>, vector<256x32xf32>,
      %c1_142 = arith.constant 1 : index
      %c7_143 = arith.constant 7 : index
      %c0_144 = arith.constant 0 : index
      %120 = vector.load %arg14[%c1_142, %c7_143, %c0_144] : memref<18x32x32xf32, #tpu.memory_space<vmem>>, vector<16x16x32xf32>
      %121 = vector.shape_cast %120 : vector<16x16x32xf32> to vector<256x32xf32>
      %c0_145 = arith.constant 0 : index
      %c96_146 = arith.constant 96 : index
      %122 = vector.load %arg16[%c0_145, %c96_146] : memref<256x288xf32, #tpu.memory_space<vmem>>, vector<256x32xf32>
      tpu.vector_store %arg16[%c0_145, %c96_146], %121 {strides = array<i32>} : memref<256x288xf32, #tpu.memory_space<vmem>>, vector<256x32xf32>,
      %c1_147 = arith.constant 1 : index
      %c8_148 = arith.constant 8 : index
      %c0_149 = arith.constant 0 : index
      %123 = vector.load %arg14[%c1_147, %c8_148, %c0_149] : memref<18x32x32xf32, #tpu.memory_space<vmem>>, vector<16x16x32xf32>
      %124 = vector.shape_cast %123 : vector<16x16x32xf32> to vector<256x32xf32>
      %c0_150 = arith.constant 0 : index
      %c128_151 = arith.constant 128 : index
      %125 = vector.load %arg16[%c0_150, %c128_151] : memref<256x288xf32, #tpu.memory_space<vmem>>, vector<256x32xf32>
      tpu.vector_store %arg16[%c0_150, %c128_151], %124 {strides = array<i32>} : memref<256x288xf32, #tpu.memory_space<vmem>>, vector<256x32xf32>,
      %c1_152 = arith.constant 1 : index
      %c9_153 = arith.constant 9 : index
      %c0_154 = arith.constant 0 : index
      %126 = vector.load %arg14[%c1_152, %c9_153, %c0_154] : memref<18x32x32xf32, #tpu.memory_space<vmem>>, vector<16x16x32xf32>
      %127 = vector.shape_cast %126 : vector<16x16x32xf32> to vector<256x32xf32>
      %c0_155 = arith.constant 0 : index
      %c160_156 = arith.constant 160 : index
      %128 = vector.load %arg16[%c0_155, %c160_156] : memref<256x288xf32, #tpu.memory_space<vmem>>, vector<256x32xf32>
      tpu.vector_store %arg16[%c0_155, %c160_156], %127 {strides = array<i32>} : memref<256x288xf32, #tpu.memory_space<vmem>>, vector<256x32xf32>,
      %c2_157 = arith.constant 2 : index
      %c7_158 = arith.constant 7 : index
      %c0_159 = arith.constant 0 : index
      %129 = vector.load %arg14[%c2_157, %c7_158, %c0_159] : memref<18x32x32xf32, #tpu.memory_space<vmem>>, vector<16x16x32xf32>
      %130 = vector.shape_cast %129 : vector<16x16x32xf32> to vector<256x32xf32>
      %c0_160 = arith.constant 0 : index
      %c192_161 = arith.constant 192 : index
      %131 = vector.load %arg16[%c0_160, %c192_161] : memref<256x288xf32, #tpu.memory_space<vmem>>, vector<256x32xf32>
      tpu.vector_store %arg16[%c0_160, %c192_161], %130 {strides = array<i32>} : memref<256x288xf32, #tpu.memory_space<vmem>>, vector<256x32xf32>,
      %c2_162 = arith.constant 2 : index
      %c8_163 = arith.constant 8 : index
      %c0_164 = arith.constant 0 : index
      %132 = vector.load %arg14[%c2_162, %c8_163, %c0_164] : memref<18x32x32xf32, #tpu.memory_space<vmem>>, vector<16x16x32xf32>
      %133 = vector.shape_cast %132 : vector<16x16x32xf32> to vector<256x32xf32>
      %c0_165 = arith.constant 0 : index
      %c224_166 = arith.constant 224 : index
      %134 = vector.load %arg16[%c0_165, %c224_166] : memref<256x288xf32, #tpu.memory_space<vmem>>, vector<256x32xf32>
      tpu.vector_store %arg16[%c0_165, %c224_166], %133 {strides = array<i32>} : memref<256x288xf32, #tpu.memory_space<vmem>>, vector<256x32xf32>,
      %c2_167 = arith.constant 2 : index
      %c9_168 = arith.constant 9 : index
      %c0_169 = arith.constant 0 : index
      %135 = vector.load %arg14[%c2_167, %c9_168, %c0_169] : memref<18x32x32xf32, #tpu.memory_space<vmem>>, vector<16x16x32xf32>
      %136 = vector.shape_cast %135 : vector<16x16x32xf32> to vector<256x32xf32>
      %c0_170 = arith.constant 0 : index
      %c256_171 = arith.constant 256 : index
      %137 = vector.load %arg16[%c0_170, %c256_171] : memref<256x288xf32, #tpu.memory_space<vmem>>, vector<256x32xf32>
      tpu.vector_store %arg16[%c0_170, %c256_171], %136 {strides = array<i32>} : memref<256x288xf32, #tpu.memory_space<vmem>>, vector<256x32xf32>,
      %c0_172 = arith.constant 0 : index
      %c0_173 = arith.constant 0 : index
      %138 = vector.load %arg16[%c0_172, %c0_173] : memref<256x288xf32, #tpu.memory_space<vmem>>, vector<256x288xf32>
      %cst_174 = arith.constant dense<0.000000e+00> : vector<256x32xf32>
      %139 = tpu.matmul %138, %109, %cst_174 {dimension_numbers = #tpu.dot_dimension_numbers<[1], [0], [0], [1], [0, 0, 1, 1], [], []>} : vector<256x288xf32>, vector<288x32xf32>, vector<256x32xf32> -> vector<256x32xf32>
      %140 = vector.broadcast %110 : vector<1x32xf32> to vector<256x32xf32>
      %141 = arith.addf %139, %140 : vector<256x32xf32>
      %142 = vector.shape_cast %141 : vector<256x32xf32> to vector<16x16x32xf32>
      %c0_175 = arith.constant 0 : index
      %c0_176 = arith.constant 0 : index
      %c0_177 = arith.constant 0 : index
      %c0_178 = arith.constant 0 : index
      %143 = vector.load %arg2[%c0_175, %c0_176, %c0_177, %c0_178] : memref<1x16x16x32xf32, #tpu.memory_space<vmem>>, vector<1x16x16x32xf32>
      %144 = vector.shape_cast %143 : vector<1x16x16x32xf32> to vector<16x16x32xf32>
      %145 = arith.addf %142, %144 : vector<16x16x32xf32>
      %c0_179 = arith.constant 0 : index
      %c0_180 = arith.constant 0 : index
      %c0_181 = arith.constant 0 : index
      %c0_182 = arith.constant 0 : index
      %146 = vector.load %arg13[%c0_179, %c0_180, %c0_181, %c0_182] : memref<1x16x16x32xf32, #tpu.memory_space<vmem>>, vector<1x16x16x32xf32>
      %147 = vector.shape_cast %146 : vector<1x16x16x32xf32> to vector<16x16x32xf32>
      %148 = vector.shape_cast %145 : vector<16x16x32xf32> to vector<1x16x16x32xf32>
      tpu.vector_store %arg13[%c0_179, %c0_180, %c0_181, %c0_182], %148 {strides = array<i32>} : memref<1x16x16x32xf32, #tpu.memory_space<vmem>>, vector<1x16x16x32xf32>,
    } else {
    }
    return
  }
  func.func @transform_0(%arg0: i32, %arg1: i32) -> (i32, i32, i32, i32) {
    %c0_i32 = arith.constant 0 : i32
    %c0_i32_0 = arith.constant 0 : i32
    %c0_i32_1 = arith.constant 0 : i32
    %c0_i32_2 = arith.constant 0 : i32
    return %arg0, %c0_i32, %c0_i32_0, %c0_i32_1 : i32, i32, i32, i32
  }
  func.func @transform_1(%arg0: i32, %arg1: i32) -> (i32, i32, i32) {
    %c0_i32 = arith.constant 0 : i32
    %c0_i32_0 = arith.constant 0 : i32
    %c0_i32_1 = arith.constant 0 : i32
    return %arg1, %c0_i32, %c0_i32_0 : i32, i32, i32
  }
  func.func @transform_2(%arg0: i32, %arg1: i32) -> (i32, i32, i32) {
    %c0_i32 = arith.constant 0 : i32
    %c0_i32_0 = arith.constant 0 : i32
    %c0_i32_1 = arith.constant 0 : i32
    return %arg1, %c0_i32, %c0_i32_0 : i32, i32, i32
  }
  func.func @transform_3(%arg0: i32, %arg1: i32) -> (i32, i32, i32) {
    %c0_i32 = arith.constant 0 : i32
    %c0_i32_0 = arith.constant 0 : i32
    %c0_i32_1 = arith.constant 0 : i32
    return %arg1, %c0_i32, %c0_i32_0 : i32, i32, i32
  }
  func.func @transform_4(%arg0: i32, %arg1: i32) -> (i32, i32, i32) {
    %c0_i32 = arith.constant 0 : i32
    %c0_i32_0 = arith.constant 0 : i32
    %c0_i32_1 = arith.constant 0 : i32
    return %arg1, %c0_i32, %c0_i32_0 : i32, i32, i32
  }
  func.func @transform_5(%arg0: i32, %arg1: i32) -> (i32, i32, i32) {
    %c0_i32 = arith.constant 0 : i32
    %c0_i32_0 = arith.constant 0 : i32
    %c0_i32_1 = arith.constant 0 : i32
    return %arg1, %c0_i32, %c0_i32_0 : i32, i32, i32
  }
  func.func @transform_6(%arg0: i32, %arg1: i32) -> (i32, i32, i32) {
    %c0_i32 = arith.constant 0 : i32
    %c0_i32_0 = arith.constant 0 : i32
    %c0_i32_1 = arith.constant 0 : i32
    return %arg1, %c0_i32, %c0_i32_0 : i32, i32, i32
  }
  func.func @transform_7(%arg0: i32, %arg1: i32) -> (i32, i32, i32) {
    %c0_i32 = arith.constant 0 : i32
    %c0_i32_0 = arith.constant 0 : i32
    %c0_i32_1 = arith.constant 0 : i32
    return %arg1, %c0_i32, %c0_i32_0 : i32, i32, i32
  }
  func.func @transform_8(%arg0: i32, %arg1: i32) -> (i32, i32, i32) {
    %c0_i32 = arith.constant 0 : i32
    %c0_i32_0 = arith.constant 0 : i32
    %c0_i32_1 = arith.constant 0 : i32
    return %arg1, %c0_i32, %c0_i32_0 : i32, i32, i32
  }
  func.func @transform_9(%arg0: i32, %arg1: i32) -> (i32, i32) {
    %c0_i32 = arith.constant 0 : i32
    %c0_i32_0 = arith.constant 0 : i32
    %c0_i32_1 = arith.constant 0 : i32
    return %c0_i32, %c0_i32_0 : i32, i32
  }
  func.func @transform_10(%arg0: i32, %arg1: i32) -> (i32, i32) {
    %c0_i32 = arith.constant 0 : i32
    %c0_i32_0 = arith.constant 0 : i32
    %c0_i32_1 = arith.constant 0 : i32
    return %c0_i32, %c0_i32_0 : i32, i32
  }
  func.func @transform_11(%arg0: i32, %arg1: i32) -> (i32, i32, i32, i32) {
    %c0_i32 = arith.constant 0 : i32
    %c0_i32_0 = arith.constant 0 : i32
    %c0_i32_1 = arith.constant 0 : i32
    %c0_i32_2 = arith.constant 0 : i32
    return %arg0, %c0_i32, %c0_i32_0, %c0_i32_1 : i32, i32, i32, i32
  }
}

</mosaic_0001>

<bundles_post_ra>
// kernel: residual_group_forward.1
= control target key start
LH: loop header
LB: loop body
LE: loop exit
PB: predicated region body
PF: predicated region fallthrough
CT: control target
= control target key end

     0   :  { %s12838_s0 = inlined_call_operand.vmem [shape: f32[2,16,16,32], index: 0, kind: input, shape index: {}]   ;;  %s12839_s1 = inlined_call_operand.vmem [shape: f32[2,288,32], index: 1, kind: input, shape index: {}]   ;;  %s12840_s2 = inlined_call_operand.vmem [shape: f32[2,1,32], index: 2, kind: input, shape index: {}]   ;;  %s12841_s3 = inlined_call_operand.vmem [shape: f32[2,288,32], index: 3, kind: input, shape index: {}]   ;;  %s12842_s4 = inlined_call_operand.vmem [shape: f32[2,1,32], index: 4, kind: input, shape index: {}]   ;;  %s12843_s5 = inlined_call_operand.vmem [shape: f32[2,32,4], index: 5, kind: input, shape index: {}]   ;;  %s12844_s6 = inlined_call_operand.vmem [shape: f32[2,1,4], index: 6, kind: input, shape index: {}]   ;;  %s12845_s7 = inlined_call_operand.vmem [shape: f32[2,4,32], index: 7, kind: input, shape index: {}]   ;;  %s12846_s8 = inlined_call_operand.vmem [shape: f32[2,1,32], index: 8, kind: input, shape index: {}]   ;;  %s12847_s9 = inlined_call_operand.vmem [shape: f32[288,32], index: 9, kind: input, shape index: {}]   ;;  %s12848_s10 = inlined_call_operand.vmem [shape: f32[1,32], index: 10, kind: input, shape index: {}]   ;;  %s12849_s11 = inlined_call_operand.hbm [shape: f32[2,16,16,32], index: 11, kind: output, shape index: {}]  }
   0x1   :  { %12863 = sst [smem:[#allocation25_spill]] %s12838_s0 }
   0x2   :  { %12864 = sst [smem:[#allocation26_spill]] %s12839_s1 }
   0x3   :  { %12865 = sst [smem:[#allocation27_spill]] %s12840_s2 }
   0x4   :  { %12866 = sst [smem:[#allocation28_spill]] %s12849_s11 }
   0x5   :  { %16 = vsyncpa [#allocation6], 0 }
   0x6   :  { %18 = vsyncpa [#allocation6 + $0x1], 0  ;;  %s8438_s17 = smov 0   ;;  %s8440_s18 = smov 0  }
   0x7   :  { %s8442_s19 = smov 0   ;;  %s8444_s20 = smov 0  }
   0x8   :  { %s8446_s21 = smov 0   ;;  %s8448_s22 = smov 0  }
   0x9   :  { %s8450_s23 = smov 0   ;;  %s8452_s24 = smov 0  }
   0xa LB: > { %12867 = sst [smem:[#allocation8_spill]] %s8334_s17  ;;  %s7542_s25 = sadd.s32 4294967295, %s8362_s24   ;;  %s8362_s24 = sphi %s8452_s24, %s24_s24   ;;  %s8358_s23 = sphi %s8450_s23, %s12909_s23   ;;  %s8354_s22 = sphi %s8448_s22, %s12908_s22   ;;  %s8350_s21 = sphi %s8446_s21, %s12907_s21   ;;  %s8346_s20 = sphi %s8444_s20, %s12906_s20   ;;  %s8342_s19 = sphi %s8442_s19, %s12905_s19   ;;  %s8338_s18 = sphi %s8440_s18, %s12904_s18   ;;  %s8334_s17 = sphi %s8438_s17, %s12903_s17  }
   0xb   : > { %12868 = sst [smem:[#allocation9_spill]] %s8338_s18  ;;  %s7543_s26 = sadd.s32 4294967294, %s8362_s24  }
   0xc   : > { %12869 = sst [smem:[#allocation10_spill]] %s8342_s19  ;;  %s33_s27 = sadd.s32 1, %s8354_s22 }
   0xd   : > { %12870 = sst [smem:[#allocation11_spill]] %s8354_s22  ;;  %p34_p0 = scmp.ge.s32.totalorder %s33_s27, 2 }
   0xe   : > { %12871 = sst [smem:[#allocation12_spill]] %s8358_s23  ;;  %s36_s28 = sadd.s32 1, %s8358_s23 }
   0xf   : > { %12872 = sst [smem:[#allocation13_spill]] %s8362_s24  ;;  %p329_p1 = scmp.ne.s32.totalorder %s8342_s19, %s8338_s18 }
  0x10   : > { %p330_p2 = scmp.eq.s32.totalorder %s7542_s25, 3  ;;  %s12911_s27 = smov (%p34_p0, %s33_s27), 0 }
  0x11   : > { %12873 = sst [smem:[#allocation14_spill]] %s12911_s27  ;;  %s12913_s28 = smov (!%p34_p0, %s36_s28), %s8358_s23 }
  0x12   : > { %p8487_p3 = por %p330_p2, %p329_p1  ;;  %p335_p4 = scmp.ne.s32.totalorder %s8338_s18, %s8334_s17 }
  0x13   : > { %p38_p5 = scmp.ge.s32.totalorder %s12913_s28, 2  ;;  %p336_p6 = scmp.eq.s32.totalorder %s7543_s26, 3 }
  0x14   : > { %s12874_s29 = scalar_select %p8487_p3, 1, 0 }
  0x15   : > { %p7546_p7 = scmp.ge.s32.totalorder %s8362_s24, 1  ;;  %p423_p8 = scmp.lt.s32.totalorder %s8362_s24, 5 }
  0x16   : > { %12875 = sst [smem:[#allocation15_spill]] %s12874_s29  ;;  %s12915_s28 = smov (%p38_p5, %s12913_s28), 0 }
  0x17   : > { %12876 = sst [smem:[#allocation16_spill]] %s12915_s28  ;;  %p8497_p9 = por %p336_p6, %p335_p4 }
  0x18   : > { %p424_p10 = pnand %p7546_p7, %p423_p8  ;;  %s316_s12 = ssub.s32 %s8358_s23, %s12915_s28 }
  0x19   : > { %s12877_s30 = scalar_select %p8497_p9, 1, 0 }
  0x1a   : > { %s319_s13 = sadd.s32 1, %s8342_s19  ;;  %p317_p11 = scmp.eq.s32.totalorder %s316_s12, 0 }
  0x1b   : > { %12878 = sst [smem:[#allocation17_spill]] %s12877_s30  ;;  %427 = sbr.rel (%p424_p10) target bundleno = 2516 (0x9d4), region = 64 }
  0x1c   : > { %s8505_s14 = scalar_select %p317_p11, %s8342_s19, %s319_s13  }
  0x1e   : > { %12879 = sst [smem:[#allocation18_spill]] %s8505_s14 }
  0x22   : > { %s12853_s15 = sand.u32 1, %s8338_s18   ;;  %p494_p12 = scmp.lt.s32.totalorder %s8350_s21, 1 }
  0x23   : > { %s7547_s16 = sshll.u32 %s12853_s15, 8  ;;  %p499_p13 = scmp.lt.s32.totalorder %s8346_s20, 1 }
  0x24   : > { %s495_s25 = scalar_select %p494_p12, %s8350_s21, 1 }
  0x25   : > { %s8514_s26 = scalar_select %p499_p13, %s8346_s20, 1 }
  0x26   : > { %s7665_s12 = sshll.u32 %s495_s25, 8  ;;  %s12880_s0 = sld [smem:[#allocation25_spill]] }
  0x27   : > { %s8177_s23 = smul.u32 288, %s8514_s26  ;;  %s12881_s2 = sld [smem:[#allocation27_spill]] }
  0x28   : > { %s12882_s1 = sld [smem:[#allocation26_spill]]  ;;  %s522_s22 = scalar_lea.vmem %s12844_s6, %s8514_s26 }
  0x29   : > { %s8540_s28 = scalar_lea.vmem %s12841_s3, %s8177_s23  ;;  %s7554_s30 = sshll.u32 %s8514_s26, 2 }
  0x2a   : > { %s8556_s24 = scalar_lea.vmem %s12845_s7, %s7554_s30  ;;  %s8562_s25 = scalar_lea.vmem [#allocation5], %s7547_s16 }
  0x2b   : > { %p7555_p0 = scmp.ne.s32.totalorder %s8346_s20, 0 }
  0x2c   : > { %s8519_s27 = scalar_lea.vmem %s12880_s0, %s7665_s12  ;;  %s7666_s12 = sshll.u32 %s8514_s26, 5  ;;  %vm534_vm0 = vcmask (!%p7555_p0), 261120   ;;  %v8364_v3 = vmov (!%p7555_p0), 0.0  }
  0x2d   : > { %s8526_s14 = scalar_lea.vmem %s12881_s2, %s8514_s26  ;;  %s8550_s19 = scalar_lea.vmem %s12843_s5, %s7666_s12  ;;  %v8566_v0 = vld [vmem:[%s8519_s27] sm:$0xff] (!%p7555_p0)  ;;  %v8569_v1 = vld [vmem:[%s8519_s27 + $0x8] sm:$0xff] (!%p7555_p0)  ;;  %v8572_v2 = vld [vmem:[%s8519_s27 + $0x10] sm:$0xff] (!%p7555_p0)  ;;  %540 = vst.msk [vmem:[#allocation2 + $0x28] sm:$0xff] (!%p7555_p0), %vm534_vm0, %v8364_v3 }
  0x2e   : > { %s8535_s29 = scalar_lea.vmem %s12882_s1, %s8177_s23  ;;  %s529_s23 = scalar_lea.vmem %s12846_s8, %s8514_s26  ;;  %535 = vst.msk [vmem:[#allocation2] sm:$0xff] (!%p7555_p0), %vm534_vm0, %v8364_v3  ;;  %536 = vst.msk [vmem:[#allocation2 + $0x8] sm:$0xff] (!%p7555_p0), %vm534_vm0, %v8364_v3  ;;  %v682_v4 = vld [vmem:[%s8519_s27 + $0x18] sm:$0xff] (!%p7555_p0)  ;;  %v683_v5 = vld [vmem:[%s8519_s27 + $0x20] sm:$0xff] (!%p7555_p0) }
  0x2f   : > { %533 = sbr.rel (%p7555_p0) target bundleno = 134 (0x86), region = 68  ;;  %537 = vst.msk [vmem:[#allocation2 + $0x10] sm:$0xff] (!%p7555_p0), %vm534_vm0, %v8364_v3  ;;  %538 = vst.msk [vmem:[#allocation2 + $0x18] sm:$0xff] (!%p7555_p0), %vm534_vm0, %v8364_v3  ;;  %v684_v6 = vld [vmem:[%s8519_s27 + $0x28] sm:$0xff] (!%p7555_p0)  ;;  %v685_v7 = vld [vmem:[%s8519_s27 + $0x30] sm:$0xff] (!%p7555_p0) }
  0x30   : > { %539 = vst.msk [vmem:[#allocation2 + $0x20] sm:$0xff] (!%p7555_p0), %vm534_vm0, %v8364_v3  ;;  %541 = vst.msk [vmem:[#allocation2 + $0x30] sm:$0xff] (!%p7555_p0), %vm534_vm0, %v8364_v3  ;;  %v686_v8 = vld [vmem:[%s8519_s27 + $0x38] sm:$0xff] (!%p7555_p0)  ;;  %v687_v9 = vld [vmem:[%s8519_s27 + $0x40] sm:$0xff] (!%p7555_p0) }
  0x31   : > { %542 = vst.msk [vmem:[#allocation2 + $0x38] sm:$0xff] (!%p7555_p0), %vm534_vm0, %v8364_v3  ;;  %543 = vst.msk [vmem:[#allocation2 + $0x40] sm:$0xff] (!%p7555_p0), %vm534_vm0, %v8364_v3  ;;  %v688_v10 = vld [vmem:[%s8519_s27 + $0x48] sm:$0xff] (!%p7555_p0)  ;;  %v689_v11 = vld [vmem:[%s8519_s27 + $0x50] sm:$0xff] (!%p7555_p0) }
  0x32   : > { %544 = vst.msk [vmem:[#allocation2 + $0x48] sm:$0xff] (!%p7555_p0), %vm534_vm0, %v8364_v3  ;;  %545 = vst.msk [vmem:[#allocation2 + $0x50] sm:$0xff] (!%p7555_p0), %vm534_vm0, %v8364_v3  ;;  %v690_v12 = vld [vmem:[%s8519_s27 + $0x58] sm:$0xff] (!%p7555_p0)  ;;  %v691_v13 = vld [vmem:[%s8519_s27 + $0x60] sm:$0xff] (!%p7555_p0) }
  0x33   : > { %546 = vst.msk [vmem:[#allocation2 + $0x58] sm:$0xff] (!%p7555_p0), %vm534_vm0, %v8364_v3  ;;  %547 = vst.msk [vmem:[#allocation2 + $0x60] sm:$0xff] (!%p7555_p0), %vm534_vm0, %v8364_v3  ;;  %v692_v14 = vld [vmem:[%s8519_s27 + $0x68] sm:$0xff] (!%p7555_p0)  ;;  %v693_v15 = vld [vmem:[%s8519_s27 + $0x70] sm:$0xff] (!%p7555_p0) }
  0x34   : > { %548 = vst.msk [vmem:[#allocation2 + $0x68] sm:$0xff] (!%p7555_p0), %vm534_vm0, %v8364_v3  ;;  %549 = vst.msk [vmem:[#allocation2 + $0x70] sm:$0xff] (!%p7555_p0), %vm534_vm0, %v8364_v3  ;;  %v694_v16 = vld [vmem:[%s8519_s27 + $0x78] sm:$0xff] (!%p7555_p0)  ;;  %v695_v17 = vld [vmem:[%s8519_s27 + $0x80] sm:$0xff] (!%p7555_p0) }
  0x35   : > { %550 = vst.msk [vmem:[#allocation2 + $0x78] sm:$0xff] (!%p7555_p0), %vm534_vm0, %v8364_v3  ;;  %551 = vst.msk [vmem:[#allocation2 + $0x80] sm:$0xff] (!%p7555_p0), %vm534_vm0, %v8364_v3  ;;  %v696_v18 = vld [vmem:[%s8519_s27 + $0x88] sm:$0xff] (!%p7555_p0)  ;;  %v697_v19 = vld [vmem:[%s8519_s27 + $0x90] sm:$0xff] (!%p7555_p0) }
  0x36   : > { %552 = vst.msk [vmem:[#allocation2 + $0x88] sm:$0xff] %vm534_vm0, %v8364_v3  ;;  %553 = vst.msk [vmem:[#allocation2 + $0x90] sm:$0xff] %vm534_vm0, %v8364_v3  ;;  %v698_v20 = vld [vmem:[%s8519_s27 + $0x98] sm:$0xff]  ;;  %v699_v21 = vld [vmem:[%s8519_s27 + $0xa0] sm:$0xff] }
  0x37   : > { %554 = vst.msk [vmem:[#allocation2 + $0x98] sm:$0xff] %vm534_vm0, %v8364_v3  ;;  %555 = vst.msk [vmem:[#allocation2 + $0xa0] sm:$0xff] %vm534_vm0, %v8364_v3  ;;  %v700_v22 = vld [vmem:[%s8519_s27 + $0xa8] sm:$0xff]  ;;  %v701_v23 = vld [vmem:[%s8519_s27 + $0xb0] sm:$0xff] }
  0x38   : > { %556 = vst.msk [vmem:[#allocation2 + $0xa8] sm:$0xff] %vm534_vm0, %v8364_v3  ;;  %557 = vst.msk [vmem:[#allocation2 + $0xb0] sm:$0xff] %vm534_vm0, %v8364_v3  ;;  %v702_v24 = vld [vmem:[%s8519_s27 + $0xb8] sm:$0xff]  ;;  %v703_v25 = vld [vmem:[%s8519_s27 + $0xc0] sm:$0xff] }
  0x39   : > { %558 = vst.msk [vmem:[#allocation2 + $0xb8] sm:$0xff] %vm534_vm0, %v8364_v3  ;;  %559 = vst.msk [vmem:[#allocation2 + $0xc0] sm:$0xff] %vm534_vm0, %v8364_v3  ;;  %v704_v26 = vld [vmem:[%s8519_s27 + $0xc8] sm:$0xff]  ;;  %v705_v27 = vld [vmem:[%s8519_s27 + $0xd0] sm:$0xff] }
  0x3a   : > { %560 = vst.msk [vmem:[#allocation2 + $0xc8] sm:$0xff] %vm534_vm0, %v8364_v3  ;;  %561 = vst.msk [vmem:[#allocation2 + $0xd0] sm:$0xff] %vm534_vm0, %v8364_v3  ;;  %v706_v28 = vld [vmem:[%s8519_s27 + $0xd8] sm:$0xff]  ;;  %v707_v29 = vld [vmem:[%s8519_s27 + $0xe0] sm:$0xff] }
  0x3b   : > { %562 = vst.msk [vmem:[#allocation2 + $0xd8] sm:$0xff] %vm534_vm0, %v8364_v3  ;;  %563 = vst.msk [vmem:[#allocation2 + $0xe0] sm:$0xff] %vm534_vm0, %v8364_v3  ;;  %v708_v30 = vld [vmem:[%s8519_s27 + $0xe8] sm:$0xff]  ;;  %v709_v31 = vld [vmem:[%s8519_s27 + $0xf0] sm:$0xff] }
  0x3c   : > { %564 = vst.msk [vmem:[#allocation2 + $0xe8] sm:$0xff] %vm534_vm0, %v8364_v3  ;;  %565 = vst.msk [vmem:[#allocation2 + $0xf0] sm:$0xff] %vm534_vm0, %v8364_v3  ;;  %v710_v32 = vld [vmem:[%s8519_s27 + $0xf8] sm:$0xff] }
  0x3d   : > { %566 = vst.msk [vmem:[#allocation2 + $0xf8] sm:$0xff] %vm534_vm0, %v8364_v3  ;;  %567 = vst.msk [vmem:[#allocation2 + $0x100] sm:$0xff] %vm534_vm0, %v8364_v3 }
  0x3e   : > { %568 = vst.msk [vmem:[#allocation2 + $0x108] sm:$0xff] %vm534_vm0, %v8364_v3  ;;  %569 = vst.msk [vmem:[#allocation2 + $0x110] sm:$0xff] %vm534_vm0, %v8364_v3 }
  0x3f   : > { %570 = vst.msk [vmem:[#allocation2 + $0x118] sm:$0xff] %vm534_vm0, %v8364_v3  ;;  %571 = vst.msk [vmem:[#allocation2 + $0x120] sm:$0xff] %vm534_vm0, %v8364_v3 }
  0x40   : > { %572 = vst.msk [vmem:[#allocation2 + $0x128] sm:$0xff] %vm534_vm0, %v8364_v3  ;;  %573 = vst.msk [vmem:[#allocation2 + $0x130] sm:$0xff] %vm534_vm0, %v8364_v3 }
  0x41   : > { %574 = vst.msk [vmem:[#allocation2 + $0x138] sm:$0xff] %vm534_vm0, %v8364_v3  ;;  %575 = vst.msk [vmem:[#allocation2 + $0x140] sm:$0xff] %vm534_vm0, %v8364_v3 }
  0x42   : > { %576 = vst.msk [vmem:[#allocation2 + $0x148] sm:$0xff] %vm534_vm0, %v8364_v3  ;;  %577 = vst.msk [vmem:[#allocation2 + $0x150] sm:$0xff] %vm534_vm0, %v8364_v3 }
  0x43   : > { %578 = vst.msk [vmem:[#allocation2 + $0x158] sm:$0xff] %vm534_vm0, %v8364_v3  ;;  %579 = vst.msk [vmem:[#allocation2 + $0x160] sm:$0xff] %vm534_vm0, %v8364_v3 }
  0x44   : > { %580 = vst.msk [vmem:[#allocation2 + $0x168] sm:$0xff] %vm534_vm0, %v8364_v3  ;;  %581 = vst.msk [vmem:[#allocation2 + $0x170] sm:$0xff] %vm534_vm0, %v8364_v3 }
  0x45   : > { %582 = vst.msk [vmem:[#allocation2 + $0x178] sm:$0xff] %vm534_vm0, %v8364_v3  ;;  %583 = vst.msk [vmem:[#allocation2 + $0x180] sm:$0xff] %vm534_vm0, %v8364_v3 }
  0x46   : > { %584 = vst.msk [vmem:[#allocation2 + $0x188] sm:$0xff] %vm534_vm0, %v8364_v3  ;;  %585 = vst.msk [vmem:[#allocation2 + $0x190] sm:$0xff] %vm534_vm0, %v8364_v3 }
  0x47   : > { %586 = vst.msk [vmem:[#allocation2 + $0x198] sm:$0xff] %vm534_vm0, %v8364_v3  ;;  %587 = vst.msk [vmem:[#allocation2 + $0x1a0] sm:$0xff] %vm534_vm0, %v8364_v3 }
  0x48   : > { %588 = vst.msk [vmem:[#allocation2 + $0x1a8] sm:$0xff] %vm534_vm0, %v8364_v3  ;;  %589 = vst.msk [vmem:[#allocation2 + $0x1b0] sm:$0xff] %vm534_vm0, %v8364_v3 }
  0x49   : > { %590 = vst.msk [vmem:[#allocation2 + $0x1b8] sm:$0xff] %vm534_vm0, %v8364_v3  ;;  %591 = vst.msk [vmem:[#allocation2 + $0x1c0] sm:$0xff] %vm534_vm0, %v8364_v3 }
  0x4a   : > { %592 = vst.msk [vmem:[#allocation2 + $0x1c8] sm:$0xff] %vm534_vm0, %v8364_v3  ;;  %593 = vst.msk [vmem:[#allocation2 + $0x1d0] sm:$0xff] %vm534_vm0, %v8364_v3 }
  0x4b   : > { %594 = vst.msk [vmem:[#allocation2 + $0x1d8] sm:$0xff] %vm534_vm0, %v8364_v3  ;;  %595 = vst.msk [vmem:[#allocation2 + $0x1e0] sm:$0xff] %vm534_vm0, %v8364_v3 }
  0x4c   : > { %596 = vst.msk [vmem:[#allocation2 + $0x1e8] sm:$0xff] %vm534_vm0, %v8364_v3  ;;  %597 = vst.msk [vmem:[#allocation2 + $0x1f0] sm:$0xff] %vm534_vm0, %v8364_v3 }
  0x4d   : > { %598 = vst.msk [vmem:[#allocation2 + $0x1f8] sm:$0xff] %vm534_vm0, %v8364_v3  ;;  %599 = vst.msk [vmem:[#allocation2 + $0x200] sm:$0xff] %vm534_vm0, %v8364_v3 }
  0x4e   : > { %600 = vst.msk [vmem:[#allocation2 + $0x208] sm:$0xff] %vm534_vm0, %v8364_v3  ;;  %601 = vst.msk [vmem:[#allocation2 + $0x210] sm:$0xff] %vm534_vm0, %v8364_v3 }
  0x4f   : > { %602 = vst.msk [vmem:[#allocation2 + $0x218] sm:$0xff] %vm534_vm0, %v8364_v3  ;;  %603 = vst.msk [vmem:[#allocation2 + $0x220] sm:$0xff] %vm534_vm0, %v8364_v3 }
  0x50   : > { %604 = vst.msk [vmem:[#allocation2 + $0x228] sm:$0xff] %vm534_vm0, %v8364_v3  ;;  %605 = vst.msk [vmem:[#allocation2 + $0x230] sm:$0xff] %vm534_vm0, %v8364_v3 }
  0x51   : > { %606 = vst.msk [vmem:[#allocation2 + $0x238] sm:$0xff] %vm534_vm0, %v8364_v3  ;;  %607 = vst.msk [vmem:[#allocation3] sm:$0xff] %vm534_vm0, %v8364_v3 }
  0x52   : > { %608 = vst.msk [vmem:[#allocation3 + $0x8] sm:$0xff] %vm534_vm0, %v8364_v3  ;;  %609 = vst.msk [vmem:[#allocation3 + $0x10] sm:$0xff] %vm534_vm0, %v8364_v3 }
  0x53   : > { %610 = vst.msk [vmem:[#allocation3 + $0x18] sm:$0xff] %vm534_vm0, %v8364_v3  ;;  %611 = vst.msk [vmem:[#allocation3 + $0x20] sm:$0xff] %vm534_vm0, %v8364_v3 }
  0x54   : > { %612 = vst.msk [vmem:[#allocation3 + $0x28] sm:$0xff] %vm534_vm0, %v8364_v3  ;;  %613 = vst.msk [vmem:[#allocation3 + $0x30] sm:$0xff] %vm534_vm0, %v8364_v3 }
  0x55   : > { %614 = vst.msk [vmem:[#allocation3 + $0x38] sm:$0xff] %vm534_vm0, %v8364_v3  ;;  %615 = vst.msk [vmem:[#allocation3 + $0x40] sm:$0xff] %vm534_vm0, %v8364_v3 }
  0x56   : > { %616 = vst.msk [vmem:[#allocation3 + $0x48] sm:$0xff] %vm534_vm0, %v8364_v3  ;;  %617 = vst.msk [vmem:[#allocation3 + $0x50] sm:$0xff] %vm534_vm0, %v8364_v3 }
  0x57   : > { %618 = vst.msk [vmem:[#allocation3 + $0x58] sm:$0xff] %vm534_vm0, %v8364_v3  ;;  %619 = vst.msk [vmem:[#allocation3 + $0x60] sm:$0xff] %vm534_vm0, %v8364_v3 }
  0x58   : > { %620 = vst.msk [vmem:[#allocation3 + $0x68] sm:$0xff] %vm534_vm0, %v8364_v3  ;;  %621 = vst.msk [vmem:[#allocation3 + $0x70] sm:$0xff] %vm534_vm0, %v8364_v3 }
  0x59   : > { %622 = vst.msk [vmem:[#allocation3 + $0x78] sm:$0xff] %vm534_vm0, %v8364_v3  ;;  %623 = vst.msk [vmem:[#allocation3 + $0x80] sm:$0xff] %vm534_vm0, %v8364_v3 }
  0x5a   : > { %624 = vst.msk [vmem:[#allocation3 + $0x88] sm:$0xff] %vm534_vm0, %v8364_v3  ;;  %625 = vst.msk [vmem:[#allocation3 + $0x90] sm:$0xff] %vm534_vm0, %v8364_v3 }
  0x5b   : > { %626 = vst.msk [vmem:[#allocation3 + $0x98] sm:$0xff] %vm534_vm0, %v8364_v3  ;;  %627 = vst.msk [vmem:[#allocation3 + $0xa0] sm:$0xff] %vm534_vm0, %v8364_v3 }
  0x5c   : > { %628 = vst.msk [vmem:[#allocation3 + $0xa8] sm:$0xff] %vm534_vm0, %v8364_v3  ;;  %629 = vst.msk [vmem:[#allocation3 + $0xb0] sm:$0xff] %vm534_vm0, %v8364_v3 }
  0x5d   : > { %630 = vst.msk [vmem:[#allocation3 + $0xb8] sm:$0xff] %vm534_vm0, %v8364_v3  ;;  %631 = vst.msk [vmem:[#allocation3 + $0xc0] sm:$0xff] %vm534_vm0, %v8364_v3 }
  0x5e   : > { %632 = vst.msk [vmem:[#allocation3 + $0xc8] sm:$0xff] %vm534_vm0, %v8364_v3  ;;  %633 = vst.msk [vmem:[#allocation3 + $0xd0] sm:$0xff] %vm534_vm0, %v8364_v3 }
  0x5f   : > { %634 = vst.msk [vmem:[#allocation3 + $0xd8] sm:$0xff] %vm534_vm0, %v8364_v3  ;;  %635 = vst.msk [vmem:[#allocation3 + $0xe0] sm:$0xff] %vm534_vm0, %v8364_v3 }
  0x60   : > { %636 = vst.msk [vmem:[#allocation3 + $0xe8] sm:$0xff] %vm534_vm0, %v8364_v3  ;;  %637 = vst.msk [vmem:[#allocation3 + $0xf0] sm:$0xff] %vm534_vm0, %v8364_v3 }
  0x61   : > { %638 = vst.msk [vmem:[#allocation3 + $0xf8] sm:$0xff] %vm534_vm0, %v8364_v3  ;;  %639 = vst.msk [vmem:[#allocation3 + $0x100] sm:$0xff] %vm534_vm0, %v8364_v3 }
  0x62   : > { %640 = vst.msk [vmem:[#allocation3 + $0x108] sm:$0xff] %vm534_vm0, %v8364_v3  ;;  %641 = vst.msk [vmem:[#allocation3 + $0x110] sm:$0xff] %vm534_vm0, %v8364_v3 }
  0x63   : > { %642 = vst.msk [vmem:[#allocation3 + $0x118] sm:$0xff] %vm534_vm0, %v8364_v3  ;;  %643 = vst.msk [vmem:[#allocation3 + $0x120] sm:$0xff] %vm534_vm0, %v8364_v3 }
  0x64   : > { %644 = vst.msk [vmem:[#allocation3 + $0x128] sm:$0xff] %vm534_vm0, %v8364_v3  ;;  %645 = vst.msk [vmem:[#allocation3 + $0x130] sm:$0xff] %vm534_vm0, %v8364_v3 }
  0x65   : > { %646 = vst.msk [vmem:[#allocation3 + $0x138] sm:$0xff] %vm534_vm0, %v8364_v3  ;;  %647 = vst.msk [vmem:[#allocation3 + $0x140] sm:$0xff] %vm534_vm0, %v8364_v3 }
  0x66   : > { %648 = vst.msk [vmem:[#allocation3 + $0x148] sm:$0xff] %vm534_vm0, %v8364_v3  ;;  %649 = vst.msk [vmem:[#allocation3 + $0x150] sm:$0xff] %vm534_vm0, %v8364_v3 }
  0x67   : > { %650 = vst.msk [vmem:[#allocation3 + $0x158] sm:$0xff] %vm534_vm0, %v8364_v3  ;;  %651 = vst.msk [vmem:[#allocation3 + $0x160] sm:$0xff] %vm534_vm0, %v8364_v3 }
  0x68   : > { %652 = vst.msk [vmem:[#allocation3 + $0x168] sm:$0xff] %vm534_vm0, %v8364_v3  ;;  %653 = vst.msk [vmem:[#allocation3 + $0x170] sm:$0xff] %vm534_vm0, %v8364_v3 }
  0x69   : > { %654 = vst.msk [vmem:[#allocation3 + $0x178] sm:$0xff] %vm534_vm0, %v8364_v3  ;;  %655 = vst.msk [vmem:[#allocation3 + $0x180] sm:$0xff] %vm534_vm0, %v8364_v3 }
  0x6a   : > { %656 = vst.msk [vmem:[#allocation3 + $0x188] sm:$0xff] %vm534_vm0, %v8364_v3  ;;  %657 = vst.msk [vmem:[#allocation3 + $0x190] sm:$0xff] %vm534_vm0, %v8364_v3 }
  0x6b   : > { %658 = vst.msk [vmem:[#allocation3 + $0x198] sm:$0xff] %vm534_vm0, %v8364_v3  ;;  %659 = vst.msk [vmem:[#allocation3 + $0x1a0] sm:$0xff] %vm534_vm0, %v8364_v3 }
  0x6c   : > { %660 = vst.msk [vmem:[#allocation3 + $0x1a8] sm:$0xff] %vm534_vm0, %v8364_v3  ;;  %661 = vst.msk [vmem:[#allocation3 + $0x1b0] sm:$0xff] %vm534_vm0, %v8364_v3 }
  0x6d   : > { %662 = vst.msk [vmem:[#allocation3 + $0x1b8] sm:$0xff] %vm534_vm0, %v8364_v3  ;;  %663 = vst.msk [vmem:[#allocation3 + $0x1c0] sm:$0xff] %vm534_vm0, %v8364_v3 }
  0x6e   : > { %664 = vst.msk [vmem:[#allocation3 + $0x1c8] sm:$0xff] %vm534_vm0, %v8364_v3  ;;  %665 = vst.msk [vmem:[#allocation3 + $0x1d0] sm:$0xff] %vm534_vm0, %v8364_v3 }
  0x6f   : > { %666 = vst.msk [vmem:[#allocation3 + $0x1d8] sm:$0xff] %vm534_vm0, %v8364_v3  ;;  %667 = vst.msk [vmem:[#allocation3 + $0x1e0] sm:$0xff] %vm534_vm0, %v8364_v3 }
  0x70   : > { %668 = vst.msk [vmem:[#allocation3 + $0x1e8] sm:$0xff] %vm534_vm0, %v8364_v3  ;;  %669 = vst.msk [vmem:[#allocation3 + $0x1f0] sm:$0xff] %vm534_vm0, %v8364_v3 }
  0x71   : > { %670 = vst.msk [vmem:[#allocation3 + $0x1f8] sm:$0xff] %vm534_vm0, %v8364_v3  ;;  %671 = vst.msk [vmem:[#allocation3 + $0x200] sm:$0xff] %vm534_vm0, %v8364_v3 }
  0x72   : > { %672 = vst.msk [vmem:[#allocation3 + $0x208] sm:$0xff] %vm534_vm0, %v8364_v3  ;;  %673 = vst.msk [vmem:[#allocation3 + $0x210] sm:$0xff] %vm534_vm0, %v8364_v3 }
  0x73   : > { %674 = vst.msk [vmem:[#allocation3 + $0x218] sm:$0xff] %vm534_vm0, %v8364_v3  ;;  %675 = vst.msk [vmem:[#allocation3 + $0x220] sm:$0xff] %vm534_vm0, %v8364_v3 }
  0x74   : > { %676 = vst.msk [vmem:[#allocation3 + $0x228] sm:$0xff] %vm534_vm0, %v8364_v3  ;;  %677 = vst.msk [vmem:[#allocation3 + $0x230] sm:$0xff] %vm534_vm0, %v8364_v3 }
  0x75   : > { %678 = vst.msk [vmem:[#allocation3 + $0x238] sm:$0xff] %vm534_vm0, %v8364_v3  ;;  %712 = vst.msk [vmem:[#allocation2 + $0x28] sm:$0xff] %vm534_vm0, %v8566_v0 }
  0x76   : > { %713 = vst.msk [vmem:[#allocation2 + $0x30] sm:$0xff] %vm534_vm0, %v8569_v1  ;;  %714 = vst.msk [vmem:[#allocation2 + $0x48] sm:$0xff] %vm534_vm0, %v8572_v2 }
  0x77   : > { %715 = vst.msk [vmem:[#allocation2 + $0x50] sm:$0xff] %vm534_vm0, %v682_v4  ;;  %716 = vst.msk [vmem:[#allocation2 + $0x68] sm:$0xff] %vm534_vm0, %v683_v5 }
  0x78   : > { %717 = vst.msk [vmem:[#allocation2 + $0x70] sm:$0xff] %vm534_vm0, %v684_v6  ;;  %718 = vst.msk [vmem:[#allocation2 + $0x88] sm:$0xff] %vm534_vm0, %v685_v7 }
  0x79   : > { %719 = vst.msk [vmem:[#allocation2 + $0x90] sm:$0xff] %vm534_vm0, %v686_v8  ;;  %720 = vst.msk [vmem:[#allocation2 + $0xa8] sm:$0xff] %vm534_vm0, %v687_v9 }
  0x7a   : > { %721 = vst.msk [vmem:[#allocation2 + $0xb0] sm:$0xff] %vm534_vm0, %v688_v10  ;;  %722 = vst.msk [vmem:[#allocation2 + $0xc8] sm:$0xff] %vm534_vm0, %v689_v11 }
  0x7b   : > { %723 = vst.msk [vmem:[#allocation2 + $0xd0] sm:$0xff] %vm534_vm0, %v690_v12  ;;  %724 = vst.msk [vmem:[#allocation2 + $0xe8] sm:$0xff] %vm534_vm0, %v691_v13 }
  0x7c   : > { %725 = vst.msk [vmem:[#allocation2 + $0xf0] sm:$0xff] %vm534_vm0, %v692_v14  ;;  %726 = vst.msk [vmem:[#allocation2 + $0x108] sm:$0xff] %vm534_vm0, %v693_v15 }
  0x7d   : > { %727 = vst.msk [vmem:[#allocation2 + $0x110] sm:$0xff] %vm534_vm0, %v694_v16  ;;  %728 = vst.msk [vmem:[#allocation2 + $0x128] sm:$0xff] %vm534_vm0, %v695_v17 }
  0x7e   : > { %729 = vst.msk [vmem:[#allocation2 + $0x130] sm:$0xff] %vm534_vm0, %v696_v18  ;;  %730 = vst.msk [vmem:[#allocation2 + $0x148] sm:$0xff] %vm534_vm0, %v697_v19 }
  0x7f   : > { %731 = vst.msk [vmem:[#allocation2 + $0x150] sm:$0xff] %vm534_vm0, %v698_v20  ;;  %732 = vst.msk [vmem:[#allocation2 + $0x168] sm:$0xff] %vm534_vm0, %v699_v21 }
  0x80   : > { %733 = vst.msk [vmem:[#allocation2 + $0x170] sm:$0xff] %vm534_vm0, %v700_v22  ;;  %734 = vst.msk [vmem:[#allocation2 + $0x188] sm:$0xff] %vm534_vm0, %v701_v23 }
  0x81   : > { %735 = vst.msk [vmem:[#allocation2 + $0x190] sm:$0xff] %vm534_vm0, %v702_v24  ;;  %736 = vst.msk [vmem:[#allocation2 + $0x1a8] sm:$0xff] %vm534_vm0, %v703_v25 }
  0x82   : > { %737 = vst.msk [vmem:[#allocation2 + $0x1b0] sm:$0xff] %vm534_vm0, %v704_v26  ;;  %738 = vst.msk [vmem:[#allocation2 + $0x1c8] sm:$0xff] %vm534_vm0, %v705_v27 }
  0x83   : > { %739 = vst.msk [vmem:[#allocation2 + $0x1d0] sm:$0xff] %vm534_vm0, %v706_v28  ;;  %740 = vst.msk [vmem:[#allocation2 + $0x1e8] sm:$0xff] %vm534_vm0, %v707_v29 }
  0x84   : > { %741 = vst.msk [vmem:[#allocation2 + $0x1f0] sm:$0xff] %vm534_vm0, %v708_v30  ;;  %742 = vst.msk [vmem:[#allocation2 + $0x208] sm:$0xff] %vm534_vm0, %v709_v31 }
  0x85   : > { %743 = vst.msk [vmem:[#allocation2 + $0x210] sm:$0xff] %vm534_vm0, %v710_v32 }
  0x86 PF: > { %s8365_s0 = smov 64   ;;  %s8366_s1 = smov 32   ;;  %vm813_vm1 = vcmask 261120   ;;  %v1039_v37 = vld [vmem:[#allocation2 + $0x9] sm:$0xff]  ;;  %v8367_v39 = vmov 0.0|0.0   ;;  %v744_v58 = vld [vmem:[%s8535_s29] sm:$0xff] }
  0x87   : > { %v8928_v34 = vld [vmem:[#allocation2 + $0x29] sm:$0xff]  ;;  %7967 = vmatprep.subr.bf16.mxu0 %v8367_v39  ;;  %s8368_s2 = smov 96   ;;  %v747_v0 = vld [vmem:[%s8535_s29 + $0x18] sm:$0xff]  ;;  %v748_v5 = vld [vmem:[%s8535_s29 + $0x20] sm:$0xff]  ;;  %vm1006_vm2 = vcmask 523520   ;;  %vm1199_vm3 = vcmask 785920  }
  0x88   : > { %1554 = vrot.lane.b32.xlu0 %v8928_v34, %s8366_s1  ;;  %v1233_v35 = vld [vmem:[#allocation2 + $0x27] sm:$0xff]  ;;  %v8944_v41 = vld [vmem:[#allocation2 + $0x2f] sm:$0xff]  ;;  %v751_v14 = vld [vmem:[%s8535_s29 + $0x38] sm:$0xff]  ;;  %vm1393_vm4 = vcmask 1048320   ;;  %vm8369_vm5 = vmmov 0   ;;  %vm5030_vm6 = vcmask 1043456  }
  0x89   : > { %v8926_v33 = vld [vmem:[#allocation2 + $0x47] sm:$0xff]  ;;  %816 = vst.msk [vmem:[#allocation4 + $0x30] sm:$0xff] %vm813_vm1, %v1233_v35  ;;  %v8942_v40 = vld [vmem:[#allocation2 + $0x4f] sm:$0xff]  ;;  %817 = vst.msk [vmem:[#allocation4 + $0x48] sm:$0xff] %vm813_vm1, %v8944_v41  ;;  %vm5026_vm7 = vcmask 31744   ;;  %p7626_p1 = scmp.ne.s32.totalorder %s8346_s20, 1 }
  0x8a   : > { %1747 = vrot.lane.b32.xlu1 %v8926_v33, %s8365_s0  ;;  %v8934_v36 = vld [vmem:[#allocation2 + $0x48] sm:$0xff]  ;;  %818 = vst.msk [vmem:[#allocation4 + $0x60] sm:$0xff] %vm813_vm1, %v8926_v33  ;;  %v8946_v42 = vld [vmem:[#allocation2 + $0x50] sm:$0xff]  ;;  %819 = vst.msk [vmem:[#allocation4 + $0x78] sm:$0xff] %vm813_vm1, %v8942_v40  ;;  %s8373_s20 = smov (!%p7626_p1), 64  }
  0x8b   : > { %v846_v38 = vld [vmem:[#allocation2 + $0x8] sm:$0xff]  ;;  %1460 = vst.msk [vmem:[#allocation4 + $0x38] sm:$0xff] %vm813_vm1, %v8934_v36  ;;  %1461 = vst.msk [vmem:[#allocation4 + $0x50] sm:$0xff] %vm813_vm1, %v8946_v42  ;;  %v8964_v47 = vld [vmem:[#allocation2 + $0x30] sm:$0xff] }
  0x8c   : > { %v8948_v43 = vld [vmem:[#allocation2 + $0x28] sm:$0xff]  ;;  %910 = vrot.lane.b32.xlu0 %v846_v38, %s8366_s1  ;;  %v8966_v48 = vld [vmem:[#allocation2 + $0x51] sm:$0xff]  ;;  %1459 = vst.msk [vmem:[#allocation4 + $0x20] sm:$0xff] %vm813_vm1, %v8964_v47  ;;  %v752_v19 = vld [vmem:[%s8535_s29 + $0x40] sm:$0xff] }
  0x8d   : > { %v8950_v44 = vld [vmem:[#allocation2 + $0x49] sm:$0xff]  ;;  %1458 = vst.msk [vmem:[#allocation4 + $0x8] sm:$0xff] %vm813_vm1, %v8948_v43  ;;  %2100 = vst.msk [vmem:[#allocation4 + $0x28] sm:$0xff] %vm813_vm1, %v8966_v48  ;;  %v8990_v54 = vld [vmem:[#allocation2 + $0x71] sm:$0xff] }
  0x8e   : > { %v8952_v45 = vld [vmem:[#allocation2 + $0x67] sm:$0xff]  ;;  %1103 = vrot.lane.b32.xlu1 %v1039_v37, %s8365_s0  ;;  %2099 = vst.msk [vmem:[#allocation4 + $0x10] sm:$0xff] %vm813_vm1, %v8950_v44  ;;  %v8974_v49 = vld [vmem:[#allocation2 + $0x6f] sm:$0xff]  ;;  %2102 = vst.msk [vmem:[#allocation4 + $0x58] sm:$0xff] %vm813_vm1, %v8990_v54 }
  0x8f   : > { %v8962_v46 = vld [vmem:[#allocation2 + $0x68] sm:$0xff]  ;;  %820 = vst.msk [vmem:[#allocation4 + $0x90] sm:$0xff] %vm813_vm1, %v8952_v45  ;;  %v8976_v50 = vld [vmem:[#allocation2 + $0x70] sm:$0xff]  ;;  %821 = vst.msk [vmem:[#allocation4 + $0xa8] sm:$0xff] %vm813_vm1, %v8974_v49 }
  0x90   : > { %v8978_v51 = vld [vmem:[#allocation2 + $0x69] sm:$0xff]  ;;  %1462 = vst.msk [vmem:[#allocation4 + $0x68] sm:$0xff] %vm813_vm1, %v8962_v46  ;;  %1463 = vst.msk [vmem:[#allocation4 + $0x80] sm:$0xff] %vm813_vm1, %v8976_v50  ;;  %1939 = vrot.lane.b32.xlu0 %v8934_v36, %s8368_s2  ;;  %v9020_v62 = vld [vmem:[#allocation2 + $0x31] sm:$0xff] }
  0x91   : > { %v8986_v52 = vld [vmem:[#allocation2 + $0x87] sm:$0xff]  ;;  %2101 = vst.msk [vmem:[#allocation4 + $0x40] sm:$0xff] %vm813_vm1, %v8978_v51  ;;  %v847_v55 = vld [vmem:[#allocation2 + $0x10] sm:$0xff]  ;;  %v755_v31 = vld [vmem:[%s8535_s29 + $0x58] sm:$0xff] }
  0x92   : > { %v8988_v53 = vld [vmem:[#allocation2 + $0x88] sm:$0xff]  ;;  %v9000_v57 = vld [vmem:[#allocation2 + $0x90] sm:$0xff]  ;;  %822 = vst.msk [vmem:[#allocation4 + $0xc0] sm:$0xff] %vm813_vm1, %v8986_v52  ;;  %1297 = vrot.lane.b32.xlu1 %v1233_v35, %s8368_s2  ;;  %v776_v25 = vld [vmem:[%s8535_s29 + $0x100] sm:$0xff] }
  0x93   : > { %v8998_v56 = vld [vmem:[#allocation2 + $0x8f] sm:$0xff]  ;;  %1464 = vst.msk [vmem:[#allocation4 + $0x98] sm:$0xff] %vm813_vm1, %v8988_v53  ;;  %1465 = vst.msk [vmem:[#allocation4 + $0xb0] sm:$0xff] %vm813_vm1, %v9000_v57  ;;  %v9023_v1 = vld [vmem:[#allocation2 + $0xa7] sm:$0xff] }
  0x94   : > { %v745_v59 = vld [vmem:[%s8535_s29 + $0x8] sm:$0xff]  ;;  %v746_v61 = vld [vmem:[%s8535_s29 + $0x10] sm:$0xff]  ;;  %823 = vst.msk [vmem:[#allocation4 + $0xd8] sm:$0xff] %vm813_vm1, %v8998_v56  ;;  %824 = vst.msk [vmem:[#allocation4 + $0xf0] sm:$0xff] %vm813_vm1, %v9023_v1  ;;  %1556 = vrot.lane.b32.xlu0 %v9020_v62, %s8366_s1 }
  0x95   : > { %v9013_v60 = vld [vmem:[#allocation2 + $0x89] sm:$0xff]  ;;  %v7968_v63 = vpack.c.bf16 %v745_v59, %v744_v58  ;;  %v7971_v3 = vpack.c.bf16 %v747_v0, %v746_v61  ;;  %v9031_v4 = vld [vmem:[#allocation2 + $0x91] sm:$0xff] }
  0x96   : > { %2103 = vst.msk [vmem:[#allocation4 + $0x70] sm:$0xff] %vm813_vm1, %v9013_v60  ;;  %v9027_v2 = vld [vmem:[#allocation2 + $0xa8] sm:$0xff]  ;;  %912 = vrot.lane.b32.xlu1 %v847_v55, %s8366_s1  ;;  %2104 = vst.msk [vmem:[#allocation4 + $0x88] sm:$0xff] %vm813_vm1, %v9031_v4  ;;  %v1040_v8 = vld [vmem:[#allocation2 + $0x11] sm:$0xff] }
  0x97   : > { %7969 = vmatpush1.bf16.msra.mxu0 %v7968_v63  ;;  %1466 = vst.msk [vmem:[#allocation4 + $0xc8] sm:$0xff] %vm813_vm1, %v9027_v2  ;;  %v749_v6 = vld [vmem:[%s8535_s29 + $0x28] sm:$0xff]  ;;  %v9045_v9 = vld [vmem:[#allocation2 + $0xb0] sm:$0xff]  ;;  %v779_v38 = vld [vmem:[%s8535_s29 + $0x118] sm:$0xff] }
  0x98   : > { %v9040_v7 = vld [vmem:[#allocation2 + $0xaf] sm:$0xff]  ;;  %7970 = vmatprep.subr.bf16.mxu0 %v8367_v39  ;;  %1467 = vst.msk [vmem:[#allocation4 + $0xe0] sm:$0xff] %vm813_vm1, %v9045_v9  ;;  %v7974_v11 = vpack.c.bf16 %v749_v6, %v748_v5  ;;  %v9053_v12 = vld [vmem:[#allocation2 + $0xc7] sm:$0xff]  ;;  %1749 = vrot.lane.b32.xlu0 %v8942_v40, %s8365_s0 }
  0x99   : > { %825 = vst.msk [vmem:[#allocation4 + $0x108] sm:$0xff] %vm813_vm1, %v9040_v7  ;;  %v9049_v10 = vld [vmem:[#allocation2 + $0xa9] sm:$0xff]  ;;  %826 = vst.msk [vmem:[#allocation4 + $0x120] sm:$0xff] %vm813_vm1, %v9053_v12  ;;  %v9067_v16 = vld [vmem:[#allocation2 + $0xb1] sm:$0xff] }
  0x9a   : > { %2105 = vst.msk [vmem:[#allocation4 + $0xa0] sm:$0xff] %vm813_vm1, %v9049_v10  ;;  %1105 = vrot.lane.b32.xlu1 %v1040_v8, %s8365_s0  ;;  %v750_v13 = vld [vmem:[%s8535_s29 + $0x30] sm:$0xff]  ;;  %v9062_v15 = vld [vmem:[#allocation2 + $0xc8] sm:$0xff]  ;;  %2106 = vst.msk [vmem:[#allocation4 + $0xb8] sm:$0xff] %vm813_vm1, %v9067_v16 }
  0x9b   : > { %7972 = vmatpush1.bf16.msra.mxu0 %v7971_v3  ;;  %1468 = vst.msk [vmem:[#allocation4 + $0xf8] sm:$0xff] %vm813_vm1, %v9062_v15  ;;  %v9071_v17 = vld [vmem:[#allocation2 + $0xcf] sm:$0xff]  ;;  %v7977_v18 = vpack.c.bf16 %v751_v14, %v750_v13  ;;  %v781_v22 = vld [vmem:[#allocation2 + $0x7] sm:$0xff]  ;;  %v759_v13 = vld [vmem:[%s8535_s29 + $0x78] sm:$0xff] }
  0x9c   : > { %7973 = vmatprep.subr.bf16.mxu0 %v8367_v39  ;;  %v9076_v20 = vld [vmem:[#allocation2 + $0xd0] sm:$0xff]  ;;  %827 = vst.msk [vmem:[#allocation4 + $0x138] sm:$0xff] %vm813_vm1, %v9071_v17  ;;  %1941 = vrot.lane.b32.xlu0 %v8946_v42, %s8368_s2  ;;  %v753_v21 = vld [vmem:[%s8535_s29 + $0x48] sm:$0xff]  ;;  %814 = vst.msk [vmem:[#allocation4] sm:$0xff] %vm813_vm1, %v781_v22 }
  0x9d   : > { %v9085_v23 = vld [vmem:[#allocation2 + $0xc9] sm:$0xff]  ;;  %1469 = vst.msk [vmem:[#allocation4 + $0x110] sm:$0xff] %vm813_vm1, %v9076_v20  ;;  %v7980_v26 = vpack.c.bf16 %v753_v21, %v752_v19  ;;  %v9108_v35 = vld [vmem:[#allocation2 + $0xd1] sm:$0xff]  ;;  %v756_v3 = vld [vmem:[%s8535_s29 + $0x60] sm:$0xff] }
  0x9e   : > { %1299 = vrot.lane.b32.xlu1 %v8944_v41, %s8368_s2  ;;  %v9091_v24 = vld [vmem:[#allocation2 + $0xe7] sm:$0xff]  ;;  %2107 = vst.msk [vmem:[#allocation4 + $0xd0] sm:$0xff] %vm813_vm1, %v9085_v23  ;;  %v782_v28 = vld [vmem:[#allocation2 + $0xf] sm:$0xff]  ;;  %2108 = vst.msk [vmem:[#allocation4 + $0xe8] sm:$0xff] %vm813_vm1, %v9108_v35 }
  0x9f   : > { %7975 = vmatpush1.bf16.msra.mxu0 %v7974_v11  ;;  %828 = vst.msk [vmem:[#allocation4 + $0x150] sm:$0xff] %vm813_vm1, %v9091_v24  ;;  %v777_v27 = vld [vmem:[%s8535_s29 + $0x108] sm:$0xff]  ;;  %v754_v30 = vld [vmem:[%s8535_s29 + $0x50] sm:$0xff]  ;;  %815 = vst.msk [vmem:[#allocation4 + $0x18] sm:$0xff] %vm813_vm1, %v782_v28 }
  0xa0   : > { %7976 = vmatprep.subr.bf16.mxu0 %v8367_v39  ;;  %v9099_v29 = vld [vmem:[#allocation2 + $0xe8] sm:$0xff]  ;;  %1558 = vrot.lane.b32.xlu0 %v8950_v44, %s8366_s1  ;;  %v8015_v32 = vpack.c.bf16 %v777_v27, %v776_v25  ;;  %v778_v37 = vld [vmem:[%s8535_s29 + $0x110] sm:$0xff]  ;;  %v7983_v59 = vpack.c.bf16 %v755_v31, %v754_v30  ;;  %v2139_v14 = vld [vmem:[#allocation4 + $0x40] sm:$0xff] }
  0xa1   : > { %1470 = vst.msk [vmem:[#allocation4 + $0x128] sm:$0xff] %vm813_vm1, %v9099_v29  ;;  %v2133_v41 = vld [vmem:[#allocation4 + $0x10] sm:$0xff]  ;;  %v9124_v63 = vld [vmem:[#allocation2 + $0x107] sm:$0xff]  ;;  %v2142_v19 = vld [vmem:[#allocation4 + $0x58] sm:$0xff] }
  0xa2   : > { %914 = vrot.lane.b32.xlu1 %v8948_v43, %s8366_s1  ;;  %8016 = vmatprep.subr.bf16.mxu1 %v8015_v32  ;;  %v8019_v43 = vpack.c.bf16 %v779_v38, %v778_v37  ;;  %v9118_v55 = vld [vmem:[#allocation2 + $0xef] sm:$0xff]  ;;  %830 = vst.msk [vmem:[#allocation4 + $0x180] sm:$0xff] %vm813_vm1, %v9124_v63  ;;  %v760_v21 = vld [vmem:[%s8535_s29 + $0x80] sm:$0xff]  ;;  %v763_v27 = vld [vmem:[%s8535_s29 + $0x98] sm:$0xff] }
  0xa3   : > { %7978 = vmatpush1.bf16.msra.mxu0 %v7977_v18  ;;  %7791 = vmatprep.mubr.msk.f32.mxu1 %vm813_vm1, %v2133_v41  ;;  %v9120_v58 = vld [vmem:[#allocation2 + $0xf0] sm:$0xff]  ;;  %v9126_v0 = vld [vmem:[#allocation2 + $0x108] sm:$0xff]  ;;  %829 = vst.msk [vmem:[#allocation4 + $0x168] sm:$0xff] %vm813_vm1, %v9118_v55  ;;  %v767_v38 = vld [vmem:[%s8535_s29 + $0xb8] sm:$0xff] }
  0xa4   : > { %7979 = vmatprep.subr.bf16.mxu0 %v8367_v39  ;;  %8018 = vmatpush3.bf16.msra.mxu1 %v8015_v32  ;;  %v9122_v61 = vld [vmem:[#allocation2 + $0xe9] sm:$0xff]  ;;  %1471 = vst.msk [vmem:[#allocation4 + $0x140] sm:$0xff] %vm813_vm1, %v9120_v58  ;;  %v9138_v6 = vld [vmem:[#allocation2 + $0xf1] sm:$0xff]  ;;  %1472 = vst.msk [vmem:[#allocation4 + $0x158] sm:$0xff] %vm813_vm1, %v9126_v0 }
  0xa5   : > { %1751 = vrot.lane.b32.xlu0 %v8952_v45, %s8365_s0  ;;  %v757_v5 = vld [vmem:[%s8535_s29 + $0x68] sm:$0xff]  ;;  %2109 = vst.msk [vmem:[#allocation4 + $0x100] sm:$0xff] %vm813_vm1, %v9122_v61  ;;  %8020 = vmatprep.subr.bf16.mxu1 %v8019_v43  ;;  %2110 = vst.msk [vmem:[#allocation4 + $0x118] sm:$0xff] %vm813_vm1, %v9138_v6  ;;  %v758_v8 = vld [vmem:[%s8535_s29 + $0x70] sm:$0xff] }
  0xa6   : > { %1107 = vrot.lane.b32.xlu1 %v8928_v34, %s8365_s0  ;;  %v7986_v34 = vpack.c.bf16 %v757_v5, %v756_v3  ;;  %v2136_v11 = vld [vmem:[#allocation4 + $0x28] sm:$0xff]  ;;  %v9169_v25 = vld [vmem:[#allocation2 + $0x110] sm:$0xff] }
  0xa7   : > { %7981 = vmatpush1.bf16.msra.mxu0 %v7980_v26  ;;  %v9155_v18 = vld [vmem:[#allocation2 + $0x10f] sm:$0xff]  ;;  %1473 = vst.msk [vmem:[#allocation4 + $0x170] sm:$0xff] %vm813_vm1, %v9169_v25  ;;  %v9192_v32 = vld [vmem:[#allocation2 + $0x127] sm:$0xff] }
  0xa8   : > { %7982 = vmatprep.subr.bf16.mxu0 %v8367_v39  ;;  %8022 = vmatpush3.bf16.msra.mxu1 %v8019_v43  ;;  %831 = vst.msk [vmem:[#allocation4 + $0x198] sm:$0xff] %vm813_vm1, %v9155_v18  ;;  %v761_v22 = vld [vmem:[%s8535_s29 + $0x88] sm:$0xff]  ;;  %832 = vst.msk [vmem:[#allocation4 + $0x1b0] sm:$0xff] %vm813_vm1, %v9192_v32  ;;  %v9214_v3 = vld [vmem:[#allocation2 + $0x111] sm:$0xff] }
  0xa9   : > { %1943 = vrot.lane.b32.xlu0 %v8962_v46, %s8368_s2  ;;  %8023 = vmatprep.subr.bf16.mxu1 %v8367_v39  ;;  %v7992_v26 = vpack.c.bf16 %v761_v22, %v760_v21  ;;  %v9181_v28 = vld [vmem:[#allocation2 + $0x109] sm:$0xff]  ;;  %2112 = vst.msk [vmem:[#allocation4 + $0x148] sm:$0xff] %vm813_vm1, %v9214_v3  ;;  %v775_v22 = vld [vmem:[%s8535_s29 + $0xf8] sm:$0xff] }
  0xaa   : > { %1301 = vrot.lane.b32.xlu1 %v8926_v33, %s8368_s2  ;;  %v7989_v33 = vpack.c.bf16 %v759_v13, %v758_v8  ;;  %2111 = vst.msk [vmem:[#allocation4 + $0x130] sm:$0xff] %vm813_vm1, %v9181_v28  ;;  %v765_v31 = vld [vmem:[%s8535_s29 + $0xa8] sm:$0xff]  ;;  %v2145_v5 = vld [vmem:[#allocation4 + $0x70] sm:$0xff] }
  0xab   : > { %7984 = vmatpush1.bf16.msra.mxu0 %v7983_v59  ;;  %7792 = vmatmul.mubr.msk.f32.vlgmr.msra.gmra.mrb[0].mxu1 %vm813_vm1, %v2136_v11  ;;  %v9203_v41 = vld [vmem:[#allocation2 + $0x128] sm:$0xff]  ;;  %v768_v59 = vld [vmem:[%s8535_s29 + $0xc0] sm:$0xff]  ;;  %v770_v8 = vld [vmem:[%s8535_s29 + $0xd0] sm:$0xff] }
  0xac   : > { %7985 = vmatprep.subr.bf16.mxu0 %v8367_v39  ;;  %7794 = vmatprep.mubr.msk.f32.mxu1 %vm813_vm1, %v2139_v14  ;;  %1474 = vst.msk [vmem:[#allocation4 + $0x188] sm:$0xff] %vm813_vm1, %v9203_v41  ;;  %v771_v11 = vld [vmem:[%s8535_s29 + $0xd8] sm:$0xff]  ;;  %v9227_v13 = vld [vmem:[#allocation2 + $0x12f] sm:$0xff] }
  0xad   : > { %1560 = vrot.lane.b32.xlu0 %v8966_v48, %s8366_s1  ;;  %833 = vst.msk [vmem:[#allocation4 + $0x1c8] sm:$0xff] %vm813_vm1, %v9227_v13  ;;  %v8007_v14 = vpack.c.bf16 %v771_v11, %v770_v8 }
  0xae   : > { %916 = vrot.lane.b32.xlu1 %v8964_v47, %s8366_s1  ;;  %v762_v47 = vld [vmem:[%s8535_s29 + $0x90] sm:$0xff] }
  0xaf   : > { %7987 = vmatpush1.bf16.msra.mxu0 %v7986_v34  ;;  %7795 = vmatmul.mubr.msk.f32.gmra.mrb[2].mxu1 %vm813_vm1, %v2142_v19  ;;  %v7995_v30 = vpack.c.bf16 %v763_v27, %v762_v47  ;;  %v2148_v34 = vld [vmem:[#allocation4 + $0x88] sm:$0xff]  ;;  %v9238_v19 = vld [vmem:[#allocation2 + $0x130] sm:$0xff] }
  0xb0   : > { %7988 = vmatprep.subr.bf16.mxu0 %v8367_v39  ;;  %7797 = vmatprep.mubr.msk.f32.mxu1 %vm813_vm1, %v2145_v5  ;;  %1475 = vst.msk [vmem:[#allocation4 + $0x1a0] sm:$0xff] %vm813_vm1, %v9238_v19  ;;  %v9267_v27 = vld [vmem:[#allocation2 + $0x148] sm:$0xff]  ;;  %v2166_v5 = vld [vmem:[#allocation4 + $0x118] sm:$0xff] }
  0xb1   : > { %1753 = vrot.lane.b32.xlu0 %v8974_v49, %s8365_s0  ;;  %1476 = vst.msk [vmem:[#allocation4 + $0x1b8] sm:$0xff] %vm813_vm1, %v9267_v27 }
  0xb2   : > { %1109 = vrot.lane.b32.xlu1 %v9020_v62, %s8365_s0  ;;  %v764_v62 = vld [vmem:[%s8535_s29 + $0xa0] sm:$0xff] }
  0xb3   : > { %7990 = vmatpush1.bf16.msra.mxu0 %v7989_v33  ;;  %v7998_v37 = vpack.c.bf16 %v765_v31, %v764_v62  ;;  %7798 = vmatmul.mubr.msk.f32.gmra.mrb[4].mxu1 %vm813_vm1, %v2148_v34  ;;  %v773_v33 = vld [vmem:[%s8535_s29 + $0xe8] sm:$0xff]  ;;  %v9293_v62 = vld [vmem:[#allocation2 + $0x150] sm:$0xff] }
  0xb4   : > { %7991 = vmatprep.subr.bf16.mxu0 %v8367_v39  ;;  %1477 = vst.msk [vmem:[#allocation4 + $0x1d0] sm:$0xff] %vm813_vm1, %v9293_v62  ;;  %v2157_v31 = vld [vmem:[#allocation4 + $0xd0] sm:$0xff] }
  0xb5   : > { %1945 = vrot.lane.b32.xlu0 %v8976_v50, %s8368_s2 }
  0xb6   : > { %1303 = vrot.lane.b32.xlu1 %v8942_v40, %s8368_s2  ;;  %v766_v40 = vld [vmem:[%s8535_s29 + $0xb0] sm:$0xff] }
  0xb7   : > { %7993 = vmatpush1.bf16.msra.mxu0 %v7992_v26  ;;  %v8001_v43 = vpack.c.bf16 %v767_v38, %v766_v40  ;;  %v9249_v26 = vld [vmem:[#allocation2 + $0x129] sm:$0xff] }
  0xb8   : > { %7994 = vmatprep.subr.bf16.mxu0 %v8367_v39  ;;  %2113 = vst.msk [vmem:[#allocation4 + $0x160] sm:$0xff] %vm813_vm1, %v9249_v26 }
  0xb9   : > { %1562 = vrot.lane.b32.xlu0 %v8978_v51, %s8366_s1 }
  0xba   : > { %918 = vrot.lane.b32.xlu1 %v8934_v36, %s8366_s1  ;;  %v769_v36 = vld [vmem:[%s8535_s29 + $0xc8] sm:$0xff] }
  0xbb   : > { %7996 = vmatpush1.bf16.msra.mxu0 %v7995_v30  ;;  %v2151_v30 = vld [vmem:[#allocation4 + $0xa0] sm:$0xff] }
  0xbc   : > { %7997 = vmatprep.subr.bf16.mxu0 %v8367_v39  ;;  %7800 = vmatprep.mubr.msk.f32.mxu1 %vm813_vm1, %v2151_v30 }
  0xbd   : > { %1755 = vrot.lane.b32.xlu0 %v8986_v52, %s8365_s0 }
  0xbe   : > { %1111 = vrot.lane.b32.xlu1 %v8950_v44, %s8365_s0  ;;  %v8004_v44 = vpack.c.bf16 %v769_v36, %v768_v59  ;;  %v2163_v36 = vld [vmem:[#allocation4 + $0x100] sm:$0xff] }
  0xbf   : > { %7999 = vmatpush1.bf16.msra.mxu0 %v7998_v37  ;;  %v9343_v37 = vld [vmem:[#allocation2 + $0x170] sm:$0xff] }
  0xc0   : > { %8000 = vmatprep.subr.bf16.mxu0 %v8367_v39  ;;  %1479 = vst.msk [vmem:[#allocation4 + $0x200] sm:$0xff] %vm813_vm1, %v9343_v37 }
  0xc1   : > { %1947 = vrot.lane.b32.xlu0 %v8988_v53, %s8368_s2 }
  0xc2   : > { %1305 = vrot.lane.b32.xlu1 %v8952_v45, %s8368_s2  ;;  %v772_v45 = vld [vmem:[%s8535_s29 + $0xe0] sm:$0xff] }
  0xc3   : > { %8002 = vmatpush1.bf16.msra.mxu0 %v8001_v43  ;;  %v8010_v21 = vpack.c.bf16 %v773_v33, %v772_v45  ;;  %v9367_v43 = vld [vmem:[#allocation2 + $0x188] sm:$0xff]  ;;  %v9395_v45 = vld [vmem:[#allocation2 + $0x190] sm:$0xff] }
  0xc4   : > { %8003 = vmatprep.subr.bf16.mxu0 %v8367_v39  ;;  %1480 = vst.msk [vmem:[#allocation4 + $0x218] sm:$0xff] %vm813_vm1, %v9367_v43  ;;  %1481 = vst.msk [vmem:[#allocation4 + $0x230] sm:$0xff] %vm813_vm1, %v9395_v45 }
  0xc5   : > { %1564 = vrot.lane.b32.xlu0 %v8990_v54, %s8366_s1 }
  0xc6   : > { %920 = vrot.lane.b32.xlu1 %v8946_v42, %s8366_s1  ;;  %v774_v42 = vld [vmem:[%s8535_s29 + $0xf0] sm:$0xff]  ;;  %s8374_s29 = smov (!%p7626_p1), 96  }
  0xc7   : > { %8005 = vmatpush1.bf16.msra.mxu0 %v8004_v44  ;;  %v8013_v47 = vpack.c.bf16 %v775_v22, %v774_v42 }
  0xc8   : > { %8006 = vmatprep.subr.bf16.mxu0 %v8367_v39 }
  0xc9   : > { %1757 = vrot.lane.b32.xlu0 %v8998_v56, %s8365_s0 }
  0xca   : > { %1113 = vrot.lane.b32.xlu1 %v8966_v48, %s8365_s0  ;;  %v9258_v48 = vld [vmem:[#allocation2 + $0x147] sm:$0xff] }
  0xcb   : > { %8008 = vmatpush1.bf16.msra.mxu0 %v8007_v14  ;;  %834 = vst.msk [vmem:[#allocation4 + $0x1e0] sm:$0xff] %vm813_vm1, %v9258_v48 }
  0xcc   : > { %8009 = vmatprep.subr.bf16.mxu0 %v8367_v39 }
  0xcd   : > { %1949 = vrot.lane.b32.xlu0 %v9000_v57, %s8368_s2 }
  0xce   : > { %1307 = vrot.lane.b32.xlu1 %v8974_v49, %s8368_s2  ;;  %v9275_v49 = vld [vmem:[#allocation2 + $0x131] sm:$0xff] }
  0xcf   : > { %8011 = vmatpush1.bf16.msra.mxu0 %v8010_v21  ;;  %2114 = vst.msk [vmem:[#allocation4 + $0x178] sm:$0xff] %vm813_vm1, %v9275_v49 }
  0xd0   : > { %8012 = vmatprep.subr.bf16.mxu0 %v8367_v39 }
  0xd1   : > { %1566 = vrot.lane.b32.xlu0 %v9013_v60, %s8366_s1 }
  0xd2   : > { %922 = vrot.lane.b32.xlu1 %v8962_v46, %s8366_s1  ;;  %v2154_v46 = vld [vmem:[#allocation4 + $0xb8] sm:$0xff] }
  0xd3   : > { %8014 = vmatpush1.bf16.msra.mxu0 %v8013_v47  ;;  %7801 = vmatmul.mubr.msk.f32.gmra.mrb[6].mxu1 %vm813_vm1, %v2154_v46  ;;  %v9421_v46 = vld [vmem:[#allocation2 + $0x1a8] sm:$0xff] }
  0xd4   : > { %7803 = vmatprep.mubr.msk.f32.mxu1 %vm813_vm1, %v2157_v31  ;;  %1482 = vst.msk [vmem:[#allocation4 + $0x248] sm:$0xff] %vm813_vm1, %v9421_v46 }
  0xd5   : > { %1759 = vrot.lane.b32.xlu0 %v9023_v1, %s8365_s0 }
  0xd6   : > { %1115 = vrot.lane.b32.xlu1 %v8978_v51, %s8365_s0  ;;  %v9285_v51 = vld [vmem:[#allocation2 + $0x14f] sm:$0xff] }
  0xd7   : > { %835 = vst.msk [vmem:[#allocation4 + $0x1f8] sm:$0xff] %vm813_vm1, %v9285_v51 }
  0xd9   : > { %1951 = vrot.lane.b32.xlu0 %v9027_v2, %s8368_s2 }
  0xda   : > { %1309 = vrot.lane.b32.xlu1 %v8986_v52, %s8368_s2  ;;  %v9301_v52 = vld [vmem:[#allocation2 + $0x149] sm:$0xff] }
  0xdb   : > { %2115 = vst.msk [vmem:[#allocation4 + $0x190] sm:$0xff] %vm813_vm1, %v9301_v52 }
  0xdd   : > { %1568 = vrot.lane.b32.xlu0 %v9031_v4, %s8366_s1 }
  0xde   : > { %924 = vrot.lane.b32.xlu1 %v8976_v50, %s8366_s1  ;;  %v9309_v50 = vld [vmem:[#allocation2 + $0x167] sm:$0xff] }
  0xdf   : > { %836 = vst.msk [vmem:[#allocation4 + $0x210] sm:$0xff] %vm813_vm1, %v9309_v50 }
  0xe1   : > { %1761 = vrot.lane.b32.xlu0 %v9040_v7, %s8365_s0 }
  0xe2   : > { %1117 = vrot.lane.b32.xlu1 %v8990_v54, %s8365_s0  ;;  %v9317_v54 = vld [vmem:[#allocation2 + $0x168] sm:$0xff] }
  0xe3   : > { %1478 = vst.msk [vmem:[#allocation4 + $0x1e8] sm:$0xff] %vm813_vm1, %v9317_v54 }
  0xe5   : > { %1953 = vrot.lane.b32.xlu0 %v9045_v9, %s8368_s2 }
  0xe6   : > { %1311 = vrot.lane.b32.xlu1 %v8998_v56, %s8368_s2  ;;  %v9325_v56 = vld [vmem:[#allocation2 + $0x151] sm:$0xff] }
  0xe7   : > { %2116 = vst.msk [vmem:[#allocation4 + $0x1a8] sm:$0xff] %vm813_vm1, %v9325_v56 }
  0xe9   : > { %1570 = vrot.lane.b32.xlu0 %v9049_v10, %s8366_s1 }
  0xea   : > { %926 = vrot.lane.b32.xlu1 %v8988_v53, %s8366_s1  ;;  %v2160_v53 = vld [vmem:[#allocation4 + $0xe8] sm:$0xff] }
  0xeb   : > { %7804 = vmatmul.mubr.msk.f32.gmra.mrb[8].mxu1 %vm813_vm1, %v2160_v53  ;;  %v2169_v53 = vld [vmem:[#allocation4 + $0x130] sm:$0xff] }
  0xec   : > { %7806 = vmatprep.mubr.msk.f32.mxu1 %vm813_vm1, %v2163_v36  ;;  %v9449_v36 = vld [vmem:[#allocation2 + $0x1b0] sm:$0xff] }
  0xed   : > { %1763 = vrot.lane.b32.xlu0 %v9053_v12, %s8365_s0  ;;  %1483 = vst.msk [vmem:[#allocation4 + $0x260] sm:$0xff] %vm813_vm1, %v9449_v36 }
  0xee   : > { %1119 = vrot.lane.b32.xlu1 %v9013_v60, %s8365_s0  ;;  %v9335_v60 = vld [vmem:[#allocation2 + $0x16f] sm:$0xff] }
  0xef   : > { %837 = vst.msk [vmem:[#allocation4 + $0x228] sm:$0xff] %vm813_vm1, %v9335_v60  ;;  %7807 = vmatmul.mubr.msk.f32.gmra.mrb[10].mxu1 %vm813_vm1, %v2166_v5 }
  0xf0   : > { %7809 = vmatprep.mubr.msk.f32.mxu1 %vm813_vm1, %v2169_v53 }
  0xf1   : > { %1955 = vrot.lane.b32.xlu0 %v9062_v15, %s8368_s2 }
  0xf2   : > { %1313 = vrot.lane.b32.xlu1 %v9023_v1, %s8368_s2  ;;  %v9351_v1 = vld [vmem:[#allocation2 + $0x169] sm:$0xff] }
  0xf3   : > { %2117 = vst.msk [vmem:[#allocation4 + $0x1c0] sm:$0xff] %vm813_vm1, %v9351_v1 }
  0xf5   : > { %1572 = vrot.lane.b32.xlu0 %v9067_v16, %s8366_s1 }
  0xf6   : > { %928 = vrot.lane.b32.xlu1 %v9000_v57, %s8366_s1 }
  0xf9   : > { %1765 = vrot.lane.b32.xlu0 %v9071_v17, %s8365_s0 }
  0xfa   : > { %1121 = vrot.lane.b32.xlu1 %v9031_v4, %s8365_s0  ;;  %v1555_v40 = vpop.permute.xlu0 %1554 }
  0xfb   : > { %1650 = vst.msk [vmem:[#allocation4 + $0x8] sm:$0xff] %vm1006_vm2, %v1555_v40 }
  0xfc   : > { %v1748_v57 = vpop.permute.xlu1 %1747 }
  0xfd   : > { %1957 = vrot.lane.b32.xlu0 %v9076_v20, %s8368_s2  ;;  %1843 = vst.msk [vmem:[#allocation4 + $0x8] sm:$0xff] %vm1199_vm3, %v1748_v57  ;;  %v2172_v57 = vld [vmem:[#allocation4 + $0x148] sm:$0xff] }
  0xfe   : > { %1315 = vrot.lane.b32.xlu1 %v9040_v7, %s8368_s2  ;;  %v911_v38 = vpop.permute.xlu0 %910  ;;  %7810 = vmatmul.mubr.msk.f32.gmra.mrb[12].mxu1 %vm813_vm1, %v2172_v57 }
  0xff   : > { %1007 = vst.msk [vmem:[#allocation4] sm:$0xff] %vm1006_vm2, %v911_v38 }
 0x100   : > { %v1104_v4 = vpop.permute.xlu1 %1103 }
 0x101   : > { %1574 = vrot.lane.b32.xlu0 %v9085_v23, %s8366_s1  ;;  %1200 = vst.msk [vmem:[#allocation4] sm:$0xff] %vm1199_vm3, %v1104_v4 }
 0x102   : > { %930 = vrot.lane.b32.xlu1 %v9027_v2, %s8366_s1  ;;  %v1940_v59 = vpop.permute.xlu0 %1939  ;;  %v9377_v2 = vld [vmem:[#allocation2 + $0x171] sm:$0xff] }
 0x103   : > { %2035 = vst.msk [vmem:[#allocation4 + $0x8] sm:$0xff] %vm1393_vm4, %v1940_v59 }
 0x104   : > { %v1298_v7 = vpop.permute.xlu1 %1297  ;;  %2118 = vst.msk [vmem:[#allocation4 + $0x1d8] sm:$0xff] %vm813_vm1, %v9377_v2 }
 0x105   : > { %1394 = vst.msk [vmem:[#allocation4] sm:$0xff] %vm1393_vm4, %v1298_v7  ;;  %1767 = vrot.lane.b32.xlu0 %v9091_v24, %s8365_s0 }
 0x106   : > { %1123 = vrot.lane.b32.xlu1 %v9049_v10, %s8365_s0  ;;  %v1557_v44 = vpop.permute.xlu0 %1556 }
 0x107   : > { %1651 = vst.msk [vmem:[#allocation4 + $0x20] sm:$0xff] %vm1006_vm2, %v1557_v44 }
 0x108   : > { %v913_v34 = vpop.permute.xlu1 %912 }
 0x109   : > { %1008 = vst.msk [vmem:[#allocation4 + $0x18] sm:$0xff] %vm1006_vm2, %v913_v34  ;;  %1959 = vrot.lane.b32.xlu0 %v9099_v29, %s8368_s2 }
 0x10a   : > { %1317 = vrot.lane.b32.xlu1 %v9053_v12, %s8368_s2  ;;  %v1750_v8 = vpop.permute.xlu0 %1749  ;;  %v2132_v11 = vld [vmem:[#allocation4 + $0x8] sm:$0xff] }
 0x10b   : > { %1844 = vst.msk [vmem:[#allocation4 + $0x20] sm:$0xff] %vm1199_vm3, %v1750_v8  ;;  %2393 = vmatprep.mubr.f32.mxu0 %v2132_v11 }
 0x10c   : > { %v1106_v10 = vpop.permute.xlu1 %1105  ;;  %v2131_v14 = vld [vmem:[#allocation4] sm:$0xff] }
 0x10d   : > { %1201 = vst.msk [vmem:[#allocation4 + $0x18] sm:$0xff] %vm1199_vm3, %v1106_v10  ;;  %1576 = vrot.lane.b32.xlu0 %v9108_v35, %s8366_s1  ;;  %2394 = vmatmul.mubr.f32.vlgmr.msra.gmra.mrb[0].mxu0 %v2131_v14  ;;  %v9475_v14 = vld [vmem:[#allocation2 + $0x1c8] sm:$0xff] }
 0x10e   : > { %932 = vrot.lane.b32.xlu1 %v9045_v9, %s8366_s1  ;;  %v1942_v33 = vpop.permute.xlu0 %1941  ;;  %v9405_v9 = vld [vmem:[#allocation2 + $0x189] sm:$0xff]  ;;  %1484 = vst.msk [vmem:[#allocation4 + $0x278] sm:$0xff] %vm813_vm1, %v9475_v14 }
 0x10f   : > { %2036 = vst.msk [vmem:[#allocation4 + $0x20] sm:$0xff] %vm1393_vm4, %v1942_v33  ;;  %v2175_v33 = vld [vmem:[#allocation4 + $0x160] sm:$0xff] }
 0x110   : > { %v1300_v12 = vpop.permute.xlu1 %1299  ;;  %2119 = vst.msk [vmem:[#allocation4 + $0x1f0] sm:$0xff] %vm813_vm1, %v9405_v9  ;;  %7812 = vmatprep.mubr.msk.f32.mxu1 %vm813_vm1, %v2175_v33 }
 0x111   : > { %1395 = vst.msk [vmem:[#allocation4 + $0x18] sm:$0xff] %vm1393_vm4, %v1300_v12  ;;  %1769 = vrot.lane.b32.xlu0 %v9118_v55, %s8365_s0 }
 0x112   : > { %1125 = vrot.lane.b32.xlu1 %v9067_v16, %s8365_s0  ;;  %v1559_v42 = vpop.permute.xlu0 %1558 }
 0x113   : > { %1652 = vst.msk [vmem:[#allocation4 + $0x38] sm:$0xff] %vm1006_vm2, %v1559_v42 }
 0x114   : > { %v915_v21 = vpop.permute.xlu1 %914 }
 0x115   : > { %1009 = vst.msk [vmem:[#allocation4 + $0x30] sm:$0xff] %vm1006_vm2, %v915_v21  ;;  %1961 = vrot.lane.b32.xlu0 %v9120_v58, %s8368_s2  ;;  %v2178_v21 = vld [vmem:[#allocation4 + $0x178] sm:$0xff] }
 0x116   : > { %1319 = vrot.lane.b32.xlu1 %v9071_v17, %s8368_s2  ;;  %v2135_v47 = vld [vmem:[#allocation4 + $0x20] sm:$0xff]  ;;  %7813 = vmatmul.mubr.msk.f32.gmra.mrb[14].mxu1 %vm813_vm1, %v2178_v21 }
 0x117   : > { %v1752_v22 = vpop.permute.xlu0 %1751  ;;  %2398 = vmatprep.mubr.f32.mxu0 %v2135_v47 }
 0x118   : > { %v1108_v16 = vpop.permute.xlu1 %1107  ;;  %v2134_v30 = vld [vmem:[#allocation4 + $0x18] sm:$0xff]  ;;  %1845 = vst.msk [vmem:[#allocation4 + $0x38] sm:$0xff] %vm1199_vm3, %v1752_v22 }
 0x119   : > { %1202 = vst.msk [vmem:[#allocation4 + $0x30] sm:$0xff] %vm1199_vm3, %v1108_v16  ;;  %1578 = vrot.lane.b32.xlu0 %v9122_v61, %s8366_s1  ;;  %2399 = vmatmul.mubr.f32.gmra.mrb[2].mxu0 %v2134_v30 }
 0x11a   : > { %934 = vrot.lane.b32.xlu1 %v9062_v15, %s8366_s1  ;;  %v9431_v15 = vld [vmem:[#allocation2 + $0x191] sm:$0xff] }
 0x11b   : > { %v1944_v31 = vpop.permute.xlu0 %1943  ;;  %2120 = vst.msk [vmem:[#allocation4 + $0x208] sm:$0xff] %vm813_vm1, %v9431_v15 }
 0x11c   : > { %v1302_v17 = vpop.permute.xlu1 %1301  ;;  %2037 = vst.msk [vmem:[#allocation4 + $0x38] sm:$0xff] %vm1393_vm4, %v1944_v31 }
 0x11d   : > { %1396 = vst.msk [vmem:[#allocation4 + $0x30] sm:$0xff] %vm1393_vm4, %v1302_v17  ;;  %1771 = vrot.lane.b32.xlu0 %v9124_v63, %s8365_s0  ;;  %v9503_v17 = vld [vmem:[#allocation2 + $0x1d0] sm:$0xff] }
 0x11e   : > { %1127 = vrot.lane.b32.xlu1 %v9085_v23, %s8365_s0  ;;  %1485 = vst.msk [vmem:[#allocation4 + $0x290] sm:$0xff] %vm813_vm1, %v9503_v17 }
 0x11f   : > { %v1561_v4 = vpop.permute.xlu0 %1560 }
 0x120   : > { %v917_v40 = vpop.permute.xlu1 %916  ;;  %1653 = vst.msk [vmem:[#allocation4 + $0x50] sm:$0xff] %vm1006_vm2, %v1561_v4 }
 0x121   : > { %1010 = vst.msk [vmem:[#allocation4 + $0x48] sm:$0xff] %vm1006_vm2, %v917_v40  ;;  %1963 = vrot.lane.b32.xlu0 %v9126_v0, %s8368_s2 }
 0x122   : > { %1321 = vrot.lane.b32.xlu1 %v9091_v24, %s8368_s2 }
 0x123   : > { %v1754_v38 = vpop.permute.xlu0 %1753  ;;  %v2138_v7 = vld [vmem:[#allocation4 + $0x38] sm:$0xff] }
 0x124   : > { %v1110_v23 = vpop.permute.xlu1 %1109  ;;  %v2137_v59 = vld [vmem:[#allocation4 + $0x30] sm:$0xff]  ;;  %1846 = vst.msk [vmem:[#allocation4 + $0x50] sm:$0xff] %vm1199_vm3, %v1754_v38  ;;  %2403 = vmatprep.mubr.f32.mxu0 %v2138_v7  ;;  %v9529_v38 = vld [vmem:[#allocation2 + $0x1e8] sm:$0xff] }
 0x125   : > { %1203 = vst.msk [vmem:[#allocation4 + $0x48] sm:$0xff] %vm1199_vm3, %v1110_v23  ;;  %1580 = vrot.lane.b32.xlu0 %v9138_v6, %s8366_s1  ;;  %2404 = vmatmul.mubr.f32.gmra.mrb[4].mxu0 %v2137_v59  ;;  %v2181_v59 = vld [vmem:[#allocation4 + $0x190] sm:$0xff] }
 0x126   : > { %936 = vrot.lane.b32.xlu1 %v9076_v20, %s8366_s1  ;;  %v9459_v20 = vld [vmem:[#allocation2 + $0x1a9] sm:$0xff]  ;;  %1486 = vst.msk [vmem:[#allocation4 + $0x2a8] sm:$0xff] %vm813_vm1, %v9529_v38  ;;  %7815 = vmatprep.mubr.msk.f32.mxu1 %vm813_vm1, %v2181_v59 }
 0x127   : > { %v1946_v5 = vpop.permute.xlu0 %1945  ;;  %2121 = vst.msk [vmem:[#allocation4 + $0x220] sm:$0xff] %vm813_vm1, %v9459_v20 }
 0x128   : > { %v1304_v24 = vpop.permute.xlu1 %1303  ;;  %2038 = vst.msk [vmem:[#allocation4 + $0x50] sm:$0xff] %vm1393_vm4, %v1946_v5 }
 0x129   : > { %1397 = vst.msk [vmem:[#allocation4 + $0x48] sm:$0xff] %vm1393_vm4, %v1304_v24  ;;  %1773 = vrot.lane.b32.xlu0 %v9155_v18, %s8365_s0  ;;  %v2184_v24 = vld [vmem:[#allocation4 + $0x1a8] sm:$0xff] }
 0x12a   : > { %1129 = vrot.lane.b32.xlu1 %v9108_v35, %s8365_s0  ;;  %7816 = vmatmul.mubr.msk.f32.gmra.mrb[16].mxu1 %vm813_vm1, %v2184_v24  ;;  %v9637_v24 = vld [vmem:[#allocation2 + $0x211] sm:$0xff] }
 0x12b   : > { %v1563_v44 = vpop.permute.xlu0 %1562  ;;  %2128 = vst.msk [vmem:[#allocation4 + $0x2c8] sm:$0xff] %vm813_vm1, %v9637_v24 }
 0x12c   : > { %v919_v34 = vpop.permute.xlu1 %918  ;;  %1654 = vst.msk [vmem:[#allocation4 + $0x68] sm:$0xff] %vm1006_vm2, %v1563_v44 }
 0x12d   : > { %1011 = vst.msk [vmem:[#allocation4 + $0x60] sm:$0xff] %vm1006_vm2, %v919_v34  ;;  %1965 = vrot.lane.b32.xlu0 %v9169_v25, %s8368_s2 }
 0x12e   : > { %1323 = vrot.lane.b32.xlu1 %v9118_v55, %s8368_s2 }
 0x12f   : > { %v1756_v10 = vpop.permute.xlu0 %1755  ;;  %v2141_v8 = vld [vmem:[#allocation4 + $0x50] sm:$0xff] }
 0x130   : > { %v1112_v35 = vpop.permute.xlu1 %1111  ;;  %v2140_v11 = vld [vmem:[#allocation4 + $0x48] sm:$0xff]  ;;  %1847 = vst.msk [vmem:[#allocation4 + $0x68] sm:$0xff] %vm1199_vm3, %v1756_v10  ;;  %2408 = vmatprep.mubr.f32.mxu0 %v2141_v8  ;;  %v9557_v8 = vld [vmem:[#allocation2 + $0x1f0] sm:$0xff] }
 0x131   : > { %1204 = vst.msk [vmem:[#allocation4 + $0x60] sm:$0xff] %vm1199_vm3, %v1112_v35  ;;  %1582 = vrot.lane.b32.xlu0 %v9181_v28, %s8366_s1  ;;  %2409 = vmatmul.mubr.f32.gmra.mrb[6].mxu0 %v2140_v11 }
 0x132   : > { %938 = vrot.lane.b32.xlu1 %v9099_v29, %s8366_s1  ;;  %v9485_v29 = vld [vmem:[#allocation2 + $0x1b1] sm:$0xff]  ;;  %1487 = vst.msk [vmem:[#allocation4 + $0x2c0] sm:$0xff] %vm813_vm1, %v9557_v8 }
 0x133   : > { %v1948_v12 = vpop.permute.xlu0 %1947  ;;  %2122 = vst.msk [vmem:[#allocation4 + $0x238] sm:$0xff] %vm813_vm1, %v9485_v29 }
 0x134   : > { %v1306_v55 = vpop.permute.xlu1 %1305  ;;  %2039 = vst.msk [vmem:[#allocation4 + $0x68] sm:$0xff] %vm1393_vm4, %v1948_v12 }
 0x135   : > { %1398 = vst.msk [vmem:[#allocation4 + $0x60] sm:$0xff] %vm1393_vm4, %v1306_v55  ;;  %1775 = vrot.lane.b32.xlu0 %v9192_v32, %s8365_s0 }
 0x136   : > { %1131 = vrot.lane.b32.xlu1 %v9122_v61, %s8365_s0 }
 0x137   : > { %v1565_v16 = vpop.permute.xlu0 %1564 }
 0x138   : > { %v921_v42 = vpop.permute.xlu1 %920  ;;  %1655 = vst.msk [vmem:[#allocation4 + $0x80] sm:$0xff] %vm1006_vm2, %v1565_v16 }
 0x139   : > { %1012 = vst.msk [vmem:[#allocation4 + $0x78] sm:$0xff] %vm1006_vm2, %v921_v42  ;;  %1967 = vrot.lane.b32.xlu0 %v9203_v41, %s8368_s2 }
 0x13a   : > { %1325 = vrot.lane.b32.xlu1 %v9124_v63, %s8368_s2 }
 0x13b   : > { %v1758_v22 = vpop.permute.xlu0 %1757  ;;  %v2144_v47 = vld [vmem:[#allocation4 + $0x68] sm:$0xff] }
 0x13c   : > { %v1114_v61 = vpop.permute.xlu1 %1113  ;;  %v2143_v30 = vld [vmem:[#allocation4 + $0x60] sm:$0xff]  ;;  %1848 = vst.msk [vmem:[#allocation4 + $0x80] sm:$0xff] %vm1199_vm3, %v1758_v22  ;;  %2413 = vmatprep.mubr.f32.mxu0 %v2144_v47 }
 0x13d   : > { %1205 = vst.msk [vmem:[#allocation4 + $0x78] sm:$0xff] %vm1199_vm3, %v1114_v61  ;;  %1584 = vrot.lane.b32.xlu0 %v9214_v3, %s8366_s1  ;;  %2414 = vmatmul.mubr.f32.gmra.mrb[8].mxu0 %v2143_v30  ;;  %v9589_v61 = vld [vmem:[#allocation2 + $0x1f1] sm:$0xff]  ;;  %v2187_v22 = vld [vmem:[#allocation4 + $0x1c0] sm:$0xff] }
 0x13e   : > { %940 = vrot.lane.b32.xlu1 %v9120_v58, %s8366_s1  ;;  %v9513_v58 = vld [vmem:[#allocation2 + $0x1c9] sm:$0xff]  ;;  %7818 = vmatprep.mubr.msk.f32.mxu1 %vm813_vm1, %v2187_v22  ;;  %2126 = vst.msk [vmem:[#allocation4 + $0x298] sm:$0xff] %vm813_vm1, %v9589_v61 }
 0x13f   : > { %v1950_v31 = vpop.permute.xlu0 %1949  ;;  %2123 = vst.msk [vmem:[#allocation4 + $0x250] sm:$0xff] %vm813_vm1, %v9513_v58 }
 0x140   : > { %v1308_v63 = vpop.permute.xlu1 %1307  ;;  %2040 = vst.msk [vmem:[#allocation4 + $0x80] sm:$0xff] %vm1393_vm4, %v1950_v31 }
 0x141   : > { %1399 = vst.msk [vmem:[#allocation4 + $0x78] sm:$0xff] %vm1393_vm4, %v1308_v63  ;;  %1777 = vrot.lane.b32.xlu0 %v9227_v13, %s8365_s0 }
 0x142   : > { %1133 = vrot.lane.b32.xlu1 %v9138_v6, %s8365_s0 }
 0x143   : > { %v1567_v57 = vpop.permute.xlu0 %1566 }
 0x144   : > { %v923_v53 = vpop.permute.xlu1 %922  ;;  %1656 = vst.msk [vmem:[#allocation4 + $0x98] sm:$0xff] %vm1006_vm2, %v1567_v57 }
 0x145   : > { %1013 = vst.msk [vmem:[#allocation4 + $0x90] sm:$0xff] %vm1006_vm2, %v923_v53  ;;  %1969 = vrot.lane.b32.xlu0 %v9238_v19, %s8368_s2 }
 0x146   : > { %1327 = vrot.lane.b32.xlu1 %v9155_v18, %s8368_s2 }
 0x147   : > { %v1760_v40 = vpop.permute.xlu0 %1759  ;;  %v2147_v4 = vld [vmem:[#allocation4 + $0x80] sm:$0xff] }
 0x148   : > { %v1116_v6 = vpop.permute.xlu1 %1115  ;;  %v2146_v23 = vld [vmem:[#allocation4 + $0x78] sm:$0xff]  ;;  %1849 = vst.msk [vmem:[#allocation4 + $0x98] sm:$0xff] %vm1199_vm3, %v1760_v40  ;;  %2418 = vmatprep.mubr.f32.mxu0 %v2147_v4 }
 0x149   : > { %1206 = vst.msk [vmem:[#allocation4 + $0x90] sm:$0xff] %vm1199_vm3, %v1116_v6  ;;  %1586 = vrot.lane.b32.xlu0 %v9249_v26, %s8366_s1  ;;  %2419 = vmatmul.mubr.f32.gmra.mrb[10].mxu0 %v2146_v23  ;;  %v9613_v6 = vld [vmem:[#allocation2 + $0x209] sm:$0xff] }
 0x14a   : > { %942 = vrot.lane.b32.xlu1 %v9126_v0, %s8366_s1  ;;  %v9539_v0 = vld [vmem:[#allocation2 + $0x1d1] sm:$0xff]  ;;  %2127 = vst.msk [vmem:[#allocation4 + $0x2b0] sm:$0xff] %vm813_vm1, %v9613_v6 }
 0x14b   : > { %v1952_v7 = vpop.permute.xlu0 %1951  ;;  %2124 = vst.msk [vmem:[#allocation4 + $0x268] sm:$0xff] %vm813_vm1, %v9539_v0 }
 0x14c   : > { %v1310_v18 = vpop.permute.xlu1 %1309  ;;  %2041 = vst.msk [vmem:[#allocation4 + $0x98] sm:$0xff] %vm1393_vm4, %v1952_v7 }
 0x14d   : > { %1400 = vst.msk [vmem:[#allocation4 + $0x90] sm:$0xff] %vm1393_vm4, %v1310_v18  ;;  %1779 = vrot.lane.b32.xlu0 %v9258_v48, %s8365_s0 }
 0x14e   : > { %1135 = vrot.lane.b32.xlu1 %v9181_v28, %s8365_s0 }
 0x14f   : > { %v1569_v34 = vpop.permute.xlu0 %1568 }
 0x150   : > { %v925_v5 = vpop.permute.xlu1 %924  ;;  %1657 = vst.msk [vmem:[#allocation4 + $0xb0] sm:$0xff] %vm1006_vm2, %v1569_v34  ;;  %v2196_v34 = vld [vmem:[#allocation4 + $0x208] sm:$0xff] }
 0x151   : > { %1014 = vst.msk [vmem:[#allocation4 + $0xa8] sm:$0xff] %vm1006_vm2, %v925_v5  ;;  %1971 = vrot.lane.b32.xlu0 %v9267_v27, %s8368_s2 }
 0x152   : > { %1329 = vrot.lane.b32.xlu1 %v9192_v32, %s8368_s2 }
 0x153   : > { %v1762_v44 = vpop.permute.xlu0 %1761  ;;  %v2150_v35 = vld [vmem:[#allocation4 + $0x98] sm:$0xff] }
 0x154   : > { %v1118_v28 = vpop.permute.xlu1 %1117  ;;  %v2149_v10 = vld [vmem:[#allocation4 + $0x90] sm:$0xff]  ;;  %1850 = vst.msk [vmem:[#allocation4 + $0xb0] sm:$0xff] %vm1199_vm3, %v1762_v44  ;;  %2423 = vmatprep.mubr.f32.mxu0 %v2150_v35 }
 0x155   : > { %1207 = vst.msk [vmem:[#allocation4 + $0xa8] sm:$0xff] %vm1199_vm3, %v1118_v28  ;;  %1588 = vrot.lane.b32.xlu0 %v9275_v49, %s8366_s1  ;;  %2424 = vmatmul.mubr.f32.gmra.mrb[12].mxu0 %v2149_v10 }
 0x156   : > { %944 = vrot.lane.b32.xlu1 %v9169_v25, %s8366_s1  ;;  %v9567_v25 = vld [vmem:[#allocation2 + $0x1e9] sm:$0xff] }
 0x157   : > { %v1954_v11 = vpop.permute.xlu0 %1953  ;;  %2125 = vst.msk [vmem:[#allocation4 + $0x280] sm:$0xff] %vm813_vm1, %v9567_v25 }
 0x158   : > { %v1312_v32 = vpop.permute.xlu1 %1311  ;;  %2042 = vst.msk [vmem:[#allocation4 + $0xb0] sm:$0xff] %vm1393_vm4, %v1954_v11 }
 0x159   : > { %1401 = vst.msk [vmem:[#allocation4 + $0xa8] sm:$0xff] %vm1393_vm4, %v1312_v32  ;;  %1781 = vrot.lane.b32.xlu0 %v9285_v51, %s8365_s0 }
 0x15a   : > { %1137 = vrot.lane.b32.xlu1 %v9214_v3, %s8365_s0 }
 0x15b   : > { %v1571_v12 = vpop.permute.xlu0 %1570 }
 0x15c   : > { %v927_v55 = vpop.permute.xlu1 %926  ;;  %1658 = vst.msk [vmem:[#allocation4 + $0xc8] sm:$0xff] %vm1006_vm2, %v1571_v12 }
 0x15d   : > { %1015 = vst.msk [vmem:[#allocation4 + $0xc0] sm:$0xff] %vm1006_vm2, %v927_v55  ;;  %1973 = vrot.lane.b32.xlu0 %v9293_v62, %s8368_s2 }
 0x15e   : > { %1331 = vrot.lane.b32.xlu1 %v9227_v13, %s8368_s2 }
 0x15f   : > { %v1764_v33 = vpop.permute.xlu0 %1763  ;;  %v2153_v21 = vld [vmem:[#allocation4 + $0xb0] sm:$0xff] }
 0x160   : > { %v1120_v3 = vpop.permute.xlu1 %1119  ;;  %v2152_v42 = vld [vmem:[#allocation4 + $0xa8] sm:$0xff]  ;;  %1851 = vst.msk [vmem:[#allocation4 + $0xc8] sm:$0xff] %vm1199_vm3, %v1764_v33  ;;  %2428 = vmatprep.mubr.f32.mxu0 %v2153_v21 }
 0x161   : > { %1208 = vst.msk [vmem:[#allocation4 + $0xc0] sm:$0xff] %vm1199_vm3, %v1120_v3  ;;  %1590 = vrot.lane.b32.xlu0 %v9301_v52, %s8366_s1  ;;  %2429 = vmatmul.mubr.f32.gmra.mrb[14].mxu0 %v2152_v42 }
 0x162   : > { %946 = vrot.lane.b32.xlu1 %v9203_v41, %s8366_s1  ;;  %v2190_v41 = vld [vmem:[#allocation4 + $0x1d8] sm:$0xff] }
 0x163   : > { %v1956_v16 = vpop.permute.xlu0 %1955  ;;  %7819 = vmatmul.mubr.msk.f32.gmra.mrb[18].mxu1 %vm813_vm1, %v2190_v41 }
 0x164   : > { %v1314_v13 = vpop.permute.xlu1 %1313  ;;  %2043 = vst.msk [vmem:[#allocation4 + $0xc8] sm:$0xff] %vm1393_vm4, %v1956_v16 }
 0x165   : > { %1402 = vst.msk [vmem:[#allocation4 + $0xc0] sm:$0xff] %vm1393_vm4, %v1314_v13  ;;  %1783 = vrot.lane.b32.xlu0 %v9309_v50, %s8365_s0 }
 0x166   : > { %1139 = vrot.lane.b32.xlu1 %v9249_v26, %s8365_s0 }
 0x167   : > { %v1573_v30 = vpop.permute.xlu0 %1572 }
 0x168   : > { %v929_v47 = vpop.permute.xlu1 %928  ;;  %1659 = vst.msk [vmem:[#allocation4 + $0xe0] sm:$0xff] %vm1006_vm2, %v1573_v30 }
 0x169   : > { %1016 = vst.msk [vmem:[#allocation4 + $0xd8] sm:$0xff] %vm1006_vm2, %v929_v47  ;;  %1975 = vrot.lane.b32.xlu0 %v9317_v54, %s8368_s2 }
 0x16a   : > { %1333 = vrot.lane.b32.xlu1 %v9258_v48, %s8368_s2 }
 0x16b   : > { %v1766_v63 = vpop.permute.xlu0 %1765  ;;  %v2156_v31 = vld [vmem:[#allocation4 + $0xc8] sm:$0xff] }
 0x16c   : > { %v1122_v26 = vpop.permute.xlu1 %1121  ;;  %v2155_v53 = vld [vmem:[#allocation4 + $0xc0] sm:$0xff]  ;;  %1852 = vst.msk [vmem:[#allocation4 + $0xe0] sm:$0xff] %vm1199_vm3, %v1766_v63  ;;  %2433 = vmatprep.mubr.f32.mxu0 %v2156_v31  ;;  %v2202_v31 = vld [vmem:[#allocation4 + $0x238] sm:$0xff] }
 0x16d   : > { %1209 = vst.msk [vmem:[#allocation4 + $0xd8] sm:$0xff] %vm1199_vm3, %v1122_v26  ;;  %1592 = vrot.lane.b32.xlu0 %v9325_v56, %s8366_s1  ;;  %2434 = vmatmul.mubr.f32.gmra.mrb[16].mxu0 %v2155_v53 }
 0x16e   : > { %948 = vrot.lane.b32.xlu1 %v9238_v19, %s8366_s1 }
 0x16f   : > { %v1958_v57 = vpop.permute.xlu0 %1957 }
 0x170   : > { %v1316_v48 = vpop.permute.xlu1 %1315  ;;  %2044 = vst.msk [vmem:[#allocation4 + $0xe0] sm:$0xff] %vm1393_vm4, %v1958_v57 }
 0x171   : > { %1403 = vst.msk [vmem:[#allocation4 + $0xd8] sm:$0xff] %vm1393_vm4, %v1316_v48  ;;  %1785 = vrot.lane.b32.xlu0 %v9335_v60, %s8365_s0 }
 0x172   : > { %1141 = vrot.lane.b32.xlu1 %v9275_v49, %s8365_s0 }
 0x173   : > { %v1575_v40 = vpop.permute.xlu0 %1574 }
 0x174   : > { %v931_v19 = vpop.permute.xlu1 %930  ;;  %1660 = vst.msk [vmem:[#allocation4 + $0xf8] sm:$0xff] %vm1006_vm2, %v1575_v40  ;;  %v9710_v40 = vld [vmem:[#allocation2 + $0x1af] sm:$0xff] }
 0x175   : > { %1017 = vst.msk [vmem:[#allocation4 + $0xf0] sm:$0xff] %vm1006_vm2, %v931_v19  ;;  %1977 = vrot.lane.b32.xlu0 %v9343_v37, %s8368_s2  ;;  %v805_v19 = vld [vmem:[#allocation2 + $0x187] sm:$0xff] }
 0x176   : > { %1335 = vrot.lane.b32.xlu1 %v9285_v51, %s8368_s2  ;;  %v9629_v51 = vld [vmem:[#allocation2 + $0x187] sm:$0xff]  ;;  %838 = vst.msk [vmem:[#allocation4 + $0x240] sm:$0xff] %vm813_vm1, %v805_v19 }
 0x177   : > { %v1768_v4 = vpop.permute.xlu0 %1767  ;;  %v2159_v23 = vld [vmem:[#allocation4 + $0xe0] sm:$0xff] }
 0x178   : > { %v1124_v49 = vpop.permute.xlu1 %1123  ;;  %v2158_v18 = vld [vmem:[#allocation4 + $0xd8] sm:$0xff]  ;;  %1853 = vst.msk [vmem:[#allocation4 + $0xf8] sm:$0xff] %vm1199_vm3, %v1768_v4  ;;  %2438 = vmatprep.mubr.f32.mxu0 %v2159_v23 }
 0x179   : > { %1210 = vst.msk [vmem:[#allocation4 + $0xf0] sm:$0xff] %vm1199_vm3, %v1124_v49  ;;  %1594 = vrot.lane.b32.xlu0 %v9351_v1, %s8366_s1  ;;  %2439 = vmatmul.mubr.f32.gmra.mrb[18].mxu0 %v2158_v18 }
 0x17a   : > { %950 = vrot.lane.b32.xlu1 %v9267_v27, %s8366_s1  ;;  %v2193_v27 = vld [vmem:[#allocation4 + $0x1f0] sm:$0xff] }
 0x17b   : > { %v1960_v59 = vpop.permute.xlu0 %1959  ;;  %7821 = vmatprep.mubr.msk.f32.mxu1 %vm813_vm1, %v2193_v27  ;;  %v9730_v27 = vld [vmem:[#allocation2 + $0x1c7] sm:$0xff] }
 0x17c   : > { %v1318_v7 = vpop.permute.xlu1 %1317  ;;  %2045 = vst.msk [vmem:[#allocation4 + $0xf8] sm:$0xff] %vm1393_vm4, %v1960_v59  ;;  %7822 = vmatmul.mubr.msk.f32.gmra.mrb[20].mxu1 %vm813_vm1, %v2196_v34 }
 0x17d   : > { %1404 = vst.msk [vmem:[#allocation4 + $0xf0] sm:$0xff] %vm1393_vm4, %v1318_v7  ;;  %1787 = vrot.lane.b32.xlu0 %v9629_v51, %s8365_s0 }
 0x17e   : > { %1143 = vrot.lane.b32.xlu1 %v9301_v52, %s8365_s0  ;;  %v9639_v5 = vpop.f32.mrb[0].mxu1 }
 0x17f   : > { %v1577_v44 = vpop.permute.xlu0 %1576  ;;  %v9647_v52 = vpop.f32.mrb[1].mxu1 }
 0x180   : > { %v933_v28 = vpop.permute.xlu1 %932  ;;  %1661 = vst.msk [vmem:[#allocation4 + $0x110] sm:$0xff] %vm1006_vm2, %v1577_v44 }
 0x181   : > { %1018 = vst.msk [vmem:[#allocation4 + $0x108] sm:$0xff] %vm1006_vm2, %v933_v28  ;;  %1979 = vrot.lane.b32.xlu0 %v9367_v43, %s8368_s2 }
 0x182   : > { %1337 = vrot.lane.b32.xlu1 %v9309_v50, %s8368_s2  ;;  %v9653_v35 = vpop.f32.mrb[2].mxu1  ;;  %v9663_v50 = vld [vmem:[#allocation2 + $0x18f] sm:$0xff] }
 0x183   : > { %v1770_v32 = vpop.permute.xlu0 %1769  ;;  %v2162_v11 = vld [vmem:[#allocation4 + $0xf8] sm:$0xff]  ;;  %v9657_v12 = vpop.f32.mrb[3].mxu1 }
 0x184   : > { %v1126_v10 = vpop.permute.xlu1 %1125  ;;  %v2161_v55 = vld [vmem:[#allocation4 + $0xf0] sm:$0xff]  ;;  %1854 = vst.msk [vmem:[#allocation4 + $0x110] sm:$0xff] %vm1199_vm3, %v1770_v32  ;;  %2443 = vmatprep.mubr.f32.mxu0 %v2162_v11 }
 0x185   : > { %1211 = vst.msk [vmem:[#allocation4 + $0x108] sm:$0xff] %vm1199_vm3, %v1126_v10  ;;  %1596 = vrot.lane.b32.xlu0 %v9377_v2, %s8366_s1  ;;  %2444 = vmatmul.mubr.f32.gmra.mrb[20].mxu0 %v2161_v55  ;;  %v2205_v10 = vld [vmem:[#allocation4 + $0x250] sm:$0xff]  ;;  %v2208_v55 = vld [vmem:[#allocation4 + $0x268] sm:$0xff] }
 0x186   : > { %952 = vrot.lane.b32.xlu1 %v9293_v62, %s8366_s1 }
 0x187   : > { %v1962_v33 = vpop.permute.xlu0 %1961 }
 0x188   : > { %v1320_v3 = vpop.permute.xlu1 %1319  ;;  %2046 = vst.msk [vmem:[#allocation4 + $0x110] sm:$0xff] %vm1393_vm4, %v1962_v33 }
 0x189   : > { %1405 = vst.msk [vmem:[#allocation4 + $0x108] sm:$0xff] %vm1393_vm4, %v1320_v3  ;;  %1789 = vrot.lane.b32.xlu0 %v9663_v50, %s8365_s0 }
 0x18a   : > { %1145 = vrot.lane.b32.xlu1 %v9325_v56, %s8365_s0  ;;  %v9683_v56 = vld [vmem:[#allocation2 + $0x1a7] sm:$0xff] }
 0x18b   : > { %v1579_v62 = vpop.permute.xlu0 %1578 }
 0x18c   : > { %v935_v21 = vpop.permute.xlu1 %934  ;;  %1662 = vst.msk [vmem:[#allocation4 + $0x128] sm:$0xff] %vm1006_vm2, %v1579_v62  ;;  %v9758_v62 = vld [vmem:[#allocation2 + $0x1cf] sm:$0xff] }
 0x18d   : > { %1019 = vst.msk [vmem:[#allocation4 + $0x120] sm:$0xff] %vm1006_vm2, %v935_v21  ;;  %1981 = vrot.lane.b32.xlu0 %v9395_v45, %s8368_s2  ;;  %v807_v21 = vld [vmem:[#allocation2 + $0x1a7] sm:$0xff] }
 0x18e   : > { %1339 = vrot.lane.b32.xlu1 %v9335_v60, %s8368_s2  ;;  %v9685_v60 = vpop.f32.mrb[4].mxu1  ;;  %840 = vst.msk [vmem:[#allocation4 + $0x270] sm:$0xff] %vm813_vm1, %v807_v21  ;;  %v2851_v21 = vld [vmem:[%s8540_s28 + $0x38] sm:$0xff] }
 0x18f   : > { %v1772_v13 = vpop.permute.xlu0 %1771  ;;  %v2165_v16 = vld [vmem:[#allocation4 + $0x110] sm:$0xff]  ;;  %v9689_v30 = vpop.f32.mrb[5].mxu1 }
 0x190   : > { %v1128_v42 = vpop.permute.xlu1 %1127  ;;  %v2164_v22 = vld [vmem:[#allocation4 + $0x108] sm:$0xff]  ;;  %1855 = vst.msk [vmem:[#allocation4 + $0x128] sm:$0xff] %vm1199_vm3, %v1772_v13  ;;  %2448 = vmatprep.mubr.f32.mxu0 %v2165_v16 }
 0x191   : > { %1212 = vst.msk [vmem:[#allocation4 + $0x120] sm:$0xff] %vm1199_vm3, %v1128_v42  ;;  %1598 = vrot.lane.b32.xlu0 %v9405_v9, %s8366_s1  ;;  %2449 = vmatmul.mubr.f32.gmra.mrb[22].mxu0 %v2164_v22 }
 0x192   : > { %954 = vrot.lane.b32.xlu1 %v9317_v54, %s8366_s1  ;;  %v2199_v54 = vld [vmem:[#allocation4 + $0x220] sm:$0xff] }
 0x193   : > { %v1964_v47 = vpop.permute.xlu0 %1963  ;;  %7824 = vmatprep.mubr.msk.f32.mxu1 %vm813_vm1, %v2199_v54  ;;  %v9778_v54 = vld [vmem:[#allocation2 + $0x1e7] sm:$0xff] }
 0x194   : > { %v1322_v41 = vpop.permute.xlu1 %1321  ;;  %2047 = vst.msk [vmem:[#allocation4 + $0x128] sm:$0xff] %vm1393_vm4, %v1964_v47  ;;  %7825 = vmatmul.mubr.msk.f32.gmra.mrb[22].mxu1 %vm813_vm1, %v2202_v31 }
 0x195   : > { %1406 = vst.msk [vmem:[#allocation4 + $0x120] sm:$0xff] %vm1393_vm4, %v1322_v41  ;;  %1791 = vrot.lane.b32.xlu0 %v9683_v56, %s8365_s0  ;;  %7827 = vmatprep.mubr.msk.f32.mxu1 %vm813_vm1, %v2205_v10  ;;  %v2849_v10 = vld [vmem:[%s8540_s28 + $0x28] sm:$0xff] }
 0x196   : > { %1147 = vrot.lane.b32.xlu1 %v9351_v1, %s8365_s0 }
 0x197   : > { %v1581_v63 = vpop.permute.xlu0 %1580 }
 0x198   : > { %v937_v26 = vpop.permute.xlu1 %936  ;;  %1663 = vst.msk [vmem:[#allocation4 + $0x140] sm:$0xff] %vm1006_vm2, %v1581_v63  ;;  %7828 = vmatmul.mubr.msk.f32.gmra.mrb[24].mxu1 %vm813_vm1, %v2208_v55 }
 0x199   : > { %1020 = vst.msk [vmem:[#allocation4 + $0x138] sm:$0xff] %vm1006_vm2, %v937_v26  ;;  %1983 = vrot.lane.b32.xlu0 %v9421_v46, %s8368_s2 }
 0x19a   : > { %1341 = vrot.lane.b32.xlu1 %v9629_v51, %s8368_s2 }
 0x19b   : > { %v1774_v53 = vpop.permute.xlu0 %1773  ;;  %v2168_v48 = vld [vmem:[#allocation4 + $0x128] sm:$0xff] }
 0x19c   : > { %v1130_v1 = vpop.permute.xlu1 %1129  ;;  %v2167_v57 = vld [vmem:[#allocation4 + $0x120] sm:$0xff]  ;;  %1856 = vst.msk [vmem:[#allocation4 + $0x140] sm:$0xff] %vm1199_vm3, %v1774_v53  ;;  %2453 = vmatprep.mubr.f32.mxu0 %v2168_v48 }
 0x19d   : > { %1213 = vst.msk [vmem:[#allocation4 + $0x138] sm:$0xff] %vm1199_vm3, %v1130_v1  ;;  %1600 = vrot.lane.b32.xlu0 %v9431_v15, %s8366_s1  ;;  %2454 = vmatmul.mubr.f32.gmra.mrb[24].mxu0 %v2167_v57  ;;  %v2211_v1 = vld [vmem:[#allocation4 + $0x280] sm:$0xff]  ;;  %v2214_v57 = vld [vmem:[#allocation4 + $0x298] sm:$0xff] }
 0x19e   : > { %956 = vrot.lane.b32.xlu1 %v9343_v37, %s8366_s1  ;;  %7830 = vmatprep.mubr.msk.f32.mxu1 %vm813_vm1, %v2211_v1  ;;  %v9854_v1 = vld [vmem:[%s8526_s14] ss:$0 sm:$0xff] }
 0x19f   : > { %v1966_v4 = vpop.permute.xlu0 %1965  ;;  %7831 = vmatmul.mubr.msk.f32.gmra.mrb[26].mxu1 %vm813_vm1, %v2214_v57  ;;  %v2855_v57 = vld [vmem:[%s8540_s28 + $0x58] sm:$0xff] }
 0x1a0   : > { %v1324_v49 = vpop.permute.xlu1 %1323  ;;  %2048 = vst.msk [vmem:[#allocation4 + $0x140] sm:$0xff] %vm1393_vm4, %v1966_v4  ;;  %v809_v4 = vld [vmem:[#allocation2 + $0x1c7] sm:$0xff] }
 0x1a1   : > { %1407 = vst.msk [vmem:[#allocation4 + $0x138] sm:$0xff] %vm1393_vm4, %v1324_v49  ;;  %1793 = vrot.lane.b32.xlu0 %v9710_v40, %s8365_s0 }
 0x1a2   : > { %1149 = vrot.lane.b32.xlu1 %v9377_v2, %s8365_s0  ;;  %v806_v2 = vld [vmem:[#allocation2 + $0x18f] sm:$0xff]  ;;  %842 = vst.msk [vmem:[#allocation4 + $0x2a0] sm:$0xff] %vm813_vm1, %v809_v4 }
 0x1a3   : > { %v1583_v37 = vpop.permute.xlu0 %1582  ;;  %839 = vst.msk [vmem:[#allocation4 + $0x258] sm:$0xff] %vm813_vm1, %v806_v2  ;;  %v2847_v2 = vld [vmem:[%s8540_s28 + $0x18] sm:$0xff] }
 0x1a4   : > { %v939_v23 = vpop.permute.xlu1 %938  ;;  %1664 = vst.msk [vmem:[#allocation4 + $0x158] sm:$0xff] %vm1006_vm2, %v1583_v37  ;;  %v2845_v37 = vld [vmem:[%s8540_s28 + $0x8] sm:$0xff] }
 0x1a5   : > { %1021 = vst.msk [vmem:[#allocation4 + $0x150] sm:$0xff] %vm1006_vm2, %v939_v23  ;;  %1985 = vrot.lane.b32.xlu0 %v9449_v36, %s8368_s2  ;;  %v2844_v23 = vld [vmem:[%s8540_s28] sm:$0xff] }
 0x1a6   : > { %1343 = vrot.lane.b32.xlu1 %v9663_v50, %s8368_s2  ;;  %v9735_v44 = vpop.f32.mrb[6].mxu1 }
 0x1a7   : > { %v1776_v51 = vpop.permute.xlu0 %1775  ;;  %v2171_v7 = vld [vmem:[#allocation4 + $0x140] sm:$0xff] }
 0x1a8   : > { %v1132_v18 = vpop.permute.xlu1 %1131  ;;  %v2170_v59 = vld [vmem:[#allocation4 + $0x138] sm:$0xff]  ;;  %1857 = vst.msk [vmem:[#allocation4 + $0x158] sm:$0xff] %vm1199_vm3, %v1776_v51  ;;  %2458 = vmatprep.mubr.f32.mxu0 %v2171_v7  ;;  %v8024_v51 = vpack.c.bf16 %v2845_v37, %v2844_v23 }
 0x1a9   : > { %1214 = vst.msk [vmem:[#allocation4 + $0x150] sm:$0xff] %vm1199_vm3, %v1132_v18  ;;  %1602 = vrot.lane.b32.xlu0 %v9459_v20, %s8366_s1  ;;  %2459 = vmatmul.mubr.f32.gmra.mrb[26].mxu0 %v2170_v59  ;;  %v9808_v18 = vld [vmem:[#allocation2 + $0x1ef] sm:$0xff] }
 0x1aa   : > { %958 = vrot.lane.b32.xlu1 %v9367_v43, %s8366_s1  ;;  %v9741_v43 = vpop.f32.mrb[7].mxu1  ;;  %8025 = vmatpush1.bf16.msra.mxu1 %v8024_v51  ;;  %v811_v51 = vld [vmem:[#allocation2 + $0x1e7] sm:$0xff] }
 0x1ab   : > { %v1968_v28 = vpop.permute.xlu0 %1967  ;;  %8026 = vmatprep.subr.bf16.mxu1 %v8367_v39  ;;  %844 = vst.msk [vmem:[#allocation4 + $0x2d0] sm:$0xff] %vm813_vm1, %v811_v51 }
 0x1ac   : > { %v1326_v34 = vpop.permute.xlu1 %1325  ;;  %2049 = vst.msk [vmem:[#allocation4 + $0x158] sm:$0xff] %vm1393_vm4, %v1968_v28 }
 0x1ad   : > { %1408 = vst.msk [vmem:[#allocation4 + $0x150] sm:$0xff] %vm1393_vm4, %v1326_v34  ;;  %1795 = vrot.lane.b32.xlu0 %v9730_v27, %s8365_s0 }
 0x1ae   : > { %1151 = vrot.lane.b32.xlu1 %v9405_v9, %s8365_s0 }
 0x1af   : > { %v1585_v11 = vpop.permute.xlu0 %1584 }
 0x1b0   : > { %v941_v32 = vpop.permute.xlu1 %940  ;;  %1665 = vst.msk [vmem:[#allocation4 + $0x170] sm:$0xff] %vm1006_vm2, %v1585_v11 }
 0x1b1   : > { %1022 = vst.msk [vmem:[#allocation4 + $0x168] sm:$0xff] %vm1006_vm2, %v941_v32  ;;  %1987 = vrot.lane.b32.xlu0 %v9475_v14, %s8368_s2 }
 0x1b2   : > { %1345 = vrot.lane.b32.xlu1 %v9683_v56, %s8368_s2 }
 0x1b3   : > { %v1778_v50 = vpop.permute.xlu0 %1777  ;;  %v2174_v3 = vld [vmem:[#allocation4 + $0x158] sm:$0xff] }
 0x1b4   : > { %v1134_v9 = vpop.permute.xlu1 %1133  ;;  %v2173_v33 = vld [vmem:[#allocation4 + $0x150] sm:$0xff]  ;;  %1858 = vst.msk [vmem:[#allocation4 + $0x170] sm:$0xff] %vm1199_vm3, %v1778_v50  ;;  %2463 = vmatprep.mubr.f32.mxu0 %v2174_v3 }
 0x1b5   : > { %1215 = vst.msk [vmem:[#allocation4 + $0x168] sm:$0xff] %vm1199_vm3, %v1134_v9  ;;  %1604 = vrot.lane.b32.xlu0 %v9485_v29, %s8366_s1  ;;  %2464 = vmatmul.mubr.f32.gmra.mrb[28].mxu0 %v2173_v33  ;;  %v810_v3 = vld [vmem:[#allocation2 + $0x1cf] sm:$0xff] }
 0x1b6   : > { %960 = vrot.lane.b32.xlu1 %v9395_v45, %s8366_s1  ;;  %v2850_v33 = vld [vmem:[%s8540_s28 + $0x30] sm:$0xff]  ;;  %843 = vst.msk [vmem:[#allocation4 + $0x2b8] sm:$0xff] %vm813_vm1, %v810_v3 }
 0x1b7   : > { %v1970_v13 = vpop.permute.xlu0 %1969 }
 0x1b8   : > { %v1328_v42 = vpop.permute.xlu1 %1327  ;;  %2050 = vst.msk [vmem:[#allocation4 + $0x170] sm:$0xff] %vm1393_vm4, %v1970_v13 }
 0x1b9   : > { %1409 = vst.msk [vmem:[#allocation4 + $0x168] sm:$0xff] %vm1393_vm4, %v1328_v42  ;;  %1797 = vrot.lane.b32.xlu0 %v9758_v62, %s8365_s0  ;;  %v8033_v42 = vpack.c.bf16 %v2851_v21, %v2850_v33 }
 0x1ba   : > { %1153 = vrot.lane.b32.xlu1 %v9431_v15, %s8365_s0  ;;  %v808_v15 = vld [vmem:[#allocation2 + $0x1af] sm:$0xff] }
 0x1bb   : > { %v1587_v45 = vpop.permute.xlu0 %1586  ;;  %841 = vst.msk [vmem:[#allocation4 + $0x288] sm:$0xff] %vm813_vm1, %v808_v15 }
 0x1bc   : > { %v943_v16 = vpop.permute.xlu1 %942  ;;  %1666 = vst.msk [vmem:[#allocation4 + $0x188] sm:$0xff] %vm1006_vm2, %v1587_v45 }
 0x1bd   : > { %1023 = vst.msk [vmem:[#allocation4 + $0x180] sm:$0xff] %vm1006_vm2, %v943_v16  ;;  %1989 = vrot.lane.b32.xlu0 %v9503_v17, %s8368_s2 }
 0x1be   : > { %1347 = vrot.lane.b32.xlu1 %v9710_v40, %s8368_s2  ;;  %v9783_v31 = vpop.f32.mrb[8].mxu1 }
 0x1bf   : > { %v1780_v56 = vpop.permute.xlu0 %1779  ;;  %v2177_v41 = vld [vmem:[#allocation4 + $0x170] sm:$0xff] }
 0x1c0   : > { %v1136_v22 = vpop.permute.xlu1 %1135  ;;  %v2176_v47 = vld [vmem:[#allocation4 + $0x168] sm:$0xff]  ;;  %1859 = vst.msk [vmem:[#allocation4 + $0x188] sm:$0xff] %vm1199_vm3, %v1780_v56  ;;  %2468 = vmatprep.mubr.f32.mxu0 %v2177_v41 }
 0x1c1   : > { %1216 = vst.msk [vmem:[#allocation4 + $0x180] sm:$0xff] %vm1199_vm3, %v1136_v22  ;;  %1606 = vrot.lane.b32.xlu0 %v9513_v58, %s8366_s1  ;;  %2469 = vmatmul.mubr.f32.gmra.mrb[30].mxu0 %v2176_v47  ;;  %v2852_v22 = vld [vmem:[%s8540_s28 + $0x40] sm:$0xff]  ;;  %v2853_v56 = vld [vmem:[%s8540_s28 + $0x48] sm:$0xff]  ;;  %v2217_v47 = vld [vmem:[#allocation4 + $0x2b0] sm:$0xff] }
 0x1c2   : > { %962 = vrot.lane.b32.xlu1 %v9421_v46, %s8366_s1  ;;  %v9789_v46 = vpop.f32.mrb[9].mxu1  ;;  %v1903_v41 = vld [vmem:[#allocation2 + $0x208] sm:$0xff]  ;;  %v8036_v15 = vpack.c.bf16 %v2853_v56, %v2852_v22  ;;  %7833 = vmatprep.mubr.msk.f32.mxu1 %vm813_vm1, %v2217_v47  ;;  %v1457_v47 = vld [vmem:[#allocation2 + $0x210] sm:$0xff] }
 0x1c3   : > { %v1972_v63 = vpop.permute.xlu0 %1971  ;;  %1489 = vst.msk [vmem:[#allocation4 + $0x2f0] sm:$0xff] %vm813_vm1, %v1457_v47  ;;  %v2870_v47 = vld [vmem:[%s8540_s28 + $0xd0] sm:$0xff] }
 0x1c4   : > { %v1330_v26 = vpop.permute.xlu1 %1329  ;;  %2051 = vst.msk [vmem:[#allocation4 + $0x188] sm:$0xff] %vm1393_vm4, %v1972_v63 }
 0x1c5   : > { %1410 = vst.msk [vmem:[#allocation4 + $0x180] sm:$0xff] %vm1393_vm4, %v1330_v26  ;;  %1799 = vrot.lane.b32.xlu0 %v9778_v54, %s8365_s0 }
 0x1c6   : > { %1155 = vrot.lane.b32.xlu1 %v9459_v20, %s8365_s0 }
 0x1c7   : > { %v1589_v48 = vpop.permute.xlu0 %1588 }
 0x1c8   : > { %v945_v53 = vpop.permute.xlu1 %944  ;;  %1667 = vst.msk [vmem:[#allocation4 + $0x1a0] sm:$0xff] %vm1006_vm2, %v1589_v48  ;;  %v2854_v48 = vld [vmem:[%s8540_s28 + $0x50] sm:$0xff] }
 0x1c9   : > { %1024 = vst.msk [vmem:[#allocation4 + $0x198] sm:$0xff] %vm1006_vm2, %v945_v53  ;;  %1991 = vrot.lane.b32.xlu0 %v9529_v38, %s8368_s2 }
 0x1ca   : > { %1349 = vrot.lane.b32.xlu1 %v9730_v27, %s8368_s2 }
 0x1cb   : > { %v1782_v19 = vpop.permute.xlu0 %1781  ;;  %v2180_v40 = vld [vmem:[#allocation4 + $0x188] sm:$0xff] }
 0x1cc   : > { %v1138_v20 = vpop.permute.xlu1 %1137  ;;  %v2179_v49 = vld [vmem:[#allocation4 + $0x180] sm:$0xff]  ;;  %1860 = vst.msk [vmem:[#allocation4 + $0x1a0] sm:$0xff] %vm1199_vm3, %v1782_v19  ;;  %2473 = vmatprep.mubr.f32.mxu0 %v2180_v40  ;;  %v8039_v40 = vpack.c.bf16 %v2855_v57, %v2854_v48 }
 0x1cd   : > { %1217 = vst.msk [vmem:[#allocation4 + $0x198] sm:$0xff] %vm1199_vm3, %v1138_v20  ;;  %1608 = vrot.lane.b32.xlu0 %v9539_v0, %s8366_s1  ;;  %2474 = vmatmul.mubr.f32.gmra.mrb[32].mxu0 %v2179_v49 }
 0x1ce   : > { %964 = vrot.lane.b32.xlu1 %v9449_v36, %s8366_s1  ;;  %v2846_v36 = vld [vmem:[%s8540_s28 + $0x10] sm:$0xff] }
 0x1cf   : > { %v1974_v59 = vpop.permute.xlu0 %1973  ;;  %v8027_v27 = vpack.c.bf16 %v2847_v2, %v2846_v36  ;;  %v9878_v2 = vld [vmem:[#allocation2 + $0x20f] sm:$0xff] }
 0x1d0   : > { %v1332_v7 = vpop.permute.xlu1 %1331  ;;  %2052 = vst.msk [vmem:[#allocation4 + $0x1a0] sm:$0xff] %vm1393_vm4, %v1974_v59  ;;  %v2856_v59 = vld [vmem:[%s8540_s28 + $0x60] sm:$0xff] }
 0x1d1   : > { %1411 = vst.msk [vmem:[#allocation4 + $0x198] sm:$0xff] %vm1393_vm4, %v1332_v7  ;;  %1801 = vrot.lane.b32.xlu0 %v9808_v18, %s8365_s0  ;;  %8028 = vmatpush1.bf16.msra.mxu1 %v8027_v27  ;;  %v1456_v7 = vld [vmem:[#allocation2 + $0x208] sm:$0xff] }
 0x1d2   : > { %1157 = vrot.lane.b32.xlu1 %v9485_v29, %s8365_s0  ;;  %v2848_v29 = vld [vmem:[%s8540_s28 + $0x20] sm:$0xff]  ;;  %8029 = vmatprep.subr.bf16.mxu1 %v8367_v39  ;;  %1488 = vst.msk [vmem:[#allocation4 + $0x2d8] sm:$0xff] %vm813_vm1, %v1456_v7 }
 0x1d3   : > { %v1591_v28 = vpop.permute.xlu0 %1590  ;;  %v8030_v32 = vpack.c.bf16 %v2849_v10, %v2848_v29  ;;  %v2859_v29 = vld [vmem:[%s8540_s28 + $0x78] sm:$0xff]  ;;  %v1904_v10 = vld [vmem:[#allocation2 + $0x210] sm:$0xff] }
 0x1d4   : > { %v947_v34 = vpop.permute.xlu1 %946  ;;  %1668 = vst.msk [vmem:[#allocation4 + $0x1b8] sm:$0xff] %vm1006_vm2, %v1591_v28 }
 0x1d5   : > { %1025 = vst.msk [vmem:[#allocation4 + $0x1b0] sm:$0xff] %vm1006_vm2, %v947_v34  ;;  %1993 = vrot.lane.b32.xlu0 %v9557_v8, %s8368_s2  ;;  %8031 = vmatpush1.bf16.msra.mxu1 %v8030_v32 }
 0x1d6   : > { %1351 = vrot.lane.b32.xlu1 %v9758_v62, %s8368_s2  ;;  %v9836_v62 = vld [vmem:[#allocation2 + $0x207] sm:$0xff]  ;;  %8032 = vmatprep.subr.bf16.mxu1 %v8367_v39 }
 0x1d7   : > { %v1784_v55 = vpop.permute.xlu0 %1783  ;;  %v2183_v9 = vld [vmem:[#allocation4 + $0x1a0] sm:$0xff] }
 0x1d8   : > { %v1140_v11 = vpop.permute.xlu1 %1139  ;;  %v2182_v50 = vld [vmem:[#allocation4 + $0x198] sm:$0xff]  ;;  %1861 = vst.msk [vmem:[#allocation4 + $0x1b8] sm:$0xff] %vm1199_vm3, %v1784_v55  ;;  %2478 = vmatprep.mubr.f32.mxu0 %v2183_v9 }
 0x1d9   : > { %1218 = vst.msk [vmem:[#allocation4 + $0x1b0] sm:$0xff] %vm1199_vm3, %v1140_v11  ;;  %1610 = vrot.lane.b32.xlu0 %v9567_v25, %s8366_s1  ;;  %2479 = vmatmul.mubr.f32.gmra.mrb[34].mxu0 %v2182_v50  ;;  %v2861_v50 = vld [vmem:[%s8540_s28 + $0x88] sm:$0xff] }
 0x1da   : > { %966 = vrot.lane.b32.xlu1 %v9475_v14, %s8366_s1  ;;  %v9842_v14 = vpop.f32.mrb[10].mxu1  ;;  %8034 = vmatpush1.bf16.msra.mxu1 %v8033_v42  ;;  %v2097_v42 = vld [vmem:[#allocation2 + $0x229] sm:$0xff] }
 0x1db   : > { %v1976_v16 = vpop.permute.xlu0 %1975  ;;  %v9848_v45 = vpop.f32.mrb[11].mxu1  ;;  %8035 = vmatprep.subr.bf16.mxu1 %v8367_v39  ;;  %2129 = vst.msk [vmem:[#allocation4 + $0x2e0] sm:$0xff] %vm813_vm1, %v2097_v42  ;;  %v2868_v42 = vld [vmem:[%s8540_s28 + $0xc0] sm:$0xff] }
 0x1dc   : > { %v1334_v13 = vpop.permute.xlu1 %1333  ;;  %2053 = vst.msk [vmem:[#allocation4 + $0x1b8] sm:$0xff] %vm1393_vm4, %v1976_v16 }
 0x1dd   : > { %1412 = vst.msk [vmem:[#allocation4 + $0x1b0] sm:$0xff] %vm1393_vm4, %v1334_v13  ;;  %1803 = vrot.lane.b32.xlu0 %v9836_v62, %s8365_s0 }
 0x1de   : > { %1159 = vrot.lane.b32.xlu1 %v9513_v58, %s8365_s0  ;;  %v2220_v58 = vld [vmem:[#allocation4 + $0x2c8] sm:$0xff]  ;;  %8037 = vmatpush1.bf16.msra.mxu1 %v8036_v15  ;;  %v2098_v15 = vld [vmem:[#allocation2 + $0x231] sm:$0xff] }
 0x1df   : > { %v1593_v63 = vpop.permute.xlu0 %1592  ;;  %7834 = vmatmul.mubr.msk.f32.gmra.mrb[28].mxu1 %vm813_vm1, %v2220_v58  ;;  %8038 = vmatprep.subr.bf16.mxu1 %v8367_v39  ;;  %2130 = vst.msk [vmem:[#allocation4 + $0x2f8] sm:$0xff] %vm813_vm1, %v2098_v15  ;;  %v2871_v15 = vld [vmem:[%s8540_s28 + $0xd8] sm:$0xff] }
 0x1e0   : > { %v949_v26 = vpop.permute.xlu1 %948  ;;  %1669 = vst.msk [vmem:[#allocation4 + $0x1d0] sm:$0xff] %vm1006_vm2, %v1593_v63  ;;  %v2395_v53 = vpop.f32.mrb[0].mxu0  ;;  %v2862_v63 = vld [vmem:[%s8540_s28 + $0x90] sm:$0xff] }
 0x1e1   : > { %1026 = vst.msk [vmem:[#allocation4 + $0x1c8] sm:$0xff] %vm1006_vm2, %v949_v26  ;;  %1995 = vrot.lane.b32.xlu0 %v1903_v41, %s8368_s2  ;;  %v2396_v20 = vadd.f32 %v9854_v1, %v2395_v53  ;;  %v2397_v19 = vpop.f32.mrb[1].mxu0  ;;  %v812_v26 = vld [vmem:[#allocation2 + $0x1ef] sm:$0xff]  ;;  %v1713_v53 = vld [vmem:[#allocation2 + $0x227] sm:$0xff] }
 0x1e2   : > { %1353 = vrot.lane.b32.xlu1 %v9778_v54, %s8368_s2  ;;  %8040 = vmatpush1.bf16.msra.mxu1 %v8039_v40  ;;  %845 = vst.msk [vmem:[#allocation4 + $0x2e8] sm:$0xff] %vm813_vm1, %v812_v26  ;;  %v2864_v40 = vld [vmem:[%s8540_s28 + $0xa0] sm:$0xff]  ;;  %v1906_v26 = vld [vmem:[#allocation2 + $0x230] sm:$0xff] }
 0x1e3   : > { %v1786_v4 = vpop.permute.xlu0 %1785  ;;  %v2186_v23 = vld [vmem:[#allocation4 + $0x1b8] sm:$0xff]  ;;  %v2621_v54 = vadd.f32 %v9647_v52, %v2396_v20  ;;  %v2857_v52 = vld [vmem:[%s8540_s28 + $0x68] sm:$0xff]  ;;  %8041 = vmatprep.subr.bf16.mxu1 %v8367_v39  ;;  %v9922_v20 = vpop.f32.mrb[12].mxu1 }
 0x1e4   : > { %v1142_v49 = vpop.permute.xlu1 %1141  ;;  %v2185_v37 = vld [vmem:[#allocation4 + $0x1b0] sm:$0xff]  ;;  %1862 = vst.msk [vmem:[#allocation4 + $0x1d0] sm:$0xff] %vm1199_vm3, %v1786_v4  ;;  %2483 = vmatprep.mubr.f32.mxu0 %v2186_v23  ;;  %v8042_v27 = vpack.c.bf16 %v2857_v52, %v2856_v59  ;;  %v9927_v19 = vpop.f32.mrb[13].mxu1  ;;  %v1905_v4 = vld [vmem:[#allocation2 + $0x228] sm:$0xff]  ;;  %v2223_v23 = vld [vmem:[#allocation4 + $0x2e0] sm:$0xff] }
 0x1e5   : > { %1219 = vst.msk [vmem:[#allocation4 + $0x1c8] sm:$0xff] %vm1199_vm3, %v1142_v49  ;;  %1612 = vrot.lane.b32.xlu0 %v9589_v61, %s8366_s1  ;;  %v2779_v36 = vmax.f32 %v2621_v54, 0.0  ;;  %2484 = vmatmul.mubr.f32.gmra.mrb[36].mxu0 %v2185_v37  ;;  %v2865_v49 = vld [vmem:[%s8540_s28 + $0xa8] sm:$0xff]  ;;  %v4193_v59 = vld [vmem:[#allocation3 + $0x231] sm:$0xff] }
 0x1e6   : > { %968 = vrot.lane.b32.xlu1 %v9503_v17, %s8366_s1  ;;  %v2858_v17 = vld [vmem:[%s8540_s28 + $0x70] sm:$0xff]  ;;  %8043 = vmatpush1.bf16.msra.mxu1 %v8042_v27  ;;  %v8054_v54 = vpack.c.bf16 %v2865_v49, %v2864_v40  ;;  %v2226_v7 = vld [vmem:[#allocation4 + $0x2f8] sm:$0xff] }
 0x1e7   : > { %v1978_v28 = vpop.permute.xlu0 %1977  ;;  %2812 = vst.msk [vmem:[#allocation3 + $0x28] sm:$0xff] %vm813_vm1, %v2779_v36  ;;  %v8045_v32 = vpack.c.bf16 %v2859_v29, %v2858_v17  ;;  %8044 = vmatprep.subr.bf16.mxu1 %v8367_v39  ;;  %7836 = vmatprep.mubr.msk.f32.mxu1 %vm813_vm1, %v2223_v23  ;;  %4225 = vst.msk [vmem:[#allocation4 + $0x2f8] sm:$0xff] %vm813_vm1, %v4193_v59  ;;  %v2866_v36 = vld [vmem:[%s8540_s28 + $0xb0] sm:$0xff]  ;;  %v2867_v27 = vld [vmem:[%s8540_s28 + $0xb8] sm:$0xff] }
 0x1e8   : > { %v1336_v34 = vpop.permute.xlu1 %1335  ;;  %2054 = vst.msk [vmem:[#allocation4 + $0x1d0] sm:$0xff] %vm1393_vm4, %v1978_v28  ;;  %7837 = vmatmul.mubr.msk.f32.gmra.mrb[30].mxu1 %vm813_vm1, %v2226_v7  ;;  %v2881_v17 = vld [vmem:[#allocation3 + $0x7] sm:$0xff]  ;;  %v2882_v7 = vld [vmem:[#allocation3 + $0xf] sm:$0xff] }
 0x1e9   : > { %1413 = vst.msk [vmem:[#allocation4 + $0x1c8] sm:$0xff] %vm1393_vm4, %v1336_v34  ;;  %1805 = vrot.lane.b32.xlu0 %v9878_v2, %s8365_s0  ;;  %v2874_v59 = vld [vmem:[%s8540_s28 + $0xf0] sm:$0xff] }
 0x1ea   : > { %1161 = vrot.lane.b32.xlu1 %v9539_v0, %s8365_s0  ;;  %v2860_v0 = vld [vmem:[%s8540_s28 + $0x80] sm:$0xff]  ;;  %8046 = vmatpush1.bf16.msra.mxu1 %v8045_v32  ;;  %2913 = vst.msk [vmem:[#allocation4] sm:$0xff] %vm813_vm1, %v2881_v17  ;;  %2914 = vst.msk [vmem:[#allocation4 + $0x18] sm:$0xff] %vm813_vm1, %v2882_v7  ;;  %v10007_v17 = vpop.f32.mrb[14].mxu1 }
 0x1eb   : > { %v1595_v55 = vpop.permute.xlu0 %1594  ;;  %v8048_v21 = vpack.c.bf16 %v2861_v50, %v2860_v0  ;;  %8047 = vmatprep.subr.bf16.mxu1 %v8367_v39  ;;  %v2876_v0 = vld [vmem:[%s8540_s28 + $0x100] sm:$0xff]  ;;  %v2877_v50 = vld [vmem:[%s8540_s28 + $0x108] sm:$0xff] }
 0x1ec   : > { %v951_v11 = vpop.permute.xlu1 %950  ;;  %1670 = vst.msk [vmem:[#allocation4 + $0x1e8] sm:$0xff] %vm1006_vm2, %v1595_v55  ;;  %v2400_v9 = vpop.f32.mrb[2].mxu0 }
 0x1ed   : > { %1027 = vst.msk [vmem:[#allocation4 + $0x1e0] sm:$0xff] %vm1006_vm2, %v951_v11  ;;  %1997 = vrot.lane.b32.xlu0 %v1904_v10, %s8368_s2  ;;  %v2401_v3 = vadd.f32 %v9854_v1, %v2400_v9  ;;  %v2402_v33 = vpop.f32.mrb[3].mxu0  ;;  %v8057_v11 = vpack.c.bf16 %v2867_v27, %v2866_v36  ;;  %v3137_v36 = vld [vmem:[#allocation3 + $0x9] sm:$0xff] }
 0x1ee   : > { %1355 = vrot.lane.b32.xlu1 %v9808_v18, %s8368_s2  ;;  %v9904_v41 = vld [vmem:[#allocation3 + $0x28] sm:$0xff]  ;;  %8049 = vmatpush1.bf16.msra.mxu1 %v8048_v21  ;;  %v9959_v21 = vpack.c.bf16 %v2877_v50, %v2876_v0 }
 0x1ef   : > { %v1788_v16 = vpop.permute.xlu0 %1787  ;;  %v2189_v22 = vld [vmem:[#allocation4 + $0x1d0] sm:$0xff]  ;;  %v2626_v18 = vadd.f32 %v9639_v5, %v2401_v3  ;;  %v2863_v5 = vld [vmem:[%s8540_s28 + $0x98] sm:$0xff]  ;;  %3553 = vst.msk [vmem:[#allocation4 + $0x8] sm:$0xff] %vm813_vm1, %v9904_v41  ;;  %8050 = vmatprep.subr.bf16.mxu1 %v8367_v39 }
 0x1f0   : > { %v1144_v13 = vpop.permute.xlu1 %1143  ;;  %v2188_v56 = vld [vmem:[#allocation4 + $0x1c8] sm:$0xff]  ;;  %1863 = vst.msk [vmem:[#allocation4 + $0x1e8] sm:$0xff] %vm1199_vm3, %v1788_v16  ;;  %2488 = vmatprep.mubr.f32.mxu0 %v2189_v22  ;;  %8072 = vmatprep.subr.bf16.mxu0 %v9959_v21  ;;  %v2878_v22 = vld [vmem:[%s8540_s28 + $0x110] sm:$0xff] }
 0x1f1   : > { %1220 = vst.msk [vmem:[#allocation4 + $0x1e0] sm:$0xff] %vm1199_vm3, %v1144_v13  ;;  %1614 = vrot.lane.b32.xlu0 %v9613_v6, %s8366_s1  ;;  %v2780_v58 = vmax.f32 %v2626_v18, 0.0  ;;  %2489 = vmatmul.mubr.f32.gmra.mrb[38].mxu0 %v2188_v56  ;;  %v2883_v6 = vld [vmem:[#allocation3 + $0x27] sm:$0xff]  ;;  %v1714_v33 = vld [vmem:[#allocation2 + $0x22f] sm:$0xff]  ;;  %v2879_v56 = vld [vmem:[%s8540_s28 + $0x118] sm:$0xff] }
 0x1f2   : > { %970 = vrot.lane.b32.xlu1 %v9529_v38, %s8366_s1  ;;  %v8051_v38 = vpack.c.bf16 %v2863_v5, %v2862_v63  ;;  %2915 = vst.msk [vmem:[#allocation4 + $0x30] sm:$0xff] %vm813_vm1, %v2883_v6  ;;  %v2869_v13 = vld [vmem:[%s8540_s28 + $0xc8] sm:$0xff]  ;;  %v9974_v18 = vpack.c.bf16 %v2879_v56, %v2878_v22  ;;  %8074 = vmatpush3.bf16.msra.mxu0 %v9959_v21 }
 0x1f3   : > { %v1980_v57 = vpop.permute.xlu0 %1979  ;;  %2813 = vst.msk [vmem:[#allocation3 + $0x30] sm:$0xff] %vm813_vm1, %v2780_v58  ;;  %v8060_v16 = vpack.c.bf16 %v2869_v13, %v2868_v42  ;;  %v8063_v58 = vpack.c.bf16 %v2871_v15, %v2870_v47 }
 0x1f4   : > { %v1338_v48 = vpop.permute.xlu1 %1337  ;;  %2055 = vst.msk [vmem:[#allocation4 + $0x1e8] sm:$0xff] %vm1393_vm4, %v1980_v57  ;;  %8052 = vmatpush1.bf16.msra.mxu1 %v8051_v38  ;;  %8076 = vmatprep.subr.bf16.mxu0 %v9974_v18  ;;  %v2873_v38 = vld [vmem:[%s8540_s28 + $0xe8] sm:$0xff] }
 0x1f5   : > { %1414 = vst.msk [vmem:[#allocation4 + $0x1e0] sm:$0xff] %vm1393_vm4, %v1338_v48  ;;  %1807 = vrot.lane.b32.xlu0 %v1713_v53, %s8365_s0  ;;  %8053 = vmatprep.subr.bf16.mxu1 %v8367_v39  ;;  %v2872_v53 = vld [vmem:[%s8540_s28 + $0xe0] sm:$0xff]  ;;  %v2945_v57 = vld [vmem:[#allocation3 + $0x8] sm:$0xff] }
 0x1f6   : > { %1163 = vrot.lane.b32.xlu1 %v9567_v25, %s8365_s0  ;;  %v4192_v25 = vld [vmem:[#allocation3 + $0x229] sm:$0xff]  ;;  %8078 = vmatpush3.bf16.msra.mxu0 %v9974_v18 }
 0x1f7   : > { %v1597_v51 = vpop.permute.xlu0 %1596  ;;  %4224 = vst.msk [vmem:[#allocation4 + $0x2e0] sm:$0xff] %vm813_vm1, %v4192_v25 }
 0x1f8   : > { %v953_v37 = vpop.permute.xlu1 %952  ;;  %1671 = vst.msk [vmem:[#allocation4 + $0x200] sm:$0xff] %vm1006_vm2, %v1597_v51  ;;  %v2405_v52 = vpop.f32.mrb[4].mxu0  ;;  %8055 = vmatpush1.bf16.msra.mxu1 %v8054_v54 }
 0x1f9   : > { %1028 = vst.msk [vmem:[#allocation4 + $0x1f8] sm:$0xff] %vm1006_vm2, %v953_v37  ;;  %1999 = vrot.lane.b32.xlu0 %v1905_v4, %s8368_s2  ;;  %v2406_v34 = vadd.f32 %v9854_v1, %v2405_v52  ;;  %v2407_v28 = vpop.f32.mrb[5].mxu0  ;;  %8056 = vmatprep.subr.bf16.mxu1 %v8367_v39  ;;  %v8066_v37 = vpack.c.bf16 %v2873_v38, %v2872_v53  ;;  %v2875_v52 = vld [vmem:[%s8540_s28 + $0xf8] sm:$0xff] }
 0x1fa   : > { %1357 = vrot.lane.b32.xlu1 %v9836_v62, %s8368_s2  ;;  %v9948_v9 = vld [vmem:[#allocation3 + $0x30] sm:$0xff]  ;;  %v8069_v28 = vpack.c.bf16 %v2875_v52, %v2874_v59 }
 0x1fb   : > { %v1790_v10 = vpop.permute.xlu0 %1789  ;;  %v2192_v32 = vld [vmem:[#allocation4 + $0x1e8] sm:$0xff]  ;;  %v2631_v55 = vadd.f32 %v9657_v12, %v2406_v34  ;;  %3554 = vst.msk [vmem:[#allocation4 + $0x20] sm:$0xff] %vm813_vm1, %v9948_v9  ;;  %v10037_v56 = vld [vmem:[#allocation3 + $0x31] sm:$0xff] }
 0x1fc   : > { %v1146_v29 = vpop.permute.xlu1 %1145  ;;  %v2191_v62 = vld [vmem:[#allocation4 + $0x1e0] sm:$0xff]  ;;  %1864 = vst.msk [vmem:[#allocation4 + $0x200] sm:$0xff] %vm1199_vm3, %v1790_v10  ;;  %2493 = vmatprep.mubr.f32.mxu0 %v2192_v32  ;;  %v2884_v12 = vld [vmem:[#allocation3 + $0x2f] sm:$0xff]  ;;  %8058 = vmatpush1.bf16.msra.mxu1 %v8057_v11  ;;  %v10013_v10 = vpop.f32.mrb[15].mxu1 }
 0x1fd   : > { %1221 = vst.msk [vmem:[#allocation4 + $0x1f8] sm:$0xff] %vm1199_vm3, %v1146_v29  ;;  %1616 = vrot.lane.b32.xlu0 %v9637_v24, %s8366_s1  ;;  %v2781_v3 = vmax.f32 %v2631_v55, 0.0  ;;  %2494 = vmatmul.mubr.f32.gmra.mrb[40].mxu0 %v2191_v62  ;;  %v9993_v51 = vld [vmem:[#allocation3 + $0x29] sm:$0xff]  ;;  %v10072_v52 = vpop.f32.mrb[16].mxu1 }
 0x1fe   : > { %972 = vrot.lane.b32.xlu1 %v9557_v8, %s8366_s1  ;;  %2916 = vst.msk [vmem:[#allocation4 + $0x48] sm:$0xff] %vm813_vm1, %v2884_v12  ;;  %8059 = vmatprep.subr.bf16.mxu1 %v8367_v39  ;;  %v3329_v11 = vld [vmem:[#allocation3 + $0x27] sm:$0xff]  ;;  %v3330_v38 = vld [vmem:[#allocation3 + $0x2f] sm:$0xff] }
 0x1ff   : > { %v1982_v24 = vpop.permute.xlu0 %1981  ;;  %2814 = vst.msk [vmem:[#allocation3 + $0x48] sm:$0xff] %vm813_vm1, %v2781_v3  ;;  %v2946_v3 = vld [vmem:[#allocation3 + $0x10] sm:$0xff] }
 0x200   : > { %v1340_v8 = vpop.permute.xlu1 %1339  ;;  %2056 = vst.msk [vmem:[#allocation4 + $0x200] sm:$0xff] %vm1393_vm4, %v1982_v24  ;;  %8061 = vmatpush1.bf16.msra.mxu1 %v8060_v16 }
 0x201   : > { %1415 = vst.msk [vmem:[#allocation4 + $0x1f8] sm:$0xff] %vm1393_vm4, %v1340_v8  ;;  %1809 = vrot.lane.b32.xlu0 %v1714_v33, %s8365_s0  ;;  %8062 = vmatprep.subr.bf16.mxu1 %v8367_v39 }
 0x202   : > { %1165 = vrot.lane.b32.xlu1 %v9589_v61, %s8365_s0 }
 0x203   : > { %v1599_v5 = vpop.permute.xlu0 %1598 }
 0x204   : > { %v955_v63 = vpop.permute.xlu1 %954  ;;  %1672 = vst.msk [vmem:[#allocation4 + $0x218] sm:$0xff] %vm1006_vm2, %v1599_v5  ;;  %v2410_v61 = vpop.f32.mrb[6].mxu0  ;;  %8064 = vmatpush1.bf16.msra.mxu1 %v8063_v58 }
 0x205   : > { %1029 = vst.msk [vmem:[#allocation4 + $0x210] sm:$0xff] %vm1006_vm2, %v955_v63  ;;  %2001 = vrot.lane.b32.xlu0 %v1906_v26, %s8368_s2  ;;  %v2411_v6 = vadd.f32 %v9854_v1, %v2410_v61  ;;  %v2412_v48 = vpop.f32.mrb[7].mxu0  ;;  %8065 = vmatprep.subr.bf16.mxu1 %v8367_v39  ;;  %v3138_v63 = vld [vmem:[#allocation3 + $0x11] sm:$0xff] }
 0x206   : > { %1359 = vrot.lane.b32.xlu1 %v9878_v2, %s8368_s2  ;;  %v3523_v54 = vld [vmem:[#allocation3 + $0x48] sm:$0xff] }
 0x207   : > { %v1792_v49 = vpop.permute.xlu0 %1791  ;;  %v2195_v4 = vld [vmem:[#allocation4 + $0x200] sm:$0xff]  ;;  %v2636_v2 = vadd.f32 %v9653_v35, %v2411_v6  ;;  %3555 = vst.msk [vmem:[#allocation4 + $0x38] sm:$0xff] %vm813_vm1, %v3523_v54  ;;  %v10020_v0 = vld [vmem:[#allocation3 + $0x48] sm:$0xff] }
 0x208   : > { %v1148_v40 = vpop.permute.xlu1 %1147  ;;  %v2194_v23 = vld [vmem:[#allocation4 + $0x1f8] sm:$0xff]  ;;  %1865 = vst.msk [vmem:[#allocation4 + $0x218] sm:$0xff] %vm1199_vm3, %v1792_v49  ;;  %2498 = vmatprep.mubr.f32.mxu0 %v2195_v4  ;;  %v2885_v25 = vld [vmem:[#allocation3 + $0x47] sm:$0xff]  ;;  %8067 = vmatpush1.bf16.msra.mxu1 %v8066_v37 }
 0x209   : > { %1222 = vst.msk [vmem:[#allocation4 + $0x210] sm:$0xff] %vm1199_vm3, %v1148_v40  ;;  %2499 = vmatmul.mubr.f32.gmra.mrb[42].mxu0 %v2194_v23  ;;  %v2782_v35 = vmax.f32 %v2636_v2, 0.0  ;;  %3649 = vrot.lane.b32.xlu0 %v9993_v51, %s8366_s1  ;;  %v10011_v29 = vld [vmem:[#allocation3 + $0x47] sm:$0xff] }
 0x20a   : > { %3009 = vrot.lane.b32.xlu1 %v2945_v57, %s8366_s1  ;;  %2917 = vst.msk [vmem:[#allocation4 + $0x60] sm:$0xff] %vm813_vm1, %v2885_v25  ;;  %8068 = vmatprep.subr.bf16.mxu1 %v8367_v39 }
 0x20b   : > { %v1984_v34 = vpop.permute.xlu0 %1983  ;;  %2815 = vst.msk [vmem:[#allocation3 + $0x50] sm:$0xff] %vm813_vm1, %v2782_v35 }
 0x20c   : > { %v1342_v27 = vpop.permute.xlu1 %1341  ;;  %2057 = vst.msk [vmem:[#allocation4 + $0x218] sm:$0xff] %vm1393_vm4, %v1984_v34  ;;  %8070 = vmatpush1.bf16.msra.mxu1 %v8069_v28 }
 0x20d   : > { %1416 = vst.msk [vmem:[#allocation4 + $0x210] sm:$0xff] %vm1393_vm4, %v1342_v27  ;;  %3842 = vrot.lane.b32.xlu0 %v10011_v29, %s8365_s0  ;;  %8141 = vmatprep.subr.bf16.mxu1 %v9959_v21 }
 0x20e   : > { %3201 = vrot.lane.b32.xlu1 %v3137_v36, %s8365_s0 }
 0x20f   : > { %v1601_v62 = vpop.permute.xlu0 %1600 }
 0x210   : > { %v957_v32 = vpop.permute.xlu1 %956  ;;  %1673 = vst.msk [vmem:[#allocation4 + $0x230] sm:$0xff] %vm1006_vm2, %v1601_v62  ;;  %v2415_v55 = vpop.f32.mrb[8].mxu0 }
 0x211   : > { %1030 = vst.msk [vmem:[#allocation4 + $0x228] sm:$0xff] %vm1006_vm2, %v957_v32  ;;  %v2416_v50 = vadd.f32 %v9854_v1, %v2415_v55  ;;  %v2417_v12 = vpop.f32.mrb[9].mxu0  ;;  %4034 = vrot.lane.b32.xlu0 %v10020_v0, %s8368_s2 }
 0x212   : > { %3393 = vrot.lane.b32.xlu1 %v3329_v11, %s8368_s2  ;;  %v10026_v33 = vld [vmem:[#allocation3 + $0x49] sm:$0xff]  ;;  %v10028_v42 = vld [vmem:[#allocation3 + $0x51] sm:$0xff] }
 0x213   : > { %v1794_v8 = vpop.permute.xlu0 %1793  ;;  %v2198_v24 = vld [vmem:[#allocation4 + $0x218] sm:$0xff]  ;;  %4194 = vst.msk [vmem:[#allocation4 + $0x10] sm:$0xff] %vm813_vm1, %v10026_v33  ;;  %4195 = vst.msk [vmem:[#allocation4 + $0x28] sm:$0xff] %vm813_vm1, %v10028_v42  ;;  %v2641_v16 = vadd.f32 %v9689_v30, %v2416_v50  ;;  %v3524_v47 = vld [vmem:[#allocation3 + $0x50] sm:$0xff] }
 0x214   : > { %v1150_v13 = vpop.permute.xlu1 %1149  ;;  %1866 = vst.msk [vmem:[#allocation4 + $0x230] sm:$0xff] %vm1199_vm3, %v1794_v8  ;;  %2503 = vmatprep.mubr.f32.mxu0 %v2198_v24  ;;  %v2197_v22 = vld [vmem:[#allocation4 + $0x210] sm:$0xff] }
 0x215   : > { %1223 = vst.msk [vmem:[#allocation4 + $0x228] sm:$0xff] %vm1199_vm3, %v1150_v13  ;;  %2504 = vmatmul.mubr.f32.gmra.mrb[44].mxu0 %v2197_v22  ;;  %v2886_v15 = vld [vmem:[#allocation3 + $0x4f] sm:$0xff]  ;;  %v2783_v26 = vmax.f32 %v2641_v16, 0.0  ;;  %3651 = vrot.lane.b32.xlu0 %v10037_v56, %s8366_s1 }
 0x216   : > { %3011 = vrot.lane.b32.xlu1 %v2946_v3, %s8366_s1  ;;  %3556 = vst.msk [vmem:[#allocation4 + $0x50] sm:$0xff] %vm813_vm1, %v3524_v47  ;;  %2918 = vst.msk [vmem:[#allocation4 + $0x78] sm:$0xff] %vm813_vm1, %v2886_v15  ;;  %v10047_v58 = vld [vmem:[#allocation3 + $0x4f] sm:$0xff] }
 0x217   : > { %v1986_v5 = vpop.permute.xlu0 %1985  ;;  %2816 = vst.msk [vmem:[#allocation3 + $0x68] sm:$0xff] %vm813_vm1, %v2783_v26  ;;  %v10054_v48 = vld [vmem:[#allocation3 + $0x50] sm:$0xff] }
 0x218   : > { %v1344_v30 = vpop.permute.xlu1 %1343  ;;  %2058 = vst.msk [vmem:[#allocation4 + $0x230] sm:$0xff] %vm1393_vm4, %v1986_v5 }
 0x219   : > { %1417 = vst.msk [vmem:[#allocation4 + $0x228] sm:$0xff] %vm1393_vm4, %v1344_v30  ;;  %3844 = vrot.lane.b32.xlu0 %v10047_v58, %s8365_s0 }
 0x21a   : > { %3203 = vrot.lane.b32.xlu1 %v3138_v63, %s8365_s0 }
 0x21b   : > { %v1603_v53 = vpop.permute.xlu0 %1602 }
 0x21c   : > { %v959_v61 = vpop.permute.xlu1 %958  ;;  %1674 = vst.msk [vmem:[#allocation4 + $0x248] sm:$0xff] %vm1006_vm2, %v1603_v53  ;;  %v2420_v6 = vpop.f32.mrb[10].mxu0 }
 0x21d   : > { %1031 = vst.msk [vmem:[#allocation4 + $0x240] sm:$0xff] %vm1006_vm2, %v959_v61  ;;  %v2421_v57 = vadd.f32 %v9854_v1, %v2420_v6  ;;  %v2422_v40 = vpop.f32.mrb[11].mxu0  ;;  %4036 = vrot.lane.b32.xlu0 %v10054_v48, %s8368_s2 }
 0x21e   : > { %3395 = vrot.lane.b32.xlu1 %v3330_v38, %s8368_s2  ;;  %v3525_v54 = vld [vmem:[#allocation3 + $0x68] sm:$0xff] }
 0x21f   : > { %v1796_v4 = vpop.permute.xlu0 %1795  ;;  %v2201_v23 = vld [vmem:[#allocation4 + $0x230] sm:$0xff]  ;;  %v2646_v2 = vadd.f32 %v9685_v60, %v2421_v57  ;;  %v2887_v25 = vld [vmem:[#allocation3 + $0x67] sm:$0xff]  ;;  %3557 = vst.msk [vmem:[#allocation4 + $0x68] sm:$0xff] %vm813_vm1, %v3525_v54 }
 0x220   : > { %v1152_v49 = vpop.permute.xlu1 %1151  ;;  %v2200_v37 = vld [vmem:[#allocation4 + $0x228] sm:$0xff]  ;;  %1867 = vst.msk [vmem:[#allocation4 + $0x248] sm:$0xff] %vm1199_vm3, %v1796_v4  ;;  %2508 = vmatprep.mubr.f32.mxu0 %v2201_v23 }
 0x221   : > { %1224 = vst.msk [vmem:[#allocation4 + $0x240] sm:$0xff] %vm1199_vm3, %v1152_v49  ;;  %2509 = vmatmul.mubr.f32.gmra.mrb[46].mxu0 %v2200_v37  ;;  %v2784_v7 = vmax.f32 %v2646_v2, 0.0  ;;  %3653 = vrot.lane.b32.xlu0 %v10026_v33, %s8366_s1  ;;  %v10074_v35 = vld [vmem:[#allocation3 + $0x67] sm:$0xff] }
 0x222   : > { %3013 = vrot.lane.b32.xlu1 %v9904_v41, %s8366_s1  ;;  %2919 = vst.msk [vmem:[#allocation4 + $0x90] sm:$0xff] %vm813_vm1, %v2887_v25  ;;  %v10078_v41 = vpop.f32.mrb[17].mxu1  ;;  %v10084_v28 = vld [vmem:[#allocation3 + $0x68] sm:$0xff] }
 0x223   : > { %v1988_v59 = vpop.permute.xlu0 %1987  ;;  %2817 = vst.msk [vmem:[#allocation3 + $0x70] sm:$0xff] %vm813_vm1, %v2784_v7 }
 0x224   : > { %v1346_v60 = vpop.permute.xlu1 %1345  ;;  %2059 = vst.msk [vmem:[#allocation4 + $0x248] sm:$0xff] %vm1393_vm4, %v1988_v59 }
 0x225   : > { %1418 = vst.msk [vmem:[#allocation4 + $0x240] sm:$0xff] %vm1393_vm4, %v1346_v60  ;;  %3846 = vrot.lane.b32.xlu0 %v10074_v35, %s8365_s0 }
 0x226   : > { %3205 = vrot.lane.b32.xlu1 %v9993_v51, %s8365_s0 }
 0x227   : > { %v1605_v27 = vpop.permute.xlu0 %1604 }
 0x228   : > { %v961_v36 = vpop.permute.xlu1 %960  ;;  %1675 = vst.msk [vmem:[#allocation4 + $0x260] sm:$0xff] %vm1006_vm2, %v1605_v27  ;;  %v2425_v34 = vpop.f32.mrb[12].mxu0 }
 0x229   : > { %1032 = vst.msk [vmem:[#allocation4 + $0x258] sm:$0xff] %vm1006_vm2, %v961_v36  ;;  %v2426_v32 = vadd.f32 %v9854_v1, %v2425_v34  ;;  %v2427_v51 = vpop.f32.mrb[13].mxu0  ;;  %4038 = vrot.lane.b32.xlu0 %v10084_v28, %s8368_s2 }
 0x22a   : > { %3397 = vrot.lane.b32.xlu1 %v10011_v29, %s8368_s2  ;;  %v10091_v62 = vld [vmem:[#allocation3 + $0x69] sm:$0xff]  ;;  %v10093_v11 = vld [vmem:[#allocation3 + $0x71] sm:$0xff] }
 0x22b   : > { %v1798_v50 = vpop.permute.xlu0 %1797  ;;  %v2204_v12 = vld [vmem:[#allocation4 + $0x248] sm:$0xff]  ;;  %4196 = vst.msk [vmem:[#allocation4 + $0x40] sm:$0xff] %vm813_vm1, %v10091_v62  ;;  %4197 = vst.msk [vmem:[#allocation4 + $0x58] sm:$0xff] %vm813_vm1, %v10093_v11  ;;  %v2651_v29 = vadd.f32 %v9741_v43, %v2426_v32  ;;  %v3526_v13 = vld [vmem:[#allocation3 + $0x70] sm:$0xff] }
 0x22c   : > { %v1154_v55 = vpop.permute.xlu1 %1153  ;;  %1868 = vst.msk [vmem:[#allocation4 + $0x260] sm:$0xff] %vm1199_vm3, %v1798_v50  ;;  %2513 = vmatprep.mubr.f32.mxu0 %v2204_v12  ;;  %v2203_v3 = vld [vmem:[#allocation4 + $0x240] sm:$0xff]  ;;  %v2888_v8 = vld [vmem:[#allocation3 + $0x6f] sm:$0xff] }
 0x22d   : > { %1225 = vst.msk [vmem:[#allocation4 + $0x258] sm:$0xff] %vm1199_vm3, %v1154_v55  ;;  %2514 = vmatmul.mubr.f32.gmra.mrb[48].mxu0 %v2203_v3  ;;  %v2785_v24 = vmax.f32 %v2651_v29, 0.0  ;;  %3655 = vrot.lane.b32.xlu0 %v10028_v42, %s8366_s1  ;;  %v10111_v22 = vld [vmem:[#allocation3 + $0x6f] sm:$0xff] }
 0x22e   : > { %3015 = vrot.lane.b32.xlu1 %v9948_v9, %s8366_s1  ;;  %3558 = vst.msk [vmem:[#allocation4 + $0x80] sm:$0xff] %vm813_vm1, %v3526_v13  ;;  %2920 = vst.msk [vmem:[#allocation4 + $0xa8] sm:$0xff] %vm813_vm1, %v2888_v8  ;;  %v10119_v26 = vld [vmem:[#allocation3 + $0x70] sm:$0xff] }
 0x22f   : > { %v1990_v16 = vpop.permute.xlu0 %1989  ;;  %2818 = vst.msk [vmem:[#allocation3 + $0x88] sm:$0xff] %vm813_vm1, %v2785_v24 }
 0x230   : > { %v1348_v43 = vpop.permute.xlu1 %1347  ;;  %2060 = vst.msk [vmem:[#allocation4 + $0x260] sm:$0xff] %vm1393_vm4, %v1990_v16 }
 0x231   : > { %1419 = vst.msk [vmem:[#allocation4 + $0x258] sm:$0xff] %vm1393_vm4, %v1348_v43  ;;  %3848 = vrot.lane.b32.xlu0 %v10111_v22, %s8365_s0 }
 0x232   : > { %3207 = vrot.lane.b32.xlu1 %v10037_v56, %s8365_s0 }
 0x233   : > { %v1607_v47 = vpop.permute.xlu0 %1606 }
 0x234   : > { %v963_v9 = vpop.permute.xlu1 %962  ;;  %1676 = vst.msk [vmem:[#allocation4 + $0x278] sm:$0xff] %vm1006_vm2, %v1607_v47  ;;  %v2430_v15 = vpop.f32.mrb[14].mxu0 }
 0x235   : > { %1033 = vst.msk [vmem:[#allocation4 + $0x270] sm:$0xff] %vm1006_vm2, %v963_v9  ;;  %v2431_v63 = vadd.f32 %v9854_v1, %v2430_v15  ;;  %v2432_v30 = vpop.f32.mrb[15].mxu0  ;;  %4040 = vrot.lane.b32.xlu0 %v10119_v26, %s8368_s2 }
 0x236   : > { %3399 = vrot.lane.b32.xlu1 %v10047_v58, %s8368_s2  ;;  %v3527_v6 = vld [vmem:[#allocation3 + $0x88] sm:$0xff]  ;;  %v10138_v49 = vpop.f32.mrb[18].mxu1 }
 0x237   : > { %v1800_v5 = vpop.permute.xlu0 %1799  ;;  %v2207_v61 = vld [vmem:[#allocation4 + $0x260] sm:$0xff]  ;;  %v2656_v38 = vadd.f32 %v9735_v44, %v2431_v63  ;;  %3559 = vst.msk [vmem:[#allocation4 + $0x98] sm:$0xff] %vm813_vm1, %v3527_v6  ;;  %v10150_v54 = vld [vmem:[#allocation3 + $0x88] sm:$0xff] }
 0x238   : > { %v1156_v56 = vpop.permute.xlu1 %1155  ;;  %v2206_v53 = vld [vmem:[#allocation4 + $0x258] sm:$0xff]  ;;  %1869 = vst.msk [vmem:[#allocation4 + $0x278] sm:$0xff] %vm1199_vm3, %v1800_v5  ;;  %2518 = vmatprep.mubr.f32.mxu0 %v2207_v61  ;;  %v2889_v57 = vld [vmem:[#allocation3 + $0x87] sm:$0xff] }
 0x239   : > { %1226 = vst.msk [vmem:[#allocation4 + $0x270] sm:$0xff] %vm1199_vm3, %v1156_v56  ;;  %2519 = vmatmul.mubr.f32.gmra.mrb[50].mxu0 %v2206_v53  ;;  %v2786_v58 = vmax.f32 %v2656_v38, 0.0  ;;  %3657 = vrot.lane.b32.xlu0 %v10091_v62, %s8366_s1  ;;  %v10140_v4 = vld [vmem:[#allocation3 + $0x87] sm:$0xff] }
 0x23a   : > { %3017 = vrot.lane.b32.xlu1 %v10020_v0, %s8366_s1  ;;  %2921 = vst.msk [vmem:[#allocation4 + $0xc0] sm:$0xff] %vm813_vm1, %v2889_v57  ;;  %v10144_v0 = vpop.f32.mrb[19].mxu1 }
 0x23b   : > { %v1992_v40 = vpop.permute.xlu0 %1991  ;;  %2819 = vst.msk [vmem:[#allocation3 + $0x90] sm:$0xff] %vm813_vm1, %v2786_v58 }
 0x23c   : > { %v1350_v44 = vpop.permute.xlu1 %1349  ;;  %2061 = vst.msk [vmem:[#allocation4 + $0x278] sm:$0xff] %vm1393_vm4, %v1992_v40 }
 0x23d   : > { %1420 = vst.msk [vmem:[#allocation4 + $0x270] sm:$0xff] %vm1393_vm4, %v1350_v44  ;;  %3850 = vrot.lane.b32.xlu0 %v10140_v4, %s8365_s0 }
 0x23e   : > { %3209 = vrot.lane.b32.xlu1 %v10026_v33, %s8365_s0 }
 0x23f   : > { %v1609_v37 = vpop.permute.xlu0 %1608 }
 0x240   : > { %v965_v23 = vpop.permute.xlu1 %964  ;;  %1677 = vst.msk [vmem:[#allocation4 + $0x290] sm:$0xff] %vm1006_vm2, %v1609_v37  ;;  %v2435_v2 = vpop.f32.mrb[16].mxu0 }
 0x241   : > { %1034 = vst.msk [vmem:[#allocation4 + $0x288] sm:$0xff] %vm1006_vm2, %v965_v23  ;;  %v2436_v25 = vadd.f32 %v9854_v1, %v2435_v2  ;;  %v2437_v33 = vpop.f32.mrb[17].mxu0  ;;  %4042 = vrot.lane.b32.xlu0 %v10150_v54, %s8368_s2 }
 0x242   : > { %3401 = vrot.lane.b32.xlu1 %v10074_v35, %s8368_s2  ;;  %v10157_v7 = vld [vmem:[#allocation3 + $0x89] sm:$0xff]  ;;  %v10159_v60 = vld [vmem:[#allocation3 + $0x91] sm:$0xff] }
 0x243   : > { %v1802_v36 = vpop.permute.xlu0 %1801  ;;  %v2210_v27 = vld [vmem:[#allocation4 + $0x278] sm:$0xff]  ;;  %4198 = vst.msk [vmem:[#allocation4 + $0x70] sm:$0xff] %vm813_vm1, %v10157_v7  ;;  %4199 = vst.msk [vmem:[#allocation4 + $0x88] sm:$0xff] %vm813_vm1, %v10159_v60  ;;  %v2661_v35 = vadd.f32 %v9789_v46, %v2436_v25  ;;  %v3528_v32 = vld [vmem:[#allocation3 + $0x90] sm:$0xff] }
 0x244   : > { %v1158_v59 = vpop.permute.xlu1 %1157  ;;  %1870 = vst.msk [vmem:[#allocation4 + $0x290] sm:$0xff] %vm1199_vm3, %v1802_v36  ;;  %2523 = vmatprep.mubr.f32.mxu0 %v2210_v27  ;;  %v2209_v34 = vld [vmem:[#allocation4 + $0x270] sm:$0xff] }
 0x245   : > { %1227 = vst.msk [vmem:[#allocation4 + $0x288] sm:$0xff] %vm1199_vm3, %v1158_v59  ;;  %2524 = vmatmul.mubr.f32.gmra.mrb[52].mxu0 %v2209_v34  ;;  %v2890_v51 = vld [vmem:[#allocation3 + $0x8f] sm:$0xff]  ;;  %v2787_v55 = vmax.f32 %v2661_v35, 0.0  ;;  %3659 = vrot.lane.b32.xlu0 %v10093_v11, %s8366_s1 }
 0x246   : > { %3019 = vrot.lane.b32.xlu1 %v10054_v48, %s8366_s1  ;;  %3560 = vst.msk [vmem:[#allocation4 + $0xb0] sm:$0xff] %vm813_vm1, %v3528_v32  ;;  %2922 = vst.msk [vmem:[#allocation4 + $0xd8] sm:$0xff] %vm813_vm1, %v2890_v51  ;;  %v10177_v12 = vld [vmem:[#allocation3 + $0x8f] sm:$0xff] }
 0x247   : > { %v1994_v50 = vpop.permute.xlu0 %1993  ;;  %2820 = vst.msk [vmem:[#allocation3 + $0xa8] sm:$0xff] %vm813_vm1, %v2787_v55  ;;  %v10185_v13 = vld [vmem:[#allocation3 + $0x90] sm:$0xff] }
 0x248   : > { %v1352_v46 = vpop.permute.xlu1 %1351  ;;  %2062 = vst.msk [vmem:[#allocation4 + $0x290] sm:$0xff] %vm1393_vm4, %v1994_v50 }
 0x249   : > { %1421 = vst.msk [vmem:[#allocation4 + $0x288] sm:$0xff] %vm1393_vm4, %v1352_v46  ;;  %3852 = vrot.lane.b32.xlu0 %v10177_v12, %s8365_s0 }
 0x24a   : > { %3211 = vrot.lane.b32.xlu1 %v10028_v42, %s8365_s0 }
 0x24b   : > { %v1611_v29 = vpop.permute.xlu0 %1610 }
 0x24c   : > { %v967_v48 = vpop.permute.xlu1 %966  ;;  %1678 = vst.msk [vmem:[#allocation4 + $0x2a8] sm:$0xff] %vm1006_vm2, %v1611_v29  ;;  %v2440_v3 = vpop.f32.mrb[18].mxu0 }
 0x24d   : > { %1035 = vst.msk [vmem:[#allocation4 + $0x2a0] sm:$0xff] %vm1006_vm2, %v967_v48  ;;  %v2441_v8 = vadd.f32 %v9854_v1, %v2440_v3  ;;  %v2442_v24 = vpop.f32.mrb[19].mxu0  ;;  %4044 = vrot.lane.b32.xlu0 %v10185_v13, %s8368_s2 }
 0x24e   : > { %3403 = vrot.lane.b32.xlu1 %v10111_v22, %s8368_s2  ;;  %v3529_v15 = vld [vmem:[#allocation3 + $0xa8] sm:$0xff] }
 0x24f   : > { %v1804_v43 = vpop.permute.xlu0 %1803  ;;  %v2213_v16 = vld [vmem:[#allocation4 + $0x290] sm:$0xff]  ;;  %v2666_v47 = vadd.f32 %v9783_v31, %v2441_v8  ;;  %v2891_v63 = vld [vmem:[#allocation3 + $0xa7] sm:$0xff]  ;;  %3561 = vst.msk [vmem:[#allocation4 + $0xc8] sm:$0xff] %vm813_vm1, %v3529_v15  ;;  %v10204_v56 = vpop.f32.mrb[20].mxu1  ;;  %v10287_v15 = vld [vmem:[%s8526_s14] ss:$0 sm:$0xff] }
 0x250   : > { %v1160_v42 = vpop.permute.xlu1 %1159  ;;  %v2212_v9 = vld [vmem:[#allocation4 + $0x288] sm:$0xff]  ;;  %1871 = vst.msk [vmem:[#allocation4 + $0x2a8] sm:$0xff] %vm1199_vm3, %v1804_v43  ;;  %2528 = vmatprep.mubr.f32.mxu0 %v2213_v16 }
 0x251   : > { %1228 = vst.msk [vmem:[#allocation4 + $0x2a0] sm:$0xff] %vm1199_vm3, %v1160_v42  ;;  %2529 = vmatmul.mubr.f32.gmra.mrb[54].mxu0 %v2212_v9  ;;  %v2788_v22 = vmax.f32 %v2666_v47, 0.0  ;;  %3661 = vrot.lane.b32.xlu0 %v10157_v7, %s8366_s1  ;;  %v10206_v5 = vld [vmem:[#allocation3 + $0xa7] sm:$0xff] }
 0x252   : > { %3021 = vrot.lane.b32.xlu1 %v10084_v28, %s8366_s1  ;;  %2923 = vst.msk [vmem:[#allocation4 + $0xf0] sm:$0xff] %vm813_vm1, %v2891_v63  ;;  %v10210_v28 = vpop.f32.mrb[21].mxu1  ;;  %v10216_v6 = vld [vmem:[#allocation3 + $0xa8] sm:$0xff] }
 0x253   : > { %v1996_v30 = vpop.permute.xlu0 %1995  ;;  %2821 = vst.msk [vmem:[#allocation3 + $0xb0] sm:$0xff] %vm813_vm1, %v2788_v22 }
 0x254   : > { %v1354_v31 = vpop.permute.xlu1 %1353  ;;  %2063 = vst.msk [vmem:[#allocation4 + $0x2a8] sm:$0xff] %vm1393_vm4, %v1996_v30 }
 0x255   : > { %1422 = vst.msk [vmem:[#allocation4 + $0x2a0] sm:$0xff] %vm1393_vm4, %v1354_v31  ;;  %3854 = vrot.lane.b32.xlu0 %v10206_v5, %s8365_s0 }
 0x256   : > { %3213 = vrot.lane.b32.xlu1 %v10091_v62, %s8365_s0 }
 0x257   : > { %v1613_v53 = vpop.permute.xlu0 %1612 }
 0x258   : > { %v969_v61 = vpop.permute.xlu1 %968  ;;  %1679 = vst.msk [vmem:[#allocation4 + $0x2c0] sm:$0xff] %vm1006_vm2, %v1613_v53  ;;  %v2445_v38 = vpop.f32.mrb[20].mxu0 }
 0x259   : > { %1036 = vst.msk [vmem:[#allocation4 + $0x2b8] sm:$0xff] %vm1006_vm2, %v969_v61  ;;  %v2446_v57 = vadd.f32 %v9854_v1, %v2445_v38  ;;  %v2447_v62 = vpop.f32.mrb[21].mxu0  ;;  %4046 = vrot.lane.b32.xlu0 %v10216_v6, %s8368_s2 }
 0x25a   : > { %3405 = vrot.lane.b32.xlu1 %v10140_v4, %s8368_s2  ;;  %v10223_v58 = vld [vmem:[#allocation3 + $0xa9] sm:$0xff]  ;;  %v10225_v44 = vld [vmem:[#allocation3 + $0xb1] sm:$0xff] }
 0x25b   : > { %v1806_v23 = vpop.permute.xlu0 %1805  ;;  %v2216_v37 = vld [vmem:[#allocation4 + $0x2a8] sm:$0xff]  ;;  %4200 = vst.msk [vmem:[#allocation4 + $0xa0] sm:$0xff] %vm813_vm1, %v10223_v58  ;;  %4201 = vst.msk [vmem:[#allocation4 + $0xb8] sm:$0xff] %vm813_vm1, %v10225_v44  ;;  %v2671_v4 = vadd.f32 %v9848_v45, %v2446_v57  ;;  %v3530_v25 = vld [vmem:[#allocation3 + $0xb0] sm:$0xff] }
 0x25c   : > { %v1162_v40 = vpop.permute.xlu1 %1161  ;;  %1872 = vst.msk [vmem:[#allocation4 + $0x2c0] sm:$0xff] %vm1199_vm3, %v1806_v23  ;;  %2533 = vmatprep.mubr.f32.mxu0 %v2216_v37  ;;  %v2215_v2 = vld [vmem:[#allocation4 + $0x2a0] sm:$0xff]  ;;  %v2892_v33 = vld [vmem:[#allocation3 + $0xaf] sm:$0xff] }
 0x25d   : > { %1229 = vst.msk [vmem:[#allocation4 + $0x2b8] sm:$0xff] %vm1199_vm3, %v1162_v40  ;;  %2534 = vmatmul.mubr.f32.gmra.mrb[56].mxu0 %v2215_v2  ;;  %v2789_v59 = vmax.f32 %v2671_v4, 0.0  ;;  %3663 = vrot.lane.b32.xlu0 %v10159_v60, %s8366_s1  ;;  %v10243_v27 = vld [vmem:[#allocation3 + $0xaf] sm:$0xff] }
 0x25e   : > { %3023 = vrot.lane.b32.xlu1 %v10119_v26, %s8366_s1  ;;  %3562 = vst.msk [vmem:[#allocation4 + $0xe0] sm:$0xff] %vm813_vm1, %v3530_v25  ;;  %2924 = vst.msk [vmem:[#allocation4 + $0x108] sm:$0xff] %vm813_vm1, %v2892_v33  ;;  %v10251_v32 = vld [vmem:[#allocation3 + $0xb0] sm:$0xff] }
 0x25f   : > { %v1998_v36 = vpop.permute.xlu0 %1997  ;;  %2822 = vst.msk [vmem:[#allocation3 + $0xc8] sm:$0xff] %vm813_vm1, %v2789_v59 }
 0x260   : > { %v1356_v45 = vpop.permute.xlu1 %1355  ;;  %2064 = vst.msk [vmem:[#allocation4 + $0x2c0] sm:$0xff] %vm1393_vm4, %v1998_v36 }
 0x261   : > { %1423 = vst.msk [vmem:[#allocation4 + $0x2b8] sm:$0xff] %vm1393_vm4, %v1356_v45  ;;  %3856 = vrot.lane.b32.xlu0 %v10243_v27, %s8365_s0 }
 0x262   : > { %3215 = vrot.lane.b32.xlu1 %v10093_v11, %s8365_s0 }
 0x263   : > { %v1615_v35 = vpop.permute.xlu0 %1614 }
 0x264   : > { %v971_v26 = vpop.permute.xlu1 %970  ;;  %1680 = vst.msk [vmem:[#allocation4 + $0x2d8] sm:$0xff] %vm1006_vm2, %v1615_v35  ;;  %v2450_v34 = vpop.f32.mrb[22].mxu0 }
 0x265   : > { %1037 = vst.msk [vmem:[#allocation4 + $0x2d0] sm:$0xff] %vm1006_vm2, %v971_v26  ;;  %v2451_v51 = vadd.f32 %v9854_v1, %v2450_v34  ;;  %v2452_v55 = vpop.f32.mrb[23].mxu0  ;;  %4048 = vrot.lane.b32.xlu0 %v10251_v32, %s8368_s2 }
 0x266   : > { %3407 = vrot.lane.b32.xlu1 %v10177_v12, %s8368_s2  ;;  %v3531_v3 = vld [vmem:[#allocation3 + $0xc8] sm:$0xff] }
 0x267   : > { %v1808_v46 = vpop.permute.xlu0 %1807  ;;  %v2219_v50 = vld [vmem:[#allocation4 + $0x2c0] sm:$0xff]  ;;  %v2676_v29 = vadd.f32 %v9842_v14, %v2451_v51  ;;  %3563 = vst.msk [vmem:[#allocation4 + $0xf8] sm:$0xff] %vm813_vm1, %v3531_v3  ;;  %v10270_v24 = vpop.f32.mrb[22].mxu1  ;;  %v10282_v47 = vld [vmem:[#allocation3 + $0xc8] sm:$0xff] }
 0x268   : > { %v1164_v11 = vpop.permute.xlu1 %1163  ;;  %v2218_v48 = vld [vmem:[#allocation4 + $0x2b8] sm:$0xff]  ;;  %1873 = vst.msk [vmem:[#allocation4 + $0x2d8] sm:$0xff] %vm1199_vm3, %v1808_v46  ;;  %2538 = vmatprep.mubr.f32.mxu0 %v2219_v50  ;;  %v2893_v8 = vld [vmem:[#allocation3 + $0xc7] sm:$0xff]  ;;  %v10276_v42 = vpop.f32.mrb[23].mxu1 }
 0x269   : > { %1230 = vst.msk [vmem:[#allocation4 + $0x2d0] sm:$0xff] %vm1199_vm3, %v1164_v11  ;;  %2539 = vmatmul.mubr.f32.gmra.mrb[58].mxu0 %v2218_v48  ;;  %v2790_v1 = vmax.f32 %v2676_v29, 0.0  ;;  %3665 = vrot.lane.b32.xlu0 %v10223_v58, %s8366_s1  ;;  %v4234_v48 = vld [vmem:[#allocation4 + $0x40] sm:$0xff] }
 0x26a   : > { %3025 = vrot.lane.b32.xlu1 %v10150_v54, %s8366_s1  ;;  %2925 = vst.msk [vmem:[#allocation4 + $0x120] sm:$0xff] %vm813_vm1, %v2893_v8  ;;  %v10272_v54 = vld [vmem:[#allocation3 + $0xc7] sm:$0xff]  ;;  %v4237_v8 = vld [vmem:[#allocation4 + $0x58] sm:$0xff] }
 0x26b   : > { %v2000_v12 = vpop.permute.xlu0 %1999  ;;  %2823 = vst.msk [vmem:[#allocation3 + $0xd0] sm:$0xff] %vm813_vm1, %v2790_v1  ;;  %v10341_v55 = vpop.f32.mrb[24].mxu1 }
 0x26c   : > { %v1358_v14 = vpop.permute.xlu1 %1357  ;;  %2065 = vst.msk [vmem:[#allocation4 + $0x2d8] sm:$0xff] %vm1393_vm4, %v2000_v12  ;;  %v10345_v46 = vpop.f32.mrb[25].mxu1 }
 0x26d   : > { %1424 = vst.msk [vmem:[#allocation4 + $0x2d0] sm:$0xff] %vm1393_vm4, %v1358_v14  ;;  %3858 = vrot.lane.b32.xlu0 %v10272_v54, %s8365_s0 }
 0x26e   : > { %3217 = vrot.lane.b32.xlu1 %v10157_v7, %s8365_s0 }
 0x26f   : > { %v1617_v16 = vpop.permute.xlu0 %1616 }
 0x270   : > { %v973_v43 = vpop.permute.xlu1 %972  ;;  %1681 = vst.msk [vmem:[#allocation4 + $0x2f0] sm:$0xff] %vm1006_vm2, %v1617_v16  ;;  %v2455_v9 = vpop.f32.mrb[24].mxu0 }
 0x271   : > { %1038 = vst.msk [vmem:[#allocation4 + $0x2e8] sm:$0xff] %vm1006_vm2, %v973_v43  ;;  %v2456_v7 = vadd.f32 %v10287_v15, %v2455_v9  ;;  %v2457_v63 = vpop.f32.mrb[25].mxu0  ;;  %4050 = vrot.lane.b32.xlu0 %v10282_v47, %s8368_s2 }
 0x272   : > { %3409 = vrot.lane.b32.xlu1 %v10206_v5, %s8368_s2  ;;  %v10292_v22 = vld [vmem:[#allocation3 + $0xc9] sm:$0xff]  ;;  %v10294_v31 = vld [vmem:[#allocation3 + $0xd1] sm:$0xff] }
 0x273   : > { %v1810_v61 = vpop.permute.xlu0 %1809  ;;  %v2222_v53 = vld [vmem:[#allocation4 + $0x2d8] sm:$0xff]  ;;  %4202 = vst.msk [vmem:[#allocation4 + $0xd0] sm:$0xff] %vm813_vm1, %v10292_v22  ;;  %4203 = vst.msk [vmem:[#allocation4 + $0xe8] sm:$0xff] %vm813_vm1, %v10294_v31  ;;  %v2681_v5 = vadd.f32 %v9927_v19, %v2456_v7  ;;  %v10303_v57 = vld [vmem:[#allocation3 + $0xd0] sm:$0xff] }
 0x274   : > { %v1166_v30 = vpop.permute.xlu1 %1165  ;;  %1874 = vst.msk [vmem:[#allocation4 + $0x2f0] sm:$0xff] %vm1199_vm3, %v1810_v61  ;;  %2543 = vmatprep.mubr.f32.mxu0 %v2222_v53  ;;  %v2221_v38 = vld [vmem:[#allocation4 + $0x2d0] sm:$0xff]  ;;  %v4243_v61 = vld [vmem:[#allocation4 + $0x88] sm:$0xff] }
 0x275   : > { %1231 = vst.msk [vmem:[#allocation4 + $0x2e8] sm:$0xff] %vm1199_vm3, %v1166_v30  ;;  %2544 = vmatmul.mubr.f32.gmra.mrb[60].mxu0 %v2221_v38  ;;  %v2894_v62 = vld [vmem:[#allocation3 + $0xcf] sm:$0xff]  ;;  %v2791_v40 = vmax.f32 %v2681_v5, 0.0  ;;  %3667 = vrot.lane.b32.xlu0 %v10225_v44, %s8366_s1 }
 0x276   : > { %3027 = vrot.lane.b32.xlu1 %v10185_v13, %s8366_s1  ;;  %3564 = vst.msk [vmem:[#allocation4 + $0x110] sm:$0xff] %vm813_vm1, %v10303_v57  ;;  %2926 = vst.msk [vmem:[#allocation4 + $0x138] sm:$0xff] %vm813_vm1, %v2894_v62  ;;  %v10315_v37 = vld [vmem:[#allocation3 + $0xcf] sm:$0xff] }
 0x277   : > { %v2002_v23 = vpop.permute.xlu0 %2001  ;;  %2824 = vst.msk [vmem:[#allocation3 + $0xe8] sm:$0xff] %vm813_vm1, %v2791_v40 }
 0x278   : > { %v1360_v19 = vpop.permute.xlu1 %1359  ;;  %2066 = vst.msk [vmem:[#allocation4 + $0x2f0] sm:$0xff] %vm1393_vm4, %v2002_v23 }
 0x279   : > { %1425 = vst.msk [vmem:[#allocation4 + $0x2e8] sm:$0xff] %vm1393_vm4, %v1360_v19  ;;  %3860 = vrot.lane.b32.xlu0 %v10315_v37, %s8365_s0  ;;  %v4249_v19 = vld [vmem:[#allocation4 + $0xb8] sm:$0xff] }
 0x27a   : > { %3219 = vrot.lane.b32.xlu1 %v10159_v60, %s8365_s0 }
 0x27b   : > { %v3650_v4 = vpop.permute.xlu0 %3649 }
 0x27c   : > { %v3010_v13 = vpop.permute.xlu1 %3009  ;;  %3745 = vst.msk [vmem:[#allocation4 + $0x8] sm:$0xff] %vm1006_vm2, %v3650_v4  ;;  %v2460_v2 = vpop.f32.mrb[26].mxu0 }
 0x27d   : > { %3105 = vst.msk [vmem:[#allocation4] sm:$0xff] %vm1006_vm2, %v3010_v13  ;;  %v2461_v25 = vadd.f32 %v10287_v15, %v2460_v2  ;;  %v2462_v33 = vpop.f32.mrb[27].mxu0  ;;  %4052 = vrot.lane.b32.xlu0 %v10303_v57, %s8368_s2  ;;  %v4252_v13 = vld [vmem:[#allocation4 + $0xd0] sm:$0xff] }
 0x27e   : > { %3411 = vrot.lane.b32.xlu1 %v10243_v27, %s8368_s2  ;;  %v10330_v35 = vld [vmem:[#allocation3 + $0xe8] sm:$0xff]  ;;  %v4228_v27 = vld [vmem:[#allocation4 + $0x10] sm:$0xff] }
 0x27f   : > { %v2225_v59 = vld [vmem:[#allocation4 + $0x2f0] sm:$0xff]  ;;  %v2686_v36 = vadd.f32 %v9922_v20, %v2461_v25  ;;  %v3843_v26 = vpop.permute.xlu0 %3842  ;;  %v2895_v34 = vld [vmem:[#allocation3 + $0xe7] sm:$0xff]  ;;  %3565 = vst.msk [vmem:[#allocation4 + $0x128] sm:$0xff] %vm813_vm1, %v10330_v35 }
 0x280   : > { %v3202_v60 = vpop.permute.xlu1 %3201  ;;  %v2224_v45 = vld [vmem:[#allocation4 + $0x2e8] sm:$0xff]  ;;  %2548 = vmatprep.mubr.f32.mxu0 %v2225_v59  ;;  %3938 = vst.msk [vmem:[#allocation4 + $0x8] sm:$0xff] %vm1199_vm3, %v3843_v26 }
 0x281   : > { %3297 = vst.msk [vmem:[#allocation4] sm:$0xff] %vm1199_vm3, %v3202_v60  ;;  %2549 = vmatmul.mubr.f32.gmra.mrb[62].mxu0 %v2224_v45  ;;  %v2792_v20 = vmax.f32 %v2686_v36, 0.0  ;;  %3669 = vrot.lane.b32.xlu0 %v10292_v22, %s8366_s1  ;;  %v10349_v50 = vld [vmem:[#allocation3 + $0xe7] sm:$0xff] }
 0x282   : > { %3029 = vrot.lane.b32.xlu1 %v10216_v6, %s8366_s1  ;;  %2927 = vst.msk [vmem:[#allocation4 + $0x150] sm:$0xff] %vm813_vm1, %v2895_v34  ;;  %7847 = vmatprep.mubr.msk.f32.mxu0 %vm813_vm1, %v4228_v27  ;;  %v4231_v6 = vld [vmem:[#allocation4 + $0x28] sm:$0xff] }
 0x283   : > { %2825 = vst.msk [vmem:[#allocation3 + $0xf0] sm:$0xff] %vm813_vm1, %v2792_v20  ;;  %v4035_v11 = vpop.permute.xlu0 %4034  ;;  %v10424_v20 = vpop.f32.mrb[26].mxu1 }
 0x284   : > { %v3394_v51 = vpop.permute.xlu1 %3393  ;;  %4130 = vst.msk [vmem:[#allocation4 + $0x8] sm:$0xff] %vm1393_vm4, %v4035_v11  ;;  %v10428_v11 = vpop.f32.mrb[27].mxu1 }
 0x285   : > { %3489 = vst.msk [vmem:[#allocation4] sm:$0xff] %vm1393_vm4, %v3394_v51  ;;  %7848 = vmatmul.mubr.msk.f32.vlgmr.msra.gmra.mrb[64].mxu0 %vm813_vm1, %v4231_v6  ;;  %3862 = vrot.lane.b32.xlu0 %v10349_v50, %s8365_s0 }
 0x286   : > { %3221 = vrot.lane.b32.xlu1 %v10223_v58, %s8365_s0  ;;  %7850 = vmatprep.mubr.msk.f32.mxu0 %vm813_vm1, %v4234_v48  ;;  %v4240_v58 = vld [vmem:[#allocation4 + $0x70] sm:$0xff] }
 0x287   : > { %v3652_v3 = vpop.permute.xlu0 %3651 }
 0x288   : > { %v3012_v29 = vpop.permute.xlu1 %3011  ;;  %3746 = vst.msk [vmem:[#allocation4 + $0x20] sm:$0xff] %vm1006_vm2, %v3652_v3  ;;  %v2465_v1 = vpop.f32.mrb[28].mxu0 }
 0x289   : > { %3106 = vst.msk [vmem:[#allocation4 + $0x18] sm:$0xff] %vm1006_vm2, %v3012_v29  ;;  %7851 = vmatmul.mubr.msk.f32.gmra.mrb[66].mxu0 %vm813_vm1, %v4237_v8  ;;  %v2466_v14 = vadd.f32 %v10287_v15, %v2465_v1  ;;  %v2467_v12 = vpop.f32.mrb[29].mxu0  ;;  %4054 = vrot.lane.b32.xlu0 %v10330_v35, %s8368_s2 }
 0x28a   : > { %3413 = vrot.lane.b32.xlu1 %v10272_v54, %s8368_s2  ;;  %7853 = vmatprep.mubr.msk.f32.mxu0 %vm813_vm1, %v4240_v58  ;;  %v10365_v43 = vld [vmem:[#allocation3 + $0xe9] sm:$0xff]  ;;  %v10367_v16 = vld [vmem:[#allocation3 + $0xf1] sm:$0xff] }
 0x28b   : > { %4204 = vst.msk [vmem:[#allocation4 + $0x100] sm:$0xff] %vm813_vm1, %v10365_v43  ;;  %4205 = vst.msk [vmem:[#allocation4 + $0x118] sm:$0xff] %vm813_vm1, %v10367_v16  ;;  %v2691_v54 = vadd.f32 %v10013_v10, %v2466_v14  ;;  %v3845_v63 = vpop.permute.xlu0 %3844  ;;  %v4227_v30 = vld [vmem:[#allocation4 + $0x8] sm:$0xff]  ;;  %v10375_v53 = vld [vmem:[#allocation3 + $0xf0] sm:$0xff] }
 0x28c   : > { %v3204_v9 = vpop.permute.xlu1 %3203  ;;  %v4226_v7 = vld [vmem:[#allocation4] sm:$0xff]  ;;  %3939 = vst.msk [vmem:[#allocation4 + $0x20] sm:$0xff] %vm1199_vm3, %v3845_v63  ;;  %4488 = vmatprep.mubr.f32.mxu1 %v4227_v30  ;;  %v2896_v5 = vld [vmem:[#allocation3 + $0xef] sm:$0xff] }
 0x28d   : > { %3298 = vst.msk [vmem:[#allocation4 + $0x18] sm:$0xff] %vm1199_vm3, %v3204_v9  ;;  %7854 = vmatmul.mubr.msk.f32.gmra.mrb[68].mxu0 %vm813_vm1, %v4243_v61  ;;  %v2793_v38 = vmax.f32 %v2691_v54, 0.0  ;;  %3671 = vrot.lane.b32.xlu0 %v10294_v31, %s8366_s1  ;;  %v4246_v10 = vld [vmem:[#allocation4 + $0xa0] sm:$0xff]  ;;  %v10392_v23 = vld [vmem:[#allocation3 + $0xef] sm:$0xff] }
 0x28e   : > { %3566 = vst.msk [vmem:[#allocation4 + $0x140] sm:$0xff] %vm813_vm1, %v10375_v53  ;;  %4489 = vmatmul.mubr.f32.vlgmr.msra.gmra.mrb[32].mxu1 %v4226_v7  ;;  %2928 = vst.msk [vmem:[#allocation4 + $0x168] sm:$0xff] %vm813_vm1, %v2896_v5  ;;  %3031 = vrot.lane.b32.xlu1 %v10251_v32, %s8366_s1 }
 0x28f   : > { %7856 = vmatprep.mubr.msk.f32.mxu0 %vm813_vm1, %v4246_v10  ;;  %2826 = vst.msk [vmem:[#allocation3 + $0x108] sm:$0xff] %vm813_vm1, %v2793_v38  ;;  %v4037_v40 = vpop.permute.xlu0 %4036  ;;  %8143 = vmatpush3.bf16.msra.mxu1 %v9959_v21  ;;  %v4255_v21 = vld [vmem:[#allocation4 + $0xe8] sm:$0xff] }
 0x290   : > { %v3396_v62 = vpop.permute.xlu1 %3395  ;;  %4131 = vst.msk [vmem:[#allocation4 + $0x20] sm:$0xff] %vm1393_vm4, %v4037_v40  ;;  %8142 = vmatprep.subr.bf16.mxu1 %v9974_v18 }
 0x291   : > { %3490 = vst.msk [vmem:[#allocation4 + $0x18] sm:$0xff] %vm1393_vm4, %v3396_v62  ;;  %7857 = vmatmul.mubr.msk.f32.gmra.mrb[70].mxu0 %vm813_vm1, %v4249_v19  ;;  %3864 = vrot.lane.b32.xlu0 %v10392_v23, %s8365_s0 }
 0x292   : > { %7859 = vmatprep.mubr.msk.f32.mxu0 %vm813_vm1, %v4252_v13  ;;  %3223 = vrot.lane.b32.xlu1 %v10225_v44, %s8365_s0  ;;  %v4258_v25 = vld [vmem:[#allocation4 + $0x100] sm:$0xff]  ;;  %v4261_v34 = vld [vmem:[#allocation4 + $0x118] sm:$0xff] }
 0x293   : > { %v3654_v4 = vpop.permute.xlu0 %3653  ;;  %8144 = vmatpush3.bf16.msra.mxu1 %v9974_v18 }
 0x294   : > { %v3014_v32 = vpop.permute.xlu1 %3013  ;;  %3747 = vst.msk [vmem:[#allocation4 + $0x38] sm:$0xff] %vm1006_vm2, %v3654_v4  ;;  %v2470_v2 = vpop.f32.mrb[30].mxu0  ;;  %8079 = vmatprep.subr.bf16.mxu1 %v8367_v39 }
 0x295   : > { %3107 = vst.msk [vmem:[#allocation4 + $0x30] sm:$0xff] %vm1006_vm2, %v3014_v32  ;;  %7860 = vmatmul.mubr.msk.f32.gmra.mrb[72].mxu0 %vm813_vm1, %v4255_v21  ;;  %v2471_v33 = vadd.f32 %v10287_v15, %v2470_v2  ;;  %v2472_v60 = vpop.f32.mrb[31].mxu0  ;;  %4056 = vrot.lane.b32.xlu0 %v10375_v53, %s8368_s2 }
 0x296   : > { %7862 = vmatprep.mubr.msk.f32.mxu0 %vm813_vm1, %v4258_v25  ;;  %3415 = vrot.lane.b32.xlu1 %v10315_v37, %s8368_s2  ;;  %v10411_v59 = vld [vmem:[#allocation3 + $0x108] sm:$0xff] }
 0x297   : > { %v2696_v45 = vadd.f32 %v10007_v17, %v2471_v33  ;;  %v3847_v36 = vpop.permute.xlu0 %3846  ;;  %v4230_v26 = vld [vmem:[#allocation4 + $0x20] sm:$0xff]  ;;  %3567 = vst.msk [vmem:[#allocation4 + $0x158] sm:$0xff] %vm813_vm1, %v10411_v59 }
 0x298   : > { %v3206_v18 = vpop.permute.xlu1 %3205  ;;  %v4229_v44 = vld [vmem:[#allocation4 + $0x18] sm:$0xff]  ;;  %v2897_v27 = vld [vmem:[#allocation3 + $0x107] sm:$0xff]  ;;  %3940 = vst.msk [vmem:[#allocation4 + $0x38] sm:$0xff] %vm1199_vm3, %v3847_v36  ;;  %4493 = vmatprep.mubr.f32.mxu1 %v4230_v26 }
 0x299   : > { %3299 = vst.msk [vmem:[#allocation4 + $0x30] sm:$0xff] %vm1199_vm3, %v3206_v18  ;;  %7863 = vmatmul.mubr.msk.f32.gmra.mrb[74].mxu0 %vm813_vm1, %v4261_v34  ;;  %v2794_v37 = vmax.f32 %v2696_v45, 0.0  ;;  %3673 = vrot.lane.b32.xlu0 %v10365_v43, %s8366_s1  ;;  %v10431_v6 = vld [vmem:[#allocation3 + $0x107] sm:$0xff] }
 0x29a   : > { %2929 = vst.msk [vmem:[#allocation4 + $0x180] sm:$0xff] %vm813_vm1, %v2897_v27  ;;  %4494 = vmatmul.mubr.f32.gmra.mrb[34].mxu1 %v4229_v44  ;;  %3033 = vrot.lane.b32.xlu1 %v10282_v47, %s8366_s1 }
 0x29b   : > { %2827 = vst.msk [vmem:[#allocation3 + $0x110] sm:$0xff] %vm813_vm1, %v2794_v37  ;;  %v4039_v51 = vpop.permute.xlu0 %4038 }
 0x29c   : > { %v3398_v17 = vpop.permute.xlu1 %3397  ;;  %4132 = vst.msk [vmem:[#allocation4 + $0x38] sm:$0xff] %vm1393_vm4, %v4039_v51 }
 0x29d   : > { %3491 = vst.msk [vmem:[#allocation4 + $0x30] sm:$0xff] %vm1393_vm4, %v3398_v17  ;;  %3866 = vrot.lane.b32.xlu0 %v10431_v6, %s8365_s0 }
 0x29e   : > { %3225 = vrot.lane.b32.xlu1 %v10292_v22, %s8365_s0 }
 0x29f   : > { %v3656_v48 = vpop.permute.xlu0 %3655 }
 0x2a0   : > { %v3016_v47 = vpop.permute.xlu1 %3015  ;;  %3748 = vst.msk [vmem:[#allocation4 + $0x50] sm:$0xff] %vm1006_vm2, %v3656_v48  ;;  %v2475_v29 = vpop.f32.mrb[32].mxu0 }
 0x2a1   : > { %3108 = vst.msk [vmem:[#allocation4 + $0x48] sm:$0xff] %vm1006_vm2, %v3016_v47  ;;  %v2476_v3 = vadd.f32 %v10287_v15, %v2475_v29  ;;  %v2477_v8 = vpop.f32.mrb[33].mxu0  ;;  %4058 = vrot.lane.b32.xlu0 %v10411_v59, %s8368_s2 }
 0x2a2   : > { %v10442_v1 = vld [vmem:[#allocation3 + $0x109] sm:$0xff]  ;;  %v10444_v58 = vld [vmem:[#allocation3 + $0x111] sm:$0xff]  ;;  %3417 = vrot.lane.b32.xlu1 %v10349_v50, %s8368_s2 }
 0x2a3   : > { %4206 = vst.msk [vmem:[#allocation4 + $0x130] sm:$0xff] %vm813_vm1, %v10442_v1  ;;  %4207 = vst.msk [vmem:[#allocation4 + $0x148] sm:$0xff] %vm813_vm1, %v10444_v58  ;;  %v2701_v12 = vadd.f32 %v10078_v41, %v2476_v3  ;;  %v3849_v9 = vpop.permute.xlu0 %3848  ;;  %v4233_v7 = vld [vmem:[#allocation4 + $0x38] sm:$0xff]  ;;  %v10454_v54 = vld [vmem:[#allocation3 + $0x110] sm:$0xff] }
 0x2a4   : > { %v3208_v22 = vpop.permute.xlu1 %3207  ;;  %v4232_v14 = vld [vmem:[#allocation4 + $0x30] sm:$0xff]  ;;  %3941 = vst.msk [vmem:[#allocation4 + $0x50] sm:$0xff] %vm1199_vm3, %v3849_v9  ;;  %4498 = vmatprep.mubr.f32.mxu1 %v4233_v7 }
 0x2a5   : > { %3300 = vst.msk [vmem:[#allocation4 + $0x48] sm:$0xff] %vm1199_vm3, %v3208_v22  ;;  %v2898_v50 = vld [vmem:[#allocation3 + $0x10f] sm:$0xff]  ;;  %v2795_v63 = vmax.f32 %v2701_v12, 0.0  ;;  %3675 = vrot.lane.b32.xlu0 %v10367_v16, %s8366_s1  ;;  %4499 = vmatmul.mubr.f32.gmra.mrb[36].mxu1 %v4232_v14 }
 0x2a6   : > { %3568 = vst.msk [vmem:[#allocation4 + $0x170] sm:$0xff] %vm813_vm1, %v10454_v54  ;;  %2930 = vst.msk [vmem:[#allocation4 + $0x198] sm:$0xff] %vm813_vm1, %v2898_v50  ;;  %3035 = vrot.lane.b32.xlu1 %v10303_v57, %s8366_s1  ;;  %v10467_v61 = vld [vmem:[#allocation3 + $0x10f] sm:$0xff] }
 0x2a7   : > { %2828 = vst.msk [vmem:[#allocation3 + $0x128] sm:$0xff] %vm813_vm1, %v2795_v63  ;;  %v4041_v30 = vpop.permute.xlu0 %4040 }
 0x2a8   : > { %v3400_v41 = vpop.permute.xlu1 %3399  ;;  %4133 = vst.msk [vmem:[#allocation4 + $0x50] sm:$0xff] %vm1393_vm4, %v4041_v30 }
 0x2a9   : > { %3492 = vst.msk [vmem:[#allocation4 + $0x48] sm:$0xff] %vm1393_vm4, %v3400_v41  ;;  %3868 = vrot.lane.b32.xlu0 %v10467_v61, %s8365_s0 }
 0x2aa   : > { %3227 = vrot.lane.b32.xlu1 %v10294_v31, %s8365_s0  ;;  %v4264_v5 = vld [vmem:[#allocation4 + $0x130] sm:$0xff]  ;;  %v4267_v10 = vld [vmem:[#allocation4 + $0x148] sm:$0xff] }
 0x2ab   : > { %7865 = vmatprep.mubr.msk.f32.mxu0 %vm813_vm1, %v4264_v5  ;;  %v3658_v57 = vpop.permute.xlu0 %3657 }
 0x2ac   : > { %v3018_v38 = vpop.permute.xlu1 %3017  ;;  %3749 = vst.msk [vmem:[#allocation4 + $0x68] sm:$0xff] %vm1006_vm2, %v3658_v57  ;;  %v2480_v62 = vpop.f32.mrb[34].mxu0  ;;  %7866 = vmatmul.mubr.msk.f32.gmra.mrb[76].mxu0 %vm813_vm1, %v4267_v10 }
 0x2ad   : > { %3109 = vst.msk [vmem:[#allocation4 + $0x60] sm:$0xff] %vm1006_vm2, %v3018_v38  ;;  %v2481_v40 = vadd.f32 %v10287_v15, %v2480_v62  ;;  %v2482_v19 = vpop.f32.mrb[35].mxu0  ;;  %4060 = vrot.lane.b32.xlu0 %v10454_v54, %s8368_s2 }
 0x2ae   : > { %3419 = vrot.lane.b32.xlu1 %v10392_v23, %s8368_s2  ;;  %v10482_v32 = vld [vmem:[#allocation3 + $0x128] sm:$0xff] }
 0x2af   : > { %v2706_v4 = vadd.f32 %v10072_v52, %v2481_v40  ;;  %v3851_v21 = vpop.permute.xlu0 %3850  ;;  %v4236_v2 = vld [vmem:[#allocation4 + $0x50] sm:$0xff]  ;;  %3569 = vst.msk [vmem:[#allocation4 + $0x188] sm:$0xff] %vm813_vm1, %v10482_v32  ;;  %v2899_v25 = vld [vmem:[#allocation3 + $0x127] sm:$0xff] }
 0x2b0   : > { %v3210_v31 = vpop.permute.xlu1 %3209  ;;  %v4235_v13 = vld [vmem:[#allocation4 + $0x48] sm:$0xff]  ;;  %3942 = vst.msk [vmem:[#allocation4 + $0x68] sm:$0xff] %vm1199_vm3, %v3851_v21  ;;  %4503 = vmatprep.mubr.f32.mxu1 %v4236_v2 }
 0x2b1   : > { %3301 = vst.msk [vmem:[#allocation4 + $0x60] sm:$0xff] %vm1199_vm3, %v3210_v31  ;;  %v2796_v23 = vmax.f32 %v2706_v4, 0.0  ;;  %3677 = vrot.lane.b32.xlu0 %v10442_v1, %s8366_s1  ;;  %4504 = vmatmul.mubr.f32.gmra.mrb[38].mxu1 %v4235_v13  ;;  %v10501_v44 = vld [vmem:[#allocation3 + $0x127] sm:$0xff] }
 0x2b2   : > { %2931 = vst.msk [vmem:[#allocation4 + $0x1b0] sm:$0xff] %vm813_vm1, %v2899_v25  ;;  %3037 = vrot.lane.b32.xlu1 %v10330_v35, %s8366_s1  ;;  %v10494_v33 = vpop.f32.mrb[28].mxu1 }
 0x2b3   : > { %2829 = vst.msk [vmem:[#allocation3 + $0x130] sm:$0xff] %vm813_vm1, %v2796_v23  ;;  %v4043_v60 = vpop.permute.xlu0 %4042  ;;  %v10498_v18 = vpop.f32.mrb[29].mxu1 }
 0x2b4   : > { %v3402_v52 = vpop.permute.xlu1 %3401  ;;  %4134 = vst.msk [vmem:[#allocation4 + $0x68] sm:$0xff] %vm1393_vm4, %v4043_v60 }
 0x2b5   : > { %3493 = vst.msk [vmem:[#allocation4 + $0x60] sm:$0xff] %vm1393_vm4, %v3402_v52  ;;  %3870 = vrot.lane.b32.xlu0 %v10501_v44, %s8365_s0 }
 0x2b6   : > { %3229 = vrot.lane.b32.xlu1 %v10365_v43, %s8365_s0 }
 0x2b7   : > { %v3660_v45 = vpop.permute.xlu0 %3659 }
 0x2b8   : > { %v3020_v35 = vpop.permute.xlu1 %3019  ;;  %3750 = vst.msk [vmem:[#allocation4 + $0x80] sm:$0xff] %vm1006_vm2, %v3660_v45  ;;  %v2485_v36 = vpop.f32.mrb[36].mxu0 }
 0x2b9   : > { %3110 = vst.msk [vmem:[#allocation4 + $0x78] sm:$0xff] %vm1006_vm2, %v3020_v35  ;;  %v2486_v26 = vadd.f32 %v10287_v15, %v2485_v36  ;;  %v2487_v34 = vpop.f32.mrb[37].mxu0  ;;  %4062 = vrot.lane.b32.xlu0 %v10482_v32, %s8368_s2 }
 0x2ba   : > { %v10512_v27 = vld [vmem:[#allocation3 + $0x129] sm:$0xff]  ;;  %v10514_v37 = vld [vmem:[#allocation3 + $0x131] sm:$0xff]  ;;  %3421 = vrot.lane.b32.xlu1 %v10431_v6, %s8368_s2 }
 0x2bb   : > { %4208 = vst.msk [vmem:[#allocation4 + $0x160] sm:$0xff] %vm813_vm1, %v10512_v27  ;;  %4209 = vst.msk [vmem:[#allocation4 + $0x178] sm:$0xff] %vm813_vm1, %v10514_v37  ;;  %v2711_v51 = vadd.f32 %v10144_v0, %v2486_v26  ;;  %v3853_v47 = vpop.permute.xlu0 %3852  ;;  %v4239_v48 = vld [vmem:[#allocation4 + $0x68] sm:$0xff]  ;;  %v10524_v29 = vld [vmem:[#allocation3 + $0x130] sm:$0xff]  ;;  %v10569_v19 = vpop.f32.mrb[30].mxu1 }
 0x2bc   : > { %v3212_v43 = vpop.permute.xlu1 %3211  ;;  %v4238_v17 = vld [vmem:[#allocation4 + $0x60] sm:$0xff]  ;;  %3943 = vst.msk [vmem:[#allocation4 + $0x80] sm:$0xff] %vm1199_vm3, %v3853_v47  ;;  %4508 = vmatprep.mubr.f32.mxu1 %v4239_v48  ;;  %v2900_v6 = vld [vmem:[#allocation3 + $0x12f] sm:$0xff]  ;;  %v10573_v31 = vpop.f32.mrb[31].mxu1 }
 0x2bd   : > { %3302 = vst.msk [vmem:[#allocation4 + $0x78] sm:$0xff] %vm1199_vm3, %v3212_v43  ;;  %v2797_v3 = vmax.f32 %v2711_v51, 0.0  ;;  %3679 = vrot.lane.b32.xlu0 %v10444_v58, %s8366_s1  ;;  %4509 = vmatmul.mubr.f32.gmra.mrb[40].mxu1 %v4238_v17  ;;  %v10537_v22 = vld [vmem:[#allocation3 + $0x12f] sm:$0xff] }
 0x2be   : > { %3570 = vst.msk [vmem:[#allocation4 + $0x1a0] sm:$0xff] %vm813_vm1, %v10524_v29  ;;  %2932 = vst.msk [vmem:[#allocation4 + $0x1c8] sm:$0xff] %vm813_vm1, %v2900_v6  ;;  %3039 = vrot.lane.b32.xlu1 %v10375_v53, %s8366_s1 }
 0x2bf   : > { %2830 = vst.msk [vmem:[#allocation3 + $0x148] sm:$0xff] %vm813_vm1, %v2797_v3  ;;  %v4045_v8 = vpop.permute.xlu0 %4044 }
 0x2c0   : > { %v3404_v0 = vpop.permute.xlu1 %3403  ;;  %4135 = vst.msk [vmem:[#allocation4 + $0x80] sm:$0xff] %vm1393_vm4, %v4045_v8 }
 0x2c1   : > { %3494 = vst.msk [vmem:[#allocation4 + $0x78] sm:$0xff] %vm1393_vm4, %v3404_v0  ;;  %3872 = vrot.lane.b32.xlu0 %v10537_v22, %s8365_s0 }
 0x2c2   : > { %3231 = vrot.lane.b32.xlu1 %v10367_v16, %s8365_s0  ;;  %v4270_v14 = vld [vmem:[#allocation4 + $0x160] sm:$0xff]  ;;  %v4273_v9 = vld [vmem:[#allocation4 + $0x178] sm:$0xff] }
 0x2c3   : > { %7868 = vmatprep.mubr.msk.f32.mxu0 %vm813_vm1, %v4270_v14  ;;  %v3662_v53 = vpop.permute.xlu0 %3661 }
 0x2c4   : > { %v3022_v12 = vpop.permute.xlu1 %3021  ;;  %3751 = vst.msk [vmem:[#allocation4 + $0x98] sm:$0xff] %vm1006_vm2, %v3662_v53  ;;  %v2490_v7 = vpop.f32.mrb[38].mxu0  ;;  %7869 = vmatmul.mubr.msk.f32.gmra.mrb[78].mxu0 %vm813_vm1, %v4273_v9 }
 0x2c5   : > { %3111 = vst.msk [vmem:[#allocation4 + $0x90] sm:$0xff] %vm1006_vm2, %v3022_v12  ;;  %v2491_v50 = vadd.f32 %v10287_v15, %v2490_v7  ;;  %v2492_v63 = vpop.f32.mrb[39].mxu0  ;;  %4064 = vrot.lane.b32.xlu0 %v10524_v29, %s8368_s2 }
 0x2c6   : > { %3423 = vrot.lane.b32.xlu1 %v10467_v61, %s8368_s2  ;;  %v10552_v30 = vld [vmem:[#allocation3 + $0x148] sm:$0xff] }
 0x2c7   : > { %v2716_v5 = vadd.f32 %v10138_v49, %v2491_v50  ;;  %v3855_v38 = vpop.permute.xlu0 %3854  ;;  %v4242_v10 = vld [vmem:[#allocation4 + $0x80] sm:$0xff]  ;;  %3571 = vst.msk [vmem:[#allocation4 + $0x1b8] sm:$0xff] %vm813_vm1, %v10552_v30 }
 0x2c8   : > { %v3214_v16 = vpop.permute.xlu1 %3213  ;;  %v4241_v41 = vld [vmem:[#allocation4 + $0x78] sm:$0xff]  ;;  %v2901_v57 = vld [vmem:[#allocation3 + $0x147] sm:$0xff]  ;;  %3944 = vst.msk [vmem:[#allocation4 + $0x98] sm:$0xff] %vm1199_vm3, %v3855_v38  ;;  %4513 = vmatprep.mubr.f32.mxu1 %v4242_v10 }
 0x2c9   : > { %3303 = vst.msk [vmem:[#allocation4 + $0x90] sm:$0xff] %vm1199_vm3, %v3214_v16  ;;  %v2798_v61 = vmax.f32 %v2716_v5, 0.0  ;;  %3681 = vrot.lane.b32.xlu0 %v10512_v27, %s8366_s1  ;;  %4514 = vmatmul.mubr.f32.gmra.mrb[42].mxu1 %v4241_v41  ;;  %v10567_v40 = vld [vmem:[#allocation3 + $0x147] sm:$0xff] }
 0x2ca   : > { %2933 = vst.msk [vmem:[#allocation4 + $0x1e0] sm:$0xff] %vm813_vm1, %v2901_v57  ;;  %3041 = vrot.lane.b32.xlu1 %v10411_v59, %s8366_s1 }
 0x2cb   : > { %2831 = vst.msk [vmem:[#allocation3 + $0x150] sm:$0xff] %vm813_vm1, %v2798_v61  ;;  %v4047_v62 = vpop.permute.xlu0 %4046 }
 0x2cc   : > { %v3406_v49 = vpop.permute.xlu1 %3405  ;;  %4136 = vst.msk [vmem:[#allocation4 + $0x98] sm:$0xff] %vm1393_vm4, %v4047_v62 }
 0x2cd   : > { %3495 = vst.msk [vmem:[#allocation4 + $0x90] sm:$0xff] %vm1393_vm4, %v3406_v49  ;;  %3874 = vrot.lane.b32.xlu0 %v10567_v40, %s8365_s0 }
 0x2ce   : > { %3233 = vrot.lane.b32.xlu1 %v10442_v1, %s8365_s0 }
 0x2cf   : > { %v3664_v13 = vpop.permute.xlu0 %3663 }
 0x2d0   : > { %v3024_v59 = vpop.permute.xlu1 %3023  ;;  %3752 = vst.msk [vmem:[#allocation4 + $0xb0] sm:$0xff] %vm1006_vm2, %v3664_v13  ;;  %v2495_v4 = vpop.f32.mrb[40].mxu0 }
 0x2d1   : > { %3112 = vst.msk [vmem:[#allocation4 + $0xa8] sm:$0xff] %vm1006_vm2, %v3024_v59  ;;  %v2496_v21 = vadd.f32 %v10287_v15, %v2495_v4  ;;  %v2497_v2 = vpop.f32.mrb[41].mxu0  ;;  %4066 = vrot.lane.b32.xlu0 %v10552_v30, %s8368_s2 }
 0x2d2   : > { %v10582_v25 = vld [vmem:[#allocation3 + $0x149] sm:$0xff]  ;;  %v10584_v23 = vld [vmem:[#allocation3 + $0x151] sm:$0xff]  ;;  %3425 = vrot.lane.b32.xlu1 %v10501_v44, %s8368_s2 }
 0x2d3   : > { %4210 = vst.msk [vmem:[#allocation4 + $0x190] sm:$0xff] %vm813_vm1, %v10582_v25  ;;  %4211 = vst.msk [vmem:[#allocation4 + $0x1a8] sm:$0xff] %vm813_vm1, %v10584_v23  ;;  %v2721_v60 = vadd.f32 %v10210_v28, %v2496_v21  ;;  %v3857_v35 = vpop.permute.xlu0 %3856  ;;  %v4245_v45 = vld [vmem:[#allocation4 + $0x98] sm:$0xff]  ;;  %v10594_v36 = vld [vmem:[#allocation3 + $0x150] sm:$0xff] }
 0x2d4   : > { %v3216_v1 = vpop.permute.xlu1 %3215  ;;  %v4244_v52 = vld [vmem:[#allocation4 + $0x90] sm:$0xff]  ;;  %3945 = vst.msk [vmem:[#allocation4 + $0xb0] sm:$0xff] %vm1199_vm3, %v3857_v35  ;;  %4518 = vmatprep.mubr.f32.mxu1 %v4245_v45 }
 0x2d5   : > { %3304 = vst.msk [vmem:[#allocation4 + $0xa8] sm:$0xff] %vm1199_vm3, %v3216_v1  ;;  %v2902_v44 = vld [vmem:[#allocation3 + $0x14f] sm:$0xff]  ;;  %v2799_v26 = vmax.f32 %v2721_v60, 0.0  ;;  %3683 = vrot.lane.b32.xlu0 %v10514_v37, %s8366_s1  ;;  %4519 = vmatmul.mubr.f32.gmra.mrb[44].mxu1 %v4244_v52 }
 0x2d6   : > { %3572 = vst.msk [vmem:[#allocation4 + $0x1d0] sm:$0xff] %vm813_vm1, %v10594_v36  ;;  %2934 = vst.msk [vmem:[#allocation4 + $0x1f8] sm:$0xff] %vm813_vm1, %v2902_v44  ;;  %3043 = vrot.lane.b32.xlu1 %v10454_v54, %s8366_s1  ;;  %v10607_v43 = vld [vmem:[#allocation3 + $0x14f] sm:$0xff] }
 0x2d7   : > { %2832 = vst.msk [vmem:[#allocation3 + $0x168] sm:$0xff] %vm813_vm1, %v2799_v26  ;;  %v4049_v34 = vpop.permute.xlu0 %4048 }
 0x2d8   : > { %v3408_v28 = vpop.permute.xlu1 %3407  ;;  %4137 = vst.msk [vmem:[#allocation4 + $0xb0] sm:$0xff] %vm1393_vm4, %v4049_v34 }
 0x2d9   : > { %3496 = vst.msk [vmem:[#allocation4 + $0xa8] sm:$0xff] %vm1393_vm4, %v3408_v28  ;;  %3876 = vrot.lane.b32.xlu0 %v10607_v43, %s8365_s0 }
 0x2da   : > { %3235 = vrot.lane.b32.xlu1 %v10444_v58, %s8365_s0  ;;  %v4276_v17 = vld [vmem:[#allocation4 + $0x190] sm:$0xff]  ;;  %v4279_v47 = vld [vmem:[#allocation4 + $0x1a8] sm:$0xff] }
 0x2db   : > { %7871 = vmatprep.mubr.msk.f32.mxu0 %vm813_vm1, %v4276_v17  ;;  %v3666_v54 = vpop.permute.xlu0 %3665 }
 0x2dc   : > { %v3026_v51 = vpop.permute.xlu1 %3025  ;;  %v2500_v48 = vpop.f32.mrb[42].mxu0  ;;  %3753 = vst.msk [vmem:[#allocation4 + $0xc8] sm:$0xff] %vm1006_vm2, %v3666_v54  ;;  %7872 = vmatmul.mubr.msk.f32.gmra.mrb[80].mxu0 %vm813_vm1, %v4279_v47 }
 0x2dd   : > { %3113 = vst.msk [vmem:[#allocation4 + $0xc0] sm:$0xff] %vm1006_vm2, %v3026_v51  ;;  %v2501_v6 = vadd.f32 %v10287_v15, %v2500_v48  ;;  %v2502_v3 = vpop.f32.mrb[43].mxu0  ;;  %4068 = vrot.lane.b32.xlu0 %v10594_v36, %s8368_s2 }
 0x2de   : > { %3427 = vrot.lane.b32.xlu1 %v10537_v22, %s8368_s2  ;;  %v10623_v14 = vld [vmem:[#allocation3 + $0x168] sm:$0xff] }
 0x2df   : > { %v2726_v58 = vadd.f32 %v10204_v56, %v2501_v6  ;;  %v3859_v12 = vpop.permute.xlu0 %3858  ;;  %v4248_v9 = vld [vmem:[#allocation4 + $0xb0] sm:$0xff]  ;;  %3573 = vst.msk [vmem:[#allocation4 + $0x1e8] sm:$0xff] %vm813_vm1, %v10623_v14  ;;  %v2903_v53 = vld [vmem:[#allocation3 + $0x167] sm:$0xff] }
 0x2e0   : > { %v3218_v0 = vpop.permute.xlu1 %3217  ;;  %v4247_v8 = vld [vmem:[#allocation4 + $0xa8] sm:$0xff]  ;;  %3946 = vst.msk [vmem:[#allocation4 + $0xc8] sm:$0xff] %vm1199_vm3, %v3859_v12  ;;  %4523 = vmatprep.mubr.f32.mxu1 %v4248_v9 }
 0x2e1   : > { %3305 = vst.msk [vmem:[#allocation4 + $0xc0] sm:$0xff] %vm1199_vm3, %v3218_v0  ;;  %v2800_v7 = vmax.f32 %v2726_v58, 0.0  ;;  %3685 = vrot.lane.b32.xlu0 %v10582_v25, %s8366_s1  ;;  %4524 = vmatmul.mubr.f32.gmra.mrb[46].mxu1 %v4247_v8  ;;  %v10637_v50 = vld [vmem:[#allocation3 + $0x167] sm:$0xff] }
 0x2e2   : > { %2935 = vst.msk [vmem:[#allocation4 + $0x210] sm:$0xff] %vm813_vm1, %v2903_v53  ;;  %3045 = vrot.lane.b32.xlu1 %v10482_v32, %s8366_s1 }
 0x2e3   : > { %2833 = vst.msk [vmem:[#allocation3 + $0x170] sm:$0xff] %vm813_vm1, %v2800_v7  ;;  %v4051_v22 = vpop.permute.xlu0 %4050 }
 0x2e4   : > { %v3410_v56 = vpop.permute.xlu1 %3409  ;;  %4138 = vst.msk [vmem:[#allocation4 + $0xc8] sm:$0xff] %vm1393_vm4, %v4051_v22 }
 0x2e5   : > { %3497 = vst.msk [vmem:[#allocation4 + $0xc0] sm:$0xff] %vm1393_vm4, %v3410_v56  ;;  %3878 = vrot.lane.b32.xlu0 %v10637_v50, %s8365_s0 }
 0x2e6   : > { %3237 = vrot.lane.b32.xlu1 %v10512_v27, %s8365_s0 }
 0x2e7   : > { %v3668_v16 = vpop.permute.xlu0 %3667 }
 0x2e8   : > { %v3028_v63 = vpop.permute.xlu1 %3027  ;;  %v2505_v41 = vpop.f32.mrb[44].mxu0  ;;  %3754 = vst.msk [vmem:[#allocation4 + $0xe0] sm:$0xff] %vm1006_vm2, %v3668_v16 }
 0x2e9   : > { %3114 = vst.msk [vmem:[#allocation4 + $0xd8] sm:$0xff] %vm1006_vm2, %v3028_v63  ;;  %v2506_v32 = vadd.f32 %v10287_v15, %v2505_v41  ;;  %v2507_v5 = vpop.f32.mrb[45].mxu0  ;;  %4070 = vrot.lane.b32.xlu0 %v10623_v14, %s8368_s2 }
 0x2ea   : > { %v10646_v38 = vld [vmem:[#allocation3 + $0x169] sm:$0xff]  ;;  %v10648_v10 = vld [vmem:[#allocation3 + $0x171] sm:$0xff]  ;;  %3429 = vrot.lane.b32.xlu1 %v10567_v40, %s8368_s2 }
 0x2eb   : > { %4212 = vst.msk [vmem:[#allocation4 + $0x1c0] sm:$0xff] %vm813_vm1, %v10646_v38  ;;  %4213 = vst.msk [vmem:[#allocation4 + $0x1d8] sm:$0xff] %vm813_vm1, %v10648_v10  ;;  %v2731_v27 = vadd.f32 %v10276_v42, %v2506_v32  ;;  %v10659_v49 = vld [vmem:[#allocation3 + $0x170] sm:$0xff]  ;;  %v3861_v59 = vpop.permute.xlu0 %3860  ;;  %v4251_v13 = vld [vmem:[#allocation4 + $0xc8] sm:$0xff] }
 0x2ec   : > { %v3220_v57 = vpop.permute.xlu1 %3219  ;;  %v4250_v61 = vld [vmem:[#allocation4 + $0xc0] sm:$0xff]  ;;  %v2904_v62 = vld [vmem:[#allocation3 + $0x16f] sm:$0xff]  ;;  %3574 = vst.msk [vmem:[#allocation4 + $0x200] sm:$0xff] %vm813_vm1, %v10659_v49  ;;  %4528 = vmatprep.mubr.f32.mxu1 %v4251_v13 }
 0x2ed   : > { %3306 = vst.msk [vmem:[#allocation4 + $0xd8] sm:$0xff] %vm1199_vm3, %v3220_v57  ;;  %v2801_v4 = vmax.f32 %v2731_v27, 0.0  ;;  %3947 = vst.msk [vmem:[#allocation4 + $0xe0] sm:$0xff] %vm1199_vm3, %v3861_v59  ;;  %3687 = vrot.lane.b32.xlu0 %v10584_v23, %s8366_s1  ;;  %4529 = vmatmul.mubr.f32.gmra.mrb[48].mxu1 %v4250_v61  ;;  %v10673_v21 = vld [vmem:[#allocation3 + $0x16f] sm:$0xff] }
 0x2ee   : > { %2936 = vst.msk [vmem:[#allocation4 + $0x228] sm:$0xff] %vm813_vm1, %v2904_v62  ;;  %3047 = vrot.lane.b32.xlu1 %v10524_v29, %s8366_s1 }
 0x2ef   : > { %2834 = vst.msk [vmem:[#allocation3 + $0x188] sm:$0xff] %vm813_vm1, %v2801_v4  ;;  %v4053_v40 = vpop.permute.xlu0 %4052 }
 0x2f0   : > { %v3412_v42 = vpop.permute.xlu1 %3411  ;;  %4139 = vst.msk [vmem:[#allocation4 + $0xe0] sm:$0xff] %vm1393_vm4, %v4053_v40 }
 0x2f1   : > { %3498 = vst.msk [vmem:[#allocation4 + $0xd8] sm:$0xff] %vm1393_vm4, %v3412_v42  ;;  %3880 = vrot.lane.b32.xlu0 %v10673_v21, %s8365_s0 }
 0x2f2   : > { %v4282_v2 = vld [vmem:[#allocation4 + $0x1c0] sm:$0xff]  ;;  %v4285_v1 = vld [vmem:[#allocation4 + $0x1d8] sm:$0xff]  ;;  %3239 = vrot.lane.b32.xlu1 %v10514_v37, %s8365_s0 }
 0x2f3   : > { %7874 = vmatprep.mubr.msk.f32.mxu0 %vm813_vm1, %v4282_v2  ;;  %v3670_v29 = vpop.permute.xlu0 %3669  ;;  %v10777_v2 = vld [vmem:[%s8526_s14] ss:$0 sm:$0xff]  ;;  %s12883_s14 = scalar_lea.vmem %s12842_s4, %s8514_s26  ;;  %s8371_s26 = smov (!%p7626_p1), 32  }
 0x2f4   : > { %v3030_v52 = vpop.permute.xlu1 %3029  ;;  %v2510_v60 = vpop.f32.mrb[46].mxu0  ;;  %7875 = vmatmul.mubr.msk.f32.gmra.mrb[82].mxu0 %vm813_vm1, %v4285_v1  ;;  %3755 = vst.msk [vmem:[#allocation4 + $0xf8] sm:$0xff] %vm1006_vm2, %v3670_v29 }
 0x2f5   : > { %3115 = vst.msk [vmem:[#allocation4 + $0xf0] sm:$0xff] %vm1006_vm2, %v3030_v52  ;;  %v2511_v35 = vadd.f32 %v10287_v15, %v2510_v60  ;;  %v2512_v45 = vpop.f32.mrb[47].mxu0  ;;  %4072 = vrot.lane.b32.xlu0 %v10659_v49, %s8368_s2 }
 0x2f6   : > { %v10686_v44 = vld [vmem:[#allocation3 + $0x188] sm:$0xff]  ;;  %3431 = vrot.lane.b32.xlu1 %v10607_v43, %s8368_s2 }
 0x2f7   : > { %v2736_v37 = vadd.f32 %v10270_v24, %v2511_v35  ;;  %3575 = vst.msk [vmem:[#allocation4 + $0x218] sm:$0xff] %vm813_vm1, %v10686_v44  ;;  %v2905_v34 = vld [vmem:[#allocation3 + $0x187] sm:$0xff]  ;;  %v3863_v17 = vpop.permute.xlu0 %3862 }
 0x2f8   : > { %v3222_v26 = vpop.permute.xlu1 %3221  ;;  %v4253_v28 = vld [vmem:[#allocation4 + $0xd8] sm:$0xff]  ;;  %v4254_v51 = vld [vmem:[#allocation4 + $0xe0] sm:$0xff]  ;;  %2937 = vst.msk [vmem:[#allocation4 + $0x240] sm:$0xff] %vm813_vm1, %v2905_v34 }
 0x2f9   : > { %3307 = vst.msk [vmem:[#allocation4 + $0xf0] sm:$0xff] %vm1199_vm3, %v3222_v26  ;;  %v2802_v47 = vmax.f32 %v2736_v37, 0.0  ;;  %3948 = vst.msk [vmem:[#allocation4 + $0xf8] sm:$0xff] %vm1199_vm3, %v3863_v17  ;;  %4533 = vmatprep.mubr.f32.mxu1 %v4254_v51  ;;  %3689 = vrot.lane.b32.xlu0 %v10646_v38, %s8366_s1  ;;  %v10703_v54 = vld [vmem:[#allocation3 + $0x187] sm:$0xff] }
 0x2fa   : > { %4534 = vmatmul.mubr.f32.gmra.mrb[50].mxu1 %v4253_v28  ;;  %3049 = vrot.lane.b32.xlu1 %v10552_v30, %s8366_s1 }
 0x2fb   : > { %2835 = vst.msk [vmem:[#allocation3 + $0x190] sm:$0xff] %vm813_vm1, %v2802_v47  ;;  %v4055_v43 = vpop.permute.xlu0 %4054 }
 0x2fc   : > { %v3414_v24 = vpop.permute.xlu1 %3413  ;;  %4140 = vst.msk [vmem:[#allocation4 + $0xf8] sm:$0xff] %vm1393_vm4, %v4055_v43 }
 0x2fd   : > { %3499 = vst.msk [vmem:[#allocation4 + $0xf0] sm:$0xff] %vm1393_vm4, %v3414_v24  ;;  %3882 = vrot.lane.b32.xlu0 %v10703_v54, %s8365_s0 }
 0x2fe   : > { %3241 = vrot.lane.b32.xlu1 %v10582_v25, %s8365_s0 }
 0x2ff   : > { %v3672_v48 = vpop.permute.xlu0 %3671 }
 0x300   : > { %v2515_v6 = vpop.f32.mrb[48].mxu0  ;;  %3756 = vst.msk [vmem:[#allocation4 + $0x110] sm:$0xff] %vm1006_vm2, %v3672_v48  ;;  %v3032_v3 = vpop.permute.xlu1 %3031 }
 0x301   : > { %v2516_v30 = vadd.f32 %v10287_v15, %v2515_v6  ;;  %v2517_v58 = vpop.f32.mrb[49].mxu0  ;;  %3116 = vst.msk [vmem:[#allocation4 + $0x108] sm:$0xff] %vm1006_vm2, %v3032_v3  ;;  %4074 = vrot.lane.b32.xlu0 %v10686_v44, %s8368_s2 }
 0x302   : > { %v10711_v0 = vld [vmem:[#allocation3 + $0x189] sm:$0xff]  ;;  %v10713_v8 = vld [vmem:[#allocation3 + $0x191] sm:$0xff]  ;;  %3433 = vrot.lane.b32.xlu1 %v10637_v50, %s8368_s2 }
 0x303   : > { %v10718_v12 = vld [vmem:[#allocation3 + $0x18f] sm:$0xff]  ;;  %4214 = vst.msk [vmem:[#allocation4 + $0x1f0] sm:$0xff] %vm813_vm1, %v10711_v0  ;;  %4215 = vst.msk [vmem:[#allocation4 + $0x208] sm:$0xff] %vm813_vm1, %v10713_v8  ;;  %v2741_v25 = vadd.f32 %v10345_v46, %v2516_v30  ;;  %v3865_v7 = vpop.permute.xlu0 %3864  ;;  %v4257_v56 = vld [vmem:[#allocation4 + $0xf8] sm:$0xff] }
 0x304   : > { %v4256_v9 = vld [vmem:[#allocation4 + $0xf0] sm:$0xff]  ;;  %2938 = vst.msk [vmem:[#allocation4 + $0x258] sm:$0xff] %vm813_vm1, %v10718_v12  ;;  %v3224_v63 = vpop.permute.xlu1 %3223  ;;  %4538 = vmatprep.mubr.f32.mxu1 %v4257_v56 }
 0x305   : > { %v10727_v53 = vld [vmem:[#allocation3 + $0x190] sm:$0xff]  ;;  %v2803_v22 = vmax.f32 %v2741_v25, 0.0  ;;  %3949 = vst.msk [vmem:[#allocation4 + $0x110] sm:$0xff] %vm1199_vm3, %v3865_v7  ;;  %3308 = vst.msk [vmem:[#allocation4 + $0x108] sm:$0xff] %vm1199_vm3, %v3224_v63  ;;  %3691 = vrot.lane.b32.xlu0 %v10648_v10, %s8366_s1  ;;  %4539 = vmatmul.mubr.f32.gmra.mrb[52].mxu1 %v4256_v9 }
 0x306   : > { %3576 = vst.msk [vmem:[#allocation4 + $0x230] sm:$0xff] %vm813_vm1, %v10727_v53  ;;  %3051 = vrot.lane.b32.xlu1 %v10594_v36, %s8366_s1 }
 0x307   : > { %2836 = vst.msk [vmem:[#allocation3 + $0x1a8] sm:$0xff] %vm813_vm1, %v2803_v22  ;;  %v4057_v46 = vpop.permute.xlu0 %4056 }
 0x308   : > { %4141 = vst.msk [vmem:[#allocation4 + $0x110] sm:$0xff] %vm1393_vm4, %v4057_v46  ;;  %v3416_v50 = vpop.permute.xlu1 %3415 }
 0x309   : > { %3500 = vst.msk [vmem:[#allocation4 + $0x108] sm:$0xff] %vm1393_vm4, %v3416_v50  ;;  %3884 = vrot.lane.b32.xlu0 %v10718_v12, %s8365_s0 }
 0x30a   : > { %3243 = vrot.lane.b32.xlu1 %v10584_v23, %s8365_s0 }
 0x30b   : > { %v3674_v16 = vpop.permute.xlu0 %3673 }
 0x30c   : > { %v2520_v41 = vpop.f32.mrb[50].mxu0  ;;  %3757 = vst.msk [vmem:[#allocation4 + $0x128] sm:$0xff] %vm1006_vm2, %v3674_v16  ;;  %v3034_v32 = vpop.permute.xlu1 %3033 }
 0x30d   : > { %v2521_v5 = vadd.f32 %v10287_v15, %v2520_v41  ;;  %v2522_v36 = vpop.f32.mrb[51].mxu0  ;;  %3117 = vst.msk [vmem:[#allocation4 + $0x120] sm:$0xff] %vm1006_vm2, %v3034_v32  ;;  %4076 = vrot.lane.b32.xlu0 %v10727_v53, %s8368_s2 }
 0x30e   : > { %v10751_v27 = vld [vmem:[#allocation3 + $0x1a7] sm:$0xff]  ;;  %3435 = vrot.lane.b32.xlu1 %v10673_v21, %s8368_s2 }
 0x30f   : > { %v10753_v57 = vld [vmem:[#allocation3 + $0x1a8] sm:$0xff]  ;;  %v2746_v61 = vadd.f32 %v10341_v55, %v2521_v5  ;;  %2939 = vst.msk [vmem:[#allocation4 + $0x270] sm:$0xff] %vm813_vm1, %v10751_v27  ;;  %v3867_v15 = vpop.permute.xlu0 %3866  ;;  %v4260_v23 = vld [vmem:[#allocation4 + $0x110] sm:$0xff] }
 0x310   : > { %3577 = vst.msk [vmem:[#allocation4 + $0x248] sm:$0xff] %vm813_vm1, %v10753_v57  ;;  %v3226_v59 = vpop.permute.xlu1 %3225  ;;  %4543 = vmatprep.mubr.f32.mxu1 %v4260_v23  ;;  %v4259_v13 = vld [vmem:[#allocation4 + $0x108] sm:$0xff] }
 0x311   : > { %v2804_v62 = vmax.f32 %v2746_v61, 0.0  ;;  %3950 = vst.msk [vmem:[#allocation4 + $0x128] sm:$0xff] %vm1199_vm3, %v3867_v15  ;;  %3309 = vst.msk [vmem:[#allocation4 + $0x120] sm:$0xff] %vm1199_vm3, %v3226_v59  ;;  %3693 = vrot.lane.b32.xlu0 %v10711_v0, %s8366_s1  ;;  %4544 = vmatmul.mubr.f32.gmra.mrb[54].mxu1 %v4259_v13 }
 0x312   : > { %3053 = vrot.lane.b32.xlu1 %v10623_v14, %s8366_s1 }
 0x313   : > { %2837 = vst.msk [vmem:[#allocation3 + $0x1b0] sm:$0xff] %vm813_vm1, %v2804_v62  ;;  %v4059_v55 = vpop.permute.xlu0 %4058 }
 0x314   : > { %4142 = vst.msk [vmem:[#allocation4 + $0x128] sm:$0xff] %vm1393_vm4, %v4059_v55  ;;  %v3418_v4 = vpop.permute.xlu1 %3417 }
 0x315   : > { %3501 = vst.msk [vmem:[#allocation4 + $0x120] sm:$0xff] %vm1393_vm4, %v3418_v4  ;;  %3886 = vrot.lane.b32.xlu0 %v10751_v27, %s8365_s0 }
 0x316   : > { %3245 = vrot.lane.b32.xlu1 %v10646_v38, %s8365_s0 }
 0x317   : > { %v3676_v42 = vpop.permute.xlu0 %3675 }
 0x318   : > { %v2525_v40 = vpop.f32.mrb[52].mxu0  ;;  %3758 = vst.msk [vmem:[#allocation4 + $0x140] sm:$0xff] %vm1006_vm2, %v3676_v42  ;;  %v3036_v21 = vpop.permute.xlu1 %3035 }
 0x319   : > { %v2526_v14 = vadd.f32 %v10777_v2, %v2525_v40  ;;  %v2527_v1 = vpop.f32.mrb[53].mxu0  ;;  %3118 = vst.msk [vmem:[#allocation4 + $0x138] sm:$0xff] %vm1006_vm2, %v3036_v21  ;;  %4078 = vrot.lane.b32.xlu0 %v10753_v57, %s8368_s2 }
 0x31a   : > { %v10780_v52 = vld [vmem:[#allocation3 + $0x1a9] sm:$0xff]  ;;  %v10782_v29 = vld [vmem:[#allocation3 + $0x1b1] sm:$0xff]  ;;  %3437 = vrot.lane.b32.xlu1 %v10703_v54, %s8368_s2 }
 0x31b   : > { %v10787_v38 = vld [vmem:[#allocation3 + $0x1af] sm:$0xff]  ;;  %4216 = vst.msk [vmem:[#allocation4 + $0x220] sm:$0xff] %vm813_vm1, %v10780_v52  ;;  %4217 = vst.msk [vmem:[#allocation4 + $0x238] sm:$0xff] %vm813_vm1, %v10782_v29  ;;  %v2751_v60 = vadd.f32 %v10428_v11, %v2526_v14  ;;  %v3869_v45 = vpop.permute.xlu0 %3868 }
 0x31c   : > { %v10796_v35 = vld [vmem:[#allocation3 + $0x1b0] sm:$0xff]  ;;  %2940 = vst.msk [vmem:[#allocation4 + $0x288] sm:$0xff] %vm813_vm1, %v10787_v38  ;;  %v4263_v37 = vld [vmem:[#allocation4 + $0x128] sm:$0xff]  ;;  %v3228_v28 = vpop.permute.xlu1 %3227  ;;  %v4262_v34 = vld [vmem:[#allocation4 + $0x120] sm:$0xff] }
 0x31d   : > { %3578 = vst.msk [vmem:[#allocation4 + $0x260] sm:$0xff] %vm813_vm1, %v10796_v35  ;;  %v2805_v26 = vmax.f32 %v2751_v60, 0.0  ;;  %4548 = vmatprep.mubr.f32.mxu1 %v4263_v37  ;;  %3695 = vrot.lane.b32.xlu0 %v10713_v8, %s8366_s1 }
 0x31e   : > { %3951 = vst.msk [vmem:[#allocation4 + $0x140] sm:$0xff] %vm1199_vm3, %v3869_v45  ;;  %3310 = vst.msk [vmem:[#allocation4 + $0x138] sm:$0xff] %vm1199_vm3, %v3228_v28  ;;  %4549 = vmatmul.mubr.f32.gmra.mrb[56].mxu1 %v4262_v34  ;;  %3055 = vrot.lane.b32.xlu1 %v10659_v49, %s8366_s1 }
 0x31f   : > { %2838 = vst.msk [vmem:[#allocation3 + $0x1c8] sm:$0xff] %vm813_vm1, %v2805_v26  ;;  %v4061_v11 = vpop.permute.xlu0 %4060 }
 0x320   : > { %4143 = vst.msk [vmem:[#allocation4 + $0x140] sm:$0xff] %vm1393_vm4, %v4061_v11  ;;  %v3420_v17 = vpop.permute.xlu1 %3419 }
 0x321   : > { %3502 = vst.msk [vmem:[#allocation4 + $0x138] sm:$0xff] %vm1393_vm4, %v3420_v17  ;;  %3888 = vrot.lane.b32.xlu0 %v10787_v38, %s8365_s0 }
 0x322   : > { %3247 = vrot.lane.b32.xlu1 %v10648_v10, %s8365_s0 }
 0x323   : > { %v3678_v51 = vpop.permute.xlu0 %3677 }
 0x324   : > { %v2530_v47 = vpop.f32.mrb[54].mxu0  ;;  %3759 = vst.msk [vmem:[#allocation4 + $0x158] sm:$0xff] %vm1006_vm2, %v3678_v51  ;;  %v3038_v24 = vpop.permute.xlu1 %3037 }
 0x325   : > { %v2531_v43 = vadd.f32 %v10777_v2, %v2530_v47  ;;  %v2532_v49 = vpop.f32.mrb[55].mxu0  ;;  %3119 = vst.msk [vmem:[#allocation4 + $0x150] sm:$0xff] %vm1006_vm2, %v3038_v24  ;;  %4080 = vrot.lane.b32.xlu0 %v10796_v35, %s8368_s2 }
 0x326   : > { %v10820_v54 = vld [vmem:[#allocation3 + $0x1c7] sm:$0xff]  ;;  %3439 = vrot.lane.b32.xlu1 %v10718_v12, %s8368_s2 }
 0x327   : > { %v10822_v48 = vld [vmem:[#allocation3 + $0x1c8] sm:$0xff]  ;;  %v2756_v6 = vadd.f32 %v10424_v20, %v2531_v43  ;;  %2941 = vst.msk [vmem:[#allocation4 + $0x2a0] sm:$0xff] %vm813_vm1, %v10820_v54  ;;  %v3871_v10 = vpop.permute.xlu0 %3870  ;;  %v4266_v3 = vld [vmem:[#allocation4 + $0x140] sm:$0xff] }
 0x328   : > { %3579 = vst.msk [vmem:[#allocation4 + $0x278] sm:$0xff] %vm813_vm1, %v10822_v48  ;;  %v3230_v58 = vpop.permute.xlu1 %3229  ;;  %4553 = vmatprep.mubr.f32.mxu1 %v4266_v3  ;;  %v4265_v25 = vld [vmem:[#allocation4 + $0x138] sm:$0xff] }
 0x329   : > { %v2806_v30 = vmax.f32 %v2756_v6, 0.0  ;;  %3952 = vst.msk [vmem:[#allocation4 + $0x158] sm:$0xff] %vm1199_vm3, %v3871_v10  ;;  %3311 = vst.msk [vmem:[#allocation4 + $0x150] sm:$0xff] %vm1199_vm3, %v3230_v58  ;;  %3697 = vrot.lane.b32.xlu0 %v10780_v52, %s8366_s1  ;;  %4554 = vmatmul.mubr.f32.gmra.mrb[58].mxu1 %v4265_v25 }
 0x32a   : > { %3057 = vrot.lane.b32.xlu1 %v10686_v44, %s8366_s1 }
 0x32b   : > { %2839 = vst.msk [vmem:[#allocation3 + $0x1d0] sm:$0xff] %vm813_vm1, %v2806_v30  ;;  %v4063_v20 = vpop.permute.xlu0 %4062 }
 0x32c   : > { %4144 = vst.msk [vmem:[#allocation4 + $0x158] sm:$0xff] %vm1393_vm4, %v4063_v20  ;;  %v3422_v12 = vpop.permute.xlu1 %3421 }
 0x32d   : > { %3503 = vst.msk [vmem:[#allocation4 + $0x150] sm:$0xff] %vm1393_vm4, %v3422_v12  ;;  %3890 = vrot.lane.b32.xlu0 %v10820_v54, %s8365_s0 }
 0x32e   : > { %3249 = vrot.lane.b32.xlu1 %v10711_v0, %s8365_s0 }
 0x32f   : > { %v3680_v9 = vpop.permute.xlu0 %3679 }
 0x330   : > { %v2535_v7 = vpop.f32.mrb[56].mxu0  ;;  %3760 = vst.msk [vmem:[#allocation4 + $0x170] sm:$0xff] %vm1006_vm2, %v3680_v9  ;;  %v3040_v56 = vpop.permute.xlu1 %3039 }
 0x331   : > { %v2536_v22 = vadd.f32 %v10777_v2, %v2535_v7  ;;  %v2537_v44 = vpop.f32.mrb[57].mxu0  ;;  %3120 = vst.msk [vmem:[#allocation4 + $0x168] sm:$0xff] %vm1006_vm2, %v3040_v56  ;;  %4082 = vrot.lane.b32.xlu0 %v10822_v48, %s8368_s2 }
 0x332   : > { %v10846_v63 = vld [vmem:[#allocation3 + $0x1c9] sm:$0xff]  ;;  %v10848_v46 = vld [vmem:[#allocation3 + $0x1d1] sm:$0xff]  ;;  %3441 = vrot.lane.b32.xlu1 %v10751_v27, %s8368_s2 }
 0x333   : > { %v10853_v50 = vld [vmem:[#allocation3 + $0x1cf] sm:$0xff]  ;;  %4218 = vst.msk [vmem:[#allocation4 + $0x250] sm:$0xff] %vm813_vm1, %v10846_v63  ;;  %4219 = vst.msk [vmem:[#allocation4 + $0x268] sm:$0xff] %vm813_vm1, %v10848_v46  ;;  %v2761_v0 = vadd.f32 %v10498_v18, %v2536_v22  ;;  %v3873_v41 = vpop.permute.xlu0 %3872  ;;  %v4269_v32 = vld [vmem:[#allocation4 + $0x158] sm:$0xff] }
 0x334   : > { %v10862_v16 = vld [vmem:[#allocation3 + $0x1d0] sm:$0xff]  ;;  %2942 = vst.msk [vmem:[#allocation4 + $0x2b8] sm:$0xff] %vm813_vm1, %v10853_v50  ;;  %v3232_v36 = vpop.permute.xlu1 %3231  ;;  %4558 = vmatprep.mubr.f32.mxu1 %v4269_v32 }
 0x335   : > { %3580 = vst.msk [vmem:[#allocation4 + $0x290] sm:$0xff] %vm813_vm1, %v10862_v16  ;;  %v2807_v5 = vmax.f32 %v2761_v0, 0.0  ;;  %v4268_v61 = vld [vmem:[#allocation4 + $0x150] sm:$0xff]  ;;  %3699 = vrot.lane.b32.xlu0 %v10782_v29, %s8366_s1 }
 0x336   : > { %3953 = vst.msk [vmem:[#allocation4 + $0x170] sm:$0xff] %vm1199_vm3, %v3873_v41  ;;  %3312 = vst.msk [vmem:[#allocation4 + $0x168] sm:$0xff] %vm1199_vm3, %v3232_v36  ;;  %4559 = vmatmul.mubr.f32.gmra.mrb[60].mxu1 %v4268_v61  ;;  %3059 = vrot.lane.b32.xlu1 %v10727_v53, %s8366_s1 }
 0x337   : > { %2840 = vst.msk [vmem:[#allocation3 + $0x1e8] sm:$0xff] %vm813_vm1, %v2807_v5  ;;  %v4065_v18 = vpop.permute.xlu0 %4064 }
 0x338   : > { %4145 = vst.msk [vmem:[#allocation4 + $0x170] sm:$0xff] %vm1393_vm4, %v4065_v18  ;;  %v3424_v27 = vpop.permute.xlu1 %3423 }
 0x339   : > { %3504 = vst.msk [vmem:[#allocation4 + $0x168] sm:$0xff] %vm1393_vm4, %v3424_v27  ;;  %3892 = vrot.lane.b32.xlu0 %v10853_v50, %s8365_s0 }
 0x33a   : > { %3251 = vrot.lane.b32.xlu1 %v10713_v8, %s8365_s0 }
 0x33b   : > { %v3682_v15 = vpop.permute.xlu0 %3681 }
 0x33c   : > { %v2540_v23 = vpop.f32.mrb[58].mxu0  ;;  %3761 = vst.msk [vmem:[#allocation4 + $0x188] sm:$0xff] %vm1006_vm2, %v3682_v15  ;;  %v3042_v62 = vpop.permute.xlu1 %3041 }
 0x33d   : > { %v2541_v59 = vadd.f32 %v10777_v2, %v2540_v23  ;;  %v2542_v53 = vpop.f32.mrb[59].mxu0  ;;  %3121 = vst.msk [vmem:[#allocation4 + $0x180] sm:$0xff] %vm1006_vm2, %v3042_v62  ;;  %4084 = vrot.lane.b32.xlu0 %v10862_v16, %s8368_s2 }
 0x33e   : > { %v10886_v13 = vld [vmem:[#allocation3 + $0x1e7] sm:$0xff]  ;;  %3443 = vrot.lane.b32.xlu1 %v10787_v38, %s8368_s2 }
 0x33f   : > { %v10888_v55 = vld [vmem:[#allocation3 + $0x1e8] sm:$0xff]  ;;  %v2766_v4 = vadd.f32 %v10494_v33, %v2541_v59  ;;  %2943 = vst.msk [vmem:[#allocation4 + $0x2d0] sm:$0xff] %vm813_vm1, %v10886_v13  ;;  %v3875_v8 = vpop.permute.xlu0 %3874  ;;  %v4272_v42 = vld [vmem:[#allocation4 + $0x170] sm:$0xff] }
 0x340   : > { %3581 = vst.msk [vmem:[#allocation4 + $0x2a8] sm:$0xff] %vm813_vm1, %v10888_v55  ;;  %v3234_v21 = vpop.permute.xlu1 %3233  ;;  %4563 = vmatprep.mubr.f32.mxu1 %v4272_v42  ;;  %v4271_v14 = vld [vmem:[#allocation4 + $0x168] sm:$0xff] }
 0x341   : > { %v2808_v40 = vmax.f32 %v2766_v4, 0.0  ;;  %3954 = vst.msk [vmem:[#allocation4 + $0x188] sm:$0xff] %vm1199_vm3, %v3875_v8  ;;  %3313 = vst.msk [vmem:[#allocation4 + $0x180] sm:$0xff] %vm1199_vm3, %v3234_v21  ;;  %3701 = vrot.lane.b32.xlu0 %v10846_v63, %s8366_s1  ;;  %4564 = vmatmul.mubr.f32.gmra.mrb[62].mxu1 %v4271_v14 }
 0x342   : > { %3061 = vrot.lane.b32.xlu1 %v10753_v57, %s8366_s1 }
 0x343   : > { %2841 = vst.msk [vmem:[#allocation3 + $0x1f0] sm:$0xff] %vm813_vm1, %v2808_v40  ;;  %v4067_v33 = vpop.permute.xlu0 %4066 }
 0x344   : > { %4146 = vst.msk [vmem:[#allocation4 + $0x188] sm:$0xff] %vm1393_vm4, %v4067_v33  ;;  %v3426_v1 = vpop.permute.xlu1 %3425 }
 0x345   : > { %3505 = vst.msk [vmem:[#allocation4 + $0x180] sm:$0xff] %vm1393_vm4, %v3426_v1  ;;  %3894 = vrot.lane.b32.xlu0 %v10886_v13, %s8365_s0 }
 0x346   : > { %3253 = vrot.lane.b32.xlu1 %v10780_v52, %s8365_s0 }
 0x347   : > { %v3684_v38 = vpop.permute.xlu0 %3683 }
 0x348   : > { %v2545_v60 = vpop.f32.mrb[60].mxu0  ;;  %3762 = vst.msk [vmem:[#allocation4 + $0x1a0] sm:$0xff] %vm1006_vm2, %v3684_v38  ;;  %v3044_v45 = vpop.permute.xlu1 %3043 }
 0x349   : > { %v2546_v37 = vadd.f32 %v10777_v2, %v2545_v60  ;;  %v2547_v57 = vpop.f32.mrb[61].mxu0  ;;  %3122 = vst.msk [vmem:[#allocation4 + $0x198] sm:$0xff] %vm1006_vm2, %v3044_v45  ;;  %4086 = vrot.lane.b32.xlu0 %v10888_v55, %s8368_s2 }
 0x34a   : > { %v10912_v26 = vld [vmem:[#allocation3 + $0x1e9] sm:$0xff]  ;;  %v10914_v28 = vld [vmem:[#allocation3 + $0x1f1] sm:$0xff]  ;;  %3445 = vrot.lane.b32.xlu1 %v10820_v54, %s8368_s2 }
 0x34b   : > { %v10919_v34 = vld [vmem:[#allocation3 + $0x1ef] sm:$0xff]  ;;  %4220 = vst.msk [vmem:[#allocation4 + $0x280] sm:$0xff] %vm813_vm1, %v10912_v26  ;;  %4221 = vst.msk [vmem:[#allocation4 + $0x298] sm:$0xff] %vm813_vm1, %v10914_v28  ;;  %v2771_v52 = vadd.f32 %v10573_v31, %v2546_v37  ;;  %v3877_v17 = vpop.permute.xlu0 %3876 }
 0x34c   : > { %v10928_v11 = vld [vmem:[#allocation3 + $0x1f0] sm:$0xff]  ;;  %2944 = vst.msk [vmem:[#allocation4 + $0x2e8] sm:$0xff] %vm813_vm1, %v10919_v34  ;;  %v4275_v51 = vld [vmem:[#allocation4 + $0x188] sm:$0xff]  ;;  %v3236_v24 = vpop.permute.xlu1 %3235  ;;  %v4274_v43 = vld [vmem:[#allocation4 + $0x180] sm:$0xff] }
 0x34d   : > { %3582 = vst.msk [vmem:[#allocation4 + $0x2c0] sm:$0xff] %vm813_vm1, %v10928_v11  ;;  %v2809_v47 = vmax.f32 %v2771_v52, 0.0  ;;  %4568 = vmatprep.mubr.f32.mxu1 %v4275_v51  ;;  %3703 = vrot.lane.b32.xlu0 %v10848_v46, %s8366_s1 }
 0x34e   : > { %3955 = vst.msk [vmem:[#allocation4 + $0x1a0] sm:$0xff] %vm1199_vm3, %v3877_v17  ;;  %3314 = vst.msk [vmem:[#allocation4 + $0x198] sm:$0xff] %vm1199_vm3, %v3236_v24  ;;  %4569 = vmatmul.mubr.f32.gmra.mrb[64].mxu1 %v4274_v43  ;;  %3063 = vrot.lane.b32.xlu1 %v10796_v35, %s8366_s1  ;;  %v3808_v24 = vld [vmem:[#allocation3 + $0x227] sm:$0xff] }
 0x34f   : > { %2842 = vst.msk [vmem:[#allocation3 + $0x208] sm:$0xff] %vm813_vm1, %v2809_v47  ;;  %v4069_v31 = vpop.permute.xlu0 %4068 }
 0x350   : > { %4147 = vst.msk [vmem:[#allocation4 + $0x1a0] sm:$0xff] %vm1393_vm4, %v4069_v31  ;;  %v3428_v49 = vpop.permute.xlu1 %3427  ;;  %v4000_v31 = vld [vmem:[#allocation3 + $0x228] sm:$0xff] }
 0x351   : > { %3506 = vst.msk [vmem:[#allocation4 + $0x198] sm:$0xff] %vm1393_vm4, %v3428_v49  ;;  %3896 = vrot.lane.b32.xlu0 %v10919_v34, %s8365_s0 }
 0x352   : > { %3255 = vrot.lane.b32.xlu1 %v10782_v29, %s8365_s0 }
 0x353   : > { %v3686_v54 = vpop.permute.xlu0 %3685 }
 0x354   : > { %v2550_v6 = vpop.f32.mrb[62].mxu0  ;;  %3763 = vst.msk [vmem:[#allocation4 + $0x1b8] sm:$0xff] %vm1006_vm2, %v3686_v54  ;;  %v3046_v10 = vpop.permute.xlu1 %3045 }
 0x355   : > { %v2551_v3 = vadd.f32 %v10777_v2, %v2550_v6  ;;  %v2552_v35 = vpop.f32.mrb[63].mxu0  ;;  %3123 = vst.msk [vmem:[#allocation4 + $0x1b0] sm:$0xff] %vm1006_vm2, %v3046_v10  ;;  %4088 = vrot.lane.b32.xlu0 %v10928_v11, %s8368_s2 }
 0x356   : > { %v3998_v30 = vld [vmem:[#allocation3 + $0x208] sm:$0xff]  ;;  %3447 = vrot.lane.b32.xlu1 %v10853_v50, %s8368_s2 }
 0x357   : > { %v2776_v58 = vadd.f32 %v10569_v19, %v2551_v3  ;;  %3583 = vst.msk [vmem:[#allocation4 + $0x2d8] sm:$0xff] %vm813_vm1, %v3998_v30  ;;  %v3879_v29 = vpop.permute.xlu0 %3878  ;;  %v4278_v25 = vld [vmem:[#allocation4 + $0x1a0] sm:$0xff] }
 0x358   : > { %v10956_v20 = vpop.f32.mrb[64].mxu0  ;;  %3956 = vst.msk [vmem:[#allocation4 + $0x1b8] sm:$0xff] %vm1199_vm3, %v3879_v29  ;;  %v3238_v2 = vpop.permute.xlu1 %3237  ;;  %4573 = vmatprep.mubr.f32.mxu1 %v4278_v25  ;;  %v4277_v7 = vld [vmem:[#allocation4 + $0x198] sm:$0xff]  ;;  %v10970_v50 = vld [vmem:[#allocation3 + $0x207] sm:$0xff]  ;;  %v3809_v29 = vld [vmem:[#allocation3 + $0x22f] sm:$0xff] }
 0x359   : > { %v2810_v12 = vmax.f32 %v2776_v58, 0.0  ;;  %v4715_v9 = vpop.f32.mrb[65].mxu0  ;;  %3315 = vst.msk [vmem:[#allocation4 + $0x1b0] sm:$0xff] %vm1199_vm3, %v3238_v2  ;;  %3705 = vrot.lane.b32.xlu0 %v10912_v26, %s8366_s1  ;;  %4574 = vmatmul.mubr.f32.gmra.mrb[66].mxu1 %v4277_v7 }
 0x35a   : > { %3065 = vrot.lane.b32.xlu1 %v10822_v48, %s8366_s1  ;;  %v10982_v48 = vld [vmem:[%s12883_s14] ss:$0 sm:$0xff] }
 0x35b   : > { %2843 = vst.msk [vmem:[#allocation3 + $0x210] sm:$0xff] %vm813_vm1, %v2810_v12  ;;  %v4071_v19 = vpop.permute.xlu0 %4070 }
 0x35c   : > { %v10965_v56 = vpop.f32.mrb[66].mxu0  ;;  %4148 = vst.msk [vmem:[#allocation4 + $0x1b8] sm:$0xff] %vm1393_vm4, %v4071_v19  ;;  %v3430_v22 = vpop.permute.xlu1 %3429 }
 0x35d   : > { %v10968_v44 = vpop.f32.mrb[67].mxu0  ;;  %3507 = vst.msk [vmem:[#allocation4 + $0x1b0] sm:$0xff] %vm1393_vm4, %v3430_v22  ;;  %3898 = vrot.lane.b32.xlu0 %v10970_v50, %s8365_s0 }
 0x35e   : > { %3257 = vrot.lane.b32.xlu1 %v10846_v63, %s8365_s0 }
 0x35f   : > { %v3688_v0 = vpop.permute.xlu0 %3687 }
 0x360   : > { %v10984_v41 = vpop.f32.mrb[68].mxu0  ;;  %3764 = vst.msk [vmem:[#allocation4 + $0x1d0] sm:$0xff] %vm1006_vm2, %v3688_v0  ;;  %v3048_v32 = vpop.permute.xlu1 %3047 }
 0x361   : > { %v4490_v5 = vpop.f32.mrb[32].mxu1  ;;  %3124 = vst.msk [vmem:[#allocation4 + $0x1c8] sm:$0xff] %vm1006_vm2, %v3048_v32  ;;  %v10991_v18 = vpop.f32.mrb[69].mxu0  ;;  %4090 = vrot.lane.b32.xlu0 %v3998_v30, %s8368_s2 }
 0x362   : > { %v4190_v36 = vld [vmem:[#allocation3 + $0x209] sm:$0xff]  ;;  %v10987_v61 = vld [vmem:[#allocation3 + $0x211] sm:$0xff]  ;;  %v4491_v63 = vadd.f32 %v10982_v48, %v4490_v5  ;;  %v4492_v27 = vpop.f32.mrb[33].mxu1  ;;  %3449 = vrot.lane.b32.xlu1 %v10886_v13, %s8368_s2 }
 0x363   : > { %4222 = vst.msk [vmem:[#allocation4 + $0x2b0] sm:$0xff] %vm813_vm1, %v4190_v36  ;;  %4223 = vst.msk [vmem:[#allocation4 + $0x2c8] sm:$0xff] %vm813_vm1, %v10987_v61  ;;  %v3999_v15 = vld [vmem:[#allocation3 + $0x210] sm:$0xff]  ;;  %v3881_v62 = vpop.permute.xlu0 %3880  ;;  %v4281_v59 = vld [vmem:[#allocation4 + $0x1b8] sm:$0xff] }
 0x364   : > { %v10999_v23 = vadd.f32 %v4715_v9, %v4491_v63  ;;  %v11001_v53 = vpop.f32.mrb[70].mxu0  ;;  %3584 = vst.msk [vmem:[#allocation4 + $0x2f0] sm:$0xff] %vm813_vm1, %v3999_v15  ;;  %v3240_v4 = vpop.permute.xlu1 %3239  ;;  %4578 = vmatprep.mubr.f32.mxu1 %v4281_v59  ;;  %v4280_v42 = vld [vmem:[#allocation4 + $0x1b0] sm:$0xff] }
 0x365   : > { %3957 = vst.msk [vmem:[#allocation4 + $0x1d0] sm:$0xff] %vm1199_vm3, %v3881_v62  ;;  %v11005_v8 = vpop.f32.mrb[71].mxu0  ;;  %3316 = vst.msk [vmem:[#allocation4 + $0x1c8] sm:$0xff] %vm1199_vm3, %v3240_v4  ;;  %3707 = vrot.lane.b32.xlu0 %v10914_v28, %s8366_s1  ;;  %4579 = vmatmul.mubr.f32.gmra.mrb[68].mxu1 %v4280_v42  ;;  %v11017_v33 = vld [vmem:[#allocation3 + $0x20f] sm:$0xff] }
 0x366   : > { %3067 = vrot.lane.b32.xlu1 %v10862_v16, %s8366_s1  ;;  %v4001_v9 = vld [vmem:[#allocation3 + $0x230] sm:$0xff] }
 0x367   : > { %v4073_v13 = vpop.permute.xlu0 %4072 }
 0x368   : > { %v11012_v40 = vpop.f32.mrb[72].mxu0  ;;  %4149 = vst.msk [vmem:[#allocation4 + $0x1d0] sm:$0xff] %vm1393_vm4, %v4073_v13  ;;  %v3432_v21 = vpop.permute.xlu1 %3431 }
 0x369   : > { %v11015_v14 = vpop.f32.mrb[73].mxu0  ;;  %3508 = vst.msk [vmem:[#allocation4 + $0x1c8] sm:$0xff] %vm1393_vm4, %v3432_v21  ;;  %3900 = vrot.lane.b32.xlu0 %v11017_v33, %s8365_s0 }
 0x36a   : > { %3259 = vrot.lane.b32.xlu1 %v10848_v46, %s8365_s0 }
 0x36b   : > { %v3690_v1 = vpop.permute.xlu0 %3689 }
 0x36c   : > { %v11024_v16 = vpop.f32.mrb[74].mxu0  ;;  %3765 = vst.msk [vmem:[#allocation4 + $0x1e8] sm:$0xff] %vm1006_vm2, %v3690_v1  ;;  %v3050_v38 = vpop.permute.xlu1 %3049 }
 0x36d   : > { %v4495_v60 = vpop.f32.mrb[34].mxu1  ;;  %3125 = vst.msk [vmem:[#allocation4 + $0x1e0] sm:$0xff] %vm1006_vm2, %v3050_v38  ;;  %v11029_v37 = vpop.f32.mrb[75].mxu0  ;;  %4092 = vrot.lane.b32.xlu0 %v3999_v15, %s8368_s2 }
 0x36e   : > { %v4496_v45 = vadd.f32 %v10982_v48, %v4495_v60  ;;  %v4497_v57 = vpop.f32.mrb[35].mxu1  ;;  %3451 = vrot.lane.b32.xlu1 %v10919_v34, %s8368_s2 }
 0x36f   : > { %v3883_v52 = vpop.permute.xlu0 %3882  ;;  %v4284_v17 = vld [vmem:[#allocation4 + $0x1d0] sm:$0xff] }
 0x370   : > { %v11035_v46 = vadd.f32 %v10956_v20, %v4496_v45  ;;  %3958 = vst.msk [vmem:[#allocation4 + $0x1e8] sm:$0xff] %vm1199_vm3, %v3883_v52  ;;  %v3242_v51 = vpop.permute.xlu1 %3241  ;;  %4583 = vmatprep.mubr.f32.mxu1 %v4284_v17  ;;  %v4283_v47 = vld [vmem:[#allocation4 + $0x1c8] sm:$0xff] }
 0x371   : > { %3317 = vst.msk [vmem:[#allocation4 + $0x1e0] sm:$0xff] %vm1199_vm3, %v3242_v51  ;;  %3709 = vrot.lane.b32.xlu0 %v4190_v36, %s8366_s1  ;;  %4584 = vmatmul.mubr.f32.gmra.mrb[70].mxu1 %v4283_v47 }
 0x372   : > { %3069 = vrot.lane.b32.xlu1 %v10888_v55, %s8366_s1 }
 0x373   : > { %v4075_v34 = vpop.permute.xlu0 %4074 }
 0x374   : > { %4150 = vst.msk [vmem:[#allocation4 + $0x1e8] sm:$0xff] %vm1393_vm4, %v4075_v34  ;;  %v3434_v43 = vpop.permute.xlu1 %3433 }
 0x375   : > { %3509 = vst.msk [vmem:[#allocation4 + $0x1e0] sm:$0xff] %vm1393_vm4, %v3434_v43  ;;  %3902 = vrot.lane.b32.xlu0 %v3808_v24, %s8365_s0 }
 0x376   : > { %3261 = vrot.lane.b32.xlu1 %v10912_v26, %s8365_s0 }
 0x377   : > { %v3692_v49 = vpop.permute.xlu0 %3691 }
 0x378   : > { %3766 = vst.msk [vmem:[#allocation4 + $0x200] sm:$0xff] %vm1006_vm2, %v3692_v49  ;;  %v3052_v54 = vpop.permute.xlu1 %3051  ;;  %v4500_v6 = vpop.f32.mrb[36].mxu1 }
 0x379   : > { %3126 = vst.msk [vmem:[#allocation4 + $0x1f8] sm:$0xff] %vm1006_vm2, %v3052_v54  ;;  %v4501_v55 = vadd.f32 %v10982_v48, %v4500_v6  ;;  %4094 = vrot.lane.b32.xlu0 %v4000_v31, %s8368_s2  ;;  %v4502_v10 = vpop.f32.mrb[37].mxu1 }
 0x37a   : > { %3453 = vrot.lane.b32.xlu1 %v10970_v50, %s8368_s2 }
 0x37b   : > { %v11054_v3 = vadd.f32 %v10968_v44, %v4501_v55  ;;  %v3885_v26 = vpop.permute.xlu0 %3884  ;;  %v4287_v35 = vld [vmem:[#allocation4 + $0x1e8] sm:$0xff] }
 0x37c   : > { %3959 = vst.msk [vmem:[#allocation4 + $0x200] sm:$0xff] %vm1199_vm3, %v3885_v26  ;;  %v3244_v30 = vpop.permute.xlu1 %3243  ;;  %4588 = vmatprep.mubr.f32.mxu1 %v4287_v35  ;;  %v4286_v58 = vld [vmem:[#allocation4 + $0x1e0] sm:$0xff] }
 0x37d   : > { %3318 = vst.msk [vmem:[#allocation4 + $0x1f8] sm:$0xff] %vm1199_vm3, %v3244_v30  ;;  %3711 = vrot.lane.b32.xlu0 %v10987_v61, %s8366_s1  ;;  %4589 = vmatmul.mubr.f32.gmra.mrb[72].mxu1 %v4286_v58 }
 0x37e   : > { %3071 = vrot.lane.b32.xlu1 %v10928_v11, %s8366_s1 }
 0x37f   : > { %v11062_v25 = vpop.f32.mrb[76].mxu0  ;;  %v4077_v20 = vpop.permute.xlu0 %4076 }
 0x380   : > { %4151 = vst.msk [vmem:[#allocation4 + $0x200] sm:$0xff] %vm1393_vm4, %v4077_v20  ;;  %v3436_v12 = vpop.permute.xlu1 %3435  ;;  %v11065_v2 = vpop.f32.mrb[77].mxu0 }
 0x381   : > { %3510 = vst.msk [vmem:[#allocation4 + $0x1f8] sm:$0xff] %vm1393_vm4, %v3436_v12  ;;  %3904 = vrot.lane.b32.xlu0 %v3809_v29, %s8365_s0 }
 0x382   : > { %3263 = vrot.lane.b32.xlu1 %v10914_v28, %s8365_s0 }
 0x383   : > { %v3694_v7 = vpop.permute.xlu0 %3693 }
 0x384   : > { %3767 = vst.msk [vmem:[#allocation4 + $0x218] sm:$0xff] %vm1006_vm2, %v3694_v7  ;;  %v3054_v11 = vpop.permute.xlu1 %3053  ;;  %v4505_v19 = vpop.f32.mrb[38].mxu1 }
 0x385   : > { %3127 = vst.msk [vmem:[#allocation4 + $0x210] sm:$0xff] %vm1006_vm2, %v3054_v11  ;;  %v4506_v22 = vadd.f32 %v10982_v48, %v4505_v19  ;;  %4096 = vrot.lane.b32.xlu0 %v4001_v9, %s8368_s2  ;;  %v4507_v44 = vpop.f32.mrb[39].mxu1 }
 0x386   : > { %3455 = vrot.lane.b32.xlu1 %v11017_v33, %s8368_s2 }
 0x387   : > { %v11078_v50 = vadd.f32 %v10965_v56, %v4506_v22  ;;  %v3887_v28 = vpop.permute.xlu0 %3886  ;;  %v4290_v0 = vld [vmem:[#allocation4 + $0x200] sm:$0xff] }
 0x388   : > { %3960 = vst.msk [vmem:[#allocation4 + $0x218] sm:$0xff] %vm1199_vm3, %v3887_v28  ;;  %v3246_v32 = vpop.permute.xlu1 %3245  ;;  %4593 = vmatprep.mubr.f32.mxu1 %v4290_v0  ;;  %v4289_v5 = vld [vmem:[#allocation4 + $0x1f8] sm:$0xff] }
 0x389   : > { %3319 = vst.msk [vmem:[#allocation4 + $0x210] sm:$0xff] %vm1199_vm3, %v3246_v32  ;;  %4594 = vmatmul.mubr.f32.gmra.mrb[74].mxu1 %v4289_v5 }
 0x38b   : > { %v4079_v36 = vpop.permute.xlu0 %4078 }
 0x38c   : > { %4152 = vst.msk [vmem:[#allocation4 + $0x218] sm:$0xff] %vm1393_vm4, %v4079_v36  ;;  %v3438_v61 = vpop.permute.xlu1 %3437 }
 0x38d   : > { %3511 = vst.msk [vmem:[#allocation4 + $0x210] sm:$0xff] %vm1393_vm4, %v3438_v61 }
 0x38f   : > { %v3696_v63 = vpop.permute.xlu0 %3695 }
 0x390   : > { %3768 = vst.msk [vmem:[#allocation4 + $0x230] sm:$0xff] %vm1006_vm2, %v3696_v63  ;;  %v3056_v56 = vpop.permute.xlu1 %3055  ;;  %v4510_v27 = vpop.f32.mrb[40].mxu1 }
 0x391   : > { %3128 = vst.msk [vmem:[#allocation4 + $0x228] sm:$0xff] %vm1006_vm2, %v3056_v56  ;;  %v4511_v15 = vadd.f32 %v10982_v48, %v4510_v27  ;;  %v4512_v62 = vpop.f32.mrb[41].mxu1 }
 0x393   : > { %v11088_v59 = vadd.f32 %v10991_v18, %v4511_v15  ;;  %v3889_v4 = vpop.permute.xlu0 %3888  ;;  %v4293_v42 = vld [vmem:[#allocation4 + $0x218] sm:$0xff] }
 0x394   : > { %3961 = vst.msk [vmem:[#allocation4 + $0x230] sm:$0xff] %vm1199_vm3, %v3889_v4  ;;  %v3248_v13 = vpop.permute.xlu1 %3247  ;;  %4598 = vmatprep.mubr.f32.mxu1 %v4293_v42  ;;  %v4292_v21 = vld [vmem:[#allocation4 + $0x210] sm:$0xff] }
 0x395   : > { %3320 = vst.msk [vmem:[#allocation4 + $0x228] sm:$0xff] %vm1199_vm3, %v3248_v13  ;;  %4599 = vmatmul.mubr.f32.gmra.mrb[76].mxu1 %v4292_v21 }
 0x397   : > { %v11092_v33 = vpop.f32.mrb[78].mxu0  ;;  %v4081_v1 = vpop.permute.xlu0 %4080 }
 0x398   : > { %4153 = vst.msk [vmem:[#allocation4 + $0x230] sm:$0xff] %vm1393_vm4, %v4081_v1  ;;  %v3440_v38 = vpop.permute.xlu1 %3439  ;;  %v11095_v60 = vpop.f32.mrb[79].mxu0 }
 0x399   : > { %3512 = vst.msk [vmem:[#allocation4 + $0x228] sm:$0xff] %vm1393_vm4, %v3440_v38 }
 0x39b   : > { %v3698_v18 = vpop.permute.xlu0 %3697 }
 0x39c   : > { %3769 = vst.msk [vmem:[#allocation4 + $0x248] sm:$0xff] %vm1006_vm2, %v3698_v18  ;;  %v3058_v45 = vpop.permute.xlu1 %3057  ;;  %v4515_v57 = vpop.f32.mrb[42].mxu1 }
 0x39d   : > { %3129 = vst.msk [vmem:[#allocation4 + $0x240] sm:$0xff] %vm1006_vm2, %v3058_v45  ;;  %v4516_v52 = vadd.f32 %v10982_v48, %v4515_v57  ;;  %v4517_v17 = vpop.f32.mrb[43].mxu1 }
 0x39f   : > { %v11102_v51 = vadd.f32 %v10984_v41, %v4516_v52  ;;  %v3891_v47 = vpop.permute.xlu0 %3890  ;;  %v4296_v24 = vld [vmem:[#allocation4 + $0x230] sm:$0xff] }
 0x3a0   : > { %3962 = vst.msk [vmem:[#allocation4 + $0x248] sm:$0xff] %vm1199_vm3, %v3891_v47  ;;  %v3250_v34 = vpop.permute.xlu1 %3249  ;;  %4603 = vmatprep.mubr.f32.mxu1 %v4296_v24  ;;  %v4295_v43 = vld [vmem:[#allocation4 + $0x228] sm:$0xff] }
 0x3a1   : > { %3321 = vst.msk [vmem:[#allocation4 + $0x240] sm:$0xff] %vm1199_vm3, %v3250_v34  ;;  %4604 = vmatmul.mubr.f32.gmra.mrb[78].mxu1 %v4295_v43 }
 0x3a3   : > { %v4083_v31 = vpop.permute.xlu0 %4082 }
 0x3a4   : > { %4154 = vst.msk [vmem:[#allocation4 + $0x248] sm:$0xff] %vm1393_vm4, %v4083_v31  ;;  %v3442_v49 = vpop.permute.xlu1 %3441 }
 0x3a5   : > { %3513 = vst.msk [vmem:[#allocation4 + $0x240] sm:$0xff] %vm1393_vm4, %v3442_v49 }
 0x3a7   : > { %v3700_v54 = vpop.permute.xlu0 %3699 }
 0x3a8   : > { %3770 = vst.msk [vmem:[#allocation4 + $0x260] sm:$0xff] %vm1006_vm2, %v3700_v54  ;;  %v3060_v41 = vpop.permute.xlu1 %3059  ;;  %v4520_v6 = vpop.f32.mrb[44].mxu1 }
 0x3a9   : > { %3130 = vst.msk [vmem:[#allocation4 + $0x258] sm:$0xff] %vm1006_vm2, %v3060_v41  ;;  %v4521_v55 = vadd.f32 %v10982_v48, %v4520_v6  ;;  %v4522_v10 = vpop.f32.mrb[45].mxu1 }
 0x3ab   : > { %v11112_v26 = vadd.f32 %v11005_v8, %v4521_v55  ;;  %v3893_v35 = vpop.permute.xlu0 %3892  ;;  %v4299_v30 = vld [vmem:[#allocation4 + $0x248] sm:$0xff] }
 0x3ac   : > { %3963 = vst.msk [vmem:[#allocation4 + $0x260] sm:$0xff] %vm1199_vm3, %v3893_v35  ;;  %v3252_v58 = vpop.permute.xlu1 %3251  ;;  %4608 = vmatprep.mubr.f32.mxu1 %v4299_v30  ;;  %v4298_v29 = vld [vmem:[#allocation4 + $0x240] sm:$0xff] }
 0x3ad   : > { %3322 = vst.msk [vmem:[#allocation4 + $0x258] sm:$0xff] %vm1199_vm3, %v3252_v58  ;;  %4609 = vmatmul.mubr.f32.gmra.mrb[80].mxu1 %v4298_v29 }
 0x3af   : > { %v11116_v20 = vpop.f32.mrb[80].mxu0  ;;  %v4085_v12 = vpop.permute.xlu0 %4084 }
 0x3b0   : > { %4155 = vst.msk [vmem:[#allocation4 + $0x260] sm:$0xff] %vm1393_vm4, %v4085_v12  ;;  %v3444_v9 = vpop.permute.xlu1 %3443  ;;  %v11119_v7 = vpop.f32.mrb[81].mxu0 }
 0x3b1   : > { %3514 = vst.msk [vmem:[#allocation4 + $0x258] sm:$0xff] %vm1393_vm4, %v3444_v9 }
 0x3b3   : > { %v3702_v8 = vpop.permute.xlu0 %3701 }
 0x3b4   : > { %3771 = vst.msk [vmem:[#allocation4 + $0x278] sm:$0xff] %vm1006_vm2, %v3702_v8  ;;  %v3062_v11 = vpop.permute.xlu1 %3061  ;;  %v4525_v19 = vpop.f32.mrb[46].mxu1 }
 0x3b5   : > { %3131 = vst.msk [vmem:[#allocation4 + $0x270] sm:$0xff] %vm1006_vm2, %v3062_v11  ;;  %v4526_v22 = vadd.f32 %v10982_v48, %v4525_v19  ;;  %v4527_v44 = vpop.f32.mrb[47].mxu1 }
 0x3b7   : > { %v11126_v28 = vadd.f32 %v11001_v53, %v4526_v22  ;;  %v3895_v0 = vpop.permute.xlu0 %3894  ;;  %v4302_v32 = vld [vmem:[#allocation4 + $0x260] sm:$0xff] }
 0x3b8   : > { %3964 = vst.msk [vmem:[#allocation4 + $0x278] sm:$0xff] %vm1199_vm3, %v3895_v0  ;;  %v3254_v5 = vpop.permute.xlu1 %3253  ;;  %4613 = vmatprep.mubr.f32.mxu1 %v4302_v32  ;;  %v4301_v36 = vld [vmem:[#allocation4 + $0x258] sm:$0xff] }
 0x3b9   : > { %3323 = vst.msk [vmem:[#allocation4 + $0x270] sm:$0xff] %vm1199_vm3, %v3254_v5  ;;  %4614 = vmatmul.mubr.f32.gmra.mrb[82].mxu1 %v4301_v36 }
 0x3bb   : > { %v4087_v61 = vpop.permute.xlu0 %4086 }
 0x3bc   : > { %4156 = vst.msk [vmem:[#allocation4 + $0x278] sm:$0xff] %vm1393_vm4, %v4087_v61  ;;  %v3446_v63 = vpop.permute.xlu1 %3445 }
 0x3bd   : > { %3515 = vst.msk [vmem:[#allocation4 + $0x270] sm:$0xff] %vm1393_vm4, %v3446_v63 }
 0x3bf   : > { %v3704_v56 = vpop.permute.xlu0 %3703 }
 0x3c0   : > { %3772 = vst.msk [vmem:[#allocation4 + $0x290] sm:$0xff] %vm1006_vm2, %v3704_v56  ;;  %v3064_v53 = vpop.permute.xlu1 %3063  ;;  %v4530_v27 = vpop.f32.mrb[48].mxu1 }
 0x3c1   : > { %3132 = vst.msk [vmem:[#allocation4 + $0x288] sm:$0xff] %vm1006_vm2, %v3064_v53  ;;  %v4531_v15 = vadd.f32 %v10982_v48, %v4530_v27  ;;  %v4532_v62 = vpop.f32.mrb[49].mxu1 }
 0x3c3   : > { %v11136_v4 = vadd.f32 %v11015_v14, %v4531_v15  ;;  %v3897_v42 = vpop.permute.xlu0 %3896  ;;  %v4305_v13 = vld [vmem:[#allocation4 + $0x278] sm:$0xff] }
 0x3c4   : > { %3965 = vst.msk [vmem:[#allocation4 + $0x290] sm:$0xff] %vm1199_vm3, %v3897_v42  ;;  %v3256_v21 = vpop.permute.xlu1 %3255  ;;  %4618 = vmatprep.mubr.f32.mxu1 %v4305_v13  ;;  %v4304_v1 = vld [vmem:[#allocation4 + $0x270] sm:$0xff] }
 0x3c5   : > { %3324 = vst.msk [vmem:[#allocation4 + $0x288] sm:$0xff] %vm1199_vm3, %v3256_v21  ;;  %4619 = vmatmul.mubr.f32.gmra.mrb[84].mxu1 %v4304_v1 }
 0x3c7   : > { %v11140_v38 = vpop.f32.mrb[82].mxu0  ;;  %v4089_v18 = vpop.permute.xlu0 %4088 }
 0x3c8   : > { %v11142_v45 = vpop.f32.mrb[83].mxu0  ;;  %4157 = vst.msk [vmem:[#allocation4 + $0x290] sm:$0xff] %vm1393_vm4, %v4089_v18  ;;  %v3448_v57 = vpop.permute.xlu1 %3447 }
 0x3c9   : > { %3516 = vst.msk [vmem:[#allocation4 + $0x288] sm:$0xff] %vm1393_vm4, %v3448_v57 }
 0x3cb   : > { %v3706_v14 = vpop.permute.xlu0 %3705 }
 0x3cc   : > { %3773 = vst.msk [vmem:[#allocation4 + $0x2a8] sm:$0xff] %vm1006_vm2, %v3706_v14  ;;  %v3066_v52 = vpop.permute.xlu1 %3065 }
 0x3cd   : > { %v4535_v17 = vpop.f32.mrb[50].mxu1  ;;  %3133 = vst.msk [vmem:[#allocation4 + $0x2a0] sm:$0xff] %vm1006_vm2, %v3066_v52 }
 0x3ce   : > { %v4536_v47 = vadd.f32 %v10982_v48, %v4535_v17  ;;  %v4537_v24 = vpop.f32.mrb[51].mxu1 }
 0x3cf   : > { %v3899_v43 = vpop.permute.xlu0 %3898  ;;  %v4308_v31 = vld [vmem:[#allocation4 + $0x290] sm:$0xff] }
 0x3d0   : > { %v11150_v34 = vadd.f32 %v11012_v40, %v4536_v47  ;;  %3966 = vst.msk [vmem:[#allocation4 + $0x2a8] sm:$0xff] %vm1199_vm3, %v3899_v43  ;;  %v3258_v49 = vpop.permute.xlu1 %3257  ;;  %4623 = vmatprep.mubr.f32.mxu1 %v4308_v31  ;;  %v4307_v54 = vld [vmem:[#allocation4 + $0x288] sm:$0xff] }
 0x3d1   : > { %3325 = vst.msk [vmem:[#allocation4 + $0x2a0] sm:$0xff] %vm1199_vm3, %v3258_v49  ;;  %4624 = vmatmul.mubr.f32.gmra.mrb[86].mxu1 %v4307_v54  ;;  %v4288_v54 = vld [vmem:[#allocation4 + $0x1f0] sm:$0xff] }
 0x3d3   : > { %v4091_v41 = vpop.permute.xlu0 %4090 }
 0x3d4   : > { %4158 = vst.msk [vmem:[#allocation4 + $0x2a8] sm:$0xff] %vm1393_vm4, %v4091_v41  ;;  %v3450_v6 = vpop.permute.xlu1 %3449  ;;  %v4291_v41 = vld [vmem:[#allocation4 + $0x208] sm:$0xff] }
 0x3d5   : > { %3517 = vst.msk [vmem:[#allocation4 + $0x2a0] sm:$0xff] %vm1393_vm4, %v3450_v6  ;;  %v4294_v6 = vld [vmem:[#allocation4 + $0x220] sm:$0xff] }
 0x3d7   : > { %v3708_v55 = vpop.permute.xlu0 %3707 }
 0x3d8   : > { %3774 = vst.msk [vmem:[#allocation4 + $0x2c0] sm:$0xff] %vm1006_vm2, %v3708_v55  ;;  %v3068_v40 = vpop.permute.xlu1 %3067  ;;  %v4540_v10 = vpop.f32.mrb[52].mxu1 }
 0x3d9   : > { %3134 = vst.msk [vmem:[#allocation4 + $0x2b8] sm:$0xff] %vm1006_vm2, %v3068_v40  ;;  %v4541_v35 = vadd.f32 %v10982_v48, %v4540_v10  ;;  %v4542_v30 = vpop.f32.mrb[53].mxu1  ;;  %v4297_v40 = vld [vmem:[#allocation4 + $0x238] sm:$0xff] }
 0x3db   : > { %v11160_v58 = vadd.f32 %v11029_v37, %v4541_v35  ;;  %v3901_v29 = vpop.permute.xlu0 %3900  ;;  %v4311_v12 = vld [vmem:[#allocation4 + $0x2a8] sm:$0xff] }
 0x3dc   : > { %3967 = vst.msk [vmem:[#allocation4 + $0x2c0] sm:$0xff] %vm1199_vm3, %v3901_v29  ;;  %v3260_v9 = vpop.permute.xlu1 %3259  ;;  %4628 = vmatprep.mubr.f32.mxu1 %v4311_v12  ;;  %v4310_v8 = vld [vmem:[#allocation4 + $0x2a0] sm:$0xff]  ;;  %v4303_v29 = vld [vmem:[#allocation4 + $0x268] sm:$0xff] }
 0x3dd   : > { %3326 = vst.msk [vmem:[#allocation4 + $0x2b8] sm:$0xff] %vm1199_vm3, %v3260_v9  ;;  %4629 = vmatmul.mubr.f32.gmra.mrb[88].mxu1 %v4310_v8  ;;  %v4306_v12 = vld [vmem:[#allocation4 + $0x280] sm:$0xff]  ;;  %v4309_v9 = vld [vmem:[#allocation4 + $0x298] sm:$0xff]  ;;  %v4312_v8 = vld [vmem:[#allocation4 + $0x2b0] sm:$0xff] }
 0x3df   : > { %v4093_v11 = vpop.permute.xlu0 %4092 }
 0x3e0   : > { %4159 = vst.msk [vmem:[#allocation4 + $0x2c0] sm:$0xff] %vm1393_vm4, %v4093_v11  ;;  %v3452_v19 = vpop.permute.xlu1 %3451  ;;  %v4318_v11 = vld [vmem:[#allocation4 + $0x2e0] sm:$0xff] }
 0x3e1   : > { %3518 = vst.msk [vmem:[#allocation4 + $0x2b8] sm:$0xff] %vm1393_vm4, %v3452_v19 }
 0x3e3   : > { %v3710_v22 = vpop.permute.xlu0 %3709 }
 0x3e4   : > { %3775 = vst.msk [vmem:[#allocation4 + $0x2d8] sm:$0xff] %vm1006_vm2, %v3710_v22  ;;  %v3070_v37 = vpop.permute.xlu1 %3069  ;;  %v4545_v44 = vpop.f32.mrb[54].mxu1  ;;  %v4315_v22 = vld [vmem:[#allocation4 + $0x2c8] sm:$0xff] }
 0x3e5   : > { %3135 = vst.msk [vmem:[#allocation4 + $0x2d0] sm:$0xff] %vm1006_vm2, %v3070_v37  ;;  %v4546_v0 = vadd.f32 %v10982_v48, %v4545_v44  ;;  %v4547_v32 = vpop.f32.mrb[55].mxu1 }
 0x3e7   : > { %v11170_v5 = vadd.f32 %v11024_v16, %v4546_v0  ;;  %v3903_v36 = vpop.permute.xlu0 %3902  ;;  %v4314_v61 = vld [vmem:[#allocation4 + $0x2c0] sm:$0xff] }
 0x3e8   : > { %3968 = vst.msk [vmem:[#allocation4 + $0x2d8] sm:$0xff] %vm1199_vm3, %v3903_v36  ;;  %v3262_v63 = vpop.permute.xlu1 %3261  ;;  %4633 = vmatprep.mubr.f32.mxu1 %v4314_v61  ;;  %v4313_v56 = vld [vmem:[#allocation4 + $0x2b8] sm:$0xff] }
 0x3e9   : > { %3327 = vst.msk [vmem:[#allocation4 + $0x2d0] sm:$0xff] %vm1199_vm3, %v3262_v63  ;;  %4634 = vmatmul.mubr.f32.gmra.mrb[90].mxu1 %v4313_v56 }
 0x3eb   : > { %v4095_v53 = vpop.permute.xlu0 %4094 }
 0x3ec   : > { %4160 = vst.msk [vmem:[#allocation4 + $0x2d8] sm:$0xff] %vm1393_vm4, %v4095_v53  ;;  %v3454_v27 = vpop.permute.xlu1 %3453 }
 0x3ed   : > { %3519 = vst.msk [vmem:[#allocation4 + $0x2d0] sm:$0xff] %vm1393_vm4, %v3454_v27 }
 0x3ef   : > { %v3712_v15 = vpop.permute.xlu0 %3711 }
 0x3f0   : > { %3776 = vst.msk [vmem:[#allocation4 + $0x2f0] sm:$0xff] %vm1006_vm2, %v3712_v15  ;;  %v3072_v16 = vpop.permute.xlu1 %3071 }
 0x3f1   : > { %v4550_v62 = vpop.f32.mrb[56].mxu1  ;;  %3136 = vst.msk [vmem:[#allocation4 + $0x2e8] sm:$0xff] %vm1006_vm2, %v3072_v16 }
 0x3f2   : > { %v4551_v42 = vadd.f32 %v10982_v48, %v4550_v62  ;;  %v4552_v13 = vpop.f32.mrb[57].mxu1 }
 0x3f3   : > { %v3905_v1 = vpop.permute.xlu0 %3904  ;;  %v4317_v18 = vld [vmem:[#allocation4 + $0x2d8] sm:$0xff] }
 0x3f4   : > { %v11180_v21 = vadd.f32 %v11065_v2, %v4551_v42  ;;  %3969 = vst.msk [vmem:[#allocation4 + $0x2f0] sm:$0xff] %vm1199_vm3, %v3905_v1  ;;  %v3264_v57 = vpop.permute.xlu1 %3263  ;;  %4638 = vmatprep.mubr.f32.mxu1 %v4317_v18  ;;  %v4316_v14 = vld [vmem:[#allocation4 + $0x2d0] sm:$0xff] }
 0x3f5   : > { %3328 = vst.msk [vmem:[#allocation4 + $0x2e8] sm:$0xff] %vm1199_vm3, %v3264_v57  ;;  %4639 = vmatmul.mubr.f32.gmra.mrb[92].mxu1 %v4316_v14 }
 0x3f7   : > { %v4097_v52 = vpop.permute.xlu0 %4096 }
 0x3f8   : > { %4161 = vst.msk [vmem:[#allocation4 + $0x2f0] sm:$0xff] %vm1393_vm4, %v4097_v52  ;;  %v3456_v17 = vpop.permute.xlu1 %3455 }
 0x3f9   : > { %3520 = vst.msk [vmem:[#allocation4 + $0x2e8] sm:$0xff] %vm1393_vm4, %v3456_v17 }
 0x3fc   : > { %v4555_v47 = vpop.f32.mrb[58].mxu1 }
 0x3fd   : > { %v4556_v2 = vadd.f32 %v10982_v48, %v4555_v47  ;;  %v4557_v24 = vpop.f32.mrb[59].mxu1 }
 0x3ff   : > { %v11188_v43 = vadd.f32 %v11062_v25, %v4556_v2  ;;  %v4320_v31 = vld [vmem:[#allocation4 + $0x2f0] sm:$0xff]  ;;  %v4946_v2 = vld [vmem:[%s8550_s19 + $0x8] sm:$0xff] }
 0x400   : > { %4643 = vmatprep.mubr.f32.mxu1 %v4320_v31  ;;  %v4319_v49 = vld [vmem:[#allocation4 + $0x2e8] sm:$0xff]  ;;  %v4300_v25 = vld [vmem:[#allocation4 + $0x250] sm:$0xff] }
 0x401   : > { %4644 = vmatmul.mubr.f32.gmra.mrb[94].mxu1 %v4319_v49 }
 0x402   : > { %7877 = vmatprep.mubr.msk.f32.mxu1 %vm813_vm1, %v4288_v54  ;;  %v4947_v54 = vld [vmem:[%s8550_s19 + $0x10] sm:$0xff] }
 0x405   : > { %7878 = vmatmul.mubr.msk.f32.vlgmr.msra.gmra.mrb[96].mxu1 %vm813_vm1, %v4291_v41  ;;  %v4948_v41 = vld [vmem:[%s8550_s19 + $0x18] sm:$0xff] }
 0x406   : > { %7880 = vmatprep.mubr.msk.f32.mxu1 %vm813_vm1, %v4294_v6 }
 0x409   : > { %v4560_v55 = vpop.f32.mrb[60].mxu1  ;;  %7881 = vmatmul.mubr.msk.f32.gmra.mrb[98].mxu1 %vm813_vm1, %v4297_v40  ;;  %v8370_v40 = vmov 0.0  }
 0x40a   : > { %v4561_v10 = vadd.f32 %v10982_v48, %v4560_v55  ;;  %v4562_v35 = vpop.f32.mrb[61].mxu1  ;;  %7883 = vmatprep.mubr.msk.f32.mxu1 %vm813_vm1, %v4300_v25  ;;  %v8083_v55 = vpack.c.bf16 %v4948_v41, %v4947_v54  ;;  %v4897_v41 = vsel %vm813_vm1, %v11180_v21, 0.0 }
 0x40c   : > { %v11197_v30 = vadd.f32 %v11095_v60, %v4561_v10  ;;  %v4321_v60 = vld [vmem:[#allocation4 + $0x2f8] sm:$0xff] }
 0x40d   : > { %7884 = vmatmul.mubr.msk.f32.gmra.mrb[100].mxu1 %vm813_vm1, %v4303_v29 }
 0x40e   : > { %7886 = vmatprep.mubr.msk.f32.mxu1 %vm813_vm1, %v4306_v12 }
 0x411   : > { %7887 = vmatmul.mubr.msk.f32.gmra.mrb[102].mxu1 %vm813_vm1, %v4309_v9 }
 0x412   : > { %7889 = vmatprep.mubr.msk.f32.mxu1 %vm813_vm1, %v4312_v8 }
 0x414   : > { %v4565_v19 = vpop.f32.mrb[62].mxu1 }
 0x415   : > { %v4566_v37 = vadd.f32 %v10982_v48, %v4565_v19  ;;  %v4567_v44 = vpop.f32.mrb[63].mxu1  ;;  %7890 = vmatmul.mubr.msk.f32.gmra.mrb[104].mxu1 %vm813_vm1, %v4315_v22  ;;  %v4874_v19 = vsel %vm813_vm1, %v10999_v23, 0.0  ;;  %v4877_v22 = vsel %vm813_vm1, %v11054_v3, 0.0 }
 0x416   : > { %7892 = vmatprep.mubr.msk.f32.mxu1 %vm813_vm1, %v4318_v11  ;;  %v4875_v11 = vsel %vm813_vm1, %v11035_v46, 0.0  ;;  %v4879_v44 = vsel %vm813_vm1, %v11078_v50, 0.0 }
 0x417   : > { %v11207_v0 = vadd.f32 %v11092_v33, %v4566_v37  ;;  %v4876_v37 = vadd.f32 %v4875_v11, %v4874_v19 }
 0x419   : > { %7893 = vmatmul.mubr.msk.f32.gmra.mrb[106].mxu1 %vm813_vm1, %v4321_v60  ;;  %v4878_v60 = vadd.f32 %v4877_v22, %v4876_v37 }
 0x41a   : > { %7903 = vmatprep.mubr.msk.f32.mxu1 %vm8369_vm5, %v8370_v40 }
 0x421   : > { %v4570_v32 = vpop.f32.mrb[64].mxu1 }
 0x422   : > { %v4571_v36 = vadd.f32 %v10982_v48, %v4570_v32  ;;  %v4572_v61 = vpop.f32.mrb[65].mxu1  ;;  %v4881_v32 = vsel %vm813_vm1, %v11088_v59, 0.0 }
 0x423   : > { %v4883_v61 = vsel %vm813_vm1, %v11102_v51, 0.0 }
 0x424   : > { %v11212_v63 = vadd.f32 %v11119_v7, %v4571_v36  ;;  %v4880_v36 = vadd.f32 %v4879_v44, %v4878_v60 }
 0x426   : > { %v4905_v19 = vsel %vm813_vm1, %v11212_v63, 0.0 }
 0x42c   : > { %v4575_v56 = vpop.f32.mrb[66].mxu1 }
 0x42d   : > { %v4576_v53 = vadd.f32 %v10982_v48, %v4575_v56  ;;  %v4577_v27 = vpop.f32.mrb[67].mxu1 }
 0x42f   : > { %v11216_v15 = vadd.f32 %v11116_v20, %v4576_v53  ;;  %v4882_v53 = vadd.f32 %v4881_v32, %v4880_v36 }
 0x431   : > { %v4907_v37 = vsel %vm813_vm1, %v11216_v15, 0.0 }
 0x438   : > { %v4580_v33 = vpop.f32.mrb[68].mxu1 }
 0x439   : > { %v4581_v16 = vadd.f32 %v10982_v48, %v4580_v33  ;;  %v4582_v62 = vpop.f32.mrb[69].mxu1  ;;  %v4885_v33 = vsel %vm813_vm1, %v11112_v26, 0.0 }
 0x43a   : > { %v4887_v62 = vsel %vm813_vm1, %v11126_v28, 0.0 }
 0x43b   : > { %v11220_v42 = vadd.f32 %v11142_v45, %v4581_v16  ;;  %v4945_v45 = vld [vmem:[%s8550_s19] sm:$0xff]  ;;  %v4884_v16 = vadd.f32 %v4883_v61, %v4882_v53 }
 0x43c   : > { %v8080_v24 = vpack.c.bf16 %v4946_v2, %v4945_v45  ;;  %v4895_v2 = vsel %vm813_vm1, %v11170_v5, 0.0 }
 0x43d   : > { %v4909_v36 = vsel %vm813_vm1, %v11220_v42, 0.0 }
 0x43e   : > { %8081 = vmatpush3.bf16.msra.mxu1 %v8080_v24 }
 0x43f   : > { %8082 = vmatprep.subr.bf16.mxu1 %v8367_v39 }
 0x442   : > { %8084 = vmatpush3.bf16.msra.mxu1 %v8083_v55  ;;  %v4899_v55 = vsel %vm813_vm1, %v11188_v43, 0.0 }
 0x443   : > { %7906 = vmatprep.subr.mxu1 %v8370_v40 }
 0x444   : > { %v4585_v13 = vpop.f32.mrb[70].mxu1 }
 0x445   : > { %v4586_v7 = vadd.f32 %v10982_v48, %v4585_v13  ;;  %v4587_v1 = vpop.f32.mrb[71].mxu1  ;;  %v4886_v13 = vadd.f32 %v4885_v33, %v4884_v16 }
 0x447   : > { %v11224_v18 = vadd.f32 %v11140_v38, %v4586_v7  ;;  %v4889_v7 = vsel %vm813_vm1, %v11136_v4, 0.0  ;;  %v4888_v1 = vadd.f32 %v4887_v62, %v4886_v13 }
 0x450   : > { %v11226_v57 = vpop.f32.mrb[72].mxu1 }
 0x451   : > { %v4592_v20 = vpop.f32.mrb[73].mxu1  ;;  %v4591_v33 = vadd.f32 %v10982_v48, %v11226_v57 }
 0x452   : > { %v4891_v20 = vsel %vm813_vm1, %v11150_v34, 0.0 }
 0x45c   : > { %v11228_v14 = vpop.f32.mrb[74].mxu1 }
 0x45d   : > { %v4597_v52 = vpop.f32.mrb[75].mxu1  ;;  %v4596_v53 = vadd.f32 %v10982_v48, %v11228_v14 }
 0x45e   : > { %v4890_v52 = vadd.f32 %v4889_v7, %v4888_v1 }
 0x460   : > { %v4892_v45 = vadd.f32 %v4891_v20, %v4890_v52 }
 0x468   : > { %v11230_v17 = vpop.f32.mrb[76].mxu1 }
 0x469   : > { %v4602_v47 = vpop.f32.mrb[77].mxu1  ;;  %v4601_v14 = vadd.f32 %v10982_v48, %v11230_v17 }
 0x46a   : > { %v4893_v47 = vsel %vm813_vm1, %v11160_v58, 0.0 }
 0x474   : > { %v11235_v31 = vpop.f32.mrb[78].mxu1 }
 0x475   : > { %v4607_v38 = vpop.f32.mrb[79].mxu1  ;;  %v4606_v20 = vadd.f32 %v10982_v48, %v11235_v31 }
 0x476   : > { %v4894_v38 = vadd.f32 %v4893_v47, %v4892_v45 }
 0x480   : > { %v11237_v49 = vpop.f32.mrb[80].mxu1 }
 0x481   : > { %v4612_v6 = vpop.f32.mrb[81].mxu1  ;;  %v4611_v17 = vadd.f32 %v10982_v48, %v11237_v49 }
 0x482   : > { %v4896_v6 = vadd.f32 %v4895_v2, %v4894_v38 }
 0x48c   : > { %v11244_v10 = vpop.f32.mrb[82].mxu1 }
 0x48d   : > { %v4617_v39 = vpop.f32.mrb[83].mxu1  ;;  %v4616_v31 = vadd.f32 %v10982_v48, %v11244_v10 }
 0x48e   : > { %v4898_v39 = vadd.f32 %v4897_v41, %v4896_v6 }
 0x498   : > { %v11246_v35 = vpop.f32.mrb[84].mxu1 }
 0x499   : > { %v4622_v25 = vpop.f32.mrb[85].mxu1  ;;  %v4621_v49 = vadd.f32 %v10982_v48, %v11246_v35 }
 0x49a   : > { %v4901_v25 = vsel %vm813_vm1, %v11197_v30, 0.0 }
 0x4a4   : > { %v11248_v29 = vpop.f32.mrb[86].mxu1 }
 0x4a5   : > { %v4627_v12 = vpop.f32.mrb[87].mxu1  ;;  %v4626_v10 = vadd.f32 %v10982_v48, %v11248_v29 }
 0x4a6   : > { %v4900_v12 = vadd.f32 %v4899_v55, %v4898_v39 }
 0x4a8   : > { %v4902_v11 = vadd.f32 %v4901_v25, %v4900_v12 }
 0x4b0   : > { %v11250_v9 = vpop.f32.mrb[88].mxu1 }
 0x4b1   : > { %v4632_v8 = vpop.f32.mrb[89].mxu1  ;;  %v4631_v35 = vadd.f32 %v10982_v48, %v11250_v9 }
 0x4b2   : > { %v4903_v8 = vsel %vm813_vm1, %v11207_v0, 0.0 }
 0x4b3   : > { %v4904_v22 = vadd.f32 %v4903_v8, %v4902_v11 }
 0x4b5   : > { %v4906_v60 = vadd.f32 %v4905_v19, %v4904_v22 }
 0x4b7   : > { %v4908_v61 = vadd.f32 %v4907_v37, %v4906_v60 }
 0x4b9   : > { %v4910_v62 = vadd.f32 %v4909_v36, %v4908_v61 }
 0x4bc   : > { %v11264_v56 = vpop.f32.mrb[90].mxu1 }
 0x4bd   : > { %v4637_v27 = vpop.f32.mrb[91].mxu1  ;;  %v4636_v29 = vadd.f32 %v10982_v48, %v11264_v56 }
 0x4be   : > { %v4911_v27 = vsel %vm813_vm1, %v11224_v18, 0.0 }
 0x4bf   : > { %v4912_v52 = vadd.f32 %v4911_v27, %v4910_v62 }
 0x4c8   : > { %v11278_v24 = vpop.f32.mrb[92].mxu1 }
 0x4c9   : > { %v4642_v54 = vpop.f32.mrb[93].mxu1 }
 0x4d4   : > { %v4645_v44 = vpop.f32.mrb[94].mxu1 }
 0x4d5   : > { %v4647_v32 = vpop.f32.mrb[95].mxu1 }
 0x4d8   : > { %v7879_v16 = vpop.f32.mrb[96].mxu1 }
 0x4d9   : > { %v11300_v13 = vadd.f32 %v7879_v16, %v4596_v53  ;;  %v4815_v7 = vpop.f32.mrb[97].mxu1 }
 0x4da   : > { %v11302_v1 = vadd.f32 %v4815_v7, %v4591_v33 }
 0x4db   : > { %v4915_v54 = vsel %vm813_vm1, %v11300_v13, 0.0 }
 0x4dc   : > { %v4913_v47 = vsel %vm813_vm1, %v11302_v1, 0.0  ;;  %v7882_v45 = vpop.f32.mrb[98].mxu1 }
 0x4dd   : > { %v4914_v2 = vadd.f32 %v4913_v47, %v4912_v52  ;;  %v11310_v57 = vadd.f32 %v7882_v45, %v4606_v20  ;;  %v4825_v38 = vpop.f32.mrb[99].mxu1  ;;  %v4646_v45 = vadd.f32 %v10982_v48, %v4645_v44 }
 0x4de   : > { %v11314_v41 = vadd.f32 %v4825_v38, %v4601_v14 }
 0x4df   : > { %v4916_v6 = vadd.f32 %v4915_v54, %v4914_v2  ;;  %v4919_v11 = vsel %vm813_vm1, %v11310_v57, 0.0  ;;  %v4641_v2 = vadd.f32 %v10982_v48, %v11278_v24 }
 0x4e0   : > { %v4917_v55 = vsel %vm813_vm1, %v11314_v41, 0.0  ;;  %v7885_v39 = vpop.f32.mrb[100].mxu1 }
 0x4e1   : > { %v4918_v25 = vadd.f32 %v4917_v55, %v4916_v6  ;;  %v11322_v12 = vadd.f32 %v7885_v39, %v4616_v31  ;;  %v4835_v8 = vpop.f32.mrb[101].mxu1 }
 0x4e2   : > { %v11326_v19 = vadd.f32 %v4835_v8, %v4611_v17 }
 0x4e3   : > { %v4920_v22 = vadd.f32 %v4919_v11, %v4918_v25  ;;  %v4923_v53 = vsel %vm813_vm1, %v11322_v12, 0.0 }
 0x4e4   : > { %v4921_v37 = vsel %vm813_vm1, %v11326_v19, 0.0  ;;  %v7888_v60 = vpop.f32.mrb[102].mxu1 }
 0x4e5   : > { %v4922_v32 = vadd.f32 %v4921_v37, %v4920_v22  ;;  %v11334_v36 = vadd.f32 %v7888_v60, %v4626_v10  ;;  %v4845_v61 = vpop.f32.mrb[103].mxu1 }
 0x4e6   : > { %v11338_v27 = vadd.f32 %v4845_v61, %v4621_v49  ;;  %v4949_v61 = vld [vmem:[%s522_s22] sm:$0x1] }
 0x4e7   : > { %v4924_v33 = vadd.f32 %v4923_v53, %v4922_v32  ;;  %v4927_v14 = vsel %vm813_vm1, %v11334_v36, 0.0  ;;  %v5024_v32 = vld [vmem:[%s8556_s24] sm:$0xf] }
 0x4e8   : > { %v4925_v16 = vsel %vm813_vm1, %v11338_v27, 0.0  ;;  %v7891_v62 = vpop.f32.mrb[104].mxu1 }
 0x4e9   : > { %v4926_v7 = vadd.f32 %v4925_v16, %v4924_v33  ;;  %v11346_v20 = vadd.f32 %v7891_v62, %v4636_v29  ;;  %v4855_v52 = vpop.f32.mrb[105].mxu1  ;;  %v5025_v16 = vld [vmem:[%s529_s23] sm:$0x1] }
 0x4ea   : > { %v11350_v47 = vadd.f32 %v4855_v52, %v4631_v35 }
 0x4eb   : > { %v4928_v56 = vadd.f32 %v4927_v14, %v4926_v7  ;;  %v4931_v17 = vsel %vm813_vm1, %v11346_v20, 0.0 }
 0x4ec   : > { %v4929_v9 = vsel %vm813_vm1, %v11350_v47, 0.0  ;;  %v7894_v38 = vpop.f32.mrb[106].mxu1 }
 0x4ed   : > { %v4930_v54 = vadd.f32 %v4929_v9, %v4928_v56  ;;  %v11357_v31 = vadd.f32 %v7894_v38, %v4646_v45  ;;  %v4865_v6 = vpop.f32.mrb[107].mxu1  ;;  %v5110_v56 = vlaneseq }
 0x4ee   : > { %v11361_v55 = vadd.f32 %v4865_v6, %v4641_v2 }
 0x4ef   : > { %v4932_v39 = vadd.f32 %v4931_v17, %v4930_v54  ;;  %v4935_v24 = vsel %vm813_vm1, %v11357_v31, 0.0  ;;  %v5111_v2 = vshrl.u32 %v5110_v56, 7  ;;  %v5166_v56 = vld [vmem:[#allocation2 + $0x168] sm:$0xff] }
 0x4f0   : > { %v4933_v44 = vsel %vm813_vm1, %v11361_v55, 0.0 }
 0x4f1   : > { %v4934_v48 = vadd.f32 %v4933_v44, %v4932_v39  ;;  %v5112_v9 = vsub.s32 0, %v5111_v2  ;;  %v5167_v2 = vld [vmem:[#allocation2 + $0x170] sm:$0xff] }
 0x4f3   : > { %v4936_v25 = vadd.f32 %v4935_v24, %v4934_v48 }
 0x4f5   : > { %v4937_v8 = vrot.slane %v4936_v25, 4 }
 0x4f7   : > { %v4938_v11 = vadd.f32 %v4937_v8, %v4936_v25 }
 0x4f9   : > { %v4939_v10 = vrot.slane %v4938_v11, 2 }
 0x4fb   : > { %v4940_v22 = vadd.f32 %v4939_v10, %v4938_v11 }
 0x4fd   : > { %v4941_v49 = vrot.slane %v4940_v22, 1 }
 0x4ff   : > { %v4942_v37 = vadd.f32 %v4941_v49, %v4940_v22  ;;  %v5151_v22 = vld [vmem:[#allocation2 + $0x70] sm:$0xff] }
 0x500   : > { %v5153_v49 = vld [vmem:[#allocation2 + $0x90] sm:$0xff] }
 0x501   : > { %v4944_v60 = vmul.f32 0.00390625, %v4942_v37 }
 0x503   : > { %7904 = vmatmul.mubr.msk.f32.vlgmr.msra.gmra.mrb[108].mxu1 %vm813_vm1, %v4944_v60 }
 0x504   : > { %7908 = vmatprep.mubr.msk.f32.mxu1 %vm8369_vm5, %v8370_v40  ;;  %7907 = vmatpush3.msk.msra.mxu1 %vm5030_vm6, %v5024_v32  ;;  %v5155_v32 = vld [vmem:[#allocation2 + $0xb0] sm:$0xff] }
 0x5d6   : > { %v5019_v53 = vpop.f32.mrb[108].mxu1 }
 0x5d7   : > { %v5020_v29 = vadd.f32 %v5019_v53, %v4949_v61  ;;  %v7905_v33 = vpop.f32.mrb[109].mxu1 }
 0x5d8   : > { %v5159_v33 = vld [vmem:[#allocation2 + $0xf0] sm:$0xff] }
 0x5d9   : > { %v5023_v35 = vmax.f32 %v5020_v29, 0.0  ;;  %v5158_v29 = vld [vmem:[#allocation2 + $0xe8] sm:$0xff] }
 0x5db   : > { %7909 = vmatmul.mubr.msk.f32.vlgmr.msra.gmra.mrb[110].mxu1 %vm5026_vm7, %v5023_v35 }
 0x6ae   : > { %v5100_v40 = vpop.f32.mrb[110].mxu1 }
 0x6af   : > { %v5101_v62 = vadd.f32 %v5100_v40, %v5025_v16  ;;  %v7910_v7 = vpop.f32.mrb[111].mxu1  ;;  %v5161_v16 = vld [vmem:[#allocation2 + $0x110] sm:$0xff]  ;;  %v5162_v40 = vld [vmem:[#allocation2 + $0x128] sm:$0xff] }
 0x6b0   : > { %v5165_v7 = vld [vmem:[#allocation2 + $0x150] sm:$0xff] }
 0x6b1   : > { %v7625_v52 = vmul.f32 -1.442695, %v5101_v62  ;;  %v5164_v62 = vld [vmem:[#allocation2 + $0x148] sm:$0xff] }
 0x6b3   : > { %8262 = vpow2.f32 %v7625_v52 }
 0x6bd   : > { %v8263_v14 = vpop.eup %8262 }
 0x6be   : > { %v5107_v45 = vadd.f32 1.0, %v8263_v14 }
 0x6c0   : > { %8264 = vrcp.f32 %v5107_v45 }
 0x6ca   : > { %v8265_v38 = vpop.eup %8264 }
 0x6cb   : > { %v5113_v54 = vrot.slane %v8265_v38, %v5112_v9 }
 0x6cd   : > { %v5114_v6 = vmul.f32 %v5113_v54, %v10999_v23  ;;  %v5115_v17 = vmul.f32 %v5113_v54, %v11035_v46  ;;  %v5116_v39 = vmul.f32 %v5113_v54, %v11054_v3  ;;  %v5117_v44 = vmul.f32 %v5113_v54, %v11078_v50 }
 0x6ce   : > { %v5118_v48 = vmul.f32 %v5113_v54, %v11088_v59  ;;  %v5119_v24 = vmul.f32 %v5113_v54, %v11102_v51  ;;  %v5120_v25 = vmul.f32 %v5113_v54, %v11112_v26  ;;  %v5121_v8 = vmul.f32 %v5113_v54, %v11126_v28  ;;  %v5146_v26 = vld [vmem:[#allocation2 + $0x28] sm:$0xff]  ;;  %v5147_v28 = vld [vmem:[#allocation2 + $0x30] sm:$0xff] }
 0x6cf   : > { %v5122_v11 = vmul.f32 %v5113_v54, %v11136_v4  ;;  %v5123_v10 = vmul.f32 %v5113_v54, %v11150_v34  ;;  %v5124_v23 = vmul.f32 %v5113_v54, %v11160_v58  ;;  %v5125_v46 = vmul.f32 %v5113_v54, %v11170_v5  ;;  %v5148_v4 = vld [vmem:[#allocation2 + $0x48] sm:$0xff]  ;;  %v5149_v34 = vld [vmem:[#allocation2 + $0x50] sm:$0xff] }
 0x6d0   : > { %v11394_v3 = vmul.f32 %v5113_v54, %v11180_v21  ;;  %v11397_v50 = vmul.f32 %v5113_v54, %v11188_v43  ;;  %v11400_v59 = vmul.f32 %v5113_v54, %v11197_v30  ;;  %v11403_v51 = vmul.f32 %v5113_v54, %v11207_v0  ;;  %v5150_v30 = vld [vmem:[#allocation2 + $0x68] sm:$0xff] }
 0x6d1   : > { %v11406_v58 = vmul.f32 %v5113_v54, %v11212_v63  ;;  %v11409_v5 = vmul.f32 %v5113_v54, %v11216_v15  ;;  %v11412_v21 = vmul.f32 %v5113_v54, %v11220_v42  ;;  %v11415_v43 = vmul.f32 %v5113_v54, %v11224_v18  ;;  %v5152_v0 = vld [vmem:[#allocation2 + $0x88] sm:$0xff] }
 0x6d2   : > { %v11418_v37 = vmul.f32 %v5113_v54, %v11302_v1  ;;  %v11421_v60 = vmul.f32 %v5113_v54, %v11300_v13  ;;  %v11424_v63 = vmul.f32 %v5113_v54, %v11314_v41  ;;  %v11427_v15 = vmul.f32 %v5113_v54, %v11310_v57  ;;  %v5154_v42 = vld [vmem:[#allocation2 + $0xa8] sm:$0xff]  ;;  %v5157_v41 = vld [vmem:[#allocation2 + $0xd0] sm:$0xff] }
 0x6d3   : > { %v5156_v18 = vld [vmem:[#allocation2 + $0xc8] sm:$0xff]  ;;  %v11430_v61 = vmul.f32 %v5113_v54, %v11326_v19  ;;  %v11433_v53 = vmul.f32 %v5113_v54, %v11322_v12  ;;  %v11436_v1 = vmul.f32 %v5113_v54, %v11338_v27  ;;  %v11439_v13 = vmul.f32 %v5113_v54, %v11334_v36  ;;  %v5163_v36 = vld [vmem:[#allocation2 + $0x130] sm:$0xff] }
 0x6d4   : > { %v11442_v57 = vmul.f32 %v5113_v54, %v11350_v47  ;;  %v11445_v35 = vmul.f32 %v5113_v54, %v11346_v20  ;;  %v11448_v19 = vmul.f32 %v5113_v54, %v11361_v55  ;;  %v11451_v12 = vmul.f32 %v5113_v54, %v11357_v31  ;;  %v5160_v27 = vld [vmem:[#allocation2 + $0x108] sm:$0xff]  ;;  %v5171_v54 = vld [vmem:[#allocation2 + $0x1b0] sm:$0xff] }
 0x6d5   : > { %12884 = vst [vmem:[#allocation19_spill] sm:$0xff] %v11436_v1  ;;  %12885 = vst [vmem:[#allocation20_spill] sm:$0xff] %v11439_v13  ;;  %v5178_v52 = vadd.f32 %v5146_v26, %v5114_v6  ;;  %v5179_v14 = vadd.f32 %v5147_v28, %v5115_v17  ;;  %v5180_v45 = vadd.f32 %v5148_v4, %v5116_v39  ;;  %v5168_v20 = vld [vmem:[#allocation2 + $0x188] sm:$0xff]  ;;  %v5173_v17 = vld [vmem:[#allocation2 + $0x1d0] sm:$0xff] }
 0x6d6   : > { %12886 = vst [vmem:[#allocation21_spill] sm:$0xff] %v11442_v57  ;;  %12887 = vst [vmem:[#allocation22_spill] sm:$0xff] %v11445_v35  ;;  %v5181_v47 = vadd.f32 %v5149_v34, %v5117_v44  ;;  %v5182_v9 = vadd.f32 %v5150_v30, %v5118_v48  ;;  %v5183_v38 = vadd.f32 %v5151_v22, %v5119_v24  ;;  %v5169_v35 = vld [vmem:[#allocation2 + $0x190] sm:$0xff]  ;;  %v5170_v31 = vld [vmem:[#allocation2 + $0x1a8] sm:$0xff] }
 0x6d7   : > { %12888 = vst [vmem:[#allocation23_spill] sm:$0xff] %v11448_v19  ;;  %12889 = vst [vmem:[#allocation24_spill] sm:$0xff] %v11451_v12  ;;  %v5184_v55 = vadd.f32 %v5152_v0, %v5120_v25  ;;  %v5185_v19 = vadd.f32 %v5153_v49, %v5121_v8  ;;  %v5186_v12 = vadd.f32 %v5154_v42, %v5122_v11  ;;  %v5172_v6 = vld [vmem:[#allocation2 + $0x1c8] sm:$0xff]  ;;  %v5175_v8 = vld [vmem:[#allocation2 + $0x1f0] sm:$0xff] }
 0x6d8   : > { %v5187_v57 = vadd.f32 %v5155_v32, %v5123_v10  ;;  %v5188_v13 = vadd.f32 %v5156_v18, %v5124_v23  ;;  %v5189_v1 = vadd.f32 %v5157_v41, %v5125_v46  ;;  %5210 = vst.msk [vmem:[#allocation2 + $0x28] sm:$0xff] %vm813_vm1, %v5178_v52  ;;  %5211 = vst.msk [vmem:[#allocation2 + $0x30] sm:$0xff] %vm813_vm1, %v5179_v14  ;;  %v5174_v39 = vld [vmem:[#allocation2 + $0x1e8] sm:$0xff]  ;;  %v5177_v10 = vld [vmem:[#allocation2 + $0x210] sm:$0xff] }
 0x6d9   : > { %5212 = vst.msk [vmem:[#allocation2 + $0x48] sm:$0xff] %vm813_vm1, %v5180_v45  ;;  %5213 = vst.msk [vmem:[#allocation2 + $0x50] sm:$0xff] %vm813_vm1, %v5181_v47  ;;  %v5190_v44 = vadd.f32 %v5158_v29, %v11394_v3  ;;  %v5191_v48 = vadd.f32 %v5159_v33, %v11397_v50  ;;  %v5192_v24 = vadd.f32 %v5160_v27, %v11400_v59  ;;  %v5176_v11 = vld [vmem:[#allocation2 + $0x208] sm:$0xff] }
 0x6da   : > { %v5193_v25 = vadd.f32 %v5161_v16, %v11403_v51  ;;  %5214 = vst.msk [vmem:[#allocation2 + $0x68] sm:$0xff] %vm813_vm1, %v5182_v9  ;;  %5215 = vst.msk [vmem:[#allocation2 + $0x70] sm:$0xff] %vm813_vm1, %v5183_v38  ;;  %v5194_v23 = vadd.f32 %v5162_v40, %v11406_v58  ;;  %v5195_v46 = vadd.f32 %v5163_v36, %v11409_v5  ;;  %v5347_v32 = vld [vmem:[#allocation2 + $0x8] sm:$0xff] (!%p7626_p1)  ;;  %v5248_v38 = vld [vmem:[%s12847_s9 + $0x10] sm:$0xff] (!%p7626_p1) }
 0x6db   : > { %5216 = vst.msk [vmem:[#allocation2 + $0x88] sm:$0xff] %vm813_vm1, %v5184_v55  ;;  %5217 = vst.msk [vmem:[#allocation2 + $0x90] sm:$0xff] %vm813_vm1, %v5185_v19  ;;  %v5196_v3 = vadd.f32 %v5164_v62, %v11412_v21  ;;  %v5197_v50 = vadd.f32 %v5165_v7, %v11415_v43  ;;  %v5198_v59 = vadd.f32 %v5166_v56, %v11418_v37  ;;  %5411 = vrot.lane.b32.xlu0 (!%p7626_p1), %v5347_v32, %s8371_s26  ;;  %v5539_v36 = vld [vmem:[#allocation2 + $0x9] sm:$0xff] (!%p7626_p1)  ;;  %v5246_v56 = vld [vmem:[%s12847_s9] sm:$0xff] (!%p7626_p1) }
 0x6dc   : > { %5218 = vst.msk [vmem:[#allocation2 + $0xa8] sm:$0xff] %vm813_vm1, %v5186_v12  ;;  %5219 = vst.msk [vmem:[#allocation2 + $0xb0] sm:$0xff] %vm813_vm1, %v5187_v57  ;;  %v5199_v51 = vadd.f32 %v5167_v2, %v11421_v60  ;;  %v5200_v26 = vadd.f32 %v5168_v20, %v11424_v63  ;;  %v5201_v28 = vadd.f32 %v5169_v35, %v11427_v15  ;;  %v12890_v58 = vld [vmem:[#allocation19_spill] sm:$0xff]  ;;  %v12891_v21 = vld [vmem:[#allocation20_spill] sm:$0xff] }
 0x6dd   : > { %5220 = vst.msk [vmem:[#allocation2 + $0xc8] sm:$0xff] %vm813_vm1, %v5188_v13  ;;  %5221 = vst.msk [vmem:[#allocation2 + $0xd0] sm:$0xff] %vm813_vm1, %v5189_v1  ;;  %v5202_v4 = vadd.f32 %v5170_v31, %v11430_v61  ;;  %v5203_v34 = vadd.f32 %v5171_v54, %v11433_v53  ;;  %v5204_v5 = vadd.f32 %v5172_v6, %v12890_v58  ;;  %v12892_v30 = vld [vmem:[#allocation21_spill] sm:$0xff]  ;;  %v12893_v0 = vld [vmem:[#allocation22_spill] sm:$0xff]  ;;  %v8372_v13 = vmov (!%p7626_p1), 0.0|0.0  }
 0x6de   : > { %5222 = vst.msk [vmem:[#allocation2 + $0xe8] sm:$0xff] %vm813_vm1, %v5190_v44  ;;  %5223 = vst.msk [vmem:[#allocation2 + $0xf0] sm:$0xff] %vm813_vm1, %v5191_v48  ;;  %v5205_v43 = vadd.f32 %v5173_v17, %v12891_v21  ;;  %v5206_v22 = vadd.f32 %v5174_v39, %v12892_v30  ;;  %v5207_v49 = vadd.f32 %v5175_v8, %v12893_v0  ;;  %v12894_v37 = vld [vmem:[#allocation23_spill] sm:$0xff]  ;;  %v12895_v63 = vld [vmem:[#allocation24_spill] sm:$0xff]  ;;  %8085 = vmatprep.subr.bf16.mxu0 (!%p7626_p1), %v8372_v13 }
 0x6df   : > { %5224 = vst.msk [vmem:[#allocation2 + $0x108] sm:$0xff] %vm813_vm1, %v5192_v24  ;;  %5225 = vst.msk [vmem:[#allocation2 + $0x110] sm:$0xff] %vm813_vm1, %v5193_v25  ;;  %v5208_v60 = vadd.f32 %v5176_v11, %v12894_v37  ;;  %v5209_v15 = vadd.f32 %v5177_v10, %v12895_v63  ;;  %v5349_v42 = vld [vmem:[#allocation2 + $0x28] sm:$0xff] (!%p7626_p1)  ;;  %v5348_v53 = vld [vmem:[#allocation2 + $0x10] sm:$0xff] (!%p7626_p1)  ;;  %8145 = vmatprep.subr.bf16.mxu1 (!%p7626_p1), %v8372_v13 }
 0x6e0   : > { %5226 = vst.msk [vmem:[#allocation2 + $0x128] sm:$0xff] %vm813_vm1, %v5194_v23  ;;  %5227 = vst.msk [vmem:[#allocation2 + $0x130] sm:$0xff] %vm813_vm1, %v5195_v46  ;;  %5415 = vrot.lane.b32.xlu1 (!%p7626_p1), %v5349_v42, %s8371_s26  ;;  %v11508_v18 = vld [vmem:[#allocation2 + $0x47] sm:$0xff] (!%p7626_p1)  ;;  %5413 = vrot.lane.b32.xlu0 (!%p7626_p1), %v5348_v53, %s8371_s26  ;;  %v11536_v35 = vld [vmem:[#allocation2 + $0x4f] sm:$0xff] (!%p7626_p1) }
 0x6e1   : > { %5228 = vst.msk [vmem:[#allocation2 + $0x148] sm:$0xff] %vm813_vm1, %v5196_v3  ;;  %5229 = vst.msk [vmem:[#allocation2 + $0x150] sm:$0xff] %vm813_vm1, %v5197_v50  ;;  %5245 = sbr.rel (%p7626_p1) target bundleno = 2490 (0x9ba), region = 72  ;;  %v11511_v61 = vld [vmem:[#allocation2 + $0x29] sm:$0xff] (!%p7626_p1)  ;;  %v5249_v55 = vld [vmem:[%s12847_s9 + $0x18] sm:$0xff] (!%p7626_p1) }
 0x6e2   : > { %5230 = vst.msk [vmem:[#allocation2 + $0x168] sm:$0xff] %vm813_vm1, %v5198_v59  ;;  %5231 = vst.msk [vmem:[#allocation2 + $0x170] sm:$0xff] %vm813_vm1, %v5199_v51  ;;  %v11513_v1 = vld [vmem:[#allocation2 + $0x48] sm:$0xff] (!%p7626_p1)  ;;  %v11546_v12 = vld [vmem:[#allocation2 + $0x50] sm:$0xff] (!%p7626_p1)  ;;  %v8089_v31 = vpack.c.bf16 (!%p7626_p1), %v5249_v55, %v5248_v38 }
 0x6e3   : > { %5232 = vst.msk [vmem:[#allocation2 + $0x188] sm:$0xff] %vm813_vm1, %v5200_v26  ;;  %5233 = vst.msk [vmem:[#allocation2 + $0x190] sm:$0xff] %vm813_vm1, %v5201_v28  ;;  %v11521_v29 = vld [vmem:[#allocation2 + $0x27] sm:$0xff] (!%p7626_p1)  ;;  %v11550_v16 = vld [vmem:[#allocation2 + $0x2f] sm:$0xff] (!%p7626_p1) }
 0x6e4   : > { %5234 = vst.msk [vmem:[#allocation2 + $0x1a8] sm:$0xff] %vm813_vm1, %v5202_v4  ;;  %5235 = vst.msk [vmem:[#allocation2 + $0x1b0] sm:$0xff] %vm813_vm1, %v5203_v34  ;;  %6051 = vrot.lane.b32.xlu1 (!%p7626_p1), %v11511_v61, %s8371_s26  ;;  %v11566_v7 = vld [vmem:[#allocation2 + $0x68] sm:$0xff] (!%p7626_p1)  ;;  %v11572_v45 = vld [vmem:[#allocation2 + $0x30] sm:$0xff] (!%p7626_p1) }
 0x6e5   : > { %5236 = vst.msk [vmem:[#allocation2 + $0x1c8] sm:$0xff] %vm813_vm1, %v5204_v5  ;;  %5237 = vst.msk [vmem:[#allocation2 + $0x1d0] sm:$0xff] %vm813_vm1, %v5205_v43  ;;  %v5247_v2 = vld [vmem:[%s12847_s9 + $0x8] sm:$0xff] (!%p7626_p1)  ;;  %v11592_v9 = vld [vmem:[#allocation2 + $0x70] sm:$0xff] (!%p7626_p1) }
 0x6e6   : > { %5238 = vst.msk [vmem:[#allocation2 + $0x1e8] sm:$0xff] %vm813_vm1, %v5206_v22  ;;  %5239 = vst.msk [vmem:[#allocation2 + $0x1f0] sm:$0xff] %vm813_vm1, %v5207_v49  ;;  %v8086_v20 = vpack.c.bf16 (!%p7626_p1), %v5247_v2, %v5246_v56  ;;  %v5250_v6 = vld [vmem:[%s12847_s9 + $0x20] sm:$0xff] (!%p7626_p1)  ;;  %v5251_v17 = vld [vmem:[%s12847_s9 + $0x28] sm:$0xff] (!%p7626_p1) }
 0x6e7   : > { %5240 = vst.msk [vmem:[#allocation2 + $0x208] sm:$0xff] %vm813_vm1, %v5208_v60  ;;  %5241 = vst.msk [vmem:[#allocation2 + $0x210] sm:$0xff] %vm813_vm1, %v5209_v15  ;;  %v8092_v44 = vpack.c.bf16 (!%p7626_p1), %v5251_v17, %v5250_v6  ;;  %v11620_v48 = vld [vmem:[#allocation2 + $0x88] sm:$0xff] (!%p7626_p1)  ;;  %v5252_v24 = vld [vmem:[%s12847_s9 + $0x30] sm:$0xff] (!%p7626_p1) }
 0x6e8   : > { %5955 = vst.msk [vmem:[#allocation4 + $0x8] sm:$0xff] %vm813_vm1, %v5349_v42  ;;  %5319 = vst.msk [vmem:[#allocation4 + $0x60] sm:$0xff] %vm813_vm1, %v11508_v18  ;;  %6243 = vrot.lane.b32.xlu1 %v11508_v18, %s8373_s20  ;;  %8087 = vmatpush1.bf16.msra.mxu0 %v8086_v20  ;;  %v5253_v25 = vld [vmem:[%s12847_s9 + $0x38] sm:$0xff]  ;;  %v5283_v8 = vld [vmem:[#allocation2 + $0x7] sm:$0xff] }
 0x6e9   : > { %5957 = vst.msk [vmem:[#allocation4 + $0x38] sm:$0xff] %vm813_vm1, %v11513_v1  ;;  %5317 = vst.msk [vmem:[#allocation4 + $0x30] sm:$0xff] %vm813_vm1, %v11521_v29  ;;  %8161 = vmatpush1.bf16.msra.mxu1 %v8086_v20  ;;  %8088 = vmatprep.subr.bf16.mxu0 %v8372_v13  ;;  %v5284_v10 = vld [vmem:[#allocation2 + $0xf] sm:$0xff]  ;;  %v8095_v23 = vpack.c.bf16 %v5253_v25, %v5252_v24  ;;  %v5254_v46 = vld [vmem:[%s12847_s9 + $0x40] sm:$0xff] }
 0x6ea   : > { %5320 = vst.msk [vmem:[#allocation4 + $0x78] sm:$0xff] %vm813_vm1, %v11536_v35  ;;  %5318 = vst.msk [vmem:[#allocation4 + $0x48] sm:$0xff] %vm813_vm1, %v11550_v16  ;;  %v5371_v52 = vld [vmem:[#allocation2 + $0x188] sm:$0xff]  ;;  %8146 = vmatprep.subr.bf16.mxu1 %v8372_v13  ;;  %v11655_v51 = vld [vmem:[#allocation2 + $0x31] sm:$0xff] }
 0x6eb   : > { %v11525_v33 = vld [vmem:[#allocation2 + $0x1a7] sm:$0xff]  ;;  %v11552_v40 = vld [vmem:[#allocation2 + $0x1af] sm:$0xff]  ;;  %5958 = vst.msk [vmem:[#allocation4 + $0x50] sm:$0xff] %vm813_vm1, %v11546_v12  ;;  %5959 = vst.msk [vmem:[#allocation4 + $0x68] sm:$0xff] %vm813_vm1, %v11566_v7 }
 0x6ec   : > { %v11519_v41 = vld [vmem:[#allocation2 + $0x1c7] sm:$0xff]  ;;  %5341 = vst.msk [vmem:[#allocation4 + $0x270] sm:$0xff] %vm813_vm1, %v11525_v33  ;;  %v11548_v27 = vld [vmem:[#allocation2 + $0x1d0] sm:$0xff]  ;;  %5342 = vst.msk [vmem:[#allocation4 + $0x288] sm:$0xff] %vm813_vm1, %v11552_v40  ;;  %5603 = vrot.lane.b32.xlu1 %v5539_v36, %s8373_s20  ;;  %8090 = vmatpush1.bf16.msra.mxu0 %v8089_v31 }
 0x6ed   : > { %v11527_v57 = vld [vmem:[#allocation2 + $0x1c8] sm:$0xff]  ;;  %5343 = vst.msk [vmem:[#allocation4 + $0x2a0] sm:$0xff] %vm813_vm1, %v11519_v41  ;;  %5982 = vst.msk [vmem:[#allocation4 + $0x290] sm:$0xff] %vm813_vm1, %v11548_v27  ;;  %v11582_v47 = vld [vmem:[#allocation2 + $0x1b0] sm:$0xff]  ;;  %8162 = vmatpush1.bf16.msra.mxu1 %v8089_v31  ;;  %8091 = vmatprep.subr.bf16.mxu0 %v8372_v13 }
 0x6ee   : > { %5981 = vst.msk [vmem:[#allocation4 + $0x278] sm:$0xff] %vm813_vm1, %v11527_v57  ;;  %v11542_v19 = vld [vmem:[#allocation2 + $0x1a9] sm:$0xff]  ;;  %5956 = vst.msk [vmem:[#allocation4 + $0x20] sm:$0xff] %vm813_vm1, %v11572_v45  ;;  %8147 = vmatprep.subr.bf16.mxu1 %v8372_v13  ;;  %v11653_v59 = vld [vmem:[#allocation2 + $0x1b1] sm:$0xff] }
 0x6ef   : > { %6099 = vrot.lane.b32.xlu0 %v11542_v19, %s8371_s26  ;;  %v11564_v62 = vld [vmem:[#allocation2 + $0x1a8] sm:$0xff]  ;;  %5980 = vst.msk [vmem:[#allocation4 + $0x260] sm:$0xff] %vm813_vm1, %v11582_v47  ;;  %5960 = vst.msk [vmem:[#allocation4 + $0x80] sm:$0xff] %vm813_vm1, %v11592_v9  ;;  %v11604_v54 = vld [vmem:[#allocation2 + $0x1f0] sm:$0xff] }
 0x6f0   : > { %v11570_v14 = vld [vmem:[#allocation2 + $0x1e8] sm:$0xff]  ;;  %5979 = vst.msk [vmem:[#allocation4 + $0x248] sm:$0xff] %vm813_vm1, %v11564_v62  ;;  %5984 = vst.msk [vmem:[#allocation4 + $0x2c0] sm:$0xff] %vm813_vm1, %v11604_v54  ;;  %6435 = vrot.lane.b32.xlu1 %v11513_v1, %s8374_s29  ;;  %8093 = vmatpush1.bf16.msra.mxu0 %v8092_v44  ;;  %v11658_v26 = vld [vmem:[#allocation2 + $0x90] sm:$0xff] }
 0x6f1   : > { %5983 = vst.msk [vmem:[#allocation4 + $0x2a8] sm:$0xff] %vm813_vm1, %v11570_v14  ;;  %v5563_v39 = vld [vmem:[#allocation2 + $0x189] sm:$0xff]  ;;  %5961 = vst.msk [vmem:[#allocation4 + $0x98] sm:$0xff] %vm813_vm1, %v11620_v48  ;;  %8163 = vmatpush1.bf16.msra.mxu1 %v8092_v44  ;;  %8094 = vmatprep.subr.bf16.mxu0 %v8372_v13  ;;  %v5257_v34 = vld [vmem:[%s12847_s9 + $0x58] sm:$0xff] }
 0x6f2   : > { %v11635_v11 = vld [vmem:[#allocation2 + $0x208] sm:$0xff]  ;;  %5315 = vst.msk [vmem:[#allocation4] sm:$0xff] %vm813_vm1, %v5283_v8  ;;  %5316 = vst.msk [vmem:[#allocation4 + $0x18] sm:$0xff] %vm813_vm1, %v5284_v10  ;;  %8148 = vmatprep.subr.bf16.mxu1 %v8372_v13  ;;  %v5256_v4 = vld [vmem:[%s12847_s9 + $0x50] sm:$0xff] }
 0x6f3   : > { %5459 = vrot.lane.b32.xlu0 %v5371_v52, %s8371_s26  ;;  %5985 = vst.msk [vmem:[#allocation4 + $0x2d8] sm:$0xff] %vm813_vm1, %v11635_v11  ;;  %v5255_v3 = vld [vmem:[%s12847_s9 + $0x48] sm:$0xff]  ;;  %5962 = vst.msk [vmem:[#allocation4 + $0xb0] sm:$0xff] %vm813_vm1, %v11658_v26  ;;  %v11670_v58 = vld [vmem:[#allocation2 + $0x210] sm:$0xff]  ;;  %v8101_v22 = vpack.c.bf16 %v5257_v34, %v5256_v4 }
 0x6f4   : > { %5795 = vrot.lane.b32.xlu1 %v11521_v29, %s8374_s29  ;;  %v5307_v50 = vld [vmem:[#allocation2 + $0x187] sm:$0xff]  ;;  %8096 = vmatpush1.bf16.msra.mxu0 %v8095_v23  ;;  %v8098_v28 = vpack.c.bf16 %v5255_v3, %v5254_v46  ;;  %v5308_v21 = vld [vmem:[#allocation2 + $0x18f] sm:$0xff]  ;;  %5986 = vst.msk [vmem:[#allocation4 + $0x2f0] sm:$0xff] %vm813_vm1, %v11670_v58  ;;  %v5261_v42 = vld [vmem:[%s12847_s9 + $0x78] sm:$0xff] }
 0x6f5   : > { %5339 = vst.msk [vmem:[#allocation4 + $0x240] sm:$0xff] %vm813_vm1, %v5307_v50  ;;  %8164 = vmatpush1.bf16.msra.mxu1 %v8095_v23  ;;  %8097 = vmatprep.subr.bf16.mxu0 %v8372_v13  ;;  %v11676_v5 = vld [vmem:[#allocation2 + $0x89] sm:$0xff]  ;;  %5340 = vst.msk [vmem:[#allocation4 + $0x258] sm:$0xff] %vm813_vm1, %v5308_v21  ;;  %v5258_v0 = vld [vmem:[%s12847_s9 + $0x60] sm:$0xff] }
 0x6f6   : > { %8149 = vmatprep.subr.bf16.mxu1 %v8372_v13  ;;  %v5372_v43 = vld [vmem:[#allocation2 + $0x190] sm:$0xff]  ;;  %v11681_v30 = vld [vmem:[#allocation2 + $0xa8] sm:$0xff]  ;;  %6599 = vst.msk [vmem:[#allocation4 + $0x70] sm:$0xff] %vm813_vm1, %v11676_v5  ;;  %v5262_v29 = vld [vmem:[%s12847_s9 + $0x80] sm:$0xff] }
 0x6f7   : > { %6291 = vrot.lane.b32.xlu0 %v11519_v41, %s8373_s20  ;;  %5963 = vst.msk [vmem:[#allocation4 + $0xc8] sm:$0xff] %vm813_vm1, %v11681_v30  ;;  %v5259_v49 = vld [vmem:[%s12847_s9 + $0x68] sm:$0xff]  ;;  %v5540_v60 = vld [vmem:[#allocation2 + $0x11] sm:$0xff]  ;;  %v5266_v55 = vld [vmem:[%s12847_s9 + $0xa0] sm:$0xff] }
 0x6f8   : > { %5843 = vrot.lane.b32.xlu1 %v11525_v33, %s8374_s29  ;;  %8099 = vmatpush1.bf16.msra.mxu0 %v8098_v28  ;;  %v11698_v37 = vld [vmem:[#allocation2 + $0x1cf] sm:$0xff]  ;;  %v8104_v63 = vpack.c.bf16 %v5259_v49, %v5258_v0  ;;  %v5265_v2 = vld [vmem:[%s12847_s9 + $0x98] sm:$0xff]  ;;  %v5270_v25 = vld [vmem:[%s12847_s9 + $0xc0] sm:$0xff] }
 0x6f9   : > { %8165 = vmatpush1.bf16.msra.mxu1 %v8098_v28  ;;  %8100 = vmatprep.subr.bf16.mxu0 %v8372_v13  ;;  %v5260_v15 = vld [vmem:[%s12847_s9 + $0x70] sm:$0xff]  ;;  %v5263_v33 = vld [vmem:[%s12847_s9 + $0x88] sm:$0xff]  ;;  %v5269_v44 = vld [vmem:[%s12847_s9 + $0xb8] sm:$0xff] }
 0x6fa   : > { %8150 = vmatprep.subr.bf16.mxu1 %v8372_v13  ;;  %v5564_v32 = vld [vmem:[#allocation2 + $0x191] sm:$0xff]  ;;  %v8107_v53 = vpack.c.bf16 %v5261_v42, %v5260_v15  ;;  %v8110_v52 = vpack.c.bf16 %v5263_v33, %v5262_v29  ;;  %v11738_v20 = vld [vmem:[#allocation2 + $0x49] sm:$0xff]  ;;  %v5274_v3 = vld [vmem:[%s12847_s9 + $0xe0] sm:$0xff] }
 0x6fb   : > { %5651 = vrot.lane.b32.xlu0 %v5563_v39, %s8373_s20  ;;  %v11722_v36 = vld [vmem:[#allocation2 + $0x91] sm:$0xff]  ;;  %v5267_v31 = vld [vmem:[%s12847_s9 + $0xa8] sm:$0xff] }
 0x6fc   : > { %6101 = vrot.lane.b32.xlu1 %v11653_v59, %s8371_s26  ;;  %8102 = vmatpush1.bf16.msra.mxu0 %v8101_v22  ;;  %6600 = vst.msk [vmem:[#allocation4 + $0x88] sm:$0xff] %vm813_vm1, %v11722_v36  ;;  %v5264_v56 = vld [vmem:[%s12847_s9 + $0x90] sm:$0xff]  ;;  %v8116_v17 = vpack.c.bf16 %v5267_v31, %v5266_v55  ;;  %v5271_v8 = vld [vmem:[%s12847_s9 + $0xc8] sm:$0xff] }
 0x6fd   : > { %8166 = vmatpush1.bf16.msra.mxu1 %v8101_v22  ;;  %8103 = vmatprep.subr.bf16.mxu0 %v8372_v13  ;;  %v8113_v38 = vpack.c.bf16 %v5265_v2, %v5264_v56  ;;  %v11754_v6 = vld [vmem:[#allocation2 + $0x1c9] sm:$0xff]  ;;  %v8122_v23 = vpack.c.bf16 %v5271_v8, %v5270_v25  ;;  %v11840_v22 = vld [vmem:[#allocation2 + $0x1d1] sm:$0xff] }
 0x6fe   : > { %8151 = vmatprep.subr.bf16.mxu1 %v8372_v13  ;;  %v5268_v39 = vld [vmem:[%s12847_s9 + $0xb0] sm:$0xff]  ;;  %v11784_v10 = vld [vmem:[#allocation2 + $0x1e7] sm:$0xff] }
 0x6ff   : > { %6483 = vrot.lane.b32.xlu0 %v11527_v57, %s8374_s29  ;;  %v8119_v24 = vpack.c.bf16 %v5269_v44, %v5268_v39  ;;  %v5272_v46 = vld [vmem:[%s12847_s9 + $0xd0] sm:$0xff]  ;;  %v5275_v50 = vld [vmem:[%s12847_s9 + $0xe8] sm:$0xff] }
 0x700   : > { %5461 = vrot.lane.b32.xlu1 %v5372_v43, %s8371_s26  ;;  %8105 = vmatpush1.bf16.msra.mxu0 %v8104_v63  ;;  %v11806_v28 = vld [vmem:[#allocation2 + $0xa9] sm:$0xff]  ;;  %v8128_v4 = vpack.c.bf16 %v5275_v50, %v5274_v3  ;;  %v11842_v0 = vld [vmem:[#allocation2 + $0xb1] sm:$0xff] }
 0x701   : > { %8167 = vmatpush1.bf16.msra.mxu1 %v8104_v63  ;;  %8106 = vmatprep.subr.bf16.mxu0 %v8372_v13  ;;  %6601 = vst.msk [vmem:[#allocation4 + $0xa0] sm:$0xff] %vm813_vm1, %v11806_v28  ;;  %v5276_v34 = vld [vmem:[%s12847_s9 + $0xf0] sm:$0xff]  ;;  %v11830_v43 = vld [vmem:[#allocation2 + $0xc8] sm:$0xff]  ;;  %6602 = vst.msk [vmem:[#allocation4 + $0xb8] sm:$0xff] %vm813_vm1, %v11842_v0 }
 0x702   : > { %8152 = vmatprep.subr.bf16.mxu1 %v8372_v13  ;;  %5965 = vst.msk [vmem:[#allocation4 + $0xf8] sm:$0xff] %vm813_vm1, %v11830_v43  ;;  %v11864_v49 = vld [vmem:[#allocation2 + $0xc9] sm:$0xff] }
 0x703   : > { %6053 = vrot.lane.b32.xlu0 %v11655_v51, %s8371_s26  ;;  %6603 = vst.msk [vmem:[#allocation4 + $0xd0] sm:$0xff] %vm813_vm1, %v11864_v49  ;;  %v11912_v63 = vld [vmem:[#allocation2 + $0xe9] sm:$0xff] }
 0x704   : > { %6293 = vrot.lane.b32.xlu1 %v11698_v37, %s8373_s20  ;;  %8108 = vmatpush1.bf16.msra.mxu0 %v8107_v53  ;;  %6605 = vst.msk [vmem:[#allocation4 + $0x100] sm:$0xff] %vm813_vm1, %v11912_v63  ;;  %v5312_v42 = vld [vmem:[#allocation2 + $0x1cf] sm:$0xff] }
 0x705   : > { %8168 = vmatpush1.bf16.msra.mxu1 %v8107_v53  ;;  %8109 = vmatprep.subr.bf16.mxu0 %v8372_v13  ;;  %5344 = vst.msk [vmem:[#allocation4 + $0x2b8] sm:$0xff] %vm813_vm1, %v5312_v42  ;;  %v11931_v33 = vld [vmem:[#allocation2 + $0x108] sm:$0xff] }
 0x706   : > { %8153 = vmatprep.subr.bf16.mxu1 %v8372_v13  ;;  %5969 = vst.msk [vmem:[#allocation4 + $0x158] sm:$0xff] %vm813_vm1, %v11931_v33  ;;  %v11959_v55 = vld [vmem:[#allocation2 + $0x20f] sm:$0xff] }
 0x707   : > { %6245 = vrot.lane.b32.xlu0 %v11536_v35, %s8373_s20  ;;  %v11974_v44 = vld [vmem:[#allocation2 + $0x109] sm:$0xff] }
 0x708   : > { %5653 = vrot.lane.b32.xlu1 %v5564_v32, %s8373_s20  ;;  %8111 = vmatpush1.bf16.msra.mxu0 %v8110_v52  ;;  %v11927_v32 = vld [vmem:[#allocation2 + $0x71] sm:$0xff]  ;;  %6607 = vst.msk [vmem:[#allocation4 + $0x130] sm:$0xff] %vm813_vm1, %v11974_v44  ;;  %v6017_v3 = vld [vmem:[#allocation2 + $0x209] sm:$0xff] }
 0x709   : > { %8169 = vmatpush1.bf16.msra.mxu1 %v8110_v52  ;;  %8112 = vmatprep.subr.bf16.mxu0 %v8372_v13  ;;  %v11941_v52 = vld [vmem:[#allocation2 + $0x1f1] sm:$0xff]  ;;  %v12028_v42 = vld [vmem:[#allocation2 + $0x129] sm:$0xff] }
 0x70a   : > { %8154 = vmatprep.subr.bf16.mxu1 %v8372_v13  ;;  %6609 = vst.msk [vmem:[#allocation4 + $0x160] sm:$0xff] %vm813_vm1, %v12028_v42 }
 0x70b   : > { %5605 = vrot.lane.b32.xlu0 %v5540_v60, %s8373_s20  ;;  %v11904_v60 = vld [vmem:[#allocation2 + $0xf0] sm:$0xff] }
 0x70c   : > { %6485 = vrot.lane.b32.xlu1 %v11548_v27, %s8374_s29  ;;  %8114 = vmatpush1.bf16.msra.mxu0 %v8113_v38  ;;  %5968 = vst.msk [vmem:[#allocation4 + $0x140] sm:$0xff] %vm813_vm1, %v11904_v60 }
 0x70d   : > { %8170 = vmatpush1.bf16.msra.mxu1 %v8113_v38  ;;  %8115 = vmatprep.subr.bf16.mxu0 %v8372_v13 }
 0x70e   : > { %8155 = vmatprep.subr.bf16.mxu1 %v8372_v13 }
 0x70f   : > { %6437 = vrot.lane.b32.xlu0 %v11546_v12, %s8374_s29 }
 0x710   : > { %6055 = vrot.lane.b32.xlu1 %v11738_v20, %s8371_s26  ;;  %8117 = vmatpush1.bf16.msra.mxu0 %v8116_v17 }
 0x711   : > { %8171 = vmatpush1.bf16.msra.mxu1 %v8116_v17  ;;  %8118 = vmatprep.subr.bf16.mxu0 %v8372_v13  ;;  %v11964_v17 = vld [vmem:[#allocation2 + $0x110] sm:$0xff] }
 0x712   : > { %8156 = vmatprep.subr.bf16.mxu1 %v8372_v13  ;;  %5970 = vst.msk [vmem:[#allocation4 + $0x170] sm:$0xff] %vm813_vm1, %v11964_v17 }
 0x713   : > { %5797 = vrot.lane.b32.xlu0 %v11550_v16, %s8374_s29  ;;  %v11752_v16 = vld [vmem:[#allocation2 + $0x67] sm:$0xff] }
 0x714   : > { %6247 = vrot.lane.b32.xlu1 %v11752_v16, %s8373_s20  ;;  %8120 = vmatpush1.bf16.msra.mxu0 %v8119_v24 }
 0x715   : > { %8172 = vmatpush1.bf16.msra.mxu1 %v8119_v24  ;;  %8121 = vmatprep.subr.bf16.mxu0 %v8372_v13 }
 0x716   : > { %8157 = vmatprep.subr.bf16.mxu1 %v8372_v13 }
 0x717   : > { %5845 = vrot.lane.b32.xlu0 %v11552_v40, %s8374_s29  ;;  %v11764_v40 = vld [vmem:[#allocation2 + $0xb0] sm:$0xff] }
 0x718   : > { %5964 = vst.msk [vmem:[#allocation4 + $0xe0] sm:$0xff] %vm813_vm1, %v11764_v40  ;;  %5607 = vrot.lane.b32.xlu1 %v11511_v61, %s8373_s20  ;;  %v5273_v61 = vld [vmem:[%s12847_s9 + $0xd8] sm:$0xff]  ;;  %8123 = vmatpush1.bf16.msra.mxu0 %v8122_v23 }
 0x719   : > { %8173 = vmatpush1.bf16.msra.mxu1 %v8122_v23  ;;  %8124 = vmatprep.subr.bf16.mxu0 %v8372_v13 }
 0x71a   : > { %8158 = vmatprep.subr.bf16.mxu1 %v8372_v13 }
 0x71b   : > { %6103 = vrot.lane.b32.xlu0 %v11754_v6, %s8371_s26 }
 0x71c   : > { %6439 = vrot.lane.b32.xlu1 %v11566_v7, %s8374_s29 }
 0x71f   : > { %5463 = vrot.lane.b32.xlu0 %v11564_v62, %s8371_s26  ;;  %v8125_v62 = vpack.c.bf16 %v5273_v61, %v5272_v46 }
 0x720   : > { %5799 = vrot.lane.b32.xlu1 %v11508_v18, %s8374_s29  ;;  %v5277_v18 = vld [vmem:[%s12847_s9 + $0xf8] sm:$0xff] }
 0x721   : > { %8126 = vmatpush1.bf16.msra.mxu0 %v8125_v62  ;;  %8174 = vmatpush1.bf16.msra.mxu1 %v8125_v62  ;;  %v8131_v21 = vpack.c.bf16 %v5277_v18, %v5276_v34  ;;  %v11991_v62 = vld [vmem:[#allocation2 + $0x128] sm:$0xff] }
 0x722   : > { %8127 = vmatprep.subr.bf16.mxu0 %v8372_v13  ;;  %8159 = vmatprep.subr.bf16.mxu1 %v8372_v13  ;;  %5971 = vst.msk [vmem:[#allocation4 + $0x188] sm:$0xff] %vm813_vm1, %v11991_v62 }
 0x723   : > { %6295 = vrot.lane.b32.xlu0 %v11784_v10, %s8373_s20 }
 0x724   : > { %5847 = vrot.lane.b32.xlu1 %v11519_v41, %s8374_s29  ;;  %v11838_v41 = vld [vmem:[#allocation2 + $0x6f] sm:$0xff] }
 0x725   : > { %8129 = vmatpush1.bf16.msra.mxu0 %v8128_v4  ;;  %8175 = vmatpush1.bf16.msra.mxu1 %v8128_v4 }
 0x726   : > { %8130 = vmatprep.subr.bf16.mxu0 %v8372_v13  ;;  %8160 = vmatprep.subr.bf16.mxu1 %v8372_v13  ;;  %v11854_v13 = vld [vmem:[#allocation2 + $0x1ef] sm:$0xff] }
 0x727   : > { %5655 = vrot.lane.b32.xlu0 %v11542_v19, %s8373_s20  ;;  %v11826_v19 = vld [vmem:[#allocation2 + $0x51] sm:$0xff] }
 0x728   : > { %5417 = vrot.lane.b32.xlu1 %v11572_v45, %s8371_s26  ;;  %v11856_v45 = vld [vmem:[#allocation2 + $0xd0] sm:$0xff] }
 0x729   : > { %8132 = vmatpush1.bf16.msra.mxu0 %v8131_v21  ;;  %8176 = vmatpush1.bf16.msra.mxu1 %v8131_v21  ;;  %5966 = vst.msk [vmem:[#allocation4 + $0x110] sm:$0xff] %vm813_vm1, %v11856_v45 }
 0x72b   : > { %6487 = vrot.lane.b32.xlu0 %v11570_v14, %s8374_s29 }
 0x72c   : > { %6249 = vrot.lane.b32.xlu1 %v11838_v41, %s8373_s20 }
 0x72f   : > { %6057 = vrot.lane.b32.xlu0 %v11826_v19, %s8371_s26 }
 0x730   : > { %5609 = vrot.lane.b32.xlu1 %v11655_v51, %s8373_s20  ;;  %v11878_v51 = vld [vmem:[#allocation2 + $0xe8] sm:$0xff] }
 0x731   : > { %5967 = vst.msk [vmem:[#allocation4 + $0x128] sm:$0xff] %vm813_vm1, %v11878_v51 }
 0x733   : > { %6105 = vrot.lane.b32.xlu0 %v11840_v22, %s8371_s26 }
 0x734   : > { %6441 = vrot.lane.b32.xlu1 %v11592_v9, %s8374_s29 }
 0x737   : > { %5465 = vrot.lane.b32.xlu0 %v11582_v47, %s8371_s26  ;;  %v11876_v47 = vld [vmem:[#allocation2 + $0x69] sm:$0xff] }
 0x738   : > { %5801 = vrot.lane.b32.xlu1 %v11536_v35, %s8374_s29  ;;  %v11886_v35 = vld [vmem:[#allocation2 + $0x87] sm:$0xff] }
 0x73b   : > { %6297 = vrot.lane.b32.xlu0 %v11854_v13, %s8373_s20 }
 0x73c   : > { %5849 = vrot.lane.b32.xlu1 %v11698_v37, %s8374_s29  ;;  %v11890_v37 = vld [vmem:[#allocation2 + $0xd1] sm:$0xff] }
 0x73d   : > { %6604 = vst.msk [vmem:[#allocation4 + $0xe8] sm:$0xff] %vm813_vm1, %v11890_v37 }
 0x73f   : > { %5657 = vrot.lane.b32.xlu0 %v11653_v59, %s8373_s20  ;;  %v11888_v59 = vld [vmem:[#allocation2 + $0x1e9] sm:$0xff] }
 0x740   : > { %5419 = vrot.lane.b32.xlu1 %v11513_v1, %s8371_s26  ;;  %v11902_v1 = vld [vmem:[#allocation2 + $0x207] sm:$0xff] }
 0x743   : > { %6489 = vrot.lane.b32.xlu0 %v11604_v54, %s8374_s29 }
 0x744   : > { %6251 = vrot.lane.b32.xlu1 %v11886_v35, %s8373_s20 }
 0x747   : > { %6059 = vrot.lane.b32.xlu0 %v11876_v47, %s8371_s26 }
 0x748   : > { %5611 = vrot.lane.b32.xlu1 %v11738_v20, %s8373_s20  ;;  %v11945_v20 = vld [vmem:[#allocation2 + $0xf1] sm:$0xff] }
 0x749   : > { %6606 = vst.msk [vmem:[#allocation4 + $0x118] sm:$0xff] %vm813_vm1, %v11945_v20 }
 0x74b   : > { %6107 = vrot.lane.b32.xlu0 %v11888_v59, %s8371_s26 }
 0x74c   : > { %6443 = vrot.lane.b32.xlu1 %v11620_v48, %s8374_s29 }
 0x74d   : > { %v5412_v15 = vpop.permute.xlu0 %5411 }
 0x74e   : > { %5507 = vst.msk [vmem:[#allocation4] sm:$0xff] %vm1006_vm2, %v5412_v15  ;;  %v12019_v15 = vld [vmem:[#allocation2 + $0x130] sm:$0xff] }
 0x74f   : > { %5467 = vrot.lane.b32.xlu0 %v11527_v57, %s8371_s26  ;;  %5972 = vst.msk [vmem:[#allocation4 + $0x1a0] sm:$0xff] %vm813_vm1, %v12019_v15 }
 0x750   : > { %5803 = vrot.lane.b32.xlu1 %v11752_v16, %s8374_s29 }
 0x752   : > { %v5416_v57 = vpop.permute.xlu1 %5415  ;;  %v5414_v29 = vpop.permute.xlu0 %5413 }
 0x753   : > { %6299 = vrot.lane.b32.xlu0 %v11902_v1, %s8373_s20  ;;  %5509 = vst.msk [vmem:[#allocation4 + $0x30] sm:$0xff] %vm1006_vm2, %v5416_v57  ;;  %5508 = vst.msk [vmem:[#allocation4 + $0x18] sm:$0xff] %vm1006_vm2, %v5414_v29  ;;  %v5290_v57 = vld [vmem:[#allocation2 + $0x6f] sm:$0xff] }
 0x754   : > { %5851 = vrot.lane.b32.xlu1 %v11784_v10, %s8374_s29  ;;  %v5313_v10 = vld [vmem:[#allocation2 + $0x1e7] sm:$0xff]  ;;  %5322 = vst.msk [vmem:[#allocation4 + $0xa8] sm:$0xff] %vm813_vm1, %v5290_v57 }
 0x755   : > { %5345 = vst.msk [vmem:[#allocation4 + $0x2d0] sm:$0xff] %vm813_vm1, %v5313_v10  ;;  %v6210_v10 = vld [vmem:[#allocation2 + $0x22f] sm:$0xff] }
 0x756   : > { %v6052_v53 = vpop.permute.xlu1 %6051  ;;  %v6565_v57 = vld [vmem:[#allocation2 + $0x69] sm:$0xff] }
 0x757   : > { %5659 = vrot.lane.b32.xlu0 %v11754_v6, %s8373_s20  ;;  %6147 = vst.msk [vmem:[#allocation4 + $0x8] sm:$0xff] %vm1006_vm2, %v6052_v53  ;;  %v5289_v6 = vld [vmem:[#allocation2 + $0x67] sm:$0xff] }
 0x758   : > { %5421 = vrot.lane.b32.xlu1 %v11546_v12, %s8371_s26  ;;  %5321 = vst.msk [vmem:[#allocation4 + $0x90] sm:$0xff] %vm813_vm1, %v5289_v6  ;;  %v6401_v53 = vld [vmem:[#allocation2 + $0x228] sm:$0xff]  ;;  %v6018_v6 = vld [vmem:[#allocation2 + $0x211] sm:$0xff]  ;;  %6597 = vst.msk [vmem:[#allocation4 + $0x40] sm:$0xff] %vm813_vm1, %v6565_v57 }
 0x75a   : > { %v6244_v56 = vpop.permute.xlu1 %6243 }
 0x75b   : > { %6491 = vrot.lane.b32.xlu0 %v11635_v11, %s8374_s29  ;;  %v11939_v11 = vld [vmem:[#allocation2 + $0x8f] sm:$0xff]  ;;  %6339 = vst.msk [vmem:[#allocation4 + $0x8] sm:$0xff] %vm1199_vm3, %v6244_v56 }
 0x75c   : > { %6253 = vrot.lane.b32.xlu1 %v11939_v11, %s8373_s20 }
 0x75e   : > { %v5604_v12 = vpop.permute.xlu1 %5603 }
 0x75f   : > { %6061 = vrot.lane.b32.xlu0 %v11927_v32, %s8371_s26  ;;  %5699 = vst.msk [vmem:[#allocation4] sm:$0xff] %vm1199_vm3, %v5604_v12  ;;  %v5314_v12 = vld [vmem:[#allocation2 + $0x1ef] sm:$0xff] }
 0x760   : > { %5613 = vrot.lane.b32.xlu1 %v11826_v19, %s8373_s20  ;;  %v12003_v19 = vld [vmem:[#allocation2 + $0x111] sm:$0xff]  ;;  %5346 = vst.msk [vmem:[#allocation4 + $0x2e8] sm:$0xff] %vm813_vm1, %v5314_v12 }
 0x761   : > { %v6100_v2 = vpop.permute.xlu0 %6099  ;;  %6608 = vst.msk [vmem:[#allocation4 + $0x148] sm:$0xff] %vm813_vm1, %v12003_v19 }
 0x762   : > { %6171 = vst.msk [vmem:[#allocation4 + $0x248] sm:$0xff] %vm1006_vm2, %v6100_v2  ;;  %v6436_v31 = vpop.permute.xlu1 %6435 }
 0x763   : > { %6109 = vrot.lane.b32.xlu0 %v11941_v52, %s8371_s26  ;;  %6531 = vst.msk [vmem:[#allocation4 + $0x8] sm:$0xff] %vm1393_vm4, %v6436_v31 }
 0x764   : > { %6445 = vrot.lane.b32.xlu1 %v11658_v26, %s8374_s29 }
 0x765   : > { %v5460_v38 = vpop.permute.xlu0 %5459 }
 0x766   : > { %5531 = vst.msk [vmem:[#allocation4 + $0x240] sm:$0xff] %vm1006_vm2, %v5460_v38 }
 0x767   : > { %5469 = vrot.lane.b32.xlu0 %v11548_v27, %s8371_s26  ;;  %v5796_v27 = vpop.permute.xlu1 %5795 }
 0x768   : > { %5891 = vst.msk [vmem:[#allocation4] sm:$0xff] %vm1393_vm4, %v5796_v27  ;;  %5805 = vrot.lane.b32.xlu1 %v11838_v41, %s8374_s29  ;;  %v6209_v41 = vld [vmem:[#allocation2 + $0x227] sm:$0xff] }
 0x769   : > { %v6292_v16 = vpop.permute.xlu0 %6291 }
 0x76a   : > { %6363 = vst.msk [vmem:[#allocation4 + $0x248] sm:$0xff] %vm1199_vm3, %v6292_v16  ;;  %v6628_v8 = vld [vmem:[#allocation4 + $0x8] sm:$0xff] }
 0x76b   : > { %6301 = vrot.lane.b32.xlu0 %v11959_v55, %s8373_s20  ;;  %v5844_v24 = vpop.permute.xlu1 %5843  ;;  %6889 = vmatprep.mubr.f32.mxu0 %v6628_v8  ;;  %v12044_v16 = vld [vmem:[#allocation2 + $0x148] sm:$0xff] }
 0x76c   : > { %5853 = vrot.lane.b32.xlu1 %v11854_v13, %s8374_s29  ;;  %5973 = vst.msk [vmem:[#allocation4 + $0x1b8] sm:$0xff] %vm813_vm1, %v12044_v16 }
 0x76d   : > { %v5652_v39 = vpop.permute.xlu0 %5651 }
 0x76e   : > { %5723 = vst.msk [vmem:[#allocation4 + $0x240] sm:$0xff] %vm1199_vm3, %v5652_v39 }
 0x76f   : > { %5661 = vrot.lane.b32.xlu0 %v11840_v22, %s8373_s20  ;;  %5915 = vst.msk [vmem:[#allocation4 + $0x240] sm:$0xff] %vm1393_vm4, %v5844_v24  ;;  %v6102_v23 = vpop.permute.xlu1 %6101  ;;  %v6627_v61 = vld [vmem:[#allocation4] sm:$0xff] }
 0x770   : > { %6172 = vst.msk [vmem:[#allocation4 + $0x260] sm:$0xff] %vm1006_vm2, %v6102_v23  ;;  %6890 = vmatmul.mubr.f32.vlgmr.msra.gmra.mrb[0].mxu0 %v6627_v61  ;;  %5423 = vrot.lane.b32.xlu1 %v11566_v7, %s8371_s26  ;;  %v5278_v61 = vld [vmem:[%s12847_s9 + $0x100] sm:$0xff] }
 0x771   : > { %v6484_v25 = vpop.permute.xlu0 %6483 }
 0x772   : > { %6555 = vst.msk [vmem:[#allocation4 + $0x248] sm:$0xff] %vm1393_vm4, %v6484_v25  ;;  %v12056_v25 = vld [vmem:[#allocation2 + $0x131] sm:$0xff] }
 0x773   : > { %6493 = vrot.lane.b32.xlu0 %v11670_v58, %s8374_s29  ;;  %v11999_v58 = vld [vmem:[#allocation2 + $0xa7] sm:$0xff]  ;;  %v5462_v50 = vpop.permute.xlu1 %5461  ;;  %6610 = vst.msk [vmem:[#allocation4 + $0x178] sm:$0xff] %vm813_vm1, %v12056_v25 }
 0x774   : > { %5532 = vst.msk [vmem:[#allocation4 + $0x258] sm:$0xff] %vm1006_vm2, %v5462_v50  ;;  %6255 = vrot.lane.b32.xlu1 %v11999_v58, %s8373_s20  ;;  %v5291_v50 = vld [vmem:[#allocation2 + $0x87] sm:$0xff] }
 0x775   : > { %v6054_v46 = vpop.permute.xlu0 %6053  ;;  %5323 = vst.msk [vmem:[#allocation4 + $0xc0] sm:$0xff] %vm813_vm1, %v5291_v50  ;;  %v12164_v50 = vld [vmem:[#allocation2 + $0x169] sm:$0xff] }
 0x776   : > { %6148 = vst.msk [vmem:[#allocation4 + $0x20] sm:$0xff] %vm1006_vm2, %v6054_v46  ;;  %v6699_v18 = vld [vmem:[#allocation4 + $0x240] sm:$0xff] }
 0x777   : > { %6063 = vrot.lane.b32.xlu0 %v11676_v5, %s8371_s26  ;;  %v6294_v7 = vpop.permute.xlu1 %6293  ;;  %6613 = vst.msk [vmem:[#allocation4 + $0x1c0] sm:$0xff] %vm813_vm1, %v12164_v50 }
 0x778   : > { %6364 = vst.msk [vmem:[#allocation4 + $0x260] sm:$0xff] %vm1199_vm3, %v6294_v7  ;;  %5615 = vrot.lane.b32.xlu1 %v11876_v47, %s8373_s20 }
 0x779   : > { %v6246_v4 = vpop.permute.xlu0 %6245  ;;  %v6700_v34 = vld [vmem:[#allocation4 + $0x248] sm:$0xff] }
 0x77a   : > { %6340 = vst.msk [vmem:[#allocation4 + $0x20] sm:$0xff] %vm1199_vm3, %v6246_v4  ;;  %7009 = vmatprep.mubr.f32.mxu1 %v6700_v34  ;;  %v6563_v4 = vld [vmem:[#allocation2 + $0x49] sm:$0xff]  ;;  %v6564_v34 = vld [vmem:[#allocation2 + $0x51] sm:$0xff] }
 0x77b   : > { %6111 = vrot.lane.b32.xlu0 %v6017_v3, %s8371_s26  ;;  %7010 = vmatmul.mubr.f32.vlgmr.msra.gmra.mrb[0].mxu1 %v6699_v18  ;;  %v5654_v22 = vpop.permute.xlu1 %5653  ;;  %v5279_v3 = vld [vmem:[%s12847_s9 + $0x108] sm:$0xff]  ;;  %6595 = vst.msk [vmem:[#allocation4 + $0x10] sm:$0xff] %vm813_vm1, %v6563_v4  ;;  %6596 = vst.msk [vmem:[#allocation4 + $0x28] sm:$0xff] %vm813_vm1, %v6564_v34 }
 0x77c   : > { %5724 = vst.msk [vmem:[#allocation4 + $0x258] sm:$0xff] %vm1199_vm3, %v5654_v22  ;;  %6447 = vrot.lane.b32.xlu1 %v11681_v30, %s8374_s29  ;;  %v5281_v22 = vld [vmem:[%s12847_s9 + $0x118] sm:$0xff] }
 0x77d   : > { %v5606_v21 = vpop.permute.xlu0 %5605 }
 0x77e   : > { %5700 = vst.msk [vmem:[#allocation4 + $0x18] sm:$0xff] %vm1199_vm3, %v5606_v21 }
 0x77f   : > { %5471 = vrot.lane.b32.xlu0 %v11570_v14, %s8371_s26  ;;  %v6486_v14 = vpop.permute.xlu1 %6485 }
 0x780   : > { %6556 = vst.msk [vmem:[#allocation4 + $0x260] sm:$0xff] %vm1393_vm4, %v6486_v14  ;;  %5807 = vrot.lane.b32.xlu1 %v11886_v35, %s8374_s29  ;;  %v12099_v14 = vld [vmem:[#allocation2 + $0x149] sm:$0xff] }
 0x781   : > { %v6438_v13 = vpop.permute.xlu0 %6437  ;;  %6611 = vst.msk [vmem:[#allocation4 + $0x190] sm:$0xff] %vm813_vm1, %v12099_v14 }
 0x782   : > { %6532 = vst.msk [vmem:[#allocation4 + $0x20] sm:$0xff] %vm1393_vm4, %v6438_v13 }
 0x783   : > { %6303 = vrot.lane.b32.xlu0 %v6209_v41, %s8373_s20  ;;  %v6056_v29 = vpop.permute.xlu1 %6055  ;;  %v5280_v41 = vld [vmem:[%s12847_s9 + $0x110] sm:$0xff] }
 0x784   : > { %6149 = vst.msk [vmem:[#allocation4 + $0x38] sm:$0xff] %vm1006_vm2, %v6056_v29  ;;  %5855 = vrot.lane.b32.xlu1 %v11902_v1, %s8374_s29  ;;  %v12052_v1 = vld [vmem:[#allocation2 + $0xaf] sm:$0xff]  ;;  %v8137_v13 = vpack.c.bf16 %v5281_v22, %v5280_v41 }
 0x785   : > { %v5798_v47 = vpop.permute.xlu0 %5797  ;;  %v12181_v41 = vld [vmem:[#allocation2 + $0x188] sm:$0xff]  ;;  %v12183_v22 = vld [vmem:[#allocation2 + $0x171] sm:$0xff] }
 0x786   : > { %5892 = vst.msk [vmem:[#allocation4 + $0x18] sm:$0xff] %vm1393_vm4, %v5798_v47  ;;  %v6566_v47 = vld [vmem:[#allocation2 + $0x71] sm:$0xff] }
 0x787   : > { %5663 = vrot.lane.b32.xlu0 %v11888_v59, %s8373_s20  ;;  %v6248_v35 = vpop.permute.xlu1 %6247  ;;  %v6703_v31 = vld [vmem:[#allocation4 + $0x260] sm:$0xff]  ;;  %6598 = vst.msk [vmem:[#allocation4 + $0x58] sm:$0xff] %vm813_vm1, %v6566_v47  ;;  %6614 = vst.msk [vmem:[#allocation4 + $0x1d8] sm:$0xff] %vm813_vm1, %v12183_v22  ;;  %v12195_v47 = vld [vmem:[#allocation2 + $0x189] sm:$0xff] }
 0x788   : > { %6341 = vst.msk [vmem:[#allocation4 + $0x38] sm:$0xff] %vm1199_vm3, %v6248_v35  ;;  %7014 = vmatprep.mubr.f32.mxu1 %v6703_v31  ;;  %5425 = vrot.lane.b32.xlu1 %v11592_v9, %s8371_s26  ;;  %v12123_v31 = vld [vmem:[#allocation2 + $0xc7] sm:$0xff] }
 0x789   : > { %v5846_v56 = vpop.permute.xlu0 %5845  ;;  %v6631_v2 = vld [vmem:[#allocation4 + $0x20] sm:$0xff]  ;;  %5977 = vst.msk [vmem:[#allocation4 + $0x218] sm:$0xff] %vm813_vm1, %v12181_v41  ;;  %6615 = vst.msk [vmem:[#allocation4 + $0x1f0] sm:$0xff] %vm813_vm1, %v12195_v47 }
 0x78a   : > { %5916 = vst.msk [vmem:[#allocation4 + $0x258] sm:$0xff] %vm1393_vm4, %v5846_v56  ;;  %6894 = vmatprep.mubr.f32.mxu0 %v6631_v2 }
 0x78b   : > { %6495 = vrot.lane.b32.xlu0 %v6401_v53, %s8374_s29  ;;  %v5608_v27 = vpop.permute.xlu1 %5607  ;;  %v6402_v53 = vld [vmem:[#allocation2 + $0x230] sm:$0xff] }
 0x78c   : > { %5701 = vst.msk [vmem:[#allocation4 + $0x30] sm:$0xff] %vm1199_vm3, %v5608_v27  ;;  %6257 = vrot.lane.b32.xlu1 %v12052_v1, %s8373_s20 }
 0x78d   : > { %v6104_v59 = vpop.permute.xlu0 %6103  ;;  %v6630_v38 = vld [vmem:[#allocation4 + $0x18] sm:$0xff] }
 0x78e   : > { %6173 = vst.msk [vmem:[#allocation4 + $0x278] sm:$0xff] %vm1006_vm2, %v6104_v59  ;;  %6895 = vmatmul.mubr.f32.gmra.mrb[2].mxu0 %v6630_v38  ;;  %v5292_v38 = vld [vmem:[#allocation2 + $0x8f] sm:$0xff] }
 0x78f   : > { %6065 = vrot.lane.b32.xlu0 %v11722_v36, %s8371_s26  ;;  %v6440_v9 = vpop.permute.xlu1 %6439  ;;  %5324 = vst.msk [vmem:[#allocation4 + $0xd8] sm:$0xff] %vm813_vm1, %v5292_v38  ;;  %v12224_v38 = vld [vmem:[#allocation2 + $0xef] sm:$0xff] }
 0x790   : > { %6533 = vst.msk [vmem:[#allocation4 + $0x38] sm:$0xff] %vm1393_vm4, %v6440_v9  ;;  %5617 = vrot.lane.b32.xlu1 %v11927_v32, %s8373_s20  ;;  %v8133_v32 = vpack.c.bf16 %v5279_v3, %v5278_v61  ;;  %v12141_v9 = vld [vmem:[#allocation2 + $0x16f] sm:$0xff] }
 0x791   : > { %v5464_v39 = vpop.permute.xlu0 %5463  ;;  %v6702_v24 = vld [vmem:[#allocation4 + $0x258] sm:$0xff]  ;;  %5338 = vst.msk [vmem:[#allocation4 + $0x228] sm:$0xff] %vm813_vm1, %v12141_v9 }
 0x792   : > { %5533 = vst.msk [vmem:[#allocation4 + $0x270] sm:$0xff] %vm1006_vm2, %v5464_v39  ;;  %7015 = vmatmul.mubr.f32.gmra.mrb[2].mxu1 %v6702_v24  ;;  %8134 = vmatprep.subr.bf16.mxu1 %v8133_v32  ;;  %v12131_v39 = vld [vmem:[#allocation2 + $0x151] sm:$0xff] }
 0x793   : > { %6113 = vrot.lane.b32.xlu0 %v6018_v6, %s8371_s26  ;;  %v5800_v23 = vpop.permute.xlu1 %5799  ;;  %8136 = vmatpush3.bf16.msra.mxu1 %v8133_v32  ;;  %6612 = vst.msk [vmem:[#allocation4 + $0x1a8] sm:$0xff] %vm813_vm1, %v12131_v39 }
 0x794   : > { %5893 = vst.msk [vmem:[#allocation4 + $0x30] sm:$0xff] %vm1393_vm4, %v5800_v23  ;;  %6449 = vrot.lane.b32.xlu1 %v11764_v40, %s8374_s29  ;;  %8138 = vmatprep.subr.bf16.mxu1 %v8137_v13  ;;  %v12152_v23 = vld [vmem:[#allocation2 + $0x170] sm:$0xff] }
 0x795   : > { %v6296_v8 = vpop.permute.xlu0 %6295  ;;  %5976 = vst.msk [vmem:[#allocation4 + $0x200] sm:$0xff] %vm813_vm1, %v12152_v23 }
 0x796   : > { %6365 = vst.msk [vmem:[#allocation4 + $0x278] sm:$0xff] %vm1199_vm3, %v6296_v8 }
 0x797   : > { %5473 = vrot.lane.b32.xlu0 %v11604_v54, %s8371_s26  ;;  %v12081_v54 = vld [vmem:[#allocation2 + $0x150] sm:$0xff]  ;;  %v5848_v18 = vpop.permute.xlu1 %5847  ;;  %v6634_v21 = vld [vmem:[#allocation4 + $0x38] sm:$0xff]  ;;  %8140 = vmatpush3.bf16.msra.mxu1 %v8137_v13 }
 0x798   : > { %5974 = vst.msk [vmem:[#allocation4 + $0x1d0] sm:$0xff] %vm813_vm1, %v12081_v54  ;;  %6899 = vmatprep.mubr.f32.mxu0 %v6634_v21  ;;  %5809 = vrot.lane.b32.xlu1 %v11939_v11, %s8374_s29  ;;  %v12110_v11 = vld [vmem:[#allocation2 + $0x167] sm:$0xff]  ;;  %v5294_v21 = vld [vmem:[#allocation2 + $0xaf] sm:$0xff] }
 0x799   : > { %v5656_v46 = vpop.permute.xlu0 %5655  ;;  %5337 = vst.msk [vmem:[#allocation4 + $0x210] sm:$0xff] %vm813_vm1, %v12110_v11  ;;  %5326 = vst.msk [vmem:[#allocation4 + $0x108] sm:$0xff] %vm813_vm1, %v5294_v21 }
 0x79a   : > { %5725 = vst.msk [vmem:[#allocation4 + $0x270] sm:$0xff] %vm1199_vm3, %v5656_v46 }
 0x79b   : > { %6305 = vrot.lane.b32.xlu0 %v6210_v10, %s8373_s20  ;;  %5917 = vst.msk [vmem:[#allocation4 + $0x270] sm:$0xff] %vm1393_vm4, %v5848_v18  ;;  %v5418_v29 = vpop.permute.xlu1 %5417  ;;  %v6633_v2 = vld [vmem:[#allocation4 + $0x30] sm:$0xff]  ;;  %v5293_v10 = vld [vmem:[#allocation2 + $0xa7] sm:$0xff] }
 0x79c   : > { %5510 = vst.msk [vmem:[#allocation4 + $0x48] sm:$0xff] %vm1006_vm2, %v5418_v29  ;;  %6900 = vmatmul.mubr.f32.gmra.mrb[4].mxu0 %v6633_v2  ;;  %5857 = vrot.lane.b32.xlu1 %v11959_v55, %s8374_s29  ;;  %v12119_v55 = vld [vmem:[#allocation2 + $0x168] sm:$0xff]  ;;  %v6586_v2 = vld [vmem:[#allocation2 + $0x1b1] sm:$0xff] }
 0x79d   : > { %v6488_v7 = vpop.permute.xlu0 %6487  ;;  %5975 = vst.msk [vmem:[#allocation4 + $0x1e8] sm:$0xff] %vm813_vm1, %v12119_v55  ;;  %5325 = vst.msk [vmem:[#allocation4 + $0xf0] sm:$0xff] %vm813_vm1, %v5293_v10 }
 0x79e   : > { %6557 = vst.msk [vmem:[#allocation4 + $0x278] sm:$0xff] %vm1393_vm4, %v6488_v7 }
 0x79f   : > { %5665 = vrot.lane.b32.xlu0 %v11941_v52, %s8373_s20  ;;  %v6250_v52 = vpop.permute.xlu1 %6249  ;;  %6618 = vst.msk [vmem:[#allocation4 + $0x238] sm:$0xff] %vm813_vm1, %v6586_v2 }
 0x7a0   : > { %5427 = vrot.lane.b32.xlu1 %v11620_v48, %s8371_s26 }
 0x7a1   : > { %v6058_v56 = vpop.permute.xlu0 %6057 }
 0x7a2   : > { %6150 = vst.msk [vmem:[#allocation4 + $0x50] sm:$0xff] %vm1006_vm2, %v6058_v56  ;;  %v6705_v59 = vld [vmem:[#allocation4 + $0x270] sm:$0xff] }
 0x7a3   : > { %6497 = vrot.lane.b32.xlu0 %v6402_v53, %s8374_s29  ;;  %6342 = vst.msk [vmem:[#allocation4 + $0x50] sm:$0xff] %vm1199_vm3, %v6250_v52  ;;  %v5610_v6 = vpop.permute.xlu1 %5609  ;;  %v6585_v56 = vld [vmem:[#allocation2 + $0x1a9] sm:$0xff] }
 0x7a4   : > { %5702 = vst.msk [vmem:[#allocation4 + $0x48] sm:$0xff] %vm1199_vm3, %v5610_v6  ;;  %5619 = vrot.lane.b32.xlu1 %v11676_v5, %s8373_s20 }
 0x7a5   : > { %v6106_v12 = vpop.permute.xlu0 %6105  ;;  %v6706_v35 = vld [vmem:[#allocation4 + $0x278] sm:$0xff]  ;;  %6617 = vst.msk [vmem:[#allocation4 + $0x220] sm:$0xff] %vm813_vm1, %v6585_v56 }
 0x7a6   : > { %6174 = vst.msk [vmem:[#allocation4 + $0x290] sm:$0xff] %vm1006_vm2, %v6106_v12  ;;  %7019 = vmatprep.mubr.f32.mxu1 %v6706_v35  ;;  %v5295_v12 = vld [vmem:[#allocation2 + $0xc7] sm:$0xff]  ;;  %v12220_v35 = vld [vmem:[#allocation2 + $0x190] sm:$0xff] }
 0x7a7   : > { %6067 = vrot.lane.b32.xlu0 %v11806_v28, %s8371_s26  ;;  %7020 = vmatmul.mubr.f32.gmra.mrb[4].mxu1 %v6705_v59  ;;  %v6442_v48 = vpop.permute.xlu1 %6441  ;;  %5327 = vst.msk [vmem:[#allocation4 + $0x120] sm:$0xff] %vm813_vm1, %v5295_v12  ;;  %v6587_v59 = vld [vmem:[#allocation2 + $0x1c9] sm:$0xff]  ;;  %5978 = vst.msk [vmem:[#allocation4 + $0x230] sm:$0xff] %vm813_vm1, %v12220_v35 }
 0x7a8   : > { %6534 = vst.msk [vmem:[#allocation4 + $0x50] sm:$0xff] %vm1393_vm4, %v6442_v48  ;;  %5811 = vrot.lane.b32.xlu1 %v11999_v58, %s8374_s29  ;;  %v12156_v58 = vld [vmem:[#allocation2 + $0xcf] sm:$0xff] }
 0x7a9   : > { %v5466_v27 = vpop.permute.xlu0 %5465  ;;  %6619 = vst.msk [vmem:[#allocation4 + $0x250] sm:$0xff] %vm813_vm1, %v6587_v59 }
 0x7aa   : > { %5534 = vst.msk [vmem:[#allocation4 + $0x288] sm:$0xff] %vm1006_vm2, %v5466_v27 }
 0x7ab   : > { %6259 = vrot.lane.b32.xlu0 %v12123_v31, %s8373_s20  ;;  %v5802_v5 = vpop.permute.xlu1 %5801 }
 0x7ac   : > { %5894 = vst.msk [vmem:[#allocation4 + $0x48] sm:$0xff] %vm1393_vm4, %v5802_v5  ;;  %5429 = vrot.lane.b32.xlu1 %v11658_v26, %s8371_s26 }
 0x7ad   : > { %v6298_v24 = vpop.permute.xlu0 %6297 }
 0x7ae   : > { %6366 = vst.msk [vmem:[#allocation4 + $0x290] sm:$0xff] %vm1199_vm3, %v6298_v24  ;;  %v6589_v24 = vld [vmem:[#allocation2 + $0x1e9] sm:$0xff] }
 0x7af   : > { %6451 = vrot.lane.b32.xlu0 %v11830_v43, %s8374_s29  ;;  %v5850_v46 = vpop.permute.xlu1 %5849  ;;  %v6637_v3 = vld [vmem:[#allocation4 + $0x50] sm:$0xff]  ;;  %6621 = vst.msk [vmem:[#allocation4 + $0x280] sm:$0xff] %vm813_vm1, %v6589_v24 }
 0x7b0   : > { %6904 = vmatprep.mubr.f32.mxu0 %v6637_v3  ;;  %5621 = vrot.lane.b32.xlu1 %v11722_v36, %s8373_s20 }
 0x7b1   : > { %v5658_v8 = vpop.permute.xlu0 %5657 }
 0x7b2   : > { %5726 = vst.msk [vmem:[#allocation4 + $0x288] sm:$0xff] %vm1199_vm3, %v5658_v8 }
 0x7b3   : > { %6069 = vrot.lane.b32.xlu0 %v11842_v0, %s8371_s26  ;;  %5918 = vst.msk [vmem:[#allocation4 + $0x288] sm:$0xff] %vm1393_vm4, %v5850_v46  ;;  %v5420_v26 = vpop.permute.xlu1 %5419  ;;  %v6636_v4 = vld [vmem:[#allocation4 + $0x48] sm:$0xff] }
 0x7b4   : > { %5511 = vst.msk [vmem:[#allocation4 + $0x60] sm:$0xff] %vm1006_vm2, %v5420_v26  ;;  %6905 = vmatmul.mubr.f32.gmra.mrb[6].mxu0 %v6636_v4  ;;  %5813 = vrot.lane.b32.xlu1 %v12052_v1, %s8374_s29  ;;  %v12187_v1 = vld [vmem:[#allocation2 + $0xe7] sm:$0xff]  ;;  %v5296_v4 = vld [vmem:[#allocation2 + $0xcf] sm:$0xff] }
 0x7b5   : > { %v6490_v61 = vpop.permute.xlu0 %6489  ;;  %v6591_v46 = vld [vmem:[#allocation2 + $0x209] sm:$0xff]  ;;  %5328 = vst.msk [vmem:[#allocation4 + $0x138] sm:$0xff] %vm813_vm1, %v5296_v4 }
 0x7b6   : > { %6558 = vst.msk [vmem:[#allocation4 + $0x290] sm:$0xff] %vm1393_vm4, %v6490_v61  ;;  %v6592_v61 = vld [vmem:[#allocation2 + $0x211] sm:$0xff] }
 0x7b7   : > { %6261 = vrot.lane.b32.xlu0 %v12156_v58, %s8373_s20  ;;  %v6252_v34 = vpop.permute.xlu1 %6251  ;;  %6623 = vst.msk [vmem:[#allocation4 + $0x2b0] sm:$0xff] %vm813_vm1, %v6591_v46  ;;  %6624 = vst.msk [vmem:[#allocation4 + $0x2c8] sm:$0xff] %vm813_vm1, %v6592_v61 }
 0x7b8   : > { %5431 = vrot.lane.b32.xlu1 %v11681_v30, %s8371_s26  ;;  %v12201_v30 = vld [vmem:[#allocation2 + $0x191] sm:$0xff] }
 0x7b9   : > { %v6060_v32 = vpop.permute.xlu0 %6059  ;;  %6616 = vst.msk [vmem:[#allocation4 + $0x208] sm:$0xff] %vm813_vm1, %v12201_v30 }
 0x7ba   : > { %6151 = vst.msk [vmem:[#allocation4 + $0x68] sm:$0xff] %vm1006_vm2, %v6060_v32  ;;  %v6708_v7 = vld [vmem:[#allocation4 + $0x288] sm:$0xff] }
 0x7bb   : > { %6453 = vrot.lane.b32.xlu0 %v11856_v45, %s8374_s29  ;;  %6343 = vst.msk [vmem:[#allocation4 + $0x68] sm:$0xff] %vm1199_vm3, %v6252_v34  ;;  %v5612_v13 = vpop.permute.xlu1 %5611  ;;  %v6593_v34 = vld [vmem:[#allocation2 + $0x229] sm:$0xff] }
 0x7bc   : > { %5703 = vst.msk [vmem:[#allocation4 + $0x60] sm:$0xff] %vm1199_vm3, %v5612_v13  ;;  %5623 = vrot.lane.b32.xlu1 %v11806_v28, %s8373_s20 }
 0x7bd   : > { %v6108_v18 = vpop.permute.xlu0 %6107  ;;  %v6709_v36 = vld [vmem:[#allocation4 + $0x290] sm:$0xff]  ;;  %6625 = vst.msk [vmem:[#allocation4 + $0x2e0] sm:$0xff] %vm813_vm1, %v6593_v34  ;;  %v12332_v34 = vld [vmem:[#allocation2 + $0x147] sm:$0xff] }
 0x7be   : > { %6175 = vst.msk [vmem:[#allocation4 + $0x2a8] sm:$0xff] %vm1006_vm2, %v6108_v18  ;;  %7024 = vmatprep.mubr.f32.mxu1 %v6709_v36  ;;  %v6191_v18 = vld [vmem:[#allocation2 + $0x107] sm:$0xff] }
 0x7bf   : > { %6071 = vrot.lane.b32.xlu0 %v11864_v49, %s8371_s26  ;;  %7025 = vmatmul.mubr.f32.gmra.mrb[6].mxu1 %v6708_v7  ;;  %v6444_v53 = vpop.permute.xlu1 %6443 }
 0x7c0   : > { %6535 = vst.msk [vmem:[#allocation4 + $0x68] sm:$0xff] %vm1393_vm4, %v6444_v53  ;;  %5815 = vrot.lane.b32.xlu1 %v12123_v31, %s8374_s29  ;;  %v6588_v31 = vld [vmem:[#allocation2 + $0x1d1] sm:$0xff]  ;;  %v5297_v53 = vld [vmem:[#allocation2 + $0xe7] sm:$0xff] }
 0x7c1   : > { %v5468_v57 = vpop.permute.xlu0 %5467  ;;  %6620 = vst.msk [vmem:[#allocation4 + $0x268] sm:$0xff] %vm813_vm1, %v6588_v31  ;;  %5329 = vst.msk [vmem:[#allocation4 + $0x150] sm:$0xff] %vm813_vm1, %v5297_v53 }
 0x7c2   : > { %5535 = vst.msk [vmem:[#allocation4 + $0x2a0] sm:$0xff] %vm1006_vm2, %v5468_v57 }
 0x7c3   : > { %6263 = vrot.lane.b32.xlu0 %v12187_v1, %s8373_s20  ;;  %v5804_v28 = vpop.permute.xlu1 %5803 }
 0x7c4   : > { %5895 = vst.msk [vmem:[#allocation4 + $0x60] sm:$0xff] %vm1393_vm4, %v5804_v28  ;;  %5433 = vrot.lane.b32.xlu1 %v11764_v40, %s8371_s26  ;;  %v6590_v40 = vld [vmem:[#allocation2 + $0x1f1] sm:$0xff] }
 0x7c5   : > { %v6300_v29 = vpop.permute.xlu0 %6299  ;;  %6622 = vst.msk [vmem:[#allocation4 + $0x298] sm:$0xff] %vm813_vm1, %v6590_v40 }
 0x7c6   : > { %6367 = vst.msk [vmem:[#allocation4 + $0x2a8] sm:$0xff] %vm1199_vm3, %v6300_v29 }
 0x7c7   : > { %6455 = vrot.lane.b32.xlu0 %v11878_v51, %s8374_s29  ;;  %v5852_v6 = vpop.permute.xlu1 %5851  ;;  %v6640_v48 = vld [vmem:[#allocation4 + $0x68] sm:$0xff] }
 0x7c8   : > { %6909 = vmatprep.mubr.f32.mxu0 %v6640_v48  ;;  %5625 = vrot.lane.b32.xlu1 %v11842_v0, %s8373_s20 }
 0x7c9   : > { %v5660_v52 = vpop.permute.xlu0 %5659 }
 0x7ca   : > { %5727 = vst.msk [vmem:[#allocation4 + $0x2a0] sm:$0xff] %vm1199_vm3, %v5660_v52 }
 0x7cb   : > { %6073 = vrot.lane.b32.xlu0 %v11890_v37, %s8371_s26  ;;  %5919 = vst.msk [vmem:[#allocation4 + $0x2a0] sm:$0xff] %vm1393_vm4, %v5852_v6  ;;  %v5422_v5 = vpop.permute.xlu1 %5421  ;;  %v6639_v10 = vld [vmem:[#allocation4 + $0x60] sm:$0xff] }
 0x7cc   : > { %5512 = vst.msk [vmem:[#allocation4 + $0x78] sm:$0xff] %vm1006_vm2, %v5422_v5  ;;  %6910 = vmatmul.mubr.f32.gmra.mrb[8].mxu0 %v6639_v10  ;;  %5817 = vrot.lane.b32.xlu1 %v12156_v58, %s8374_s29  ;;  %v6594_v58 = vld [vmem:[#allocation2 + $0x231] sm:$0xff]  ;;  %v5299_v5 = vld [vmem:[#allocation2 + $0x107] sm:$0xff] }
 0x7cd   : > { %v6492_v27 = vpop.permute.xlu0 %6491  ;;  %6626 = vst.msk [vmem:[#allocation4 + $0x2f8] sm:$0xff] %vm813_vm1, %v6594_v58  ;;  %5331 = vst.msk [vmem:[#allocation4 + $0x180] sm:$0xff] %vm813_vm1, %v5299_v5  ;;  %v5303_v5 = vld [vmem:[#allocation2 + $0x147] sm:$0xff] }
 0x7ce   : > { %6559 = vst.msk [vmem:[#allocation4 + $0x2a8] sm:$0xff] %vm1393_vm4, %v6492_v27 }
 0x7cf   : > { %6265 = vrot.lane.b32.xlu0 %v12224_v38, %s8373_s20  ;;  %v6254_v0 = vpop.permute.xlu1 %6253  ;;  %5335 = vst.msk [vmem:[#allocation4 + $0x1e0] sm:$0xff] %vm813_vm1, %v5303_v5 }
 0x7d0   : > { %5435 = vrot.lane.b32.xlu1 %v11830_v43, %s8371_s26 }
 0x7d1   : > { %v6062_v8 = vpop.permute.xlu0 %6061 }
 0x7d2   : > { %6152 = vst.msk [vmem:[#allocation4 + $0x80] sm:$0xff] %vm1006_vm2, %v6062_v8  ;;  %v6711_v32 = vld [vmem:[#allocation4 + $0x2a0] sm:$0xff] }
 0x7d3   : > { %6457 = vrot.lane.b32.xlu0 %v11904_v60, %s8374_s29  ;;  %6344 = vst.msk [vmem:[#allocation4 + $0x80] sm:$0xff] %vm1199_vm3, %v6254_v0  ;;  %v5614_v36 = vpop.permute.xlu1 %5613 }
 0x7d4   : > { %5704 = vst.msk [vmem:[#allocation4 + $0x78] sm:$0xff] %vm1199_vm3, %v5614_v36  ;;  %5627 = vrot.lane.b32.xlu1 %v11864_v49, %s8373_s20  ;;  %v12273_v49 = vld [vmem:[#allocation2 + $0x10f] sm:$0xff] }
 0x7d5   : > { %v6110_v3 = vpop.permute.xlu0 %6109  ;;  %v6712_v26 = vld [vmem:[#allocation4 + $0x2a8] sm:$0xff] }
 0x7d6   : > { %6176 = vst.msk [vmem:[#allocation4 + $0x2c0] sm:$0xff] %vm1006_vm2, %v6110_v3  ;;  %7029 = vmatprep.mubr.f32.mxu1 %v6712_v26 }
 0x7d7   : > { %6075 = vrot.lane.b32.xlu0 %v11912_v63, %s8371_s26  ;;  %7030 = vmatmul.mubr.f32.gmra.mrb[8].mxu1 %v6711_v32  ;;  %v6446_v21 = vpop.permute.xlu1 %6445 }
 0x7d8   : > { %6536 = vst.msk [vmem:[#allocation4 + $0x80] sm:$0xff] %vm1393_vm4, %v6446_v21  ;;  %5819 = vrot.lane.b32.xlu1 %v12187_v1, %s8374_s29 }
 0x7d9   : > { %v5470_v7 = vpop.permute.xlu0 %5469 }
 0x7da   : > { %5536 = vst.msk [vmem:[#allocation4 + $0x2b8] sm:$0xff] %vm1006_vm2, %v5470_v7 }
 0x7db   : > { %6267 = vrot.lane.b32.xlu0 %v6191_v18, %s8373_s20  ;;  %v5806_v43 = vpop.permute.xlu1 %5805 }
 0x7dc   : > { %5896 = vst.msk [vmem:[#allocation4 + $0x78] sm:$0xff] %vm1393_vm4, %v5806_v43  ;;  %5437 = vrot.lane.b32.xlu1 %v11856_v45, %s8371_s26 }
 0x7dd   : > { %v6302_v13 = vpop.permute.xlu0 %6301 }
 0x7de   : > { %6368 = vst.msk [vmem:[#allocation4 + $0x2c0] sm:$0xff] %vm1199_vm3, %v6302_v13  ;;  %v5301_v13 = vld [vmem:[#allocation2 + $0x127] sm:$0xff] }
 0x7df   : > { %6459 = vrot.lane.b32.xlu0 %v11931_v33, %s8374_s29  ;;  %v5854_v29 = vpop.permute.xlu1 %5853  ;;  %v6643_v1 = vld [vmem:[#allocation4 + $0x80] sm:$0xff]  ;;  %5333 = vst.msk [vmem:[#allocation4 + $0x1b0] sm:$0xff] %vm813_vm1, %v5301_v13 }
 0x7e0   : > { %6914 = vmatprep.mubr.f32.mxu0 %v6643_v1  ;;  %5629 = vrot.lane.b32.xlu1 %v11890_v37, %s8373_s20  ;;  %v5298_v37 = vld [vmem:[#allocation2 + $0xef] sm:$0xff] }
 0x7e1   : > { %v5662_v57 = vpop.permute.xlu0 %5661  ;;  %5330 = vst.msk [vmem:[#allocation4 + $0x168] sm:$0xff] %vm813_vm1, %v5298_v37 }
 0x7e2   : > { %5728 = vst.msk [vmem:[#allocation4 + $0x2b8] sm:$0xff] %vm1199_vm3, %v5662_v57 }
 0x7e3   : > { %6077 = vrot.lane.b32.xlu0 %v11945_v20, %s8371_s26  ;;  %5920 = vst.msk [vmem:[#allocation4 + $0x2b8] sm:$0xff] %vm1393_vm4, %v5854_v29  ;;  %v5424_v2 = vpop.permute.xlu1 %5423  ;;  %v6642_v52 = vld [vmem:[#allocation4 + $0x78] sm:$0xff] }
 0x7e4   : > { %5513 = vst.msk [vmem:[#allocation4 + $0x90] sm:$0xff] %vm1006_vm2, %v5424_v2  ;;  %6915 = vmatmul.mubr.f32.gmra.mrb[10].mxu0 %v6642_v52  ;;  %5821 = vrot.lane.b32.xlu1 %v12224_v38, %s8374_s29  ;;  %v6193_v38 = vld [vmem:[#allocation2 + $0x127] sm:$0xff]  ;;  %v5302_v52 = vld [vmem:[#allocation2 + $0x12f] sm:$0xff] }
 0x7e5   : > { %v6494_v56 = vpop.permute.xlu0 %6493  ;;  %5334 = vst.msk [vmem:[#allocation4 + $0x1c8] sm:$0xff] %vm813_vm1, %v5302_v52 }
 0x7e6   : > { %6560 = vst.msk [vmem:[#allocation4 + $0x2c0] sm:$0xff] %vm1393_vm4, %v6494_v56 }
 0x7e7   : > { %6269 = vrot.lane.b32.xlu0 %v12273_v49, %s8373_s20  ;;  %v6256_v45 = vpop.permute.xlu1 %6255 }
 0x7e8   : > { %5439 = vrot.lane.b32.xlu1 %v11878_v51, %s8371_s26 }
 0x7e9   : > { %v6064_v28 = vpop.permute.xlu0 %6063 }
 0x7ea   : > { %6153 = vst.msk [vmem:[#allocation4 + $0x98] sm:$0xff] %vm1006_vm2, %v6064_v28  ;;  %v6714_v31 = vld [vmem:[#allocation4 + $0x2b8] sm:$0xff]  ;;  %v6629_v28 = vld [vmem:[#allocation4 + $0x10] sm:$0xff] }
 0x7eb   : > { %6461 = vrot.lane.b32.xlu0 %v11964_v17, %s8374_s29  ;;  %6345 = vst.msk [vmem:[#allocation4 + $0x98] sm:$0xff] %vm1199_vm3, %v6256_v45  ;;  %v5616_v6 = vpop.permute.xlu1 %5615  ;;  %v6632_v45 = vld [vmem:[#allocation4 + $0x28] sm:$0xff] }
 0x7ec   : > { %5705 = vst.msk [vmem:[#allocation4 + $0x90] sm:$0xff] %vm1199_vm3, %v5616_v6  ;;  %5631 = vrot.lane.b32.xlu1 %v11912_v63, %s8373_s20  ;;  %v12311_v63 = vld [vmem:[#allocation2 + $0x12f] sm:$0xff] }
 0x7ed   : > { %v6112_v12 = vpop.permute.xlu0 %6111  ;;  %v6715_v59 = vld [vmem:[#allocation4 + $0x2c0] sm:$0xff] }
 0x7ee   : > { %6177 = vst.msk [vmem:[#allocation4 + $0x2d8] sm:$0xff] %vm1006_vm2, %v6112_v12  ;;  %7034 = vmatprep.mubr.f32.mxu1 %v6715_v59  ;;  %v6635_v59 = vld [vmem:[#allocation4 + $0x40] sm:$0xff] }
 0x7ef   : > { %6079 = vrot.lane.b32.xlu0 %v11974_v44, %s8371_s26  ;;  %7035 = vmatmul.mubr.f32.gmra.mrb[10].mxu1 %v6714_v31  ;;  %v6448_v48 = vpop.permute.xlu1 %6447 }
 0x7f0   : > { %6537 = vst.msk [vmem:[#allocation4 + $0x98] sm:$0xff] %vm1393_vm4, %v6448_v48  ;;  %5823 = vrot.lane.b32.xlu1 %v6191_v18, %s8374_s29  ;;  %v6644_v48 = vld [vmem:[#allocation4 + $0x88] sm:$0xff] }
 0x7f1   : > { %v5472_v27 = vpop.permute.xlu0 %5471 }
 0x7f2   : > { %5537 = vst.msk [vmem:[#allocation4 + $0x2d0] sm:$0xff] %vm1006_vm2, %v5472_v27 }
 0x7f3   : > { %6271 = vrot.lane.b32.xlu0 %v6193_v38, %s8373_s20  ;;  %v5808_v51 = vpop.permute.xlu1 %5807 }
 0x7f4   : > { %5897 = vst.msk [vmem:[#allocation4 + $0x90] sm:$0xff] %vm1393_vm4, %v5808_v51  ;;  %5441 = vrot.lane.b32.xlu1 %v11904_v60, %s8371_s26 }
 0x7f5   : > { %v6304_v24 = vpop.permute.xlu0 %6303 }
 0x7f6   : > { %6369 = vst.msk [vmem:[#allocation4 + $0x2d8] sm:$0xff] %vm1199_vm3, %v6304_v24 }
 0x7f7   : > { %6463 = vrot.lane.b32.xlu0 %v11991_v62, %s8374_s29  ;;  %v5856_v8 = vpop.permute.xlu1 %5855  ;;  %v6646_v46 = vld [vmem:[#allocation4 + $0x98] sm:$0xff] }
 0x7f8   : > { %6919 = vmatprep.mubr.f32.mxu0 %v6646_v46  ;;  %5633 = vrot.lane.b32.xlu1 %v11945_v20, %s8373_s20  ;;  %v5300_v20 = vld [vmem:[#allocation2 + $0x10f] sm:$0xff] }
 0x7f9   : > { %v5664_v40 = vpop.permute.xlu0 %5663  ;;  %5332 = vst.msk [vmem:[#allocation4 + $0x198] sm:$0xff] %vm813_vm1, %v5300_v20  ;;  %v6653_v46 = vld [vmem:[#allocation4 + $0xd0] sm:$0xff] }
 0x7fa   : > { %5729 = vst.msk [vmem:[#allocation4 + $0x2d0] sm:$0xff] %vm1199_vm3, %v5664_v40  ;;  %v6647_v40 = vld [vmem:[#allocation4 + $0xa0] sm:$0xff]  ;;  %v6665_v20 = vld [vmem:[#allocation4 + $0x130] sm:$0xff] }
 0x7fb   : > { %6081 = vrot.lane.b32.xlu0 %v12003_v19, %s8371_s26  ;;  %5921 = vst.msk [vmem:[#allocation4 + $0x2d0] sm:$0xff] %vm1393_vm4, %v5856_v8  ;;  %v5426_v61 = vpop.permute.xlu1 %5425  ;;  %v6645_v3 = vld [vmem:[#allocation4 + $0x90] sm:$0xff]  ;;  %v6650_v8 = vld [vmem:[#allocation4 + $0xb8] sm:$0xff] }
 0x7fc   : > { %5514 = vst.msk [vmem:[#allocation4 + $0xa8] sm:$0xff] %vm1006_vm2, %v5426_v61  ;;  %6920 = vmatmul.mubr.f32.gmra.mrb[12].mxu0 %v6645_v3  ;;  %5825 = vrot.lane.b32.xlu1 %v12273_v49, %s8374_s29  ;;  %v6659_v3 = vld [vmem:[#allocation4 + $0x100] sm:$0xff] }
 0x7fd   : > { %v6496_v10 = vpop.permute.xlu0 %6495 }
 0x7fe   : > { %6561 = vst.msk [vmem:[#allocation4 + $0x2d8] sm:$0xff] %vm1393_vm4, %v6496_v10 }
 0x7ff   : > { %6273 = vrot.lane.b32.xlu0 %v12311_v63, %s8373_s20  ;;  %v6258_v60 = vpop.permute.xlu1 %6257 }
 0x800   : > { %5443 = vrot.lane.b32.xlu1 %v11931_v33, %s8371_s26 }
 0x801   : > { %v6066_v0 = vpop.permute.xlu0 %6065 }
 0x802   : > { %6154 = vst.msk [vmem:[#allocation4 + $0xb0] sm:$0xff] %vm1006_vm2, %v6066_v0  ;;  %v6717_v4 = vld [vmem:[#allocation4 + $0x2d0] sm:$0xff] }
 0x803   : > { %6465 = vrot.lane.b32.xlu0 %v12019_v15, %s8374_s29  ;;  %6346 = vst.msk [vmem:[#allocation4 + $0xb0] sm:$0xff] %vm1199_vm3, %v6258_v60  ;;  %v5618_v58 = vpop.permute.xlu1 %5617 }
 0x804   : > { %5706 = vst.msk [vmem:[#allocation4 + $0xa8] sm:$0xff] %vm1199_vm3, %v5618_v58  ;;  %5635 = vrot.lane.b32.xlu1 %v11974_v44, %s8373_s20  ;;  %v12352_v44 = vld [vmem:[#allocation2 + $0x14f] sm:$0xff]  ;;  %v12423_v58 = vld [vmem:[#allocation2 + $0x187] sm:$0xff] }
 0x805   : > { %v6114_v26 = vpop.permute.xlu0 %6113  ;;  %v6718_v32 = vld [vmem:[#allocation4 + $0x2d8] sm:$0xff] }
 0x806   : > { %6178 = vst.msk [vmem:[#allocation4 + $0x2f0] sm:$0xff] %vm1006_vm2, %v6114_v26  ;;  %7039 = vmatprep.mubr.f32.mxu1 %v6718_v32  ;;  %v6662_v26 = vld [vmem:[#allocation4 + $0x118] sm:$0xff] }
 0x807   : > { %6083 = vrot.lane.b32.xlu0 %v12028_v42, %s8371_s26  ;;  %7040 = vmatmul.mubr.f32.gmra.mrb[12].mxu1 %v6717_v4  ;;  %v6450_v36 = vpop.permute.xlu1 %6449 }
 0x808   : > { %6538 = vst.msk [vmem:[#allocation4 + $0xb0] sm:$0xff] %vm1393_vm4, %v6450_v36  ;;  %5827 = vrot.lane.b32.xlu1 %v6193_v38, %s8374_s29  ;;  %v6641_v38 = vld [vmem:[#allocation4 + $0x70] sm:$0xff]  ;;  %v6668_v36 = vld [vmem:[#allocation4 + $0x148] sm:$0xff] }
 0x809   : > { %v5474_v18 = vpop.permute.xlu0 %5473 }
 0x80a   : > { %5538 = vst.msk [vmem:[#allocation4 + $0x2e8] sm:$0xff] %vm1006_vm2, %v5474_v18 }
 0x80b   : > { %6275 = vrot.lane.b32.xlu0 %v12332_v34, %s8373_s20  ;;  %v5810_v33 = vpop.permute.xlu1 %5809 }
 0x80c   : > { %5898 = vst.msk [vmem:[#allocation4 + $0xa8] sm:$0xff] %vm1393_vm4, %v5810_v33  ;;  %5445 = vrot.lane.b32.xlu1 %v11964_v17, %s8371_s26  ;;  %v6671_v33 = vld [vmem:[#allocation4 + $0x160] sm:$0xff] }
 0x80d   : > { %v6306_v7 = vpop.permute.xlu0 %6305 }
 0x80e   : > { %6370 = vst.msk [vmem:[#allocation4 + $0x2f0] sm:$0xff] %vm1199_vm3, %v6306_v7 }
 0x80f   : > { %6467 = vrot.lane.b32.xlu0 %v12044_v16, %s8374_s29  ;;  %v5858_v57 = vpop.permute.xlu1 %5857  ;;  %v6649_v53 = vld [vmem:[#allocation4 + $0xb0] sm:$0xff] }
 0x810   : > { %6924 = vmatprep.mubr.f32.mxu0 %v6649_v53  ;;  %5637 = vrot.lane.b32.xlu1 %v12003_v19, %s8373_s20 }
 0x811   : > { %v5666_v21 = vpop.permute.xlu0 %5665 }
 0x812   : > { %5730 = vst.msk [vmem:[#allocation4 + $0x2e8] sm:$0xff] %vm1199_vm3, %v5666_v21  ;;  %v6674_v21 = vld [vmem:[#allocation4 + $0x178] sm:$0xff] }
 0x813   : > { %6085 = vrot.lane.b32.xlu0 %v12056_v25, %s8371_s26  ;;  %5922 = vst.msk [vmem:[#allocation4 + $0x2e8] sm:$0xff] %vm1393_vm4, %v5858_v57  ;;  %v6648_v29 = vld [vmem:[#allocation4 + $0xa8] sm:$0xff]  ;;  %v5428_v17 = vpop.permute.xlu1 %5427 }
 0x814   : > { %6925 = vmatmul.mubr.f32.gmra.mrb[14].mxu0 %v6648_v29  ;;  %5515 = vst.msk [vmem:[#allocation4 + $0xc0] sm:$0xff] %vm1006_vm2, %v5428_v17  ;;  %5829 = vrot.lane.b32.xlu1 %v12311_v63, %s8374_s29  ;;  %v6680_v57 = vld [vmem:[#allocation4 + $0x1a8] sm:$0xff]  ;;  %v6683_v29 = vld [vmem:[#allocation4 + $0x1c0] sm:$0xff]  ;;  %v6686_v17 = vld [vmem:[#allocation4 + $0x1d8] sm:$0xff] }
 0x815   : > { %v6498_v43 = vpop.permute.xlu0 %6497 }
 0x816   : > { %6562 = vst.msk [vmem:[#allocation4 + $0x2f0] sm:$0xff] %vm1393_vm4, %v6498_v43 }
 0x817   : > { %6277 = vrot.lane.b32.xlu0 %v12352_v44, %s8373_s20  ;;  %v5620_v19 = vpop.permute.xlu1 %5619 }
 0x818   : > { %5707 = vst.msk [vmem:[#allocation4 + $0xc0] sm:$0xff] %vm1199_vm3, %v5620_v19  ;;  %5447 = vrot.lane.b32.xlu1 %v11991_v62, %s8371_s26  ;;  %v6638_v62 = vld [vmem:[#allocation4 + $0x58] sm:$0xff] }
 0x819   : > { %v6068_v49 = vpop.permute.xlu0 %6067 }
 0x81a   : > { %6155 = vst.msk [vmem:[#allocation4 + $0xc8] sm:$0xff] %vm1006_vm2, %v6068_v49  ;;  %v6720_v2 = vld [vmem:[#allocation4 + $0x2e8] sm:$0xff] }
 0x81b   : > { %6469 = vrot.lane.b32.xlu0 %v12081_v54, %s8374_s29  ;;  %v5812_v31 = vpop.permute.xlu1 %5811 }
 0x81c   : > { %5899 = vst.msk [vmem:[#allocation4 + $0xc0] sm:$0xff] %vm1393_vm4, %v5812_v31  ;;  %5639 = vrot.lane.b32.xlu1 %v12028_v42, %s8373_s20 }
 0x81d   : > { %v6260_v56 = vpop.permute.xlu0 %6259  ;;  %v6721_v1 = vld [vmem:[#allocation4 + $0x2f0] sm:$0xff] }
 0x81e   : > { %6347 = vst.msk [vmem:[#allocation4 + $0xc8] sm:$0xff] %vm1199_vm3, %v6260_v56  ;;  %7044 = vmatprep.mubr.f32.mxu1 %v6721_v1  ;;  %v6689_v1 = vld [vmem:[#allocation4 + $0x1f0] sm:$0xff] }
 0x81f   : > { %6087 = vrot.lane.b32.xlu0 %v12099_v14, %s8371_s26  ;;  %7045 = vmatmul.mubr.f32.gmra.mrb[14].mxu1 %v6720_v2  ;;  %v5430_v6 = vpop.permute.xlu1 %5429 }
 0x820   : > { %7919 = vmatprep.mubr.msk.f32.mxu1 %vm813_vm1, %v6629_v28  ;;  %5516 = vst.msk [vmem:[#allocation4 + $0xd8] sm:$0xff] %vm1006_vm2, %v5430_v6  ;;  %5831 = vrot.lane.b32.xlu1 %v12332_v34, %s8374_s29  ;;  %v5304_v34 = vld [vmem:[#allocation2 + $0x14f] sm:$0xff] }
 0x821   : > { %v6452_v12 = vpop.permute.xlu0 %6451  ;;  %5336 = vst.msk [vmem:[#allocation4 + $0x1f8] sm:$0xff] %vm813_vm1, %v5304_v34  ;;  %v6692_v28 = vld [vmem:[#allocation4 + $0x208] sm:$0xff] }
 0x822   : > { %6539 = vst.msk [vmem:[#allocation4 + $0xc8] sm:$0xff] %vm1393_vm4, %v6452_v12 }
 0x823   : > { %6279 = vrot.lane.b32.xlu0 %v12110_v11, %s8373_s20  ;;  %7920 = vmatmul.mubr.msk.f32.vlgmr.msra.gmra.mrb[16].mxu1 %vm813_vm1, %v6632_v45  ;;  %v5622_v24 = vpop.permute.xlu1 %5621  ;;  %v6651_v51 = vld [vmem:[#allocation4 + $0xc0] sm:$0xff] }
 0x824   : > { %7922 = vmatprep.mubr.msk.f32.mxu1 %vm813_vm1, %v6635_v59  ;;  %5708 = vst.msk [vmem:[#allocation4 + $0xd8] sm:$0xff] %vm1199_vm3, %v5622_v24  ;;  %5449 = vrot.lane.b32.xlu1 %v12019_v15, %s8371_s26  ;;  %v6656_v15 = vld [vmem:[#allocation4 + $0xe8] sm:$0xff]  ;;  %v6695_v45 = vld [vmem:[#allocation4 + $0x220] sm:$0xff]  ;;  %v6698_v59 = vld [vmem:[#allocation4 + $0x238] sm:$0xff] }
 0x825   : > { %v6070_v37 = vpop.permute.xlu0 %6069  ;;  %v6710_v24 = vld [vmem:[#allocation4 + $0x298] sm:$0xff] }
 0x826   : > { %6156 = vst.msk [vmem:[#allocation4 + $0xe0] sm:$0xff] %vm1006_vm2, %v6070_v37  ;;  %v6701_v37 = vld [vmem:[#allocation4 + $0x250] sm:$0xff] }
 0x827   : > { %6471 = vrot.lane.b32.xlu0 %v12119_v55, %s8374_s29  ;;  %7923 = vmatmul.mubr.msk.f32.gmra.mrb[18].mxu1 %vm813_vm1, %v6638_v62  ;;  %v5814_v10 = vpop.permute.xlu1 %5813 }
 0x828   : > { %7925 = vmatprep.mubr.msk.f32.mxu1 %vm813_vm1, %v6641_v38  ;;  %5900 = vst.msk [vmem:[#allocation4 + $0xd8] sm:$0xff] %vm1393_vm4, %v5814_v10  ;;  %5641 = vrot.lane.b32.xlu1 %v12056_v25, %s8373_s20 }
 0x829   : > { %v6262_v42 = vpop.permute.xlu0 %6261  ;;  %v6652_v27 = vld [vmem:[#allocation4 + $0xc8] sm:$0xff] }
 0x82a   : > { %6348 = vst.msk [vmem:[#allocation4 + $0xe0] sm:$0xff] %vm1199_vm3, %v6262_v42  ;;  %6929 = vmatprep.mubr.f32.mxu0 %v6652_v27  ;;  %v6704_v42 = vld [vmem:[#allocation4 + $0x268] sm:$0xff] }
 0x82b   : > { %6089 = vrot.lane.b32.xlu0 %v12131_v39, %s8371_s26  ;;  %6930 = vmatmul.mubr.f32.gmra.mrb[16].mxu0 %v6651_v51  ;;  %v5432_v0 = vpop.permute.xlu1 %5431 }
 0x82c   : > { %7926 = vmatmul.mubr.msk.f32.gmra.mrb[20].mxu1 %vm813_vm1, %v6644_v48  ;;  %5517 = vst.msk [vmem:[#allocation4 + $0xf0] sm:$0xff] %vm1006_vm2, %v5432_v0  ;;  %5833 = vrot.lane.b32.xlu1 %v12352_v44, %s8374_s29  ;;  %v6677_v44 = vld [vmem:[#allocation4 + $0x190] sm:$0xff]  ;;  %v6707_v48 = vld [vmem:[#allocation4 + $0x280] sm:$0xff]  ;;  %v6722_v0 = vld [vmem:[#allocation4 + $0x2f8] sm:$0xff] }
 0x82d   : > { %v6454_v63 = vpop.permute.xlu0 %6453  ;;  %7928 = vmatprep.mubr.msk.f32.mxu1 %vm813_vm1, %v6647_v40  ;;  %v6713_v40 = vld [vmem:[#allocation4 + $0x2b0] sm:$0xff] }
 0x82e   : > { %6540 = vst.msk [vmem:[#allocation4 + $0xe0] sm:$0xff] %vm1393_vm4, %v6454_v63  ;;  %v6716_v63 = vld [vmem:[#allocation4 + $0x2c8] sm:$0xff] }
 0x82f   : > { %6281 = vrot.lane.b32.xlu0 %v12141_v9, %s8373_s20  ;;  %v5624_v32 = vpop.permute.xlu1 %5623  ;;  %v6654_v4 = vld [vmem:[#allocation4 + $0xd8] sm:$0xff] }
 0x830   : > { %7929 = vmatmul.mubr.msk.f32.gmra.mrb[22].mxu1 %vm813_vm1, %v6650_v8  ;;  %5709 = vst.msk [vmem:[#allocation4 + $0xf0] sm:$0xff] %vm1199_vm3, %v5624_v32  ;;  %5451 = vrot.lane.b32.xlu1 %v12044_v16, %s8371_s26 }
 0x831   : > { %v6072_v61 = vpop.permute.xlu0 %6071  ;;  %7931 = vmatprep.mubr.msk.f32.mxu1 %vm813_vm1, %v6653_v46  ;;  %v6719_v46 = vld [vmem:[#allocation4 + $0x2e0] sm:$0xff] }
 0x832   : > { %6157 = vst.msk [vmem:[#allocation4 + $0xf8] sm:$0xff] %vm1006_vm2, %v6072_v61  ;;  %v6202_v61 = vld [vmem:[#allocation2 + $0x1af] sm:$0xff] }
 0x833   : > { %6473 = vrot.lane.b32.xlu0 %v12152_v23, %s8374_s29  ;;  %v5816_v7 = vpop.permute.xlu1 %5815 }
 0x834   : > { %7932 = vmatmul.mubr.msk.f32.gmra.mrb[24].mxu1 %vm813_vm1, %v6656_v15  ;;  %5901 = vst.msk [vmem:[#allocation4 + $0xf0] sm:$0xff] %vm1393_vm4, %v5816_v7  ;;  %5643 = vrot.lane.b32.xlu1 %v12099_v14, %s8373_s20 }
 0x835   : > { %v6264_v60 = vpop.permute.xlu0 %6263  ;;  %v6655_v25 = vld [vmem:[#allocation4 + $0xe0] sm:$0xff]  ;;  %7934 = vmatprep.mubr.msk.f32.mxu1 %vm813_vm1, %v6659_v3 }
 0x836   : > { %6349 = vst.msk [vmem:[#allocation4 + $0xf8] sm:$0xff] %vm1199_vm3, %v6264_v60  ;;  %6934 = vmatprep.mubr.f32.mxu0 %v6655_v25 }
 0x837   : > { %6091 = vrot.lane.b32.xlu0 %v12164_v50, %s8371_s26  ;;  %6935 = vmatmul.mubr.f32.gmra.mrb[18].mxu0 %v6654_v4  ;;  %v5434_v13 = vpop.permute.xlu1 %5433 }
 0x838   : > { %7935 = vmatmul.mubr.msk.f32.gmra.mrb[26].mxu1 %vm813_vm1, %v6662_v26  ;;  %5518 = vst.msk [vmem:[#allocation4 + $0x108] sm:$0xff] %vm1006_vm2, %v5434_v13  ;;  %5835 = vrot.lane.b32.xlu1 %v12110_v11, %s8374_s29  ;;  %v12449_v11 = vld [vmem:[#allocation2 + $0x18f] sm:$0xff] }
 0x839   : > { %v6456_v18 = vpop.permute.xlu0 %6455  ;;  %7937 = vmatprep.mubr.msk.f32.mxu1 %vm813_vm1, %v6665_v20 }
 0x83a   : > { %6541 = vst.msk [vmem:[#allocation4 + $0xf8] sm:$0xff] %vm1393_vm4, %v6456_v18 }
 0x83b   : > { %6283 = vrot.lane.b32.xlu0 %v12423_v58, %s8373_s20  ;;  %v5626_v53 = vpop.permute.xlu1 %5625  ;;  %v6657_v49 = vld [vmem:[#allocation4 + $0xf0] sm:$0xff] }
 0x83c   : > { %7938 = vmatmul.mubr.msk.f32.gmra.mrb[28].mxu1 %vm813_vm1, %v6668_v36  ;;  %5710 = vst.msk [vmem:[#allocation4 + $0x108] sm:$0xff] %vm1199_vm3, %v5626_v53  ;;  %5453 = vrot.lane.b32.xlu1 %v12081_v54, %s8371_s26 }
 0x83d   : > { %v6074_v16 = vpop.permute.xlu0 %6073  ;;  %7940 = vmatprep.mubr.msk.f32.mxu1 %vm813_vm1, %v6671_v33 }
 0x83e   : > { %6158 = vst.msk [vmem:[#allocation4 + $0x110] sm:$0xff] %vm1006_vm2, %v6074_v16 }
 0x83f   : > { %6475 = vrot.lane.b32.xlu0 %v12181_v41, %s8374_s29  ;;  %v5818_v56 = vpop.permute.xlu1 %5817 }
 0x840   : > { %7941 = vmatmul.mubr.msk.f32.gmra.mrb[30].mxu1 %vm813_vm1, %v6674_v21  ;;  %5902 = vst.msk [vmem:[#allocation4 + $0x108] sm:$0xff] %vm1393_vm4, %v5818_v56  ;;  %5645 = vrot.lane.b32.xlu1 %v12131_v39, %s8373_s20 }
 0x841   : > { %v6266_v43 = vpop.permute.xlu0 %6265  ;;  %v6658_v14 = vld [vmem:[#allocation4 + $0xf8] sm:$0xff]  ;;  %7943 = vmatprep.mubr.msk.f32.mxu1 %vm813_vm1, %v6677_v44 }
 0x842   : > { %6350 = vst.msk [vmem:[#allocation4 + $0x110] sm:$0xff] %vm1199_vm3, %v6266_v43  ;;  %6939 = vmatprep.mubr.f32.mxu0 %v6658_v14 }
 0x843   : > { %6093 = vrot.lane.b32.xlu0 %v12183_v22, %s8371_s26  ;;  %6940 = vmatmul.mubr.f32.gmra.mrb[20].mxu0 %v6657_v49  ;;  %v12459_v2 = vpop.f32.mrb[0].mxu0  ;;  %v5436_v19 = vpop.permute.xlu1 %5435 }
 0x844   : > { %7944 = vmatmul.mubr.msk.f32.gmra.mrb[32].mxu1 %vm813_vm1, %v6680_v57  ;;  %v6893_v52 = vpop.f32.mrb[1].mxu0  ;;  %5519 = vst.msk [vmem:[#allocation4 + $0x120] sm:$0xff] %vm1006_vm2, %v5436_v19  ;;  %5837 = vrot.lane.b32.xlu1 %v12141_v9, %s8374_s29 }
 0x845   : > { %v6458_v41 = vpop.permute.xlu0 %6457  ;;  %7946 = vmatprep.mubr.msk.f32.mxu1 %vm813_vm1, %v6683_v29 }
 0x846   : > { %6542 = vst.msk [vmem:[#allocation4 + $0x110] sm:$0xff] %vm1393_vm4, %v6458_v41 }
 0x847   : > { %6285 = vrot.lane.b32.xlu0 %v12449_v11, %s8373_s20  ;;  %v5628_v31 = vpop.permute.xlu1 %5627  ;;  %v6660_v62 = vld [vmem:[#allocation4 + $0x108] sm:$0xff] }
 0x848   : > { %7947 = vmatmul.mubr.msk.f32.gmra.mrb[34].mxu1 %vm813_vm1, %v6686_v17  ;;  %5711 = vst.msk [vmem:[#allocation4 + $0x120] sm:$0xff] %vm1199_vm3, %v5628_v31  ;;  %5455 = vrot.lane.b32.xlu1 %v12119_v55, %s8371_s26 }
 0x849   : > { %v6076_v54 = vpop.permute.xlu0 %6075  ;;  %7949 = vmatprep.mubr.msk.f32.mxu1 %vm813_vm1, %v6689_v1 }
 0x84a   : > { %6159 = vst.msk [vmem:[#allocation4 + $0x128] sm:$0xff] %vm1006_vm2, %v6076_v54 }
 0x84b   : > { %6477 = vrot.lane.b32.xlu0 %v12220_v35, %s8374_s29  ;;  %v6201_v35 = vld [vmem:[#allocation2 + $0x1a7] sm:$0xff]  ;;  %v5820_v27 = vpop.permute.xlu1 %5819 }
 0x84c   : > { %7950 = vmatmul.mubr.msk.f32.gmra.mrb[36].mxu1 %vm813_vm1, %v6692_v28  ;;  %5903 = vst.msk [vmem:[#allocation4 + $0x120] sm:$0xff] %vm1393_vm4, %v5820_v27  ;;  %5647 = vrot.lane.b32.xlu1 %v12164_v50, %s8373_s20 }
 0x84d   : > { %v6268_v39 = vpop.permute.xlu0 %6267  ;;  %v6661_v12 = vld [vmem:[#allocation4 + $0x110] sm:$0xff]  ;;  %7952 = vmatprep.mubr.msk.f32.mxu1 %vm813_vm1, %v6695_v45 }
 0x84e   : > { %6351 = vst.msk [vmem:[#allocation4 + $0x128] sm:$0xff] %vm1199_vm3, %v6268_v39  ;;  %6944 = vmatprep.mubr.f32.mxu0 %v6661_v12  ;;  %v12472_v38 = vpop.f32.mrb[0].mxu1 }
 0x84f   : > { %6095 = vrot.lane.b32.xlu0 %v12195_v47, %s8371_s26  ;;  %6945 = vmatmul.mubr.f32.gmra.mrb[22].mxu0 %v6660_v62  ;;  %v7013_v9 = vpop.f32.mrb[1].mxu1  ;;  %v6393_v47 = vld [vmem:[#allocation2 + $0x1a8] sm:$0xff]  ;;  %v5438_v51 = vpop.permute.xlu1 %5437 }
 0x850   : > { %7953 = vmatmul.mubr.msk.f32.gmra.mrb[38].mxu1 %vm813_vm1, %v6698_v59  ;;  %5520 = vst.msk [vmem:[#allocation4 + $0x138] sm:$0xff] %vm1006_vm2, %v5438_v51  ;;  %5839 = vrot.lane.b32.xlu1 %v12423_v58, %s8374_s29 }
 0x851   : > { %v6460_v6 = vpop.permute.xlu0 %6459  ;;  %7955 = vmatprep.mubr.msk.f32.mxu1 %vm813_vm1, %v6701_v37 }
 0x852   : > { %6543 = vst.msk [vmem:[#allocation4 + $0x128] sm:$0xff] %vm1393_vm4, %v6460_v6 }
 0x853   : > { %6287 = vrot.lane.b32.xlu0 %v6201_v35, %s8373_s20  ;;  %v5630_v8 = vpop.permute.xlu1 %5629  ;;  %v6663_v10 = vld [vmem:[#allocation4 + $0x120] sm:$0xff] }
 0x854   : > { %7956 = vmatmul.mubr.msk.f32.gmra.mrb[40].mxu1 %vm813_vm1, %v6704_v42  ;;  %5712 = vst.msk [vmem:[#allocation4 + $0x138] sm:$0xff] %vm1199_vm3, %v5630_v8  ;;  %5457 = vrot.lane.b32.xlu1 %v12152_v23, %s8371_s26 }
 0x855   : > { %v6078_v55 = vpop.permute.xlu0 %6077  ;;  %7958 = vmatprep.mubr.msk.f32.mxu1 %vm813_vm1, %v6707_v48 }
 0x856   : > { %6160 = vst.msk [vmem:[#allocation4 + $0x140] sm:$0xff] %vm1006_vm2, %v6078_v55 }
 0x857   : > { %6479 = vrot.lane.b32.xlu0 %v6393_v47, %s8374_s29  ;;  %v5822_v3 = vpop.permute.xlu1 %5821 }
 0x858   : > { %7959 = vmatmul.mubr.msk.f32.gmra.mrb[42].mxu1 %vm813_vm1, %v6710_v24  ;;  %5904 = vst.msk [vmem:[#allocation4 + $0x138] sm:$0xff] %vm1393_vm4, %v5822_v3  ;;  %5649 = vrot.lane.b32.xlu1 %v12183_v22, %s8373_s20 }
 0x859   : > { %v6270_v5 = vpop.permute.xlu0 %6269  ;;  %v6664_v50 = vld [vmem:[#allocation4 + $0x128] sm:$0xff]  ;;  %7961 = vmatprep.mubr.msk.f32.mxu1 %vm813_vm1, %v6713_v40 }
 0x85a   : > { %6352 = vst.msk [vmem:[#allocation4 + $0x140] sm:$0xff] %vm1199_vm3, %v6270_v5  ;;  %6949 = vmatprep.mubr.f32.mxu0 %v6664_v50 }
 0x85b   : > { %6097 = vrot.lane.b32.xlu0 %v12201_v30, %s8371_s26  ;;  %6950 = vmatmul.mubr.f32.gmra.mrb[24].mxu0 %v6663_v10  ;;  %v6394_v30 = vld [vmem:[#allocation2 + $0x1b0] sm:$0xff]  ;;  %v5440_v25 = vpop.permute.xlu1 %5439 }
 0x85c   : > { %7962 = vmatmul.mubr.msk.f32.gmra.mrb[44].mxu1 %vm813_vm1, %v6716_v63  ;;  %5521 = vst.msk [vmem:[#allocation4 + $0x150] sm:$0xff] %vm1006_vm2, %v5440_v25  ;;  %5841 = vrot.lane.b32.xlu1 %v12449_v11, %s8374_s29 }
 0x85d   : > { %v6462_v15 = vpop.permute.xlu0 %6461  ;;  %7964 = vmatprep.mubr.msk.f32.mxu1 %vm813_vm1, %v6719_v46 }
 0x85e   : > { %6544 = vst.msk [vmem:[#allocation4 + $0x140] sm:$0xff] %vm1393_vm4, %v6462_v15 }
 0x85f   : > { %6289 = vrot.lane.b32.xlu0 %v6202_v61, %s8373_s20  ;;  %v5632_v22 = vpop.permute.xlu1 %5631  ;;  %v6666_v58 = vld [vmem:[#allocation4 + $0x138] sm:$0xff] }
 0x860   : > { %7965 = vmatmul.mubr.msk.f32.gmra.mrb[46].mxu1 %vm813_vm1, %v6722_v0  ;;  %5713 = vst.msk [vmem:[#allocation4 + $0x150] sm:$0xff] %vm1199_vm3, %v5632_v22 }
 0x861   : > { %v6080_v60 = vpop.permute.xlu0 %6079  ;;  %v12508_v23 = vpop.f32.mrb[2].mxu0 }
 0x862   : > { %6161 = vst.msk [vmem:[#allocation4 + $0x158] sm:$0xff] %vm1006_vm2, %v6080_v60  ;;  %v6898_v26 = vpop.f32.mrb[3].mxu0 }
 0x863   : > { %6481 = vrot.lane.b32.xlu0 %v6394_v30, %s8374_s29  ;;  %v5824_v36 = vpop.permute.xlu1 %5823 }
 0x864   : > { %5905 = vst.msk [vmem:[#allocation4 + $0x150] sm:$0xff] %vm1393_vm4, %v5824_v36 }
 0x865   : > { %v6272_v32 = vpop.permute.xlu0 %6271  ;;  %v12515_v4 = vpop.f32.mrb[2].mxu1  ;;  %v6667_v20 = vld [vmem:[#allocation4 + $0x140] sm:$0xff] }
 0x866   : > { %6353 = vst.msk [vmem:[#allocation4 + $0x158] sm:$0xff] %vm1199_vm3, %v6272_v32  ;;  %6954 = vmatprep.mubr.f32.mxu0 %v6667_v20  ;;  %v7018_v34 = vpop.f32.mrb[3].mxu1 }
 0x867   : > { %6955 = vmatmul.mubr.f32.gmra.mrb[26].mxu0 %v6666_v58  ;;  %v5442_v33 = vpop.permute.xlu1 %5441 }
 0x868   : > { %5522 = vst.msk [vmem:[#allocation4 + $0x168] sm:$0xff] %vm1006_vm2, %v5442_v33 }
 0x869   : > { %v6464_v18 = vpop.permute.xlu0 %6463 }
 0x86a   : > { %6545 = vst.msk [vmem:[#allocation4 + $0x158] sm:$0xff] %vm1393_vm4, %v6464_v18 }
 0x86b   : > { %v5634_v13 = vpop.permute.xlu1 %5633  ;;  %v6669_v44 = vld [vmem:[#allocation4 + $0x150] sm:$0xff] }
 0x86c   : > { %5714 = vst.msk [vmem:[#allocation4 + $0x168] sm:$0xff] %vm1199_vm3, %v5634_v13 }
 0x86d   : > { %v6082_v7 = vpop.permute.xlu0 %6081 }
 0x86e   : > { %6162 = vst.msk [vmem:[#allocation4 + $0x170] sm:$0xff] %vm1006_vm2, %v6082_v7 }
 0x86f   : > { %v12525_v14 = vpop.f32.mrb[4].mxu0  ;;  %v5826_v57 = vpop.permute.xlu1 %5825 }
 0x870   : > { %v6903_v53 = vpop.f32.mrb[5].mxu0  ;;  %5906 = vst.msk [vmem:[#allocation4 + $0x168] sm:$0xff] %vm1393_vm4, %v5826_v57 }
 0x871   : > { %v6274_v16 = vpop.permute.xlu0 %6273  ;;  %v6670_v21 = vld [vmem:[#allocation4 + $0x158] sm:$0xff] }
 0x872   : > { %6354 = vst.msk [vmem:[#allocation4 + $0x170] sm:$0xff] %vm1199_vm3, %v6274_v16  ;;  %6959 = vmatprep.mubr.f32.mxu0 %v6670_v21 }
 0x873   : > { %6960 = vmatmul.mubr.f32.gmra.mrb[28].mxu0 %v6669_v44  ;;  %v5444_v29 = vpop.permute.xlu1 %5443 }
 0x874   : > { %5523 = vst.msk [vmem:[#allocation4 + $0x180] sm:$0xff] %vm1006_vm2, %v5444_v29 }
 0x875   : > { %v6466_v43 = vpop.permute.xlu0 %6465 }
 0x876   : > { %6546 = vst.msk [vmem:[#allocation4 + $0x170] sm:$0xff] %vm1393_vm4, %v6466_v43 }
 0x877   : > { %v5636_v1 = vpop.permute.xlu1 %5635  ;;  %v6672_v54 = vld [vmem:[#allocation4 + $0x168] sm:$0xff] }
 0x878   : > { %5715 = vst.msk [vmem:[#allocation4 + $0x180] sm:$0xff] %vm1199_vm3, %v5636_v1 }
 0x879   : > { %v6084_v49 = vpop.permute.xlu0 %6083 }
 0x87a   : > { %6163 = vst.msk [vmem:[#allocation4 + $0x188] sm:$0xff] %vm1006_vm2, %v6084_v49  ;;  %v12530_v11 = vpop.f32.mrb[4].mxu1 }
 0x87b   : > { %v7023_v41 = vpop.f32.mrb[5].mxu1  ;;  %v5828_v19 = vpop.permute.xlu1 %5827 }
 0x87c   : > { %5907 = vst.msk [vmem:[#allocation4 + $0x180] sm:$0xff] %vm1393_vm4, %v5828_v19 }
 0x87d   : > { %v6276_v17 = vpop.permute.xlu0 %6275  ;;  %v6673_v56 = vld [vmem:[#allocation4 + $0x170] sm:$0xff] }
 0x87e   : > { %6355 = vst.msk [vmem:[#allocation4 + $0x188] sm:$0xff] %vm1199_vm3, %v6276_v17  ;;  %6964 = vmatprep.mubr.f32.mxu0 %v6673_v56 }
 0x87f   : > { %6965 = vmatmul.mubr.f32.gmra.mrb[30].mxu0 %v6672_v54  ;;  %v5446_v45 = vpop.permute.xlu1 %5445 }
 0x880   : > { %5524 = vst.msk [vmem:[#allocation4 + $0x198] sm:$0xff] %vm1006_vm2, %v5446_v45 }
 0x881   : > { %v6468_v28 = vpop.permute.xlu0 %6467 }
 0x882   : > { %6547 = vst.msk [vmem:[#allocation4 + $0x188] sm:$0xff] %vm1393_vm4, %v6468_v28 }
 0x883   : > { %v5638_v59 = vpop.permute.xlu1 %5637  ;;  %v6675_v31 = vld [vmem:[#allocation4 + $0x180] sm:$0xff] }
 0x884   : > { %5716 = vst.msk [vmem:[#allocation4 + $0x198] sm:$0xff] %vm1199_vm3, %v5638_v59 }
 0x885   : > { %v6086_v52 = vpop.permute.xlu0 %6085 }
 0x886   : > { %6164 = vst.msk [vmem:[#allocation4 + $0x1a0] sm:$0xff] %vm1006_vm2, %v6086_v52 }
 0x887   : > { %v12541_v37 = vpop.f32.mrb[6].mxu0  ;;  %v5830_v9 = vpop.permute.xlu1 %5829 }
 0x888   : > { %v6908_v35 = vpop.f32.mrb[7].mxu0  ;;  %5908 = vst.msk [vmem:[#allocation4 + $0x198] sm:$0xff] %vm1393_vm4, %v5830_v9 }
 0x889   : > { %v6278_v39 = vpop.permute.xlu0 %6277  ;;  %v6676_v12 = vld [vmem:[#allocation4 + $0x188] sm:$0xff] }
 0x88a   : > { %6356 = vst.msk [vmem:[#allocation4 + $0x1a0] sm:$0xff] %vm1199_vm3, %v6278_v39  ;;  %6969 = vmatprep.mubr.f32.mxu0 %v6676_v12 }
 0x88b   : > { %6970 = vmatmul.mubr.f32.gmra.mrb[32].mxu0 %v6675_v31  ;;  %v5448_v42 = vpop.permute.xlu1 %5447 }
 0x88c   : > { %5525 = vst.msk [vmem:[#allocation4 + $0x1b0] sm:$0xff] %vm1006_vm2, %v5448_v42 }
 0x88d   : > { %v6470_v62 = vpop.permute.xlu0 %6469 }
 0x88e   : > { %6548 = vst.msk [vmem:[#allocation4 + $0x1a0] sm:$0xff] %vm1393_vm4, %v6470_v62 }
 0x88f   : > { %v5640_v24 = vpop.permute.xlu1 %5639  ;;  %v6678_v51 = vld [vmem:[#allocation4 + $0x198] sm:$0xff] }
 0x890   : > { %5717 = vst.msk [vmem:[#allocation4 + $0x1b0] sm:$0xff] %vm1199_vm3, %v5640_v24 }
 0x891   : > { %v6088_v6 = vpop.permute.xlu0 %6087 }
 0x892   : > { %6165 = vst.msk [vmem:[#allocation4 + $0x1b8] sm:$0xff] %vm1006_vm2, %v6088_v6  ;;  %v12546_v27 = vpop.f32.mrb[6].mxu1 }
 0x893   : > { %v7028_v48 = vpop.f32.mrb[7].mxu1  ;;  %v5832_v5 = vpop.permute.xlu1 %5831 }
 0x894   : > { %5909 = vst.msk [vmem:[#allocation4 + $0x1b0] sm:$0xff] %vm1393_vm4, %v5832_v5 }
 0x895   : > { %v6280_v47 = vpop.permute.xlu0 %6279  ;;  %v6679_v55 = vld [vmem:[#allocation4 + $0x1a0] sm:$0xff] }
 0x896   : > { %6357 = vst.msk [vmem:[#allocation4 + $0x1b8] sm:$0xff] %vm1199_vm3, %v6280_v47  ;;  %6974 = vmatprep.mubr.f32.mxu0 %v6679_v55 }
 0x897   : > { %6975 = vmatmul.mubr.f32.gmra.mrb[34].mxu0 %v6678_v51  ;;  %v5450_v63 = vpop.permute.xlu1 %5449 }
 0x898   : > { %5526 = vst.msk [vmem:[#allocation4 + $0x1c8] sm:$0xff] %vm1006_vm2, %v5450_v63  ;;  %v12598_v63 = vld [vmem:[%s12848_s10] ss:$0 sm:$0xff] }
 0x899   : > { %v6472_v40 = vpop.permute.xlu0 %6471 }
 0x89a   : > { %6549 = vst.msk [vmem:[#allocation4 + $0x1b8] sm:$0xff] %vm1393_vm4, %v6472_v40 }
 0x89b   : > { %v5642_v46 = vpop.permute.xlu1 %5641  ;;  %v6681_v61 = vld [vmem:[#allocation4 + $0x1b0] sm:$0xff] }
 0x89c   : > { %5718 = vst.msk [vmem:[#allocation4 + $0x1c8] sm:$0xff] %vm1199_vm3, %v5642_v46  ;;  %v6892_v46 = vadd.f32 %v12598_v63, %v12459_v2  ;;  %v7278_v2 = vld [vmem:[%s8519_s27 + $0x18] sm:$0xff] }
 0x89d   : > { %v6090_v50 = vpop.permute.xlu0 %6089 }
 0x89e   : > { %6166 = vst.msk [vmem:[#allocation4 + $0x1d0] sm:$0xff] %vm1006_vm2, %v6090_v50 }
 0x89f   : > { %v12557_v0 = vpop.f32.mrb[8].mxu0  ;;  %v5834_v3 = vpop.permute.xlu1 %5833 }
 0x8a0   : > { %v6913_v30 = vpop.f32.mrb[9].mxu0  ;;  %5910 = vst.msk [vmem:[#allocation4 + $0x1c8] sm:$0xff] %vm1393_vm4, %v5834_v3 }
 0x8a1   : > { %v6282_v8 = vpop.permute.xlu0 %6281  ;;  %v6682_v10 = vld [vmem:[#allocation4 + $0x1b8] sm:$0xff] }
 0x8a2   : > { %6358 = vst.msk [vmem:[#allocation4 + $0x1d0] sm:$0xff] %vm1199_vm3, %v6282_v8  ;;  %6979 = vmatprep.mubr.f32.mxu0 %v6682_v10  ;;  %v6897_v10 = vadd.f32 %v12598_v63, %v12508_v23 }
 0x8a3   : > { %6980 = vmatmul.mubr.f32.gmra.mrb[36].mxu0 %v6681_v61  ;;  %v5452_v25 = vpop.permute.xlu1 %5451 }
 0x8a4   : > { %5527 = vst.msk [vmem:[#allocation4 + $0x1e0] sm:$0xff] %vm1006_vm2, %v5452_v25 }
 0x8a5   : > { %v6474_v15 = vpop.permute.xlu0 %6473 }
 0x8a6   : > { %6550 = vst.msk [vmem:[#allocation4 + $0x1d0] sm:$0xff] %vm1393_vm4, %v6474_v15  ;;  %v7276_v15 = vld [vmem:[%s8519_s27 + $0x8] sm:$0xff] }
 0x8a7   : > { %v5644_v34 = vpop.permute.xlu1 %5643  ;;  %v6684_v58 = vld [vmem:[#allocation4 + $0x1c8] sm:$0xff] }
 0x8a8   : > { %5719 = vst.msk [vmem:[#allocation4 + $0x1e0] sm:$0xff] %vm1199_vm3, %v5644_v34 }
 0x8a9   : > { %v6092_v60 = vpop.permute.xlu0 %6091 }
 0x8aa   : > { %6167 = vst.msk [vmem:[#allocation4 + $0x1e8] sm:$0xff] %vm1006_vm2, %v6092_v60  ;;  %v12562_v26 = vpop.f32.mrb[8].mxu1  ;;  %v7275_v60 = vld [vmem:[%s8519_s27] sm:$0xff] }
 0x8ab   : > { %v7033_v32 = vpop.f32.mrb[9].mxu1  ;;  %v5836_v36 = vpop.permute.xlu1 %5835 }
 0x8ac   : > { %5911 = vst.msk [vmem:[#allocation4 + $0x1e0] sm:$0xff] %vm1393_vm4, %v5836_v36  ;;  %v6907_v32 = vadd.f32 %v12598_v63, %v12541_v37  ;;  %v7277_v36 = vld [vmem:[%s8519_s27 + $0x10] sm:$0xff] }
 0x8ad   : > { %v6284_v20 = vpop.permute.xlu0 %6283  ;;  %v6685_v22 = vld [vmem:[#allocation4 + $0x1d0] sm:$0xff] }
 0x8ae   : > { %6359 = vst.msk [vmem:[#allocation4 + $0x1e8] sm:$0xff] %vm1199_vm3, %v6284_v20  ;;  %6984 = vmatprep.mubr.f32.mxu0 %v6685_v22  ;;  %v6902_v22 = vadd.f32 %v12598_v63, %v12525_v14 }
 0x8af   : > { %6985 = vmatmul.mubr.f32.gmra.mrb[38].mxu0 %v6684_v58  ;;  %v5454_v33 = vpop.permute.xlu1 %5453 }
 0x8b0   : > { %5528 = vst.msk [vmem:[#allocation4 + $0x1f8] sm:$0xff] %vm1006_vm2, %v5454_v33 }
 0x8b1   : > { %v6476_v18 = vpop.permute.xlu0 %6475 }
 0x8b2   : > { %6551 = vst.msk [vmem:[#allocation4 + $0x1e8] sm:$0xff] %vm1393_vm4, %v6476_v18 }
 0x8b3   : > { %v5646_v13 = vpop.permute.xlu1 %5645  ;;  %v6687_v44 = vld [vmem:[#allocation4 + $0x1e0] sm:$0xff] }
 0x8b4   : > { %5720 = vst.msk [vmem:[#allocation4 + $0x1f8] sm:$0xff] %vm1199_vm3, %v5646_v13 }
 0x8b5   : > { %v6094_v7 = vpop.permute.xlu0 %6093 }
 0x8b6   : > { %6168 = vst.msk [vmem:[#allocation4 + $0x200] sm:$0xff] %vm1006_vm2, %v6094_v7 }
 0x8b7   : > { %v12573_v57 = vpop.f32.mrb[10].mxu0  ;;  %v5838_v53 = vpop.permute.xlu1 %5837 }
 0x8b8   : > { %v6918_v49 = vpop.f32.mrb[11].mxu0  ;;  %5912 = vst.msk [vmem:[#allocation4 + $0x1f8] sm:$0xff] %vm1393_vm4, %v5838_v53  ;;  %v6917_v33 = vadd.f32 %v12598_v63, %v12573_v57 }
 0x8b9   : > { %v6286_v16 = vpop.permute.xlu0 %6285  ;;  %v6688_v21 = vld [vmem:[#allocation4 + $0x1e8] sm:$0xff] }
 0x8ba   : > { %6360 = vst.msk [vmem:[#allocation4 + $0x200] sm:$0xff] %vm1199_vm3, %v6286_v16  ;;  %6989 = vmatprep.mubr.f32.mxu0 %v6688_v21  ;;  %v6912_v21 = vadd.f32 %v12598_v63, %v12557_v0 }
 0x8bb   : > { %6990 = vmatmul.mubr.f32.gmra.mrb[40].mxu0 %v6687_v44  ;;  %v5456_v41 = vpop.permute.xlu1 %5455  ;;  %v7280_v44 = vld [vmem:[%s8519_s27 + $0x28] sm:$0xff] }
 0x8bc   : > { %5529 = vst.msk [vmem:[#allocation4 + $0x210] sm:$0xff] %vm1006_vm2, %v5456_v41 }
 0x8bd   : > { %v6478_v43 = vpop.permute.xlu0 %6477 }
 0x8be   : > { %6552 = vst.msk [vmem:[#allocation4 + $0x200] sm:$0xff] %vm1393_vm4, %v6478_v43 }
 0x8bf   : > { %v5648_v28 = vpop.permute.xlu1 %5647  ;;  %v6690_v19 = vld [vmem:[#allocation4 + $0x1f8] sm:$0xff] }
 0x8c0   : > { %5721 = vst.msk [vmem:[#allocation4 + $0x210] sm:$0xff] %vm1199_vm3, %v5648_v28  ;;  %v7282_v28 = vld [vmem:[%s8519_s27 + $0x38] sm:$0xff] }
 0x8c1   : > { %v6096_v29 = vpop.permute.xlu0 %6095 }
 0x8c2   : > { %6169 = vst.msk [vmem:[#allocation4 + $0x218] sm:$0xff] %vm1006_vm2, %v6096_v29  ;;  %v12578_v17 = vpop.f32.mrb[10].mxu1  ;;  %v7279_v29 = vld [vmem:[%s8519_s27 + $0x20] sm:$0xff] }
 0x8c3   : > { %v7038_v56 = vpop.f32.mrb[11].mxu1  ;;  %v5840_v45 = vpop.permute.xlu1 %5839 }
 0x8c4   : > { %5913 = vst.msk [vmem:[#allocation4 + $0x210] sm:$0xff] %vm1393_vm4, %v5840_v45  ;;  %v7281_v45 = vld [vmem:[%s8519_s27 + $0x30] sm:$0xff] }
 0x8c5   : > { %v6288_v1 = vpop.permute.xlu0 %6287  ;;  %v6691_v54 = vld [vmem:[#allocation4 + $0x200] sm:$0xff] }
 0x8c6   : > { %6361 = vst.msk [vmem:[#allocation4 + $0x218] sm:$0xff] %vm1199_vm3, %v6288_v1  ;;  %6994 = vmatprep.mubr.f32.mxu0 %v6691_v54 }
 0x8c7   : > { %6995 = vmatmul.mubr.f32.gmra.mrb[42].mxu0 %v6690_v19  ;;  %v5458_v12 = vpop.permute.xlu1 %5457 }
 0x8c8   : > { %5530 = vst.msk [vmem:[#allocation4 + $0x228] sm:$0xff] %vm1006_vm2, %v5458_v12 }
 0x8c9   : > { %v6480_v52 = vpop.permute.xlu0 %6479 }
 0x8ca   : > { %6553 = vst.msk [vmem:[#allocation4 + $0x218] sm:$0xff] %vm1393_vm4, %v6480_v52 }
 0x8cb   : > { %v5650_v62 = vpop.permute.xlu1 %5649  ;;  %v6693_v9 = vld [vmem:[#allocation4 + $0x210] sm:$0xff] }
 0x8cc   : > { %5722 = vst.msk [vmem:[#allocation4 + $0x228] sm:$0xff] %vm1199_vm3, %v5650_v62 }
 0x8cd   : > { %v6098_v39 = vpop.permute.xlu0 %6097 }
 0x8ce   : > { %6170 = vst.msk [vmem:[#allocation4 + $0x230] sm:$0xff] %vm1006_vm2, %v6098_v39 }
 0x8cf   : > { %v6921_v6 = vpop.f32.mrb[12].mxu0  ;;  %v5842_v42 = vpop.permute.xlu1 %5841 }
 0x8d0   : > { %v6923_v48 = vpop.f32.mrb[13].mxu0  ;;  %5914 = vst.msk [vmem:[#allocation4 + $0x228] sm:$0xff] %vm1393_vm4, %v5842_v42  ;;  %v6922_v0 = vadd.f32 %v12598_v63, %v6921_v6 }
 0x8d1   : > { %v6290_v59 = vpop.permute.xlu0 %6289  ;;  %v6694_v31 = vld [vmem:[#allocation4 + $0x218] sm:$0xff] }
 0x8d2   : > { %6362 = vst.msk [vmem:[#allocation4 + $0x230] sm:$0xff] %vm1199_vm3, %v6290_v59  ;;  %6999 = vmatprep.mubr.f32.mxu0 %v6694_v31 }
 0x8d3   : > { %7000 = vmatmul.mubr.f32.gmra.mrb[44].mxu0 %v6693_v9 }
 0x8d5   : > { %v6482_v35 = vpop.permute.xlu0 %6481 }
 0x8d6   : > { %6554 = vst.msk [vmem:[#allocation4 + $0x230] sm:$0xff] %vm1393_vm4, %v6482_v35  ;;  %v7283_v35 = vld [vmem:[%s8519_s27 + $0x40] sm:$0xff] }
 0x8d7   : > { %v6696_v51 = vld [vmem:[#allocation4 + $0x228] sm:$0xff] }
 0x8da   : > { %v12591_v47 = vpop.f32.mrb[12].mxu1 }
 0x8db   : > { %v7043_v55 = vpop.f32.mrb[13].mxu1 }
 0x8dd   : > { %v6697_v24 = vld [vmem:[#allocation4 + $0x230] sm:$0xff] }
 0x8de   : > { %7004 = vmatprep.mubr.f32.mxu0 %v6697_v24 }
 0x8df   : > { %7005 = vmatmul.mubr.f32.gmra.mrb[46].mxu0 %v6696_v51 }
 0x8e7   : > { %v6926_v40 = vpop.f32.mrb[14].mxu0 }
 0x8e8   : > { %v6928_v5 = vpop.f32.mrb[15].mxu0  ;;  %v6927_v41 = vadd.f32 %v12598_v63, %v6926_v40  ;;  %v7284_v40 = vld [vmem:[%s8519_s27 + $0x48] sm:$0xff] }
 0x8f2   : > { %v12593_v50 = vpop.f32.mrb[14].mxu1 }
 0x8f3   : > { %v7048_v8 = vpop.f32.mrb[15].mxu1 }
 0x8f6   : > { %v7921_v61 = vpop.f32.mrb[16].mxu1 }
 0x8f7   : > { %v7122_v3 = vadd.f32 %v7921_v61, %v6897_v10  ;;  %v7116_v30 = vpop.f32.mrb[17].mxu1 }
 0x8f8   : > { %v7117_v25 = vadd.f32 %v7116_v30, %v6892_v46 }
 0x8f9   : > { %v7308_v20 = vadd.f32 %v7276_v15, %v7122_v3 }
 0x8fa   : > { %v7307_v23 = vadd.f32 %v7275_v60, %v7117_v25  ;;  %v7924_v34 = vpop.f32.mrb[18].mxu1 }
 0x8fb   : > { %7340 = vst.msk [vmem:[%s8562_s25 + $0x8] sm:$0xff] %vm813_vm1, %v7308_v20  ;;  %v7132_v58 = vadd.f32 %v7924_v34, %v6907_v32  ;;  %v7126_v18 = vpop.f32.mrb[19].mxu1  ;;  %v7285_v20 = vld [vmem:[%s8519_s27 + $0x50] sm:$0xff] }
 0x8fc   : > { %7339 = vst.msk [vmem:[%s8562_s25] sm:$0xff] %vm813_vm1, %v7307_v23  ;;  %v7127_v7 = vadd.f32 %v7126_v18, %v6902_v22 }
 0x8fd   : > { %v7310_v37 = vadd.f32 %v7278_v2, %v7132_v58 }
 0x8fe   : > { %v7309_v16 = vadd.f32 %v7277_v36, %v7127_v7  ;;  %v6931_v14 = vpop.f32.mrb[16].mxu0 }
 0x8ff   : > { %7342 = vst.msk [vmem:[%s8562_s25 + $0x18] sm:$0xff] %vm813_vm1, %v7310_v37  ;;  %v7927_v13 = vpop.f32.mrb[20].mxu1  ;;  %v6933_v43 = vpop.f32.mrb[17].mxu0  ;;  %v6932_v59 = vadd.f32 %v12598_v63, %v6931_v14  ;;  %v7286_v14 = vld [vmem:[%s8519_s27 + $0x58] sm:$0xff] }
 0x900   : > { %7341 = vst.msk [vmem:[%s8562_s25 + $0x10] sm:$0xff] %vm813_vm1, %v7309_v16  ;;  %v7142_v53 = vadd.f32 %v7927_v13, %v6917_v33  ;;  %v7136_v49 = vpop.f32.mrb[21].mxu1  ;;  %v7012_v43 = vadd.f32 %v12598_v63, %v12472_v38 }
 0x901   : > { %v7137_v57 = vadd.f32 %v7136_v49, %v6912_v21 }
 0x902   : > { %v7312_v56 = vadd.f32 %v7280_v44, %v7142_v53  ;;  %v7017_v44 = vadd.f32 %v12598_v63, %v12515_v4  ;;  %v7022_v4 = vadd.f32 %v12598_v63, %v12530_v11 }
 0x903   : > { %v7311_v1 = vadd.f32 %v7279_v29, %v7137_v57  ;;  %v7930_v54 = vpop.f32.mrb[22].mxu1  ;;  %v7300_v29 = vld [vmem:[%s8519_s27 + $0xc8] sm:$0xff] }
 0x904   : > { %7344 = vst.msk [vmem:[%s8562_s25 + $0x28] sm:$0xff] %vm813_vm1, %v7312_v56  ;;  %v7152_v19 = vadd.f32 %v7930_v54, %v6927_v41  ;;  %v7146_v52 = vpop.f32.mrb[23].mxu1  ;;  %v7299_v56 = vld [vmem:[%s8519_s27 + $0xc0] sm:$0xff] }
 0x905   : > { %7343 = vst.msk [vmem:[%s8562_s25 + $0x20] sm:$0xff] %vm813_vm1, %v7311_v1  ;;  %v7147_v39 = vadd.f32 %v7146_v52, %v6922_v0  ;;  %v7027_v1 = vadd.f32 %v12598_v63, %v12546_v27 }
 0x906   : > { %v7314_v12 = vadd.f32 %v7282_v28, %v7152_v19  ;;  %v7302_v19 = vld [vmem:[%s8519_s27 + $0xd8] sm:$0xff] }
 0x907   : > { %v7313_v31 = vadd.f32 %v7281_v45, %v7147_v39  ;;  %v7933_v62 = vpop.f32.mrb[24].mxu1  ;;  %v7301_v39 = vld [vmem:[%s8519_s27 + $0xd0] sm:$0xff] }
 0x908   : > { %7346 = vst.msk [vmem:[%s8562_s25 + $0x38] sm:$0xff] %vm813_vm1, %v7314_v12  ;;  %v7156_v9 = vpop.f32.mrb[25].mxu1  ;;  %v7037_v12 = vadd.f32 %v12598_v63, %v12578_v17  ;;  %v7303_v17 = vld [vmem:[%s8519_s27 + $0xe0] sm:$0xff] }
 0x909   : > { %7345 = vst.msk [vmem:[%s8562_s25 + $0x30] sm:$0xff] %vm813_vm1, %v7313_v31  ;;  %v7157_v6 = vadd.f32 %v7156_v9, %v6932_v59  ;;  %v7032_v31 = vadd.f32 %v12598_v63, %v12562_v26 }
 0x90a   : > { %v6936_v42 = vpop.f32.mrb[18].mxu0 }
 0x90b   : > { %v7315_v48 = vadd.f32 %v7283_v35, %v7157_v6  ;;  %v6937_v55 = vadd.f32 %v12598_v63, %v6936_v42  ;;  %v6938_v24 = vpop.f32.mrb[19].mxu0  ;;  %v7936_v51 = vpop.f32.mrb[26].mxu1  ;;  %v7304_v6 = vld [vmem:[%s8519_s27 + $0xe8] sm:$0xff] }
 0x90c   : > { %v7166_v5 = vpop.f32.mrb[27].mxu1 }
 0x90d   : > { %7347 = vst.msk [vmem:[%s8562_s25 + $0x40] sm:$0xff] %vm813_vm1, %v7315_v48  ;;  %v7162_v8 = vadd.f32 %v7933_v62, %v6937_v55  ;;  %v7287_v48 = vld [vmem:[%s8519_s27 + $0x60] sm:$0xff] }
 0x90f   : > { %v7316_v10 = vadd.f32 %v7284_v40, %v7162_v8  ;;  %v12644_v46 = vpop.f32.mrb[28].mxu1  ;;  %v7047_v40 = vadd.f32 %v12598_v63, %v12593_v50  ;;  %v7042_v8 = vadd.f32 %v12598_v63, %v12591_v47 }
 0x910   : > { %v7176_v61 = vpop.f32.mrb[29].mxu1 }
 0x911   : > { %7348 = vst.msk [vmem:[%s8562_s25 + $0x48] sm:$0xff] %vm813_vm1, %v7316_v10 }
 0x913   : > { %v12648_v15 = vpop.f32.mrb[30].mxu1 }
 0x914   : > { %v12650_v3 = vpop.f32.mrb[31].mxu1 }
 0x916   : > { %v6941_v30 = vpop.f32.mrb[20].mxu0 }
 0x917   : > { %v6942_v60 = vadd.f32 %v12598_v63, %v6941_v30  ;;  %v6943_v25 = vpop.f32.mrb[21].mxu0  ;;  %v12653_v32 = vpop.f32.mrb[32].mxu1 }
 0x918   : > { %v12656_v22 = vpop.f32.mrb[33].mxu1  ;;  %v7306_v25 = vld [vmem:[%s8519_s27 + $0xf8] sm:$0xff] }
 0x919   : > { %v7167_v23 = vadd.f32 %v7166_v5, %v6942_v60 }
 0x91b   : > { %v7317_v34 = vadd.f32 %v7285_v20, %v7167_v23  ;;  %v12658_v2 = vpop.f32.mrb[34].mxu1  ;;  %v7305_v23 = vld [vmem:[%s8519_s27 + $0xf0] sm:$0xff] }
 0x91c   : > { %v12660_v58 = vpop.f32.mrb[35].mxu1 }
 0x91d   : > { %7349 = vst.msk [vmem:[%s8562_s25 + $0x50] sm:$0xff] %vm813_vm1, %v7317_v34 }
 0x91f   : > { %v12664_v18 = vpop.f32.mrb[36].mxu1 }
 0x920   : > { %v12666_v36 = vpop.f32.mrb[37].mxu1 }
 0x922   : > { %v6946_v7 = vpop.f32.mrb[22].mxu0 }
 0x923   : > { %v6947_v37 = vadd.f32 %v12598_v63, %v6946_v7  ;;  %v6948_v33 = vpop.f32.mrb[23].mxu0  ;;  %v12669_v16 = vpop.f32.mrb[38].mxu1 }
 0x924   : > { %v12672_v21 = vpop.f32.mrb[39].mxu1 }
 0x925   : > { %v7172_v13 = vadd.f32 %v7936_v51, %v6947_v37 }
 0x927   : > { %v7318_v53 = vadd.f32 %v7286_v14, %v7172_v13  ;;  %v7957_v49 = vpop.f32.mrb[40].mxu1  ;;  %v7288_v14 = vld [vmem:[%s8519_s27 + $0x68] sm:$0xff] }
 0x928   : > { %v7242_v57 = vadd.f32 %v7957_v49, %v7017_v44  ;;  %v7236_v41 = vpop.f32.mrb[41].mxu1 }
 0x929   : > { %7350 = vst.msk [vmem:[%s8562_s25 + $0x58] sm:$0xff] %vm813_vm1, %v7318_v53  ;;  %v7237_v0 = vadd.f32 %v7236_v41, %v7012_v43 }
 0x92a   : > { %v7332_v54 = vadd.f32 %v7300_v29, %v7242_v57  ;;  %v7289_v29 = vld [vmem:[%s8519_s27 + $0x70] sm:$0xff] }
 0x92b   : > { %v7331_v28 = vadd.f32 %v7299_v56, %v7237_v0  ;;  %v7960_v38 = vpop.f32.mrb[42].mxu1 }
 0x92c   : > { %7364 = vst.msk [vmem:[%s8562_s25 + $0xc8] sm:$0xff] %vm813_vm1, %v7332_v54  ;;  %v7252_v52 = vadd.f32 %v7960_v38, %v7027_v1  ;;  %v7246_v45 = vpop.f32.mrb[43].mxu1  ;;  %v7290_v1 = vld [vmem:[%s8519_s27 + $0x78] sm:$0xff] }
 0x92d   : > { %7363 = vst.msk [vmem:[%s8562_s25 + $0xc0] sm:$0xff] %vm813_vm1, %v7331_v28  ;;  %v7247_v27 = vadd.f32 %v7246_v45, %v7022_v4 }
 0x92e   : > { %v7334_v11 = vadd.f32 %v7302_v19, %v7252_v52  ;;  %v6951_v59 = vpop.f32.mrb[24].mxu0  ;;  %v7291_v19 = vld [vmem:[%s8519_s27 + $0x80] sm:$0xff] }
 0x92f   : > { %v7333_v62 = vadd.f32 %v7301_v39, %v7247_v27  ;;  %v6952_v9 = vadd.f32 %v12598_v63, %v6951_v59  ;;  %v7963_v35 = vpop.f32.mrb[44].mxu1  ;;  %v6953_v42 = vpop.f32.mrb[25].mxu0 }
 0x930   : > { %7366 = vst.msk [vmem:[%s8562_s25 + $0xd8] sm:$0xff] %vm813_vm1, %v7334_v11  ;;  %v7262_v55 = vadd.f32 %v7963_v35, %v7037_v12  ;;  %v7256_v24 = vpop.f32.mrb[45].mxu1  ;;  %v7292_v12 = vld [vmem:[%s8519_s27 + $0x88] sm:$0xff] }
 0x931   : > { %7365 = vst.msk [vmem:[%s8562_s25 + $0xd0] sm:$0xff] %vm813_vm1, %v7333_v62  ;;  %v7177_v26 = vadd.f32 %v7176_v61, %v6952_v9  ;;  %v7257_v51 = vadd.f32 %v7256_v24, %v7032_v31  ;;  %v7293_v9 = vld [vmem:[%s8519_s27 + $0x90] sm:$0xff] }
 0x932   : > { %v7336_v5 = vadd.f32 %v7304_v6, %v7262_v55  ;;  %v7294_v55 = vld [vmem:[%s8519_s27 + $0x98] sm:$0xff] }
 0x933   : > { %v7319_v10 = vadd.f32 %v7287_v48, %v7177_v26  ;;  %v7335_v30 = vadd.f32 %v7303_v17, %v7257_v51  ;;  %v7966_v60 = vpop.f32.mrb[46].mxu1 }
 0x934   : > { %7368 = vst.msk [vmem:[%s8562_s25 + $0xe8] sm:$0xff] %vm813_vm1, %v7336_v5  ;;  %v7272_v20 = vadd.f32 %v7966_v60, %v7047_v40  ;;  %v7266_v61 = vpop.f32.mrb[47].mxu1  ;;  %v7295_v40 = vld [vmem:[%s8519_s27 + $0xa0] sm:$0xff]  ;;  %v7296_v60 = vld [vmem:[%s8519_s27 + $0xa8] sm:$0xff] }
 0x935   : > { %7351 = vst.msk [vmem:[%s8562_s25 + $0x60] sm:$0xff] %vm813_vm1, %v7319_v10  ;;  %7367 = vst.msk [vmem:[%s8562_s25 + $0xe0] sm:$0xff] %vm813_vm1, %v7335_v30  ;;  %v7267_v50 = vadd.f32 %v7266_v61, %v7042_v8 }
 0x936   : > { %v7338_v34 = vadd.f32 %v7306_v25, %v7272_v20 }
 0x937   : > { %v7337_v7 = vadd.f32 %v7305_v23, %v7267_v50  ;;  %v7297_v50 = vld [vmem:[%s8519_s27 + $0xb0] sm:$0xff] }
 0x938   : > { %7370 = vst.msk [vmem:[%s8562_s25 + $0xf8] sm:$0xff] %vm813_vm1, %v7338_v34 }
 0x939   : > { %7369 = vst.msk [vmem:[%s8562_s25 + $0xf0] sm:$0xff] %vm813_vm1, %v7337_v7 }
 0x93a   : > { %v6956_v47 = vpop.f32.mrb[26].mxu0 }
 0x93b   : > { %v6957_v37 = vadd.f32 %v12598_v63, %v6956_v47  ;;  %v6958_v33 = vpop.f32.mrb[27].mxu0 }
 0x93d   : > { %v7182_v13 = vadd.f32 %v12644_v46, %v6957_v37 }
 0x93f   : > { %v7320_v44 = vadd.f32 %v7288_v14, %v7182_v13  ;;  %v7298_v14 = vld [vmem:[%s8519_s27 + $0xb8] sm:$0xff] }
 0x941   : > { %7352 = vst.msk [vmem:[%s8562_s25 + $0x68] sm:$0xff] %vm813_vm1, %v7320_v44 }
 0x946   : > { %v6961_v43 = vpop.f32.mrb[28].mxu0 }
 0x947   : > { %v6962_v53 = vadd.f32 %v12598_v63, %v6961_v43  ;;  %v6963_v49 = vpop.f32.mrb[29].mxu0 }
 0x949   : > { %v7187_v57 = vadd.f32 %v12650_v3, %v6962_v53 }
 0x94b   : > { %v7321_v41 = vadd.f32 %v7289_v29, %v7187_v57 }
 0x94d   : > { %7353 = vst.msk [vmem:[%s8562_s25 + $0x70] sm:$0xff] %vm813_vm1, %v7321_v41 }
 0x952   : > { %v6966_v56 = vpop.f32.mrb[30].mxu0 }
 0x953   : > { %v6967_v0 = vadd.f32 %v12598_v63, %v6966_v56  ;;  %v6968_v46 = vpop.f32.mrb[31].mxu0 }
 0x955   : > { %v7192_v54 = vadd.f32 %v12648_v15, %v6967_v0 }
 0x957   : > { %v7322_v4 = vadd.f32 %v7290_v1, %v7192_v54 }
 0x959   : > { %7354 = vst.msk [vmem:[%s8562_s25 + $0x78] sm:$0xff] %vm813_vm1, %v7322_v4 }
 0x95e   : > { %v6971_v28 = vpop.f32.mrb[32].mxu0 }
 0x95f   : > { %v6972_v38 = vadd.f32 %v12598_v63, %v6971_v28  ;;  %v6973_v3 = vpop.f32.mrb[33].mxu0 }
 0x961   : > { %v7197_v52 = vadd.f32 %v12656_v22, %v6972_v38 }
 0x963   : > { %v7323_v45 = vadd.f32 %v7291_v19, %v7197_v52 }
 0x965   : > { %7355 = vst.msk [vmem:[%s8562_s25 + $0x80] sm:$0xff] %vm813_vm1, %v7323_v45 }
 0x96a   : > { %v6976_v39 = vpop.f32.mrb[34].mxu0 }
 0x96b   : > { %v6977_v27 = vadd.f32 %v12598_v63, %v6976_v39  ;;  %v6978_v15 = vpop.f32.mrb[35].mxu0 }
 0x96d   : > { %v7202_v11 = vadd.f32 %v12653_v32, %v6977_v27 }
 0x96f   : > { %v7324_v59 = vadd.f32 %v7292_v12, %v7202_v11 }
 0x971   : > { %7356 = vst.msk [vmem:[%s8562_s25 + $0x88] sm:$0xff] %vm813_vm1, %v7324_v59 }
 0x976   : > { %v6981_v31 = vpop.f32.mrb[36].mxu0 }
 0x977   : > { %v6982_v62 = vadd.f32 %v12598_v63, %v6981_v31  ;;  %v6983_v22 = vpop.f32.mrb[37].mxu0 }
 0x979   : > { %v7207_v35 = vadd.f32 %v12660_v58, %v6982_v62 }
 0x97b   : > { %v7325_v6 = vadd.f32 %v7293_v9, %v7207_v35 }
 0x97d   : > { %7357 = vst.msk [vmem:[%s8562_s25 + $0x90] sm:$0xff] %vm813_vm1, %v7325_v6 }
 0x982   : > { %v6986_v42 = vpop.f32.mrb[38].mxu0 }
 0x983   : > { %v6987_v48 = vadd.f32 %v12598_v63, %v6986_v42  ;;  %v6988_v32 = vpop.f32.mrb[39].mxu0 }
 0x985   : > { %v7212_v24 = vadd.f32 %v12658_v2, %v6987_v48 }
 0x987   : > { %v7326_v17 = vadd.f32 %v7294_v55, %v7212_v24 }
 0x989   : > { %7358 = vst.msk [vmem:[%s8562_s25 + $0x98] sm:$0xff] %vm813_vm1, %v7326_v17 }
 0x98e   : > { %v6991_v26 = vpop.f32.mrb[40].mxu0 }
 0x98f   : > { %v6992_v51 = vadd.f32 %v12598_v63, %v6991_v26  ;;  %v6993_v58 = vpop.f32.mrb[41].mxu0 }
 0x991   : > { %v7217_v5 = vadd.f32 %v12666_v36, %v6992_v51 }
 0x993   : > { %v7327_v8 = vadd.f32 %v7295_v40, %v7217_v5 }
 0x995   : > { %7359 = vst.msk [vmem:[%s8562_s25 + $0xa0] sm:$0xff] %vm813_vm1, %v7327_v8 }
 0x99a   : > { %v6996_v10 = vpop.f32.mrb[42].mxu0 }
 0x99b   : > { %v6997_v30 = vadd.f32 %v12598_v63, %v6996_v10  ;;  %v6998_v2 = vpop.f32.mrb[43].mxu0 }
 0x99d   : > { %v7222_v25 = vadd.f32 %v12664_v18, %v6997_v30 }
 0x99f   : > { %v7328_v20 = vadd.f32 %v7296_v60, %v7222_v25 }
 0x9a1   : > { %7360 = vst.msk [vmem:[%s8562_s25 + $0xa8] sm:$0xff] %vm813_vm1, %v7328_v20 }
 0x9a6   : > { %v7001_v61 = vpop.f32.mrb[44].mxu0 }
 0x9a7   : > { %v7002_v23 = vadd.f32 %v12598_v63, %v7001_v61  ;;  %v7003_v36 = vpop.f32.mrb[45].mxu0 }
 0x9a9   : > { %v7227_v34 = vadd.f32 %v12672_v21, %v7002_v23 }
 0x9ab   : > { %v7329_v7 = vadd.f32 %v7297_v50, %v7227_v34 }
 0x9ad   : > { %7361 = vst.msk [vmem:[%s8562_s25 + $0xb0] sm:$0xff] %vm813_vm1, %v7329_v7 }
 0x9b2   : > { %v7006_v47 = vpop.f32.mrb[46].mxu0 }
 0x9b3   : > { %v7007_v37 = vadd.f32 %v12598_v63, %v7006_v47  ;;  %v7008_v33 = vpop.f32.mrb[47].mxu0 }
 0x9b5   : > { %v7232_v18 = vadd.f32 %v12669_v16, %v7007_v37 }
 0x9b7   : > { %v7330_v13 = vadd.f32 %v7298_v14, %v7232_v18 }
 0x9b9   : > { %7362 = vst.msk [vmem:[%s8562_s25 + $0xb8] sm:$0xff] %vm813_vm1, %v7330_v13 }
 0x9ba PF: > { %s12896_s29 = sld [smem:[#allocation9_spill]]  ;;  %s7667_s24 = sshll.u32 %s8350_s21, 12 }
 0x9bb   : > { %s12898_s0 = sld [smem:[#allocation28_spill]]  ;;  %s7385_s2 = sshll.u32 %s8562_s25, 4  ;;  %s12782_s2 = int_to_ptr.vmem [resolvable:$true] %s7385_s2 }
 0x9bc   : > { %s8268_s14 = scalar_lea.vmem %s12782_s2, 4096  ;;  %s8375_s21 = smov [#allocation5]  }
 0x9bd   : > { %p8269_p2 = scmp.ne.s32.totalorder %s12782_s2, %s8268_s14  ;;  %s8272_s16 = sshll.u32 %s8375_s21, 4  ;;  %s8273_s16 = int_to_ptr.vmem [resolvable:$false] %s8272_s16 }
 0x9be   : > { %s8274_s28 = scalar_lea.vmem %s8273_s16, 8192  ;;  %p8275_p6 = scmp.lt.s32.totalorder %s12782_s2, %s8273_s16 }
 0x9bf   : > { %p8270_p4 = pnand %p8269_p2, %p8487_p3  ;;  %p8276_p7 = scmp.lt.s32.totalorder %s8274_s28, %s8268_s14 }
 0x9c0   : > { %s12899_s27 = sand.u32 1, %s12896_s29  }
 0x9c1   : > { %s12779_s1 = scalar_lea.hbm %s12898_s0, %s7667_s24  ;;  %s12786_s17 = scalar_lea.sflag [#allocation6], %s12899_s27 }
 0x9c2   : > { %p8271_p5 = pneg %p8270_p4  ;;  %p8277_p8 = por %p8276_p7, %p8275_p6 }
 0x9c4   : > { %p8278_p10 = pnand %p8277_p8, %p8271_p5 }
 0x9c6   : > { %8281 = shalt.err (!%p8278_p10)
}
 0x9c7   : > { %s8282_s25 = scalar_lea.hbm %s12779_s1, 4096  ;;  %s8286_s22 = scalar_lea.hbm %s12898_s0, 8192 }
 0x9c8   : > { %p8283_p11 = scmp.ne.s32.totalorder %s12779_s1, %s8282_s25  ;;  %p8287_p0 = scmp.lt.u32.totalorder %s12779_s1, %s12898_s0 }
 0x9c9   : > { %p8288_p1 = scmp.lt.u32.totalorder %s8286_s22, %s8282_s25  ;;  %p8290_p4 = scmp.lt.u32.totalorder %s8282_s25, %s12779_s1 }
 0x9ca   : > { %p8284_p12 = pnand %p8283_p11, %p8487_p3 }
 0x9cb   : > { %p8289_p2 = por %p8288_p1, %p8287_p0 }
 0x9cc   : > { %p8285_p13 = pneg %p8284_p12 }
 0x9cd   : > { %p8291_p5 = por %p8290_p4, %p8289_p2 }
 0x9cf   : > { %p8292_p6 = pnand %p8291_p5, %p8285_p13 }
 0x9d1   : > { %8295 = shalt.err (!%p8292_p6)
}
 0x9d2   : > { %s8376_s30 = smov 128   ;;  %s8377_s26 = smov 8  }
 0x9d3   : > { %8178 = dma.vmem_to_hbm [thread:$0]  (%p8487_p3), %s12782_s2, 4096, %s12779_s1, %s12786_s17, %s8376_s30, %s8376_s30, %s8377_s26  }
 0x9d4 PF: > { %s12900_s20 = sld [smem:[#allocation13_spill]]  ;;  %s12901_s29 = sld [smem:[#allocation8_spill]] }
 0x9da   : > { %p8184_p7 = scmp.ge.s32.totalorder %s12900_s20, 2  ;;  %s7400_s18 = sand.u32 1, %s12901_s29  }
 0x9db   : > { %s7401_s23 = scalar_lea.sflag [#allocation6], %s7400_s18 }
 0x9dc   : > { %p8181_p8 = pnand %p8184_p7, %p8497_p9 }
 0x9de   : > { %8329 = dma.done.wait (!%p8181_p8), %s7401_s23, 4096  }
 0x9df   : > { %8331 = vsyncadd (!%p8181_p8), %s7401_s23, 4294963200  ;;  %s24_s24 = sadd.s32 1, %s12900_s20   ;;  %s12903_s17 = sld [smem:[#allocation9_spill]] }
 0x9e0   : > { %p21_p10 = scmp.ge.s32.totalorder %s24_s24, 6   ;;  %s12904_s18 = sld [smem:[#allocation10_spill]] }
 0x9e1   : > { %s12905_s19 = sld [smem:[#allocation18_spill]]  ;;  %s12906_s20 = sld [smem:[#allocation11_spill]] }
 0x9e2   : > { %s12907_s21 = sld [smem:[#allocation12_spill]]  ;;  %s12908_s22 = sld [smem:[#allocation14_spill]] }
 0x9e3   : > { %s12909_s23 = sld [smem:[#allocation16_spill]]  ;;  %23 = sbr.rel (!%p21_p10) target bundleno = 10 (0xa), region = 136 }
 0x9ea   :  { %7406 = vsyncpa [#allocation6], 1 }
 0x9eb   :  { %7408 = vsyncpa [#allocation6 + $0x1], 1 }

</bundles_post_ra>
